<compile_context>
chip_gen: v7x
topology: tpu7x:2x2x1
jax: 0.10.0
libtpu: 0.0.40
codegen_flags: <defaults>
</compile_context>

<pallas_src>
import jax
import jax.numpy as jnp
from jax.experimental import pallas as pl
from jax.experimental.pallas import tpu as pltpu

EPS = 1e-5
VMEM_LIMIT_BYTES = 48 * 1024 * 1024   # fits v7x's 64 MiB/TC, fine on v5e/v6e
K_STEM = 256                          # 7*7*3 = 147 zero-padded K for the stem
C_STEM = 128                          # stem out channels zero-padded 64 -> 128
TN = 512                              # chunk width inside the fused deep kernel


# ---------------------------------------------------------------------------
# Pallas kernel 1: tiled  act(x @ w + shift)   (used for the im2col'ed stem).
# Grid is (N, M) with M innermost, so the weight block stays resident across
# the M sweep (never re-streamed) and both axes are "parallel" for megacore.
# ---------------------------------------------------------------------------
def matmul_bias_act(x, w, bias, *, act="relu", tm=256, tn=None,
                    out_dtype=jnp.bfloat16):
    M, K = x.shape
    Kw, N = w.shape
    assert K == Kw
    tm = min(tm, M)
    tn = N if tn is None else min(tn, N)
    grid = (pl.cdiv(N, tn), pl.cdiv(M, tm))   # N outer, M inner

    def kernel(x_ref, w_ref, b_ref, o_ref):
        acc = jnp.dot(x_ref[...], w_ref[...], preferred_element_type=jnp.float32)
        acc = acc + b_ref[...]
        if act == "relu":
            acc = jnp.maximum(acc, 0.0)
        o_ref[...] = acc.astype(o_ref.dtype)

    return pl.pallas_call(
        kernel,
        out_shape=jax.ShapeDtypeStruct((M, N), out_dtype),
        grid=grid,
        in_specs=[
            pl.BlockSpec((tm, K), lambda j, i: (i, 0)),
            pl.BlockSpec((K, tn), lambda j, i: (0, j)),
            pl.BlockSpec((1, tn), lambda j, i: (0, j)),
        ],
        out_specs=pl.BlockSpec((tm, tn), lambda j, i: (i, j)),
        compiler_params=pltpu.CompilerParams(
            dimension_semantics=("parallel", "parallel"),
            vmem_limit_bytes=VMEM_LIMIT_BYTES,
        ),
    )(x, w, bias)


# ---------------------------------------------------------------------------
# Pallas kernel 2: fused layer1..layer4 + Baseline head in ONE pallas_call.
#   grid step 0      : layer1, layer2, layer3 (layer3 in two static N halves)
#   grid steps 1..4  : layer4, one 512-wide N-chunk per step (weight streams)
#   grid step 5      : local_reduction + SE parts + BN1d(512)s + GAP/BN1d(2048)
#                      -> writes concat([local_feat_0, local_feat_1, feat])
# ---------------------------------------------------------------------------
def fused_deep_net(x0, p, *, B, H, W, use_parts):
    HW = H * W
    M = B * HW
    C4 = p["l4_w"].shape[1]          # 2048
    C3 = p["l3_w"].shape[1]          # 1024
    Cr = p["lr_w"].shape[1]          # 512
    NC4 = C4 // TN                   # 4 layer4 N-chunks
    NSTEP = 1 + NC4 + 1              # 6 grid steps
    rpp = HW // use_parts            # flattened spatial rows per part
    out_dim = use_parts * Cr + C4

    def kernel(x0_ref, w1_ref, b1_ref, w2_ref, b2_ref, w3_ref, b3_ref,
               w4_ref, b4_ref, lrw_ref, lrb_ref,
               sew1_ref, seb1_ref, sew2_ref, seb2_ref,
               bngs_ref, bngb_ref, lbs_ref, lbb_ref,
               o_ref, x3_scr, x4_scr, sq_scr):
        s = pl.program_id(0)

        # ---- step 0: layer1 -> layer2 -> layer3 (all bf16 MXU, fp32 acc) ----
        @pl.when(s == 0)
        def _():
            x1 = jnp.dot(x0_ref[...], w1_ref[...],
                         preferred_element_type=jnp.float32)
            x1 = jnp.maximum(x1 + b1_ref[...], 0.0).astype(jnp.bfloat16)
            x2 = jnp.dot(x1, w2_ref[...], preferred_element_type=jnp.float32)
            x2 = jnp.maximum(x2 + b2_ref[...], 0.0).astype(jnp.bfloat16)
            for c0 in range(0, C3, TN):      # bound epilogue liveness (16 vregs)
                a3 = jnp.dot(x2, w3_ref[:, c0:c0 + TN],
                             preferred_element_type=jnp.float32)
                a3 = jnp.maximum(a3 + b3_ref[:, c0:c0 + TN], 0.0)
                x3_scr[:, c0:c0 + TN] = a3.astype(jnp.bfloat16)

        # ---- steps 1..NC4: layer4, one streamed 512-wide N chunk per step ----
        @pl.when(jnp.logical_and(s >= 1, s <= NC4))
        def _():
            off = pl.multiple_of((s - 1) * TN, TN)
            a4 = jnp.dot(x3_scr[...], w4_ref[...],
                         preferred_element_type=jnp.float32)
            a4 = jnp.maximum(a4 + b4_ref[...], 0.0)                 # [M, TN]
            x4_scr[:, pl.ds(off, TN)] = a4.astype(jnp.bfloat16)

        # ---- last step: head (local_reduction + SE + BN1ds + GAP + concat) ----
        @pl.when(s == NSTEP - 1)
        def _():
            # local_reduction: 1x1 conv (BN folded into weights) + ReLU
            lx = jnp.dot(x4_scr[...], lrw_ref[...],
                         preferred_element_type=jnp.float32)
            lx = jnp.maximum(lx + lrb_ref[...], 0.0)                # [M, Cr]

            # per-(part, batch) spatial means (SE squeeze)
            for i in range(use_parts):
                for b in range(B):
                    r0 = b * HW + i * rpp
                    sq_scr[i * B + b:i * B + b + 1, :] = jnp.mean(
                        lx[r0:r0 + rpp, :], axis=0, keepdims=True)

            # SE excite, batched over parts*batch
            sq = sq_scr[...]                                         # [P*B, Cr]
            z = jnp.dot(sq.astype(jnp.bfloat16), sew1_ref[...],
                        preferred_element_type=jnp.float32) + seb1_ref[...]
            z = jnp.maximum(z, 0.0)
            g = jax.nn.sigmoid(
                jnp.dot(z.astype(jnp.bfloat16), sew2_ref[...],
                        preferred_element_type=jnp.float32) + seb2_ref[...])
            # GAP(part * gate) == gate * GAP(part)   (gate constant over space)
            feats = sq * g                                           # [P*B, Cr]
            for i in range(use_parts):
                o_ref[:, i * Cr:(i + 1) * Cr] = (
                    feats[i * B:(i + 1) * B, :] * lbs_ref[i:i + 1, :]
                    + lbb_ref[i:i + 1, :])
            # TODO(synk): per-part / global classifier logits are unused in the
            #             eval-mode return and therefore not computed.

            # global branch: GAP (fp32 accumulation) + BatchNorm1d(2048)
            base = use_parts * Cr
            for b in range(B):
                for c0 in range(0, C4, TN):
                    gm = jnp.mean(
                        x4_scr[b * HW:(b + 1) * HW, c0:c0 + TN].astype(
                            jnp.float32), axis=0, keepdims=True)     # [1, TN]
                    o_ref[b:b + 1, base + c0:base + c0 + TN] = (
                        gm * bngs_ref[:, c0:c0 + TN] + bngb_ref[:, c0:c0 + TN])

    nchunk = lambda s: (0, jnp.maximum(jnp.minimum(s - 1, NC4 - 1), 0))
    in_specs = [
        pl.BlockSpec((M, x0.shape[1]), lambda s: (0, 0)),            # x0
        pl.BlockSpec(p["l1_w"].shape, lambda s: (0, 0)),
        pl.BlockSpec(p["l1_b"].shape, lambda s: (0, 0)),
        pl.BlockSpec(p["l2_w"].shape, lambda s: (0, 0)),
        pl.BlockSpec(p["l2_b"].shape, lambda s: (0, 0)),
        pl.BlockSpec(p["l3_w"].shape, lambda s: (0, 0)),
        pl.BlockSpec(p["l3_b"].shape, lambda s: (0, 0)),
        pl.BlockSpec((p["l4_w"].shape[0], TN), nchunk),              # streamed
        pl.BlockSpec((1, TN), nchunk),                               # streamed
        pl.BlockSpec(p["lr_w"].shape, lambda s: (0, 0)),
        pl.BlockSpec(p["lr_b"].shape, lambda s: (0, 0)),
        pl.BlockSpec(p["se_w1"].shape, lambda s: (0, 0)),
        pl.BlockSpec(p["se_b1"].shape, lambda s: (0, 0)),
        pl.BlockSpec(p["se_w2"].shape, lambda s: (0, 0)),
        pl.BlockSpec(p["se_b2"].shape, lambda s: (0, 0)),
        pl.BlockSpec(p["bottleneck_s"].shape, lambda s: (0, 0)),
        pl.BlockSpec(p["bottleneck_b"].shape, lambda s: (0, 0)),
        pl.BlockSpec(p["local_bn_s"].shape, lambda s: (0, 0)),
        pl.BlockSpec(p["local_bn_b"].shape, lambda s: (0, 0)),
    ]

    return pl.pallas_call(
        kernel,
        out_shape=jax.ShapeDtypeStruct((B, out_dim), jnp.float32),
        grid=(NSTEP,),
        in_specs=in_specs,
        out_specs=pl.BlockSpec((B, out_dim), lambda s: (0, 0)),
        scratch_shapes=[
            pltpu.VMEM((M, C3), jnp.bfloat16),                       # x3
            pltpu.VMEM((M, C4), jnp.bfloat16),                       # x4
            pltpu.VMEM((use_parts * B, Cr), jnp.float32),            # SE squeeze
        ],
        compiler_params=pltpu.CompilerParams(
            dimension_semantics=("arbitrary",),
            vmem_limit_bytes=VMEM_LIMIT_BYTES,
        ),
    )(x0, p["l1_w"], p["l1_b"], p["l2_w"], p["l2_b"], p["l3_w"], p["l3_b"],
      p["l4_w"], p["l4_b"], p["lr_w"], p["lr_b"],
      p["se_w1"], p["se_b1"], p["se_w2"], p["se_b2"],
      p["bottleneck_s"], p["bottleneck_b"],
      p["local_bn_s"], p["local_bn_b"])


# ---------------------------------------------------------------------------
# Parameters (deterministic, synthetic).  Freshly-initialized eval BatchNorm
# (gamma=1, beta=0, mean=0, var=1) is folded: scale into the weight columns,
# shift kept as a per-channel add.
# ---------------------------------------------------------------------------
def fold_bn(c):
    gamma = jnp.ones((c,), jnp.float32)
    beta = jnp.zeros((c,), jnp.float32)
    mean = jnp.zeros((c,), jnp.float32)
    var = jnp.ones((c,), jnp.float32)
    scale = gamma / jnp.sqrt(var + EPS)
    shift = beta - mean * scale
    return scale, shift


def _folded_linear(key, cin, cout, std):
    # conv1x1(no bias)+BN(eval):  (x@w)*s + b  ==  x @ (w*s) + b
    w = std * jax.random.normal(key, (cin, cout), jnp.float32)
    s, b = fold_bn(cout)
    return (w * s[None, :]).astype(jnp.bfloat16), b.reshape(1, cout)


def init_params(key, num_classes=16, use_parts=2):
    ks = iter(jax.random.split(key, 16))
    p = {"use_parts": use_parts, "num_classes": num_classes}

    # stem 7x7/s2 conv + BN(64) + ReLU as an im2col matmul.  Weight rows are
    # channel-major (c, kh, kw) to match conv_general_dilated_patches.
    # K padded 147->256, out channels padded 64->128 (exact: pads are zero).
    w = 0.05 * jax.random.normal(next(ks), (3, 7, 7, 64), jnp.float32)
    s, b = fold_bn(64)
    w = (w * s).reshape(7 * 7 * 3, 64)
    w = jnp.pad(w, ((0, K_STEM - 7 * 7 * 3), (0, C_STEM - 64)))
    p["conv1_w"] = w.astype(jnp.bfloat16)
    p["conv1_b"] = jnp.pad(b, (0, C_STEM - 64)).reshape(1, C_STEM)

    # backbone stand-in stages (see TODO at top): ->256->512->1024->2048
    w1 = 0.05 * jax.random.normal(next(ks), (64, 256), jnp.float32)
    s, b = fold_bn(256)
    w1 = jnp.pad(w1 * s[None, :], ((0, C_STEM - 64), (0, 0)))  # zero rows for pads
    p["l1_w"], p["l1_b"] = w1.astype(jnp.bfloat16), b.reshape(1, 256)
    p["l2_w"], p["l2_b"] = _folded_linear(next(ks), 256, 512, 0.04)
    p["l3_w"], p["l3_b"] = _folded_linear(next(ks), 512, 1024, 0.03)
    p["l4_w"], p["l4_b"] = _folded_linear(next(ks), 1024, 2048, 0.02)

    # head: bottleneck BN1d(2048) (eval affine)
    s, b = fold_bn(2048)
    p["bottleneck_s"], p["bottleneck_b"] = s.reshape(1, 2048), b.reshape(1, 2048)

    # local_reduction = BasicConv2d(2048, 512, 1): conv(no bias) + BN2d + ReLU
    p["lr_w"], p["lr_b"] = _folded_linear(next(ks), 2048, 512, 0.02)

    # SELayer_Local(512), reduction=16
    p["se_w1"] = (0.05 * jax.random.normal(next(ks), (512, 32),
                                           jnp.float32)).astype(jnp.bfloat16)
    p["se_b1"] = jnp.zeros((1, 32), jnp.float32)
    p["se_w2"] = (0.05 * jax.random.normal(next(ks), (32, 512),
                                           jnp.float32)).astype(jnp.bfloat16)
    p["se_b2"] = jnp.zeros((1, 512), jnp.float32)

    # per-part BN1d(512) (eval affine), stacked [use_parts, 512]
    ls, lb = [], []
    for _ in range(use_parts):
        s, b = fold_bn(512)
        ls.append(s)
        lb.append(b)
    p["local_bn_s"] = jnp.stack(ls)
    p["local_bn_b"] = jnp.stack(lb)
    return p


# ---------------------------------------------------------------------------
# Baseline forward (eval mode)
# ---------------------------------------------------------------------------
def baseline_forward_eval(x_nchw, params):
    B = x_nchw.shape[0]
    use_parts = params["use_parts"]

    # ---- stem: single-op bf16 im2col + Pallas matmul (folded BN + ReLU) ----
    xb = x_nchw.astype(jnp.bfloat16)
    patches = jax.lax.conv_general_dilated_patches(
        xb, filter_shape=(7, 7), window_strides=(2, 2),
        padding=((3, 3), (3, 3)),
        dimension_numbers=("NCHW", "OIHW", "NHWC"))        # [B, 32, 32, 147]
    Ho, Wo = patches.shape[1], patches.shape[2]
    patches = patches.reshape(B * Ho * Wo, -1)
    patches = jnp.pad(patches, ((0, 0), (0, K_STEM - patches.shape[1])))
    y = matmul_bias_act(patches, params["conv1_w"], params["conv1_b"])
    y = y.reshape(B, Ho, Wo, C_STEM)                        # [B,32,32,128] bf16

    # ---- maxpool 3x3/s2/p1 with the (exact, eval-only) layer2/layer3 stride
    #      hoist folded in: keep every 4th pooled position -> window stride 8.
    x0 = jax.lax.reduce_window(
        y, jnp.asarray(-jnp.inf, y.dtype), jax.lax.max,
        window_dimensions=(1, 3, 3, 1), window_strides=(1, 8, 8, 1),
        padding=((0, 0), (1, 1), (1, 1), (0, 0)))           # [B,4,4,128]
    Hs, Ws = x0.shape[1], x0.shape[2]
    x0 = x0.reshape(B * Hs * Ws, C_STEM)

    # ---- fused layer1..layer4 + head: one pallas_call, streams the big
    #      weights behind the running matmuls, writes the final concat ----
    return fused_deep_net(x0, params, B=B, H=Hs, W=Ws, use_parts=use_parts)


if __name__ == "__main__":
    key = jax.random.PRNGKey(0)
    kx, kp = jax.random.split(key)
    num_classes, use_parts = 16, 2
    # PyTorch-style NCHW input image.
    x = jax.random.normal(kx, (2, 3, 64, 64), jnp.float32)
    params = init_params(kp, num_classes=num_classes, use_parts=use_parts)

    fwd = jax.jit(lambda xx: baseline_forward_eval(xx, params))
    out = jax.block_until_ready(fwd(x))
    assert out.shape == (2, 512 * use_parts + 2048), out.shape
    assert bool(jnp.all(jnp.isfinite(out)))
    print("KERNEL_OK")
</pallas_src>

<mosaic_0001>
module attributes {stable_mosaic.version = 11 : i64} {
  func.func @kernel(%arg0: i32, %arg1: i32, %arg2: memref<256x256xbf16, #tpu.memory_space<vmem>>, %arg3: memref<256x128xbf16, #tpu.memory_space<vmem>>, %arg4: memref<1x128xf32, #tpu.memory_space<vmem>>, %arg5: memref<256x128xbf16, #tpu.memory_space<vmem>>) attributes {dimension_semantics = [#tpu.dimension_semantics<parallel>, #tpu.dimension_semantics<parallel>], iteration_bounds = array<i64: 1, 8>, scalar_prefetch = 0 : i64, scratch_operands = 0 : i64, tpu.core_type = #tpu.core_type<tc>, window_params = [{transform_indices = @transform_0, window_bounds = array<i64: 256, 256>}, {transform_indices = @transform_1, window_bounds = array<i64: 256, 128>}, {transform_indices = @transform_2, window_bounds = array<i64: 1, 128>}, {transform_indices = @transform_3, window_bounds = array<i64: 256, 128>}]} {
    %c0 = arith.constant 0 : index
    %c0_0 = arith.constant 0 : index
    %0 = vector.load %arg2[%c0, %c0_0] : memref<256x256xbf16, #tpu.memory_space<vmem>>, vector<256x256xbf16>
    %c0_1 = arith.constant 0 : index
    %c0_2 = arith.constant 0 : index
    %1 = vector.load %arg3[%c0_1, %c0_2] : memref<256x128xbf16, #tpu.memory_space<vmem>>, vector<256x128xbf16>
    %cst = arith.constant dense<0.000000e+00> : vector<256x128xf32>
    %2 = tpu.matmul %0, %1, %cst {dimension_numbers = #tpu.dot_dimension_numbers<[1], [0], [0], [1], [0, 0, 1, 1], [], []>} : vector<256x256xbf16>, vector<256x128xbf16>, vector<256x128xf32> -> vector<256x128xf32>
    %c0_3 = arith.constant 0 : index
    %c0_4 = arith.constant 0 : index
    %3 = vector.load %arg4[%c0_3, %c0_4] : memref<1x128xf32, #tpu.memory_space<vmem>>, vector<1x128xf32>
    %4 = vector.broadcast %3 : vector<1x128xf32> to vector<256x128xf32>
    %5 = arith.addf %2, %4 : vector<256x128xf32>
    %cst_5 = arith.constant 0.000000e+00 : f32
    %6 = vector.broadcast %cst_5 : f32 to vector<256x128xf32>
    %7 = arith.maximumf %5, %6 : vector<256x128xf32>
    %8 = arith.truncf %7 : vector<256x128xf32> to vector<256x128xbf16>
    %c0_6 = arith.constant 0 : index
    %c0_7 = arith.constant 0 : index
    %9 = vector.load %arg5[%c0_6, %c0_7] : memref<256x128xbf16, #tpu.memory_space<vmem>>, vector<256x128xbf16>
    tpu.vector_store %arg5[%c0_6, %c0_7], %8 {strides = array<i32>} : memref<256x128xbf16, #tpu.memory_space<vmem>>, vector<256x128xbf16>,
    return
  }
  func.func @transform_0(%arg0: i32, %arg1: i32) -> (i32, i32) {
    %c0_i32 = arith.constant 0 : i32
    %c0_i32_0 = arith.constant 0 : i32
    return %arg1, %c0_i32 : i32, i32
  }
  func.func @transform_1(%arg0: i32, %arg1: i32) -> (i32, i32) {
    %c0_i32 = arith.constant 0 : i32
    %c0_i32_0 = arith.constant 0 : i32
    return %c0_i32, %arg0 : i32, i32
  }
  func.func @transform_2(%arg0: i32, %arg1: i32) -> (i32, i32) {
    %c0_i32 = arith.constant 0 : i32
    %c0_i32_0 = arith.constant 0 : i32
    return %c0_i32, %arg0 : i32, i32
  }
  func.func @transform_3(%arg0: i32, %arg1: i32) -> (i32, i32) {
    %c0_i32 = arith.constant 0 : i32
    return %arg1, %arg0 : i32, i32
  }
}

module attributes {stable_mosaic.version = 11 : i64} {
  func.func @kernel(%arg0: i32, %arg1: memref<32x128xbf16, #tpu.memory_space<vmem>>, %arg2: memref<128x256xbf16, #tpu.memory_space<vmem>>, %arg3: memref<1x256xf32, #tpu.memory_space<vmem>>, %arg4: memref<256x512xbf16, #tpu.memory_space<vmem>>, %arg5: memref<1x512xf32, #tpu.memory_space<vmem>>, %arg6: memref<512x1024xbf16, #tpu.memory_space<vmem>>, %arg7: memref<1x1024xf32, #tpu.memory_space<vmem>>, %arg8: memref<1024x512xbf16, #tpu.memory_space<vmem>>, %arg9: memref<1x512xf32, #tpu.memory_space<vmem>>, %arg10: memref<2048x512xbf16, #tpu.memory_space<vmem>>, %arg11: memref<1x512xf32, #tpu.memory_space<vmem>>, %arg12: memref<512x32xbf16, #tpu.memory_space<vmem>>, %arg13: memref<1x32xf32, #tpu.memory_space<vmem>>, %arg14: memref<32x512xbf16, #tpu.memory_space<vmem>>, %arg15: memref<1x512xf32, #tpu.memory_space<vmem>>, %arg16: memref<1x2048xf32, #tpu.memory_space<vmem>>, %arg17: memref<1x2048xf32, #tpu.memory_space<vmem>>, %arg18: memref<2x512xf32, #tpu.memory_space<vmem>>, %arg19: memref<2x512xf32, #tpu.memory_space<vmem>>, %arg20: memref<2x3072xf32, #tpu.memory_space<vmem>>, %arg21: memref<32x1024xbf16, #tpu.memory_space<vmem>>, %arg22: memref<32x2048xbf16, #tpu.memory_space<vmem>>, %arg23: memref<4x512xf32, #tpu.memory_space<vmem>>) attributes {dimension_semantics = [#tpu.dimension_semantics<arbitrary>], iteration_bounds = array<i64: 6>, scalar_prefetch = 0 : i64, scratch_operands = 3 : i64, tpu.core_type = #tpu.core_type<tc>, window_params = [{pipeline_mode = #tpu.pipeline_mode<synchronous>, transform_indices = @transform_0, window_bounds = array<i64: 32, 128>}, {pipeline_mode = #tpu.pipeline_mode<synchronous>, transform_indices = @transform_1, window_bounds = array<i64: 128, 256>}, {pipeline_mode = #tpu.pipeline_mode<synchronous>, transform_indices = @transform_2, window_bounds = array<i64: 1, 256>}, {pipeline_mode = #tpu.pipeline_mode<synchronous>, transform_indices = @transform_3, window_bounds = array<i64: 256, 512>}, {pipeline_mode = #tpu.pipeline_mode<synchronous>, transform_indices = @transform_4, window_bounds = array<i64: 1, 512>}, {pipeline_mode = #tpu.pipeline_mode<synchronous>, transform_indices = @transform_5, window_bounds = array<i64: 512, 1024>}, {pipeline_mode = #tpu.pipeline_mode<synchronous>, transform_indices = @transform_6, window_bounds = array<i64: 1, 1024>}, {transform_indices = @transform_7, window_bounds = array<i64: 1024, 512>}, {transform_indices = @transform_8, window_bounds = array<i64: 1, 512>}, {pipeline_mode = #tpu.pipeline_mode<synchronous>, transform_indices = @transform_9, window_bounds = array<i64: 2048, 512>}, {pipeline_mode = #tpu.pipeline_mode<synchronous>, transform_indices = @transform_10, window_bounds = array<i64: 1, 512>}, {pipeline_mode = #tpu.pipeline_mode<synchronous>, transform_indices = @transform_11, window_bounds = array<i64: 512, 32>}, {pipeline_mode = #tpu.pipeline_mode<synchronous>, transform_indices = @transform_12, window_bounds = array<i64: 1, 32>}, {pipeline_mode = #tpu.pipeline_mode<synchronous>, transform_indices = @transform_13, window_bounds = array<i64: 32, 512>}, {pipeline_mode = #tpu.pipeline_mode<synchronous>, transform_indices = @transform_14, window_bounds = array<i64: 1, 512>}, {pipeline_mode = #tpu.pipeline_mode<synchronous>, transform_indices = @transform_15, window_bounds = array<i64: 1, 2048>}, {pipeline_mode = #tpu.pipeline_mode<synchronous>, transform_indices = @transform_16, window_bounds = array<i64: 1, 2048>}, {pipeline_mode = #tpu.pipeline_mode<synchronous>, transform_indices = @transform_17, window_bounds = array<i64: 2, 512>}, {pipeline_mode = #tpu.pipeline_mode<synchronous>, transform_indices = @transform_18, window_bounds = array<i64: 2, 512>}, {pipeline_mode = #tpu.pipeline_mode<synchronous>, transform_indices = @transform_19, window_bounds = array<i64: 2, 3072>}]} {
    %c0_i32 = arith.constant 0 : i32
    %0 = arith.cmpi eq, %arg0, %c0_i32 : i32
    %1 = arith.extui %0 : i1 to i32
    %c0_i32_0 = arith.constant 0 : i32
    %2 = arith.cmpi ne, %1, %c0_i32_0 : i32
    scf.if %2 {
      %c0 = arith.constant 0 : index
      %c0_3 = arith.constant 0 : index
      %11 = vector.load %arg1[%c0, %c0_3] : memref<32x128xbf16, #tpu.memory_space<vmem>>, vector<32x128xbf16>
      %c0_4 = arith.constant 0 : index
      %c0_5 = arith.constant 0 : index
      %12 = vector.load %arg2[%c0_4, %c0_5] : memref<128x256xbf16, #tpu.memory_space<vmem>>, vector<128x256xbf16>
      %cst = arith.constant dense<0.000000e+00> : vector<32x256xf32>
      %13 = tpu.matmul %11, %12, %cst {dimension_numbers = #tpu.dot_dimension_numbers<[1], [0], [0], [1], [0, 0, 1, 1], [], []>} : vector<32x128xbf16>, vector<128x256xbf16>, vector<32x256xf32> -> vector<32x256xf32>
      %c0_6 = arith.constant 0 : index
      %c0_7 = arith.constant 0 : index
      %14 = vector.load %arg3[%c0_6, %c0_7] : memref<1x256xf32, #tpu.memory_space<vmem>>, vector<1x256xf32>
      %15 = vector.broadcast %14 : vector<1x256xf32> to vector<32x256xf32>
      %16 = arith.addf %13, %15 : vector<32x256xf32>
      %cst_8 = arith.constant 0.000000e+00 : f32
      %17 = vector.broadcast %cst_8 : f32 to vector<32x256xf32>
      %18 = arith.maximumf %16, %17 : vector<32x256xf32>
      %19 = arith.truncf %18 : vector<32x256xf32> to vector<32x256xbf16>
      %c0_9 = arith.constant 0 : index
      %c0_10 = arith.constant 0 : index
      %20 = vector.load %arg4[%c0_9, %c0_10] : memref<256x512xbf16, #tpu.memory_space<vmem>>, vector<256x512xbf16>
      %cst_11 = arith.constant dense<0.000000e+00> : vector<32x512xf32>
      %21 = tpu.matmul %19, %20, %cst_11 {dimension_numbers = #tpu.dot_dimension_numbers<[1], [0], [0], [1], [0, 0, 1, 1], [], []>} : vector<32x256xbf16>, vector<256x512xbf16>, vector<32x512xf32> -> vector<32x512xf32>
      %c0_12 = arith.constant 0 : index
      %c0_13 = arith.constant 0 : index
      %22 = vector.load %arg5[%c0_12, %c0_13] : memref<1x512xf32, #tpu.memory_space<vmem>>, vector<1x512xf32>
      %23 = vector.broadcast %22 : vector<1x512xf32> to vector<32x512xf32>
      %24 = arith.addf %21, %23 : vector<32x512xf32>
      %cst_14 = arith.constant 0.000000e+00 : f32
      %25 = vector.broadcast %cst_14 : f32 to vector<32x512xf32>
      %26 = arith.maximumf %24, %25 : vector<32x512xf32>
      %27 = arith.truncf %26 : vector<32x512xf32> to vector<32x512xbf16>
      %c0_15 = arith.constant 0 : index
      %c0_16 = arith.constant 0 : index
      %28 = vector.load %arg6[%c0_15, %c0_16] : memref<512x1024xbf16, #tpu.memory_space<vmem>>, vector<512x512xbf16>
      %cst_17 = arith.constant dense<0.000000e+00> : vector<32x512xf32>
      %29 = tpu.matmul %27, %28, %cst_17 {dimension_numbers = #tpu.dot_dimension_numbers<[1], [0], [0], [1], [0, 0, 1, 1], [], []>} : vector<32x512xbf16>, vector<512x512xbf16>, vector<32x512xf32> -> vector<32x512xf32>
      %c0_18 = arith.constant 0 : index
      %c0_19 = arith.constant 0 : index
      %30 = vector.load %arg7[%c0_18, %c0_19] : memref<1x1024xf32, #tpu.memory_space<vmem>>, vector<1x512xf32>
      %31 = vector.broadcast %30 : vector<1x512xf32> to vector<32x512xf32>
      %32 = arith.addf %29, %31 : vector<32x512xf32>
      %cst_20 = arith.constant 0.000000e+00 : f32
      %33 = vector.broadcast %cst_20 : f32 to vector<32x512xf32>
      %34 = arith.maximumf %32, %33 : vector<32x512xf32>
      %35 = arith.truncf %34 : vector<32x512xf32> to vector<32x512xbf16>
      %c0_21 = arith.constant 0 : index
      %c0_22 = arith.constant 0 : index
      %36 = vector.load %arg21[%c0_21, %c0_22] : memref<32x1024xbf16, #tpu.memory_space<vmem>>, vector<32x512xbf16>
      tpu.vector_store %arg21[%c0_21, %c0_22], %35 {strides = array<i32>} : memref<32x1024xbf16, #tpu.memory_space<vmem>>, vector<32x512xbf16>,
      %c0_23 = arith.constant 0 : index
      %c512 = arith.constant 512 : index
      %37 = vector.load %arg6[%c0_23, %c512] : memref<512x1024xbf16, #tpu.memory_space<vmem>>, vector<512x512xbf16>
      %cst_24 = arith.constant dense<0.000000e+00> : vector<32x512xf32>
      %38 = tpu.matmul %27, %37, %cst_24 {dimension_numbers = #tpu.dot_dimension_numbers<[1], [0], [0], [1], [0, 0, 1, 1], [], []>} : vector<32x512xbf16>, vector<512x512xbf16>, vector<32x512xf32> -> vector<32x512xf32>
      %c0_25 = arith.constant 0 : index
      %c512_26 = arith.constant 512 : index
      %39 = vector.load %arg7[%c0_25, %c512_26] : memref<1x1024xf32, #tpu.memory_space<vmem>>, vector<1x512xf32>
      %40 = vector.broadcast %39 : vector<1x512xf32> to vector<32x512xf32>
      %41 = arith.addf %38, %40 : vector<32x512xf32>
      %cst_27 = arith.constant 0.000000e+00 : f32
      %42 = vector.broadcast %cst_27 : f32 to vector<32x512xf32>
      %43 = arith.maximumf %41, %42 : vector<32x512xf32>
      %44 = arith.truncf %43 : vector<32x512xf32> to vector<32x512xbf16>
      %c0_28 = arith.constant 0 : index
      %c512_29 = arith.constant 512 : index
      %45 = vector.load %arg21[%c0_28, %c512_29] : memref<32x1024xbf16, #tpu.memory_space<vmem>>, vector<32x512xbf16>
      tpu.vector_store %arg21[%c0_28, %c512_29], %44 {strides = array<i32>} : memref<32x1024xbf16, #tpu.memory_space<vmem>>, vector<32x512xbf16>,
    } else {
    }
    %c1_i32 = arith.constant 1 : i32
    %3 = arith.cmpi sge, %arg0, %c1_i32 : i32
    %c4_i32 = arith.constant 4 : i32
    %4 = arith.cmpi sle, %arg0, %c4_i32 : i32
    %5 = arith.andi %3, %4 : i1
    %6 = arith.extui %5 : i1 to i32
    %c0_i32_1 = arith.constant 0 : i32
    %7 = arith.cmpi ne, %6, %c0_i32_1 : i32
    scf.if %7 {
      %c1_i32_3 = arith.constant 1 : i32
      %11 = arith.subi %arg0, %c1_i32_3 : i32
      %c512_i32 = arith.constant 512 : i32
      %12 = arith.muli %11, %c512_i32 : i32
      %13 = tpu.assume_multiple %12, 512 : i32
      %c0 = arith.constant 0 : index
      %c0_4 = arith.constant 0 : index
      %14 = vector.load %arg21[%c0, %c0_4] : memref<32x1024xbf16, #tpu.memory_space<vmem>>, vector<32x1024xbf16>
      %c0_5 = arith.constant 0 : index
      %c0_6 = arith.constant 0 : index
      %15 = vector.load %arg8[%c0_5, %c0_6] : memref<1024x512xbf16, #tpu.memory_space<vmem>>, vector<1024x512xbf16>
      %cst = arith.constant dense<0.000000e+00> : vector<32x512xf32>
      %16 = tpu.matmul %14, %15, %cst {dimension_numbers = #tpu.dot_dimension_numbers<[1], [0], [0], [1], [0, 0, 1, 1], [], []>} : vector<32x1024xbf16>, vector<1024x512xbf16>, vector<32x512xf32> -> vector<32x512xf32>
      %c0_7 = arith.constant 0 : index
      %c0_8 = arith.constant 0 : index
      %17 = vector.load %arg9[%c0_7, %c0_8] : memref<1x512xf32, #tpu.memory_space<vmem>>, vector<1x512xf32>
      %18 = vector.broadcast %17 : vector<1x512xf32> to vector<32x512xf32>
      %19 = arith.addf %16, %18 : vector<32x512xf32>
      %cst_9 = arith.constant 0.000000e+00 : f32
      %20 = vector.broadcast %cst_9 : f32 to vector<32x512xf32>
      %21 = arith.maximumf %19, %20 : vector<32x512xf32>
      %22 = arith.truncf %21 : vector<32x512xf32> to vector<32x512xbf16>
      %c0_10 = arith.constant 0 : index
      %23 = arith.index_cast %13 : i32 to index
      %24 = vector.load %arg22[%c0_10, %23] : memref<32x2048xbf16, #tpu.memory_space<vmem>>, vector<32x512xbf16>
      tpu.vector_store %arg22[%c0_10, %23], %22 {strides = array<i32>} : memref<32x2048xbf16, #tpu.memory_space<vmem>>, vector<32x512xbf16>,
    } else {
    }
    %c5_i32 = arith.constant 5 : i32
    %8 = arith.cmpi eq, %arg0, %c5_i32 : i32
    %9 = arith.extui %8 : i1 to i32
    %c0_i32_2 = arith.constant 0 : i32
    %10 = arith.cmpi ne, %9, %c0_i32_2 : i32
    scf.if %10 {
      %c0 = arith.constant 0 : index
      %c0_3 = arith.constant 0 : index
      %11 = vector.load %arg22[%c0, %c0_3] : memref<32x2048xbf16, #tpu.memory_space<vmem>>, vector<32x2048xbf16>
      %c0_4 = arith.constant 0 : index
      %c0_5 = arith.constant 0 : index
      %12 = vector.load %arg10[%c0_4, %c0_5] : memref<2048x512xbf16, #tpu.memory_space<vmem>>, vector<2048x512xbf16>
      %cst = arith.constant dense<0.000000e+00> : vector<32x512xf32>
      %13 = tpu.matmul %11, %12, %cst {dimension_numbers = #tpu.dot_dimension_numbers<[1], [0], [0], [1], [0, 0, 1, 1], [], []>} : vector<32x2048xbf16>, vector<2048x512xbf16>, vector<32x512xf32> -> vector<32x512xf32>
      %c0_6 = arith.constant 0 : index
      %c0_7 = arith.constant 0 : index
      %14 = vector.load %arg11[%c0_6, %c0_7] : memref<1x512xf32, #tpu.memory_space<vmem>>, vector<1x512xf32>
      %15 = vector.broadcast %14 : vector<1x512xf32> to vector<32x512xf32>
      %16 = arith.addf %13, %15 : vector<32x512xf32>
      %cst_8 = arith.constant 0.000000e+00 : f32
      %17 = vector.broadcast %cst_8 : f32 to vector<32x512xf32>
      %18 = arith.maximumf %16, %17 : vector<32x512xf32>
      %19 = vector.extract_strided_slice %18 {offsets = [0, 0], sizes = [8, 512], strides = [1, 1]} : vector<32x512xf32> to vector<8x512xf32>
      %cst_9 = arith.constant dense<0.000000e+00> : vector<512xf32>
      %20 = vector.multi_reduction <add>, %19, %cst_9 [0] : vector<8x512xf32> to vector<512xf32>
      %21 = vector.shape_cast %20 : vector<512xf32> to vector<1x512xf32>
      %cst_10 = arith.constant 8.000000e+00 : f32
      %22 = vector.broadcast %cst_10 : f32 to vector<1x512xf32>
      %23 = arith.divf %21, %22 : vector<1x512xf32>
      %c0_11 = arith.constant 0 : index
      %c0_12 = arith.constant 0 : index
      %24 = vector.load %arg23[%c0_11, %c0_12] : memref<4x512xf32, #tpu.memory_space<vmem>>, vector<1x512xf32>
      tpu.vector_store %arg23[%c0_11, %c0_12], %23 {strides = array<i32>} : memref<4x512xf32, #tpu.memory_space<vmem>>, vector<1x512xf32>,
      %25 = vector.extract_strided_slice %18 {offsets = [16, 0], sizes = [8, 512], strides = [1, 1]} : vector<32x512xf32> to vector<8x512xf32>
      %cst_13 = arith.constant dense<0.000000e+00> : vector<512xf32>
      %26 = vector.multi_reduction <add>, %25, %cst_13 [0] : vector<8x512xf32> to vector<512xf32>
      %27 = vector.shape_cast %26 : vector<512xf32> to vector<1x512xf32>
      %cst_14 = arith.constant 8.000000e+00 : f32
      %28 = vector.broadcast %cst_14 : f32 to vector<1x512xf32>
      %29 = arith.divf %27, %28 : vector<1x512xf32>
      %c1 = arith.constant 1 : index
      %c0_15 = arith.constant 0 : index
      %30 = vector.load %arg23[%c1, %c0_15] : memref<4x512xf32, #tpu.memory_space<vmem>>, vector<1x512xf32>
      tpu.vector_store %arg23[%c1, %c0_15], %29 {strides = array<i32>} : memref<4x512xf32, #tpu.memory_space<vmem>>, vector<1x512xf32>,
      %31 = vector.extract_strided_slice %18 {offsets = [8, 0], sizes = [8, 512], strides = [1, 1]} : vector<32x512xf32> to vector<8x512xf32>
      %cst_16 = arith.constant dense<0.000000e+00> : vector<512xf32>
      %32 = vector.multi_reduction <add>, %31, %cst_16 [0] : vector<8x512xf32> to vector<512xf32>
      %33 = vector.shape_cast %32 : vector<512xf32> to vector<1x512xf32>
      %cst_17 = arith.constant 8.000000e+00 : f32
      %34 = vector.broadcast %cst_17 : f32 to vector<1x512xf32>
      %35 = arith.divf %33, %34 : vector<1x512xf32>
      %c2 = arith.constant 2 : index
      %c0_18 = arith.constant 0 : index
      %36 = vector.load %arg23[%c2, %c0_18] : memref<4x512xf32, #tpu.memory_space<vmem>>, vector<1x512xf32>
      tpu.vector_store %arg23[%c2, %c0_18], %35 {strides = array<i32>} : memref<4x512xf32, #tpu.memory_space<vmem>>, vector<1x512xf32>,
      %37 = vector.extract_strided_slice %18 {offsets = [24, 0], sizes = [8, 512], strides = [1, 1]} : vector<32x512xf32> to vector<8x512xf32>
      %cst_19 = arith.constant dense<0.000000e+00> : vector<512xf32>
      %38 = vector.multi_reduction <add>, %37, %cst_19 [0] : vector<8x512xf32> to vector<512xf32>
      %39 = vector.shape_cast %38 : vector<512xf32> to vector<1x512xf32>
      %cst_20 = arith.constant 8.000000e+00 : f32
      %40 = vector.broadcast %cst_20 : f32 to vector<1x512xf32>
      %41 = arith.divf %39, %40 : vector<1x512xf32>
      %c3 = arith.constant 3 : index
      %c0_21 = arith.constant 0 : index
      %42 = vector.load %arg23[%c3, %c0_21] : memref<4x512xf32, #tpu.memory_space<vmem>>, vector<1x512xf32>
      tpu.vector_store %arg23[%c3, %c0_21], %41 {strides = array<i32>} : memref<4x512xf32, #tpu.memory_space<vmem>>, vector<1x512xf32>,
      %c0_22 = arith.constant 0 : index
      %c0_23 = arith.constant 0 : index
      %43 = vector.load %arg23[%c0_22, %c0_23] : memref<4x512xf32, #tpu.memory_space<vmem>>, vector<4x512xf32>
      %44 = arith.truncf %43 : vector<4x512xf32> to vector<4x512xbf16>
      %c0_24 = arith.constant 0 : index
      %c0_25 = arith.constant 0 : index
      %45 = vector.load %arg12[%c0_24, %c0_25] : memref<512x32xbf16, #tpu.memory_space<vmem>>, vector<512x32xbf16>
      %cst_26 = arith.constant dense<0.000000e+00> : vector<4x32xf32>
      %46 = tpu.matmul %44, %45, %cst_26 {dimension_numbers = #tpu.dot_dimension_numbers<[1], [0], [0], [1], [0, 0, 1, 1], [], []>} : vector<4x512xbf16>, vector<512x32xbf16>, vector<4x32xf32> -> vector<4x32xf32>
      %c0_27 = arith.constant 0 : index
      %c0_28 = arith.constant 0 : index
      %47 = vector.load %arg13[%c0_27, %c0_28] : memref<1x32xf32, #tpu.memory_space<vmem>>, vector<1x32xf32>
      %48 = vector.broadcast %47 : vector<1x32xf32> to vector<4x32xf32>
      %49 = arith.addf %46, %48 : vector<4x32xf32>
      %cst_29 = arith.constant 0.000000e+00 : f32
      %50 = vector.broadcast %cst_29 : f32 to vector<4x32xf32>
      %51 = arith.maximumf %49, %50 : vector<4x32xf32>
      %52 = arith.truncf %51 : vector<4x32xf32> to vector<4x32xbf16>
      %c0_30 = arith.constant 0 : index
      %c0_31 = arith.constant 0 : index
      %53 = vector.load %arg14[%c0_30, %c0_31] : memref<32x512xbf16, #tpu.memory_space<vmem>>, vector<32x512xbf16>
      %cst_32 = arith.constant dense<0.000000e+00> : vector<4x512xf32>
      %54 = tpu.matmul %52, %53, %cst_32 {dimension_numbers = #tpu.dot_dimension_numbers<[1], [0], [0], [1], [0, 0, 1, 1], [], []>} : vector<4x32xbf16>, vector<32x512xbf16>, vector<4x512xf32> -> vector<4x512xf32>
      %c0_33 = arith.constant 0 : index
      %c0_34 = arith.constant 0 : index
      %55 = vector.load %arg15[%c0_33, %c0_34] : memref<1x512xf32, #tpu.memory_space<vmem>>, vector<1x512xf32>
      %56 = vector.broadcast %55 : vector<1x512xf32> to vector<4x512xf32>
      %57 = arith.addf %54, %56 : vector<4x512xf32>
      %58 = arith.negf %57 : vector<4x512xf32>
      %59 = math.exp %58 : vector<4x512xf32>
      %cst_35 = arith.constant 1.000000e+00 : f32
      %60 = vector.broadcast %cst_35 : f32 to vector<4x512xf32>
      %61 = arith.addf %60, %59 : vector<4x512xf32>
      %62 = arith.divf %60, %61 : vector<4x512xf32>
      %63 = arith.mulf %43, %62 : vector<4x512xf32>
      %64 = vector.extract_strided_slice %63 {offsets = [0, 0], sizes = [2, 512], strides = [1, 1]} : vector<4x512xf32> to vector<2x512xf32>
      %c0_36 = arith.constant 0 : index
      %c0_37 = arith.constant 0 : index
      %65 = vector.load %arg18[%c0_36, %c0_37] : memref<2x512xf32, #tpu.memory_space<vmem>>, vector<1x512xf32>
      %66 = vector.broadcast %65 : vector<1x512xf32> to vector<2x512xf32>
      %67 = arith.mulf %64, %66 : vector<2x512xf32>
      %c0_38 = arith.constant 0 : index
      %c0_39 = arith.constant 0 : index
      %68 = vector.load %arg19[%c0_38, %c0_39] : memref<2x512xf32, #tpu.memory_space<vmem>>, vector<1x512xf32>
      %69 = vector.broadcast %68 : vector<1x512xf32> to vector<2x512xf32>
      %70 = arith.addf %67, %69 : vector<2x512xf32>
      %c0_40 = arith.constant 0 : index
      %c0_41 = arith.constant 0 : index
      %71 = vector.load %arg20[%c0_40, %c0_41] : memref<2x3072xf32, #tpu.memory_space<vmem>>, vector<2x512xf32>
      tpu.vector_store %arg20[%c0_40, %c0_41], %70 {strides = array<i32>} : memref<2x3072xf32, #tpu.memory_space<vmem>>, vector<2x512xf32>,
      %72 = vector.extract_strided_slice %63 {offsets = [2, 0], sizes = [2, 512], strides = [1, 1]} : vector<4x512xf32> to vector<2x512xf32>
      %c1_42 = arith.constant 1 : index
      %c0_43 = arith.constant 0 : index
      %73 = vector.load %arg18[%c1_42, %c0_43] : memref<2x512xf32, #tpu.memory_space<vmem>>, vector<1x512xf32>
      %74 = vector.broadcast %73 : vector<1x512xf32> to vector<2x512xf32>
      %75 = arith.mulf %72, %74 : vector<2x512xf32>
      %c1_44 = arith.constant 1 : index
      %c0_45 = arith.constant 0 : index
      %76 = vector.load %arg19[%c1_44, %c0_45] : memref<2x512xf32, #tpu.memory_space<vmem>>, vector<1x512xf32>
      %77 = vector.broadcast %76 : vector<1x512xf32> to vector<2x512xf32>
      %78 = arith.addf %75, %77 : vector<2x512xf32>
      %c0_46 = arith.constant 0 : index
      %c512 = arith.constant 512 : index
      %79 = vector.load %arg20[%c0_46, %c512] : memref<2x3072xf32, #tpu.memory_space<vmem>>, vector<2x512xf32>
      tpu.vector_store %arg20[%c0_46, %c512], %78 {strides = array<i32>} : memref<2x3072xf32, #tpu.memory_space<vmem>>, vector<2x512xf32>,
      %c0_47 = arith.constant 0 : index
      %c0_48 = arith.constant 0 : index
      %80 = vector.load %arg22[%c0_47, %c0_48] : memref<32x2048xbf16, #tpu.memory_space<vmem>>, vector<16x512xbf16>
      %81 = arith.extf %80 : vector<16x512xbf16> to vector<16x512xf32>
      %cst_49 = arith.constant dense<0.000000e+00> : vector<512xf32>
      %82 = vector.multi_reduction <add>, %81, %cst_49 [0] : vector<16x512xf32> to vector<512xf32>
      %83 = vector.shape_cast %82 : vector<512xf32> to vector<1x512xf32>
      %cst_50 = arith.constant 1.600000e+01 : f32
      %84 = vector.broadcast %cst_50 : f32 to vector<1x512xf32>
      %85 = arith.divf %83, %84 : vector<1x512xf32>
      %c0_51 = arith.constant 0 : index
      %c0_52 = arith.constant 0 : index
      %86 = vector.load %arg16[%c0_51, %c0_52] : memref<1x2048xf32, #tpu.memory_space<vmem>>, vector<1x512xf32>
      %87 = arith.mulf %85, %86 : vector<1x512xf32>
      %c0_53 = arith.constant 0 : index
      %c0_54 = arith.constant 0 : index
      %88 = vector.load %arg17[%c0_53, %c0_54] : memref<1x2048xf32, #tpu.memory_space<vmem>>, vector<1x512xf32>
      %89 = arith.addf %87, %88 : vector<1x512xf32>
      %c0_55 = arith.constant 0 : index
      %c1024 = arith.constant 1024 : index
      %90 = vector.load %arg20[%c0_55, %c1024] : memref<2x3072xf32, #tpu.memory_space<vmem>>, vector<1x512xf32>
      tpu.vector_store %arg20[%c0_55, %c1024], %89 {strides = array<i32>} : memref<2x3072xf32, #tpu.memory_space<vmem>>, vector<1x512xf32>,
      %c0_56 = arith.constant 0 : index
      %c512_57 = arith.constant 512 : index
      %91 = vector.load %arg22[%c0_56, %c512_57] : memref<32x2048xbf16, #tpu.memory_space<vmem>>, vector<16x512xbf16>
      %92 = arith.extf %91 : vector<16x512xbf16> to vector<16x512xf32>
      %cst_58 = arith.constant dense<0.000000e+00> : vector<512xf32>
      %93 = vector.multi_reduction <add>, %92, %cst_58 [0] : vector<16x512xf32> to vector<512xf32>
      %94 = vector.shape_cast %93 : vector<512xf32> to vector<1x512xf32>
      %cst_59 = arith.constant 1.600000e+01 : f32
      %95 = vector.broadcast %cst_59 : f32 to vector<1x512xf32>
      %96 = arith.divf %94, %95 : vector<1x512xf32>
      %c0_60 = arith.constant 0 : index
      %c512_61 = arith.constant 512 : index
      %97 = vector.load %arg16[%c0_60, %c512_61] : memref<1x2048xf32, #tpu.memory_space<vmem>>, vector<1x512xf32>
      %98 = arith.mulf %96, %97 : vector<1x512xf32>
      %c0_62 = arith.constant 0 : index
      %c512_63 = arith.constant 512 : index
      %99 = vector.load %arg17[%c0_62, %c512_63] : memref<1x2048xf32, #tpu.memory_space<vmem>>, vector<1x512xf32>
      %100 = arith.addf %98, %99 : vector<1x512xf32>
      %c0_64 = arith.constant 0 : index
      %c1536 = arith.constant 1536 : index
      %101 = vector.load %arg20[%c0_64, %c1536] : memref<2x3072xf32, #tpu.memory_space<vmem>>, vector<1x512xf32>
      tpu.vector_store %arg20[%c0_64, %c1536], %100 {strides = array<i32>} : memref<2x3072xf32, #tpu.memory_space<vmem>>, vector<1x512xf32>,
      %c0_65 = arith.constant 0 : index
      %c1024_66 = arith.constant 1024 : index
      %102 = vector.load %arg22[%c0_65, %c1024_66] : memref<32x2048xbf16, #tpu.memory_space<vmem>>, vector<16x512xbf16>
      %103 = arith.extf %102 : vector<16x512xbf16> to vector<16x512xf32>
      %cst_67 = arith.constant dense<0.000000e+00> : vector<512xf32>
      %104 = vector.multi_reduction <add>, %103, %cst_67 [0] : vector<16x512xf32> to vector<512xf32>
      %105 = vector.shape_cast %104 : vector<512xf32> to vector<1x512xf32>
      %cst_68 = arith.constant 1.600000e+01 : f32
      %106 = vector.broadcast %cst_68 : f32 to vector<1x512xf32>
      %107 = arith.divf %105, %106 : vector<1x512xf32>
      %c0_69 = arith.constant 0 : index
      %c1024_70 = arith.constant 1024 : index
      %108 = vector.load %arg16[%c0_69, %c1024_70] : memref<1x2048xf32, #tpu.memory_space<vmem>>, vector<1x512xf32>
      %109 = arith.mulf %107, %108 : vector<1x512xf32>
      %c0_71 = arith.constant 0 : index
      %c1024_72 = arith.constant 1024 : index
      %110 = vector.load %arg17[%c0_71, %c1024_72] : memref<1x2048xf32, #tpu.memory_space<vmem>>, vector<1x512xf32>
      %111 = arith.addf %109, %110 : vector<1x512xf32>
      %c0_73 = arith.constant 0 : index
      %c2048 = arith.constant 2048 : index
      %112 = vector.load %arg20[%c0_73, %c2048] : memref<2x3072xf32, #tpu.memory_space<vmem>>, vector<1x512xf32>
      tpu.vector_store %arg20[%c0_73, %c2048], %111 {strides = array<i32>} : memref<2x3072xf32, #tpu.memory_space<vmem>>, vector<1x512xf32>,
      %c0_74 = arith.constant 0 : index
      %c1536_75 = arith.constant 1536 : index
      %113 = vector.load %arg22[%c0_74, %c1536_75] : memref<32x2048xbf16, #tpu.memory_space<vmem>>, vector<16x512xbf16>
      %114 = arith.extf %113 : vector<16x512xbf16> to vector<16x512xf32>
      %cst_76 = arith.constant dense<0.000000e+00> : vector<512xf32>
      %115 = vector.multi_reduction <add>, %114, %cst_76 [0] : vector<16x512xf32> to vector<512xf32>
      %116 = vector.shape_cast %115 : vector<512xf32> to vector<1x512xf32>
      %cst_77 = arith.constant 1.600000e+01 : f32
      %117 = vector.broadcast %cst_77 : f32 to vector<1x512xf32>
      %118 = arith.divf %116, %117 : vector<1x512xf32>
      %c0_78 = arith.constant 0 : index
      %c1536_79 = arith.constant 1536 : index
      %119 = vector.load %arg16[%c0_78, %c1536_79] : memref<1x2048xf32, #tpu.memory_space<vmem>>, vector<1x512xf32>
      %120 = arith.mulf %118, %119 : vector<1x512xf32>
      %c0_80 = arith.constant 0 : index
      %c1536_81 = arith.constant 1536 : index
      %121 = vector.load %arg17[%c0_80, %c1536_81] : memref<1x2048xf32, #tpu.memory_space<vmem>>, vector<1x512xf32>
      %122 = arith.addf %120, %121 : vector<1x512xf32>
      %c0_82 = arith.constant 0 : index
      %c2560 = arith.constant 2560 : index
      %123 = vector.load %arg20[%c0_82, %c2560] : memref<2x3072xf32, #tpu.memory_space<vmem>>, vector<1x512xf32>
      tpu.vector_store %arg20[%c0_82, %c2560], %122 {strides = array<i32>} : memref<2x3072xf32, #tpu.memory_space<vmem>>, vector<1x512xf32>,
      %c16 = arith.constant 16 : index
      %c0_83 = arith.constant 0 : index
      %124 = vector.load %arg22[%c16, %c0_83] : memref<32x2048xbf16, #tpu.memory_space<vmem>>, vector<16x512xbf16>
      %125 = arith.extf %124 : vector<16x512xbf16> to vector<16x512xf32>
      %cst_84 = arith.constant dense<0.000000e+00> : vector<512xf32>
      %126 = vector.multi_reduction <add>, %125, %cst_84 [0] : vector<16x512xf32> to vector<512xf32>
      %127 = vector.shape_cast %126 : vector<512xf32> to vector<1x512xf32>
      %cst_85 = arith.constant 1.600000e+01 : f32
      %128 = vector.broadcast %cst_85 : f32 to vector<1x512xf32>
      %129 = arith.divf %127, %128 : vector<1x512xf32>
      %c0_86 = arith.constant 0 : index
      %c0_87 = arith.constant 0 : index
      %130 = vector.load %arg16[%c0_86, %c0_87] : memref<1x2048xf32, #tpu.memory_space<vmem>>, vector<1x512xf32>
      %131 = arith.mulf %129, %130 : vector<1x512xf32>
      %c0_88 = arith.constant 0 : index
      %c0_89 = arith.constant 0 : index
      %132 = vector.load %arg17[%c0_88, %c0_89] : memref<1x2048xf32, #tpu.memory_space<vmem>>, vector<1x512xf32>
      %133 = arith.addf %131, %132 : vector<1x512xf32>
      %c1_90 = arith.constant 1 : index
      %c1024_91 = arith.constant 1024 : index
      %134 = vector.load %arg20[%c1_90, %c1024_91] : memref<2x3072xf32, #tpu.memory_space<vmem>>, vector<1x512xf32>
      tpu.vector_store %arg20[%c1_90, %c1024_91], %133 {strides = array<i32>} : memref<2x3072xf32, #tpu.memory_space<vmem>>, vector<1x512xf32>,
      %c16_92 = arith.constant 16 : index
      %c512_93 = arith.constant 512 : index
      %135 = vector.load %arg22[%c16_92, %c512_93] : memref<32x2048xbf16, #tpu.memory_space<vmem>>, vector<16x512xbf16>
      %136 = arith.extf %135 : vector<16x512xbf16> to vector<16x512xf32>
      %cst_94 = arith.constant dense<0.000000e+00> : vector<512xf32>
      %137 = vector.multi_reduction <add>, %136, %cst_94 [0] : vector<16x512xf32> to vector<512xf32>
      %138 = vector.shape_cast %137 : vector<512xf32> to vector<1x512xf32>
      %cst_95 = arith.constant 1.600000e+01 : f32
      %139 = vector.broadcast %cst_95 : f32 to vector<1x512xf32>
      %140 = arith.divf %138, %139 : vector<1x512xf32>
      %c0_96 = arith.constant 0 : index
      %c512_97 = arith.constant 512 : index
      %141 = vector.load %arg16[%c0_96, %c512_97] : memref<1x2048xf32, #tpu.memory_space<vmem>>, vector<1x512xf32>
      %142 = arith.mulf %140, %141 : vector<1x512xf32>
      %c0_98 = arith.constant 0 : index
      %c512_99 = arith.constant 512 : index
      %143 = vector.load %arg17[%c0_98, %c512_99] : memref<1x2048xf32, #tpu.memory_space<vmem>>, vector<1x512xf32>
      %144 = arith.addf %142, %143 : vector<1x512xf32>
      %c1_100 = arith.constant 1 : index
      %c1536_101 = arith.constant 1536 : index
      %145 = vector.load %arg20[%c1_100, %c1536_101] : memref<2x3072xf32, #tpu.memory_space<vmem>>, vector<1x512xf32>
      tpu.vector_store %arg20[%c1_100, %c1536_101], %144 {strides = array<i32>} : memref<2x3072xf32, #tpu.memory_space<vmem>>, vector<1x512xf32>,
      %c16_102 = arith.constant 16 : index
      %c1024_103 = arith.constant 1024 : index
      %146 = vector.load %arg22[%c16_102, %c1024_103] : memref<32x2048xbf16, #tpu.memory_space<vmem>>, vector<16x512xbf16>
      %147 = arith.extf %146 : vector<16x512xbf16> to vector<16x512xf32>
      %cst_104 = arith.constant dense<0.000000e+00> : vector<512xf32>
      %148 = vector.multi_reduction <add>, %147, %cst_104 [0] : vector<16x512xf32> to vector<512xf32>
      %149 = vector.shape_cast %148 : vector<512xf32> to vector<1x512xf32>
      %cst_105 = arith.constant 1.600000e+01 : f32
      %150 = vector.broadcast %cst_105 : f32 to vector<1x512xf32>
      %151 = arith.divf %149, %150 : vector<1x512xf32>
      %c0_106 = arith.constant 0 : index
      %c1024_107 = arith.constant 1024 : index
      %152 = vector.load %arg16[%c0_106, %c1024_107] : memref<1x2048xf32, #tpu.memory_space<vmem>>, vector<1x512xf32>
      %153 = arith.mulf %151, %152 : vector<1x512xf32>
      %c0_108 = arith.constant 0 : index
      %c1024_109 = arith.constant 1024 : index
      %154 = vector.load %arg17[%c0_108, %c1024_109] : memref<1x2048xf32, #tpu.memory_space<vmem>>, vector<1x512xf32>
      %155 = arith.addf %153, %154 : vector<1x512xf32>
      %c1_110 = arith.constant 1 : index
      %c2048_111 = arith.constant 2048 : index
      %156 = vector.load %arg20[%c1_110, %c2048_111] : memref<2x3072xf32, #tpu.memory_space<vmem>>, vector<1x512xf32>
      tpu.vector_store %arg20[%c1_110, %c2048_111], %155 {strides = array<i32>} : memref<2x3072xf32, #tpu.memory_space<vmem>>, vector<1x512xf32>,
      %c16_112 = arith.constant 16 : index
      %c1536_113 = arith.constant 1536 : index
      %157 = vector.load %arg22[%c16_112, %c1536_113] : memref<32x2048xbf16, #tpu.memory_space<vmem>>, vector<16x512xbf16>
      %158 = arith.extf %157 : vector<16x512xbf16> to vector<16x512xf32>
      %cst_114 = arith.constant dense<0.000000e+00> : vector<512xf32>
      %159 = vector.multi_reduction <add>, %158, %cst_114 [0] : vector<16x512xf32> to vector<512xf32>
      %160 = vector.shape_cast %159 : vector<512xf32> to vector<1x512xf32>
      %cst_115 = arith.constant 1.600000e+01 : f32
      %161 = vector.broadcast %cst_115 : f32 to vector<1x512xf32>
      %162 = arith.divf %160, %161 : vector<1x512xf32>
      %c0_116 = arith.constant 0 : index
      %c1536_117 = arith.constant 1536 : index
      %163 = vector.load %arg16[%c0_116, %c1536_117] : memref<1x2048xf32, #tpu.memory_space<vmem>>, vector<1x512xf32>
      %164 = arith.mulf %162, %163 : vector<1x512xf32>
      %c0_118 = arith.constant 0 : index
      %c1536_119 = arith.constant 1536 : index
      %165 = vector.load %arg17[%c0_118, %c1536_119] : memref<1x2048xf32, #tpu.memory_space<vmem>>, vector<1x512xf32>
      %166 = arith.addf %164, %165 : vector<1x512xf32>
      %c1_120 = arith.constant 1 : index
      %c2560_121 = arith.constant 2560 : index
      %167 = vector.load %arg20[%c1_120, %c2560_121] : memref<2x3072xf32, #tpu.memory_space<vmem>>, vector<1x512xf32>
      tpu.vector_store %arg20[%c1_120, %c2560_121], %166 {strides = array<i32>} : memref<2x3072xf32, #tpu.memory_space<vmem>>, vector<1x512xf32>,
    } else {
    }
    return
  }
  func.func @transform_0(%arg0: i32) -> (i32, i32) {
    %c0_i32 = arith.constant 0 : i32
    %c0_i32_0 = arith.constant 0 : i32
    %c0_i32_1 = arith.constant 0 : i32
    return %c0_i32, %c0_i32_0 : i32, i32
  }
  func.func @transform_1(%arg0: i32) -> (i32, i32) {
    %c0_i32 = arith.constant 0 : i32
    %c0_i32_0 = arith.constant 0 : i32
    %c0_i32_1 = arith.constant 0 : i32
    return %c0_i32, %c0_i32_0 : i32, i32
  }
  func.func @transform_2(%arg0: i32) -> (i32, i32) {
    %c0_i32 = arith.constant 0 : i32
    %c0_i32_0 = arith.constant 0 : i32
    %c0_i32_1 = arith.constant 0 : i32
    return %c0_i32, %c0_i32_0 : i32, i32
  }
  func.func @transform_3(%arg0: i32) -> (i32, i32) {
    %c0_i32 = arith.constant 0 : i32
    %c0_i32_0 = arith.constant 0 : i32
    %c0_i32_1 = arith.constant 0 : i32
    return %c0_i32, %c0_i32_0 : i32, i32
  }
  func.func @transform_4(%arg0: i32) -> (i32, i32) {
    %c0_i32 = arith.constant 0 : i32
    %c0_i32_0 = arith.constant 0 : i32
    %c0_i32_1 = arith.constant 0 : i32
    return %c0_i32, %c0_i32_0 : i32, i32
  }
  func.func @transform_5(%arg0: i32) -> (i32, i32) {
    %c0_i32 = arith.constant 0 : i32
    %c0_i32_0 = arith.constant 0 : i32
    %c0_i32_1 = arith.constant 0 : i32
    return %c0_i32, %c0_i32_0 : i32, i32
  }
  func.func @transform_6(%arg0: i32) -> (i32, i32) {
    %c0_i32 = arith.constant 0 : i32
    %c0_i32_0 = arith.constant 0 : i32
    %c0_i32_1 = arith.constant 0 : i32
    return %c0_i32, %c0_i32_0 : i32, i32
  }
  func.func @transform_7(%arg0: i32) -> (i32, i32) {
    %c1_i32 = arith.constant 1 : i32
    %0 = arith.subi %arg0, %c1_i32 : i32
    %c3_i32 = arith.constant 3 : i32
    %1 = arith.minsi %0, %c3_i32 : i32
    %c0_i32 = arith.constant 0 : i32
    %2 = arith.maxsi %1, %c0_i32 : i32
    %c0_i32_0 = arith.constant 0 : i32
    %c0_i32_1 = arith.constant 0 : i32
    return %c0_i32_0, %2 : i32, i32
  }
  func.func @transform_8(%arg0: i32) -> (i32, i32) {
    %c1_i32 = arith.constant 1 : i32
    %0 = arith.subi %arg0, %c1_i32 : i32
    %c3_i32 = arith.constant 3 : i32
    %1 = arith.minsi %0, %c3_i32 : i32
    %c0_i32 = arith.constant 0 : i32
    %2 = arith.maxsi %1, %c0_i32 : i32
    %c0_i32_0 = arith.constant 0 : i32
    %c0_i32_1 = arith.constant 0 : i32
    return %c0_i32_0, %2 : i32, i32
  }
  func.func @transform_9(%arg0: i32) -> (i32, i32) {
    %c0_i32 = arith.constant 0 : i32
    %c0_i32_0 = arith.constant 0 : i32
    %c0_i32_1 = arith.constant 0 : i32
    return %c0_i32, %c0_i32_0 : i32, i32
  }
  func.func @transform_10(%arg0: i32) -> (i32, i32) {
    %c0_i32 = arith.constant 0 : i32
    %c0_i32_0 = arith.constant 0 : i32
    %c0_i32_1 = arith.constant 0 : i32
    return %c0_i32, %c0_i32_0 : i32, i32
  }
  func.func @transform_11(%arg0: i32) -> (i32, i32) {
    %c0_i32 = arith.constant 0 : i32
    %c0_i32_0 = arith.constant 0 : i32
    %c0_i32_1 = arith.constant 0 : i32
    return %c0_i32, %c0_i32_0 : i32, i32
  }
  func.func @transform_12(%arg0: i32) -> (i32, i32) {
    %c0_i32 = arith.constant 0 : i32
    %c0_i32_0 = arith.constant 0 : i32
    %c0_i32_1 = arith.constant 0 : i32
    return %c0_i32, %c0_i32_0 : i32, i32
  }
  func.func @transform_13(%arg0: i32) -> (i32, i32) {
    %c0_i32 = arith.constant 0 : i32
    %c0_i32_0 = arith.constant 0 : i32
    %c0_i32_1 = arith.constant 0 : i32
    return %c0_i32, %c0_i32_0 : i32, i32
  }
  func.func @transform_14(%arg0: i32) -> (i32, i32) {
    %c0_i32 = arith.constant 0 : i32
    %c0_i32_0 = arith.constant 0 : i32
    %c0_i32_1 = arith.constant 0 : i32
    return %c0_i32, %c0_i32_0 : i32, i32
  }
  func.func @transform_15(%arg0: i32) -> (i32, i32) {
    %c0_i32 = arith.constant 0 : i32
    %c0_i32_0 = arith.constant 0 : i32
    %c0_i32_1 = arith.constant 0 : i32
    return %c0_i32, %c0_i32_0 : i32, i32
  }
  func.func @transform_16(%arg0: i32) -> (i32, i32) {
    %c0_i32 = arith.constant 0 : i32
    %c0_i32_0 = arith.constant 0 : i32
    %c0_i32_1 = arith.constant 0 : i32
    return %c0_i32, %c0_i32_0 : i32, i32
  }
  func.func @transform_17(%arg0: i32) -> (i32, i32) {
    %c0_i32 = arith.constant 0 : i32
    %c0_i32_0 = arith.constant 0 : i32
    %c0_i32_1 = arith.constant 0 : i32
    return %c0_i32, %c0_i32_0 : i32, i32
  }
  func.func @transform_18(%arg0: i32) -> (i32, i32) {
    %c0_i32 = arith.constant 0 : i32
    %c0_i32_0 = arith.constant 0 : i32
    %c0_i32_1 = arith.constant 0 : i32
    return %c0_i32, %c0_i32_0 : i32, i32
  }
  func.func @transform_19(%arg0: i32) -> (i32, i32) {
    %c0_i32 = arith.constant 0 : i32
    %c0_i32_0 = arith.constant 0 : i32
    %c0_i32_1 = arith.constant 0 : i32
    return %c0_i32, %c0_i32_0 : i32, i32
  }
}

</mosaic_0001>

<bundles_post_ra>
// kernel: _lambda_.2
= control target key start
LH: loop header
LB: loop body
LE: loop exit
PB: predicated region body
PF: predicated region fallthrough
CT: control target
= control target key end

     0   :  { %s1494_s12 = smov 0   ;;  %s1496_s13 = smov 0   ;;  %s1668_s0 = inlined_call_operand.vmem [shape: bf16[2048,256], index: 0, kind: input, shape index: {}]   ;;  %s1669_s1 = inlined_call_operand.vmem [shape: bf16[256,128], index: 1, kind: input, shape index: {}]   ;;  %s1670_s2 = inlined_call_operand.vmem [shape: f32[1,128], index: 2, kind: input, shape index: {}]   ;;  %s1671_s3 = inlined_call_operand.vmem [shape: bf16[2048,128], index: 3, kind: output, shape index: {}]  }
   0x1   :  { %s1498_s14 = smov 0  }
   0x2 LB: > { %s22_s15 = sadd.s32 1, %s1468_s13  ;;  %p1017_p0 = scmp.ge.s32.totalorder %s1472_s14, 1  ;;  %s1472_s14 = sphi %s1498_s14, %s13_s14   ;;  %s1468_s13 = sphi %s1496_s13, %s1673_s13   ;;  %s1464_s12 = sphi %s1494_s12, %s1672_s12  }
   0x3   : > { %p23_p1 = scmp.ge.s32.totalorder %s22_s15, 8  ;;  %p170_p2 = scmp.lt.s32.totalorder %s1472_s14, 9 }
   0x5   : > { %s1675_s15 = smov (%p23_p1, %s22_s15), 0  ;;  %p171_p3 = pnand %p1017_p0, %p170_p2 }
   0x6   : > { %v1386_v0 = vld [vmem:[%s1669_s1 + $0x40] sm:$0xff] (!%p171_p3)   ;;  %s1018_s18 = sshll.u32 (!%p171_p3), %s1464_s12, 5  ;;  %v1388_v2 = vld [vmem:[%s1669_s1 + $0x48] sm:$0xff] (!%p171_p3)   ;;  %v1390_v4 = vld [vmem:[%s1669_s1 + $0x50] sm:$0xff] (!%p171_p3)  }
   0x7   : > { %174 = sbr.rel (%p171_p3) target bundleno = 320 (0x140), region = 32  ;;  %v1387_v1 = vld [vmem:[%s1669_s1] sm:$0xff] (!%p171_p3)   ;;  %1234 = vmatprep.subr.bf16.mxu0 (!%p171_p3), %v1386_v0  ;;  %1346 = vmatprep.subr.bf16.mxu1 (!%p171_p3), %v1386_v0  ;;  %v1389_v3 = vld [vmem:[%s1669_s1 + $0x8] sm:$0xff] (!%p171_p3)   ;;  %p206_p4 = scmp.lt.s32.totalorder (!%p171_p3), %s1018_s18, 255  ;;  %v1391_v5 = vld [vmem:[%s1669_s1 + $0x10] sm:$0xff] (!%p171_p3)  }
   0x8   : > { %1235 = vmatpush3.bf16.msra.mxu0 (!%p171_p3), %v1387_v1  ;;  %1354 = vmatpush3.bf16.msra.mxu1 (!%p171_p3), %v1387_v1  ;;  %v1392_v6 = vld [vmem:[%s1669_s1 + $0x58] sm:$0xff] (!%p171_p3)   ;;  %v1394_v8 = vld [vmem:[%s1669_s1 + $0x60] sm:$0xff] (!%p171_p3)   ;;  %v1396_v10 = vld [vmem:[%s1669_s1 + $0x68] sm:$0xff] (!%p171_p3)  }
   0x9   : > { %1236 = vmatprep.subr.bf16.mxu0 (!%p171_p3), %v1388_v2  ;;  %1347 = vmatprep.subr.bf16.mxu1 (!%p171_p3), %v1388_v2  ;;  %v1393_v7 = vld [vmem:[%s1669_s1 + $0x18] sm:$0xff] (!%p171_p3)   ;;  %v1395_v9 = vld [vmem:[%s1669_s1 + $0x20] sm:$0xff] (!%p171_p3)   ;;  %v1397_v13 = vld [vmem:[%s1669_s1 + $0x28] sm:$0xff] (!%p171_p3)  }
   0xa   : > { %v1398_v14 = vld [vmem:[%s1669_s1 + $0x70] sm:$0xff] (!%p171_p3)   ;;  %v1400_v16 = vld [vmem:[%s1669_s1 + $0x78] sm:$0xff] (!%p171_p3)   ;;  %v1603_v50 = vld [vmem:[%s1670_s2] ss:$0 sm:$0xff] (!%p171_p3) }
   0xb   : > { %v1399_v15 = vld [vmem:[%s1669_s1 + $0x30] sm:$0xff] (!%p171_p3)   ;;  %v1401_v17 = vld [vmem:[%s1669_s1 + $0x38] sm:$0xff] (!%p171_p3)  }
   0xc   : > { %1237 = vmatpush3.bf16.msra.mxu0 (!%p171_p3), %v1389_v3  ;;  %1355 = vmatpush3.bf16.msra.mxu1 (!%p171_p3), %v1389_v3 }
   0xd   : > { %1238 = vmatprep.subr.bf16.mxu0 (!%p171_p3), %v1390_v4  ;;  %1348 = vmatprep.subr.bf16.mxu1 (!%p171_p3), %v1390_v4 }
   0xe   : > { %s1677_s18 = smov (!%p206_p4, %s1018_s18), 255 }
   0xf   : > { %s1106_s6 = sshll.u32 %s1677_s18, 3  ;;  %s1022_s5 = sshll.u32 %s1677_s18, 2 }
  0x10   : > { %1239 = vmatpush3.bf16.msra.mxu0 %v1391_v5  ;;  %1356 = vmatpush3.bf16.msra.mxu1 %v1391_v5  ;;  %s1545_s11 = scalar_lea.vmem %s1668_s0, %s1106_s6  ;;  %s1613_s8 = scalar_lea.vmem %s1671_s3, %s1022_s5 }
  0x11   : > { %1240 = vmatprep.subr.bf16.mxu0 %v1392_v6  ;;  %1349 = vmatprep.subr.bf16.mxu1 %v1392_v6  ;;  %v1404_v11 = vld [vmem:[%s1545_s11 + $0x4] ss:$8 sps:$4 sm:$0xff]   ;;  %v1402_v18 = vld [vmem:[%s1545_s11] ss:$8 sps:$4 sm:$0xff]   ;;  %v1408_v20 = vld [vmem:[%s1545_s11 + $0x14] ss:$8 sps:$4 sm:$0xff]  }
  0x12   : > { %v1407_v12 = vld [vmem:[%s1545_s11 + $0x84] ss:$8 sps:$4 sm:$0xff]   ;;  %588 = vmatprep.mubr.bf16.mxu0 %v1404_v11  ;;  %v1405_v19 = vld [vmem:[%s1545_s11 + $0x80] ss:$8 sps:$4 sm:$0xff]   ;;  %v1410_v21 = vld [vmem:[%s1545_s11 + $0x94] ss:$8 sps:$4 sm:$0xff]  }
  0x13   : > { %652 = vmatprep.mubr.bf16.mxu1 %v1407_v12  ;;  %v1412_v22 = vld [vmem:[%s1545_s11 + $0x10] ss:$8 sps:$4 sm:$0xff]   ;;  %v1414_v24 = vld [vmem:[%s1545_s11 + $0x24] ss:$8 sps:$4 sm:$0xff]   ;;  %v1418_v26 = vld [vmem:[%s1545_s11 + $0x20] ss:$8 sps:$4 sm:$0xff]  }
  0x14   : > { %1241 = vmatpush3.bf16.msra.mxu0 %v1393_v7  ;;  %1357 = vmatpush3.bf16.msra.mxu1 %v1393_v7  ;;  %v1413_v23 = vld [vmem:[%s1545_s11 + $0x90] ss:$8 sps:$4 sm:$0xff]   ;;  %v1416_v25 = vld [vmem:[%s1545_s11 + $0xa4] ss:$8 sps:$4 sm:$0xff]   ;;  %v1419_v27 = vld [vmem:[%s1545_s11 + $0xa0] ss:$8 sps:$4 sm:$0xff]  }
  0x15   : > { %1242 = vmatprep.subr.bf16.mxu0 %v1394_v8  ;;  %1350 = vmatprep.subr.bf16.mxu1 %v1394_v8  ;;  %v1420_v28 = vld [vmem:[%s1545_s11 + $0x34] ss:$8 sps:$4 sm:$0xff]   ;;  %v1424_v30 = vld [vmem:[%s1545_s11 + $0x30] ss:$8 sps:$4 sm:$0xff]   ;;  %v1426_v32 = vld [vmem:[%s1545_s11 + $0x44] ss:$8 sps:$4 sm:$0xff]  }
  0x16   : > { %v1422_v29 = vld [vmem:[%s1545_s11 + $0xb4] ss:$8 sps:$4 sm:$0xff]   ;;  %v1425_v31 = vld [vmem:[%s1545_s11 + $0xb0] ss:$8 sps:$4 sm:$0xff]   ;;  %v1428_v33 = vld [vmem:[%s1545_s11 + $0xc4] ss:$8 sps:$4 sm:$0xff]  }
  0x17   : > { %v1430_v34 = vld [vmem:[%s1545_s11 + $0x40] ss:$8 sps:$4 sm:$0xff]   ;;  %v1432_v36 = vld [vmem:[%s1545_s11 + $0x54] ss:$8 sps:$4 sm:$0xff]   ;;  %v1436_v38 = vld [vmem:[%s1545_s11 + $0x50] ss:$8 sps:$4 sm:$0xff]  }
  0x18   : > { %1243 = vmatpush3.bf16.msra.mxu0 %v1395_v9  ;;  %1358 = vmatpush3.bf16.msra.mxu1 %v1395_v9  ;;  %v1431_v35 = vld [vmem:[%s1545_s11 + $0xc0] ss:$8 sps:$4 sm:$0xff]   ;;  %v1434_v37 = vld [vmem:[%s1545_s11 + $0xd4] ss:$8 sps:$4 sm:$0xff]   ;;  %v1437_v39 = vld [vmem:[%s1545_s11 + $0xd0] ss:$8 sps:$4 sm:$0xff]  }
  0x19   : > { %1244 = vmatprep.subr.bf16.mxu0 %v1396_v10  ;;  %1351 = vmatprep.subr.bf16.mxu1 %v1396_v10  ;;  %v1438_v40 = vld [vmem:[%s1545_s11 + $0x64] ss:$8 sps:$4 sm:$0xff]   ;;  %v1442_v42 = vld [vmem:[%s1545_s11 + $0x60] ss:$8 sps:$4 sm:$0xff]   ;;  %v1444_v44 = vld [vmem:[%s1545_s11 + $0x74] ss:$8 sps:$4 sm:$0xff]  }
  0x1a   : > { %v1440_v41 = vld [vmem:[%s1545_s11 + $0xe4] ss:$8 sps:$4 sm:$0xff]   ;;  %v1443_v43 = vld [vmem:[%s1545_s11 + $0xe0] ss:$8 sps:$4 sm:$0xff]   ;;  %v1446_v45 = vld [vmem:[%s1545_s11 + $0xf4] ss:$8 sps:$4 sm:$0xff]  }
  0x1b   : > { %v1448_v46 = vld [vmem:[%s1545_s11 + $0x70] ss:$8 sps:$4 sm:$0xff]  }
  0x1c   : > { %1245 = vmatpush3.bf16.msra.mxu0 %v1397_v13  ;;  %1359 = vmatpush3.bf16.msra.mxu1 %v1397_v13  ;;  %v1449_v47 = vld [vmem:[%s1545_s11 + $0xf0] ss:$8 sps:$4 sm:$0xff]  }
  0x1d   : > { %1246 = vmatprep.subr.bf16.mxu0 %v1398_v14  ;;  %1352 = vmatprep.subr.bf16.mxu1 %v1398_v14 }
  0x20   : > { %1247 = vmatpush3.bf16.msra.mxu0 %v1399_v15  ;;  %1360 = vmatpush3.bf16.msra.mxu1 %v1399_v15 }
  0x21   : > { %1248 = vmatprep.subr.bf16.mxu0 %v1400_v16  ;;  %1353 = vmatprep.subr.bf16.mxu1 %v1400_v16 }
  0x24   : > { %1249 = vmatpush3.bf16.msra.mxu0 %v1401_v17  ;;  %1361 = vmatpush3.bf16.msra.mxu1 %v1401_v17 }
  0x27   : > { %589 = vmatmul.mubr.bf16.vlgmr.msra.gmra.mrb[0].mxu0 %v1402_v18  ;;  %653 = vmatmul.mubr.bf16.vlgmr.msra.gmra.mrb[0].mxu1 %v1405_v19 }
  0x28   : > { %596 = vmatprep.mubr.bf16.mxu0 %v1408_v20  ;;  %660 = vmatprep.mubr.bf16.mxu1 %v1410_v21 }
  0x2f   : > { %597 = vmatmul.mubr.bf16.gmra.mrb[4].mxu0 %v1412_v22  ;;  %661 = vmatmul.mubr.bf16.gmra.mrb[4].mxu1 %v1413_v23 }
  0x30   : > { %604 = vmatprep.mubr.bf16.mxu0 %v1414_v24  ;;  %668 = vmatprep.mubr.bf16.mxu1 %v1416_v25 }
  0x37   : > { %605 = vmatmul.mubr.bf16.gmra.mrb[8].mxu0 %v1418_v26  ;;  %669 = vmatmul.mubr.bf16.gmra.mrb[8].mxu1 %v1419_v27 }
  0x38   : > { %612 = vmatprep.mubr.bf16.mxu0 %v1420_v28  ;;  %676 = vmatprep.mubr.bf16.mxu1 %v1422_v29 }
  0x3f   : > { %613 = vmatmul.mubr.bf16.gmra.mrb[12].mxu0 %v1424_v30  ;;  %677 = vmatmul.mubr.bf16.gmra.mrb[12].mxu1 %v1425_v31 }
  0x40   : > { %620 = vmatprep.mubr.bf16.mxu0 %v1426_v32  ;;  %684 = vmatprep.mubr.bf16.mxu1 %v1428_v33 }
  0x47   : > { %621 = vmatmul.mubr.bf16.gmra.mrb[16].mxu0 %v1430_v34  ;;  %685 = vmatmul.mubr.bf16.gmra.mrb[16].mxu1 %v1431_v35 }
  0x48   : > { %628 = vmatprep.mubr.bf16.mxu0 %v1432_v36  ;;  %692 = vmatprep.mubr.bf16.mxu1 %v1434_v37 }
  0x4f   : > { %629 = vmatmul.mubr.bf16.gmra.mrb[20].mxu0 %v1436_v38  ;;  %693 = vmatmul.mubr.bf16.gmra.mrb[20].mxu1 %v1437_v39 }
  0x50   : > { %636 = vmatprep.mubr.bf16.mxu0 %v1438_v40  ;;  %700 = vmatprep.mubr.bf16.mxu1 %v1440_v41 }
  0x57   : > { %637 = vmatmul.mubr.bf16.gmra.mrb[24].mxu0 %v1442_v42  ;;  %701 = vmatmul.mubr.bf16.gmra.mrb[24].mxu1 %v1443_v43 }
  0x58   : > { %644 = vmatprep.mubr.bf16.mxu0 %v1444_v44  ;;  %708 = vmatprep.mubr.bf16.mxu1 %v1446_v45 }
  0x5f   : > { %645 = vmatmul.mubr.bf16.gmra.mrb[28].mxu0 %v1448_v46  ;;  %709 = vmatmul.mubr.bf16.gmra.mrb[28].mxu1 %v1449_v47 }
  0xfa   : > { %v1250_v48 = vpop.f32.mrb[0].mxu0  ;;  %v1298_v49 = vpop.f32.mrb[0].mxu1 }
  0xfb   : > { %v1251_v51 = vpop.f32.mrb[1].mxu0  ;;  %v1299_v52 = vpop.f32.mrb[1].mxu1 }
  0xfc   : > { %v1252_v53 = vadd.f32 %v1251_v51, %v1250_v48  ;;  %v1300_v54 = vadd.f32 %v1299_v52, %v1298_v49  ;;  %v1253_v55 = vpop.f32.mrb[2].mxu0  ;;  %v1301_v56 = vpop.f32.mrb[2].mxu1 }
  0xfd   : > { %v1254_v57 = vpop.f32.mrb[3].mxu0  ;;  %v1302_v58 = vpop.f32.mrb[3].mxu1 }
  0xfe   : > { %v591_v59 = vadd.f32 %v1252_v53, %v1603_v50  ;;  %v655_v60 = vadd.f32 %v1300_v54, %v1603_v50  ;;  %v1255_v61 = vadd.f32 %v1254_v57, %v1253_v55  ;;  %v1303_v62 = vadd.f32 %v1302_v58, %v1301_v56 }
 0x100   : > { %v594_v63 = vadd.f32 %v1255_v61, %v1603_v50  ;;  %v658_v0 = vadd.f32 %v1303_v62, %v1603_v50  ;;  %v717_v1 = vmax.f32 %v591_v59, 0.0  ;;  %v733_v2 = vmax.f32 %v655_v60, 0.0 }
 0x102   : > { %v718_v3 = vmax.f32 %v594_v63, 0.0  ;;  %v734_v4 = vmax.f32 %v658_v0, 0.0  ;;  %v1256_v5 = vpop.f32.mrb[4].mxu0  ;;  %v1304_v6 = vpop.f32.mrb[4].mxu1 }
 0x103   : > { %v1257_v7 = vpop.f32.mrb[5].mxu0  ;;  %v1305_v8 = vpop.f32.mrb[5].mxu1 }
 0x104   : > { %v1142_v9 = vpack.c.bf16 %v718_v3, %v717_v1  ;;  %v1182_v10 = vpack.c.bf16 %v734_v4, %v733_v2  ;;  %v1258_v11 = vadd.f32 %v1257_v7, %v1256_v5  ;;  %v1306_v12 = vadd.f32 %v1305_v8, %v1304_v6  ;;  %v1259_v13 = vpop.f32.mrb[6].mxu0  ;;  %v1307_v14 = vpop.f32.mrb[6].mxu1 }
 0x105   : > { %v1260_v15 = vpop.f32.mrb[7].mxu0  ;;  %v1308_v16 = vpop.f32.mrb[7].mxu1 }
 0x106   : > { %1143 = vst [vmem:[%s1613_s8] sm:$0xff] %v1142_v9   ;;  %1226 = vst [vmem:[%s1613_s8 + $0x40] sm:$0xff] %v1182_v10   ;;  %v599_v17 = vadd.f32 %v1258_v11, %v1603_v50  ;;  %v663_v18 = vadd.f32 %v1306_v12, %v1603_v50  ;;  %v1261_v19 = vadd.f32 %v1260_v15, %v1259_v13 }
 0x107   : > { %v1309_v20 = vadd.f32 %v1308_v16, %v1307_v14 }
 0x108   : > { %v602_v21 = vadd.f32 %v1261_v19, %v1603_v50  ;;  %v719_v23 = vmax.f32 %v599_v17, 0.0  ;;  %v735_v24 = vmax.f32 %v663_v18, 0.0 }
 0x109   : > { %v666_v22 = vadd.f32 %v1309_v20, %v1603_v50 }
 0x10a   : > { %v720_v25 = vmax.f32 %v602_v21, 0.0  ;;  %v1262_v27 = vpop.f32.mrb[8].mxu0  ;;  %v1310_v28 = vpop.f32.mrb[8].mxu1 }
 0x10b   : > { %v736_v26 = vmax.f32 %v666_v22, 0.0  ;;  %v1263_v29 = vpop.f32.mrb[9].mxu0  ;;  %v1311_v30 = vpop.f32.mrb[9].mxu1 }
 0x10c   : > { %v1147_v31 = vpack.c.bf16 %v720_v25, %v719_v23  ;;  %v1264_v33 = vadd.f32 %v1263_v29, %v1262_v27  ;;  %v1312_v34 = vadd.f32 %v1311_v30, %v1310_v28  ;;  %v1265_v35 = vpop.f32.mrb[10].mxu0  ;;  %v1313_v36 = vpop.f32.mrb[10].mxu1 }
 0x10d   : > { %v1187_v32 = vpack.c.bf16 %v736_v26, %v735_v24  ;;  %v1266_v37 = vpop.f32.mrb[11].mxu0  ;;  %v1314_v38 = vpop.f32.mrb[11].mxu1 }
 0x10e   : > { %1219 = vst [vmem:[%s1613_s8 + $0x8] sm:$0xff] %v1147_v31   ;;  %v607_v39 = vadd.f32 %v1264_v33, %v1603_v50  ;;  %v671_v40 = vadd.f32 %v1312_v34, %v1603_v50  ;;  %v1267_v41 = vadd.f32 %v1266_v37, %v1265_v35  ;;  %v1315_v42 = vadd.f32 %v1314_v38, %v1313_v36 }
 0x10f   : > { %1227 = vst [vmem:[%s1613_s8 + $0x48] sm:$0xff] %v1187_v32  }
 0x110   : > { %v610_v43 = vadd.f32 %v1267_v41, %v1603_v50  ;;  %v674_v44 = vadd.f32 %v1315_v42, %v1603_v50  ;;  %v721_v45 = vmax.f32 %v607_v39, 0.0  ;;  %v737_v46 = vmax.f32 %v671_v40, 0.0 }
 0x112   : > { %v722_v47 = vmax.f32 %v610_v43, 0.0  ;;  %v738_v48 = vmax.f32 %v674_v44, 0.0  ;;  %v1268_v49 = vpop.f32.mrb[12].mxu0  ;;  %v1316_v51 = vpop.f32.mrb[12].mxu1 }
 0x113   : > { %v1269_v52 = vpop.f32.mrb[13].mxu0  ;;  %v1317_v53 = vpop.f32.mrb[13].mxu1 }
 0x114   : > { %v1152_v54 = vpack.c.bf16 %v722_v47, %v721_v45  ;;  %v1192_v55 = vpack.c.bf16 %v738_v48, %v737_v46  ;;  %v1270_v56 = vadd.f32 %v1269_v52, %v1268_v49  ;;  %v1318_v57 = vadd.f32 %v1317_v53, %v1316_v51  ;;  %v1271_v58 = vpop.f32.mrb[14].mxu0  ;;  %v1319_v59 = vpop.f32.mrb[14].mxu1 }
 0x115   : > { %v1272_v60 = vpop.f32.mrb[15].mxu0  ;;  %v1320_v61 = vpop.f32.mrb[15].mxu1 }
 0x116   : > { %1220 = vst [vmem:[%s1613_s8 + $0x10] sm:$0xff] %v1152_v54   ;;  %1228 = vst [vmem:[%s1613_s8 + $0x50] sm:$0xff] %v1192_v55   ;;  %v615_v62 = vadd.f32 %v1270_v56, %v1603_v50  ;;  %v679_v63 = vadd.f32 %v1318_v57, %v1603_v50  ;;  %v1273_v0 = vadd.f32 %v1272_v60, %v1271_v58 }
 0x117   : > { %v1321_v1 = vadd.f32 %v1320_v61, %v1319_v59 }
 0x118   : > { %v618_v2 = vadd.f32 %v1273_v0, %v1603_v50  ;;  %v723_v4 = vmax.f32 %v615_v62, 0.0  ;;  %v739_v5 = vmax.f32 %v679_v63, 0.0 }
 0x119   : > { %v682_v3 = vadd.f32 %v1321_v1, %v1603_v50 }
 0x11a   : > { %v724_v6 = vmax.f32 %v618_v2, 0.0  ;;  %v1274_v8 = vpop.f32.mrb[16].mxu0  ;;  %v1322_v9 = vpop.f32.mrb[16].mxu1 }
 0x11b   : > { %v740_v7 = vmax.f32 %v682_v3, 0.0  ;;  %v1275_v10 = vpop.f32.mrb[17].mxu0  ;;  %v1323_v11 = vpop.f32.mrb[17].mxu1 }
 0x11c   : > { %v1157_v12 = vpack.c.bf16 %v724_v6, %v723_v4  ;;  %v1276_v14 = vadd.f32 %v1275_v10, %v1274_v8  ;;  %v1324_v15 = vadd.f32 %v1323_v11, %v1322_v9  ;;  %v1277_v16 = vpop.f32.mrb[18].mxu0  ;;  %v1325_v17 = vpop.f32.mrb[18].mxu1 }
 0x11d   : > { %v1197_v13 = vpack.c.bf16 %v740_v7, %v739_v5  ;;  %v1278_v18 = vpop.f32.mrb[19].mxu0  ;;  %v1326_v19 = vpop.f32.mrb[19].mxu1 }
 0x11e   : > { %1221 = vst [vmem:[%s1613_s8 + $0x18] sm:$0xff] %v1157_v12   ;;  %v623_v20 = vadd.f32 %v1276_v14, %v1603_v50  ;;  %v687_v21 = vadd.f32 %v1324_v15, %v1603_v50  ;;  %v1279_v22 = vadd.f32 %v1278_v18, %v1277_v16  ;;  %v1327_v23 = vadd.f32 %v1326_v19, %v1325_v17 }
 0x11f   : > { %1229 = vst [vmem:[%s1613_s8 + $0x58] sm:$0xff] %v1197_v13  }
 0x120   : > { %v626_v24 = vadd.f32 %v1279_v22, %v1603_v50  ;;  %v690_v25 = vadd.f32 %v1327_v23, %v1603_v50  ;;  %v725_v26 = vmax.f32 %v623_v20, 0.0  ;;  %v741_v27 = vmax.f32 %v687_v21, 0.0 }
 0x122   : > { %v726_v28 = vmax.f32 %v626_v24, 0.0  ;;  %v742_v29 = vmax.f32 %v690_v25, 0.0  ;;  %v1280_v30 = vpop.f32.mrb[20].mxu0  ;;  %v1328_v31 = vpop.f32.mrb[20].mxu1 }
 0x123   : > { %v1281_v32 = vpop.f32.mrb[21].mxu0  ;;  %v1329_v33 = vpop.f32.mrb[21].mxu1 }
 0x124   : > { %v1162_v34 = vpack.c.bf16 %v726_v28, %v725_v26  ;;  %v1202_v35 = vpack.c.bf16 %v742_v29, %v741_v27  ;;  %v1282_v36 = vadd.f32 %v1281_v32, %v1280_v30  ;;  %v1330_v37 = vadd.f32 %v1329_v33, %v1328_v31  ;;  %v1283_v38 = vpop.f32.mrb[22].mxu0  ;;  %v1331_v39 = vpop.f32.mrb[22].mxu1 }
 0x125   : > { %v1284_v40 = vpop.f32.mrb[23].mxu0  ;;  %v1332_v41 = vpop.f32.mrb[23].mxu1 }
 0x126   : > { %1222 = vst [vmem:[%s1613_s8 + $0x20] sm:$0xff] %v1162_v34   ;;  %1230 = vst [vmem:[%s1613_s8 + $0x60] sm:$0xff] %v1202_v35   ;;  %v631_v42 = vadd.f32 %v1282_v36, %v1603_v50  ;;  %v695_v43 = vadd.f32 %v1330_v37, %v1603_v50  ;;  %v1285_v44 = vadd.f32 %v1284_v40, %v1283_v38 }
 0x127   : > { %v1333_v45 = vadd.f32 %v1332_v41, %v1331_v39 }
 0x128   : > { %v634_v46 = vadd.f32 %v1285_v44, %v1603_v50  ;;  %v727_v48 = vmax.f32 %v631_v42, 0.0  ;;  %v743_v49 = vmax.f32 %v695_v43, 0.0 }
 0x129   : > { %v698_v47 = vadd.f32 %v1333_v45, %v1603_v50 }
 0x12a   : > { %v728_v51 = vmax.f32 %v634_v46, 0.0  ;;  %v1286_v53 = vpop.f32.mrb[24].mxu0  ;;  %v1334_v54 = vpop.f32.mrb[24].mxu1 }
 0x12b   : > { %v744_v52 = vmax.f32 %v698_v47, 0.0  ;;  %v1287_v55 = vpop.f32.mrb[25].mxu0  ;;  %v1335_v56 = vpop.f32.mrb[25].mxu1 }
 0x12c   : > { %v1167_v57 = vpack.c.bf16 %v728_v51, %v727_v48  ;;  %v1288_v59 = vadd.f32 %v1287_v55, %v1286_v53  ;;  %v1336_v60 = vadd.f32 %v1335_v56, %v1334_v54  ;;  %v1289_v61 = vpop.f32.mrb[26].mxu0  ;;  %v1337_v62 = vpop.f32.mrb[26].mxu1 }
 0x12d   : > { %v1207_v58 = vpack.c.bf16 %v744_v52, %v743_v49  ;;  %v1290_v63 = vpop.f32.mrb[27].mxu0  ;;  %v1338_v0 = vpop.f32.mrb[27].mxu1 }
 0x12e   : > { %1223 = vst [vmem:[%s1613_s8 + $0x28] sm:$0xff] %v1167_v57   ;;  %v639_v1 = vadd.f32 %v1288_v59, %v1603_v50  ;;  %v703_v2 = vadd.f32 %v1336_v60, %v1603_v50  ;;  %v1291_v3 = vadd.f32 %v1290_v63, %v1289_v61  ;;  %v1339_v4 = vadd.f32 %v1338_v0, %v1337_v62 }
 0x12f   : > { %1231 = vst [vmem:[%s1613_s8 + $0x68] sm:$0xff] %v1207_v58  }
 0x130   : > { %v642_v5 = vadd.f32 %v1291_v3, %v1603_v50  ;;  %v706_v6 = vadd.f32 %v1339_v4, %v1603_v50  ;;  %v729_v7 = vmax.f32 %v639_v1, 0.0  ;;  %v745_v8 = vmax.f32 %v703_v2, 0.0 }
 0x132   : > { %v730_v9 = vmax.f32 %v642_v5, 0.0  ;;  %v746_v10 = vmax.f32 %v706_v6, 0.0  ;;  %v1292_v11 = vpop.f32.mrb[28].mxu0  ;;  %v1340_v12 = vpop.f32.mrb[28].mxu1 }
 0x133   : > { %v1293_v13 = vpop.f32.mrb[29].mxu0  ;;  %v1341_v14 = vpop.f32.mrb[29].mxu1 }
 0x134   : > { %v1172_v15 = vpack.c.bf16 %v730_v9, %v729_v7  ;;  %v1212_v16 = vpack.c.bf16 %v746_v10, %v745_v8  ;;  %v1294_v17 = vadd.f32 %v1293_v13, %v1292_v11  ;;  %v1342_v18 = vadd.f32 %v1341_v14, %v1340_v12  ;;  %v1295_v19 = vpop.f32.mrb[30].mxu0  ;;  %v1343_v20 = vpop.f32.mrb[30].mxu1 }
 0x135   : > { %v1296_v21 = vpop.f32.mrb[31].mxu0  ;;  %v1344_v22 = vpop.f32.mrb[31].mxu1 }
 0x136   : > { %1224 = vst [vmem:[%s1613_s8 + $0x30] sm:$0xff] %v1172_v15   ;;  %1232 = vst [vmem:[%s1613_s8 + $0x70] sm:$0xff] %v1212_v16   ;;  %v647_v23 = vadd.f32 %v1294_v17, %v1603_v50  ;;  %v711_v24 = vadd.f32 %v1342_v18, %v1603_v50  ;;  %v1297_v25 = vadd.f32 %v1296_v21, %v1295_v19 }
 0x137   : > { %v1345_v26 = vadd.f32 %v1344_v22, %v1343_v20 }
 0x138   : > { %v650_v27 = vadd.f32 %v1297_v25, %v1603_v50  ;;  %v731_v29 = vmax.f32 %v647_v23, 0.0  ;;  %v747_v30 = vmax.f32 %v711_v24, 0.0 }
 0x139   : > { %v714_v28 = vadd.f32 %v1345_v26, %v1603_v50 }
 0x13a   : > { %v732_v31 = vmax.f32 %v650_v27, 0.0 }
 0x13b   : > { %v748_v32 = vmax.f32 %v714_v28, 0.0 }
 0x13c   : > { %v1177_v33 = vpack.c.bf16 %v732_v31, %v731_v29 }
 0x13d   : > { %v1217_v34 = vpack.c.bf16 %v748_v32, %v747_v30 }
 0x13e   : > { %1225 = vst [vmem:[%s1613_s8 + $0x38] sm:$0xff] %v1177_v33  }
 0x13f   : > { %1233 = vst [vmem:[%s1613_s8 + $0x78] sm:$0xff] %v1217_v34  }
 0x140 PF: > { %s13_s14 = sadd.s32 1, %s1472_s14   ;;  %s1672_s12 = smov %s1468_s13 }
 0x141   : > { %p10_p5 = scmp.ge.s32.totalorder %s13_s14, 10   ;;  %s1673_s13 = smov %s1675_s15 }
 0x143   :  { %12 = sbr.rel (!%p10_p5) target bundleno = 2 (0x2), region = 68 }

// kernel: _lambda_.3
= control target key start
LH: loop header
LB: loop body
LE: loop exit
PB: predicated region body
PF: predicated region fallthrough
CT: control target
= control target key end

     0   :  { %s19273_s0 = inlined_call_operand.vmem [shape: bf16[32,128], index: 0, kind: input, shape index: {}]   ;;  %s19274_s1 = inlined_call_operand.vmem [shape: bf16[128,256], index: 1, kind: input, shape index: {}]   ;;  %s19275_s2 = inlined_call_operand.vmem [shape: f32[1,256], index: 2, kind: input, shape index: {}]   ;;  %s19276_s3 = inlined_call_operand.vmem [shape: bf16[256,512], index: 3, kind: input, shape index: {}]   ;;  %s19277_s4 = inlined_call_operand.vmem [shape: f32[1,512], index: 4, kind: input, shape index: {}, may-alias: {4,10,14}]   ;;  %s19278_s5 = inlined_call_operand.vmem [shape: bf16[512,1024], index: 5, kind: input, shape index: {}]   ;;  %s19279_s6 = inlined_call_operand.vmem [shape: f32[1,1024], index: 6, kind: input, shape index: {}]   ;;  %s19280_s7 = inlined_call_operand.vmem [shape: bf16[1024,2048], index: 7, kind: input, shape index: {}]   ;;  %s19281_s8 = inlined_call_operand.vmem [shape: f32[1,2048], index: 8, kind: input, shape index: {}, may-alias: {8,16}]   ;;  %s19282_s9 = inlined_call_operand.vmem [shape: bf16[2048,512], index: 9, kind: input, shape index: {}]   ;;  %s19283_s10 = inlined_call_operand.vmem [shape: f32[1,512], index: 10, kind: input, shape index: {}, may-alias: {4,10,14}]   ;;  %s19284_s11 = inlined_call_operand.vmem [shape: bf16[512,32], index: 11, kind: input, shape index: {}]   ;;  %s19285_s12 = inlined_call_operand.vmem [shape: f32[1,32], index: 12, kind: input, shape index: {}]   ;;  %s19286_s13 = inlined_call_operand.vmem [shape: bf16[32,512], index: 13, kind: input, shape index: {}]   ;;  %s19287_s14 = inlined_call_operand.vmem [shape: f32[1,512], index: 14, kind: input, shape index: {}, may-alias: {4,10,14}]   ;;  %s19288_s15 = inlined_call_operand.vmem [shape: f32[1,2048], index: 15, kind: input, shape index: {}]   ;;  %s19289_s16 = inlined_call_operand.vmem [shape: f32[1,2048], index: 16, kind: input, shape index: {}, may-alias: {8,16}]   ;;  %s19290_s17 = inlined_call_operand.vmem [shape: f32[2,512], index: 17, kind: input, shape index: {}]   ;;  %s19291_s18 = inlined_call_operand.vmem [shape: f32[2,512], index: 18, kind: input, shape index: {}]   ;;  %s19292_s19 = inlined_call_operand.hbm [shape: f32[2,3072], index: 19, kind: output, shape index: {}]  }
   0x1   :  { %19300 = sst [smem:[#allocation12_spill]] %s19273_s0 }
   0x2   :  { %19301 = sst [smem:[#allocation13_spill]] %s19274_s1 }
   0x3   :  { %19302 = sst [smem:[#allocation14_spill]] %s19275_s2 }
   0x4   :  { %19303 = sst [smem:[#allocation15_spill]] %s19276_s3 }
   0x5   :  { %19304 = sst [smem:[#allocation16_spill]] %s19280_s7 }
   0x6   :  { %19305 = sst [smem:[#allocation17_spill]] %s19292_s19 }
   0x7   :  { %24 = vsyncpa [#allocation7], 0  ;;  %s15087_s0 = smov 0   ;;  %s15089_s30 = smov 0  }
   0x8   :  { %s15091_s20 = smov 0  }
   0x9 LB: > { %19306 = sst [smem:[#allocation9_spill]] %s14976_s30  ;;  %s15103_s21 = sadd.s32 4294967295, %s14980_s20   ;;  %s14980_s20 = sphi %s15091_s20, %s19320_s20   ;;  %s14976_s30 = sphi %s15089_s30, %s19322_s30   ;;  %s14972_s0 = sphi %s15087_s0, %s19321_s0  }
   0xa   : > { %s15106_s1 = sadd.s32 1, %s14980_s20   ;;  %p182_p0 = scmp.lt.s32.totalorder %s15103_s21, 3 }
   0xb   : > { %19307 = sst [smem:[#allocation10_spill]] %s15106_s1  ;;  %p12037_p1 = scmp.gt.s32.totalorder %s15103_s21, 0 }
   0xc   : > { %s12042_s22 = sadd.s32 4294967295, %s15106_s1  ;;  %p201_p4 = scmp.ne.s32.totalorder %s14976_s30, %s14972_s0 }
   0xd   : > { %s183_s2 = scalar_select %p182_p0, %s15103_s21, 3 }
   0xe   : > { %p187_p2 = scmp.lt.s32.totalorder %s12042_s22, 3  ;;  %p12043_p3 = scmp.gt.s32.totalorder %s12042_s22, 0 }
   0xf   : > { %s19324_s2 = smov (!%p12037_p1, %s183_s2), 0  ;;  %p202_p5 = scmp.eq.s32.totalorder %s14980_s20, 0 }
  0x10   : > { %s19326_s22 = smov (!%p187_p2, %s12042_s22), 3  ;;  %s194_s24 = sadd.s32 1, %s14976_s30 }
  0x11   : > { %s19328_s22 = smov (!%p12043_p3, %s19326_s22), 0  ;;  %p203_p6 = por %p202_p5, %p201_p4 }
  0x12   : > { %s191_s23 = ssub.s32 %s19324_s2, %s19328_s22  ;;  %p12061_p8 = scmp.ge.s32.totalorder %s14980_s20, 6 }
  0x13   : > { %p192_p7 = scmp.eq.s32.totalorder %s191_s23, 0 }
  0x14   : > { %545 = sbr.rel (%p12061_p8) target bundleno = 165 (0xa5), region = 84 }
  0x15   : > { %s15117_s25 = scalar_select %p192_p7, %s14976_s30, %s194_s24  }
  0x17   : > { %19308 = sst [smem:[#allocation11_spill]] %s15117_s25 }
  0x1b   : > { %548 = sbr.rel (!%p203_p6) target bundleno = 165 (0xa5), region = 88  ;;  %s550_s3 = sand.u32 (%p203_p6), 1, %s14976_s30  }
  0x1c   : > { %s13254_s26 = sshll.u32 (%p203_p6), %s19324_s2, 4  ;;  %s12062_s27 = sshll.u32 (%p203_p6), %s550_s3, 11 }
  0x1d   : > { %s19309_s7 = sld [smem:[#allocation16_spill]] (%p203_p6)  ;;  %s15129_s22 = scalar_lea.vmem (%p203_p6), [#allocation5], %s12062_s27 }
  0x23   : > { %s15124_s1 = scalar_lea.vmem %s19309_s7, %s13254_s26 }
  0x24   : > { %v573_v0 = vld [vmem:[%s15124_s1] sm:$0xff]  ;;  %v575_v1 = vld [vmem:[%s15124_s1 + $0x8] sm:$0xff] }
  0x25   : > { %v577_v2 = vld [vmem:[%s15124_s1 + $0x40] sm:$0xff]  ;;  %574 = vst [vmem:[%s15129_s22] sm:$0xff] %v573_v0  ;;  %576 = vst [vmem:[%s15129_s22 + $0x8] sm:$0xff] %v575_v1  ;;  %v579_v3 = vld [vmem:[%s15124_s1 + $0x48] sm:$0xff] }
  0x26   : > { %578 = vst [vmem:[%s15129_s22 + $0x10] sm:$0xff] %v577_v2  ;;  %v581_v4 = vld [vmem:[%s15124_s1 + $0x80] sm:$0xff]  ;;  %v583_v5 = vld [vmem:[%s15124_s1 + $0x88] sm:$0xff]  ;;  %580 = vst [vmem:[%s15129_s22 + $0x18] sm:$0xff] %v579_v3 }
  0x27   : > { %582 = vst [vmem:[%s15129_s22 + $0x20] sm:$0xff] %v581_v4  ;;  %584 = vst [vmem:[%s15129_s22 + $0x28] sm:$0xff] %v583_v5  ;;  %v585_v6 = vld [vmem:[%s15124_s1 + $0xc0] sm:$0xff]  ;;  %v587_v7 = vld [vmem:[%s15124_s1 + $0xc8] sm:$0xff] }
  0x28   : > { %v589_v8 = vld [vmem:[%s15124_s1 + $0x100] sm:$0xff]  ;;  %586 = vst [vmem:[%s15129_s22 + $0x30] sm:$0xff] %v585_v6  ;;  %588 = vst [vmem:[%s15129_s22 + $0x38] sm:$0xff] %v587_v7  ;;  %v591_v9 = vld [vmem:[%s15124_s1 + $0x108] sm:$0xff] }
  0x29   : > { %590 = vst [vmem:[%s15129_s22 + $0x40] sm:$0xff] %v589_v8  ;;  %v593_v10 = vld [vmem:[%s15124_s1 + $0x140] sm:$0xff]  ;;  %v595_v11 = vld [vmem:[%s15124_s1 + $0x148] sm:$0xff]  ;;  %592 = vst [vmem:[%s15129_s22 + $0x48] sm:$0xff] %v591_v9 }
  0x2a   : > { %594 = vst [vmem:[%s15129_s22 + $0x50] sm:$0xff] %v593_v10  ;;  %596 = vst [vmem:[%s15129_s22 + $0x58] sm:$0xff] %v595_v11  ;;  %v597_v12 = vld [vmem:[%s15124_s1 + $0x180] sm:$0xff]  ;;  %v599_v13 = vld [vmem:[%s15124_s1 + $0x188] sm:$0xff] }
  0x2b   : > { %v601_v14 = vld [vmem:[%s15124_s1 + $0x1c0] sm:$0xff]  ;;  %598 = vst [vmem:[%s15129_s22 + $0x60] sm:$0xff] %v597_v12  ;;  %600 = vst [vmem:[%s15129_s22 + $0x68] sm:$0xff] %v599_v13  ;;  %v603_v15 = vld [vmem:[%s15124_s1 + $0x1c8] sm:$0xff] }
  0x2c   : > { %602 = vst [vmem:[%s15129_s22 + $0x70] sm:$0xff] %v601_v14  ;;  %v605_v16 = vld [vmem:[%s15124_s1 + $0x200] sm:$0xff]  ;;  %v607_v17 = vld [vmem:[%s15124_s1 + $0x208] sm:$0xff]  ;;  %604 = vst [vmem:[%s15129_s22 + $0x78] sm:$0xff] %v603_v15 }
  0x2d   : > { %606 = vst [vmem:[%s15129_s22 + $0x80] sm:$0xff] %v605_v16  ;;  %608 = vst [vmem:[%s15129_s22 + $0x88] sm:$0xff] %v607_v17  ;;  %v609_v18 = vld [vmem:[%s15124_s1 + $0x240] sm:$0xff]  ;;  %v611_v19 = vld [vmem:[%s15124_s1 + $0x248] sm:$0xff] }
  0x2e   : > { %v613_v20 = vld [vmem:[%s15124_s1 + $0x280] sm:$0xff]  ;;  %610 = vst [vmem:[%s15129_s22 + $0x90] sm:$0xff] %v609_v18  ;;  %612 = vst [vmem:[%s15129_s22 + $0x98] sm:$0xff] %v611_v19  ;;  %v615_v21 = vld [vmem:[%s15124_s1 + $0x288] sm:$0xff] }
  0x2f   : > { %614 = vst [vmem:[%s15129_s22 + $0xa0] sm:$0xff] %v613_v20  ;;  %v617_v22 = vld [vmem:[%s15124_s1 + $0x2c0] sm:$0xff]  ;;  %v619_v23 = vld [vmem:[%s15124_s1 + $0x2c8] sm:$0xff]  ;;  %616 = vst [vmem:[%s15129_s22 + $0xa8] sm:$0xff] %v615_v21 }
  0x30   : > { %618 = vst [vmem:[%s15129_s22 + $0xb0] sm:$0xff] %v617_v22  ;;  %620 = vst [vmem:[%s15129_s22 + $0xb8] sm:$0xff] %v619_v23  ;;  %v621_v24 = vld [vmem:[%s15124_s1 + $0x300] sm:$0xff]  ;;  %v623_v25 = vld [vmem:[%s15124_s1 + $0x308] sm:$0xff] }
  0x31   : > { %v625_v26 = vld [vmem:[%s15124_s1 + $0x340] sm:$0xff]  ;;  %622 = vst [vmem:[%s15129_s22 + $0xc0] sm:$0xff] %v621_v24  ;;  %624 = vst [vmem:[%s15129_s22 + $0xc8] sm:$0xff] %v623_v25  ;;  %v627_v27 = vld [vmem:[%s15124_s1 + $0x348] sm:$0xff] }
  0x32   : > { %626 = vst [vmem:[%s15129_s22 + $0xd0] sm:$0xff] %v625_v26  ;;  %v629_v28 = vld [vmem:[%s15124_s1 + $0x380] sm:$0xff]  ;;  %v631_v29 = vld [vmem:[%s15124_s1 + $0x388] sm:$0xff]  ;;  %628 = vst [vmem:[%s15129_s22 + $0xd8] sm:$0xff] %v627_v27 }
  0x33   : > { %630 = vst [vmem:[%s15129_s22 + $0xe0] sm:$0xff] %v629_v28  ;;  %632 = vst [vmem:[%s15129_s22 + $0xe8] sm:$0xff] %v631_v29  ;;  %v633_v30 = vld [vmem:[%s15124_s1 + $0x3c0] sm:$0xff]  ;;  %v635_v31 = vld [vmem:[%s15124_s1 + $0x3c8] sm:$0xff] }
  0x34   : > { %v637_v32 = vld [vmem:[%s15124_s1 + $0x400] sm:$0xff]  ;;  %634 = vst [vmem:[%s15129_s22 + $0xf0] sm:$0xff] %v633_v30  ;;  %636 = vst [vmem:[%s15129_s22 + $0xf8] sm:$0xff] %v635_v31  ;;  %v639_v33 = vld [vmem:[%s15124_s1 + $0x408] sm:$0xff] }
  0x35   : > { %638 = vst [vmem:[%s15129_s22 + $0x100] sm:$0xff] %v637_v32  ;;  %v641_v34 = vld [vmem:[%s15124_s1 + $0x440] sm:$0xff]  ;;  %v643_v35 = vld [vmem:[%s15124_s1 + $0x448] sm:$0xff]  ;;  %640 = vst [vmem:[%s15129_s22 + $0x108] sm:$0xff] %v639_v33 }
  0x36   : > { %642 = vst [vmem:[%s15129_s22 + $0x110] sm:$0xff] %v641_v34  ;;  %644 = vst [vmem:[%s15129_s22 + $0x118] sm:$0xff] %v643_v35  ;;  %v645_v36 = vld [vmem:[%s15124_s1 + $0x480] sm:$0xff]  ;;  %v647_v37 = vld [vmem:[%s15124_s1 + $0x488] sm:$0xff] }
  0x37   : > { %v649_v38 = vld [vmem:[%s15124_s1 + $0x4c0] sm:$0xff]  ;;  %646 = vst [vmem:[%s15129_s22 + $0x120] sm:$0xff] %v645_v36  ;;  %648 = vst [vmem:[%s15129_s22 + $0x128] sm:$0xff] %v647_v37  ;;  %v651_v39 = vld [vmem:[%s15124_s1 + $0x4c8] sm:$0xff] }
  0x38   : > { %650 = vst [vmem:[%s15129_s22 + $0x130] sm:$0xff] %v649_v38  ;;  %v653_v40 = vld [vmem:[%s15124_s1 + $0x500] sm:$0xff]  ;;  %v655_v41 = vld [vmem:[%s15124_s1 + $0x508] sm:$0xff]  ;;  %652 = vst [vmem:[%s15129_s22 + $0x138] sm:$0xff] %v651_v39 }
  0x39   : > { %654 = vst [vmem:[%s15129_s22 + $0x140] sm:$0xff] %v653_v40  ;;  %656 = vst [vmem:[%s15129_s22 + $0x148] sm:$0xff] %v655_v41  ;;  %v657_v42 = vld [vmem:[%s15124_s1 + $0x540] sm:$0xff]  ;;  %v659_v43 = vld [vmem:[%s15124_s1 + $0x548] sm:$0xff] }
  0x3a   : > { %v661_v44 = vld [vmem:[%s15124_s1 + $0x580] sm:$0xff]  ;;  %658 = vst [vmem:[%s15129_s22 + $0x150] sm:$0xff] %v657_v42  ;;  %660 = vst [vmem:[%s15129_s22 + $0x158] sm:$0xff] %v659_v43  ;;  %v663_v45 = vld [vmem:[%s15124_s1 + $0x588] sm:$0xff] }
  0x3b   : > { %662 = vst [vmem:[%s15129_s22 + $0x160] sm:$0xff] %v661_v44  ;;  %v665_v46 = vld [vmem:[%s15124_s1 + $0x5c0] sm:$0xff]  ;;  %v667_v47 = vld [vmem:[%s15124_s1 + $0x5c8] sm:$0xff]  ;;  %664 = vst [vmem:[%s15129_s22 + $0x168] sm:$0xff] %v663_v45 }
  0x3c   : > { %666 = vst [vmem:[%s15129_s22 + $0x170] sm:$0xff] %v665_v46  ;;  %668 = vst [vmem:[%s15129_s22 + $0x178] sm:$0xff] %v667_v47  ;;  %v669_v48 = vld [vmem:[%s15124_s1 + $0x600] sm:$0xff]  ;;  %v671_v49 = vld [vmem:[%s15124_s1 + $0x608] sm:$0xff] }
  0x3d   : > { %v673_v50 = vld [vmem:[%s15124_s1 + $0x640] sm:$0xff]  ;;  %670 = vst [vmem:[%s15129_s22 + $0x180] sm:$0xff] %v669_v48  ;;  %672 = vst [vmem:[%s15129_s22 + $0x188] sm:$0xff] %v671_v49  ;;  %v675_v51 = vld [vmem:[%s15124_s1 + $0x648] sm:$0xff] }
  0x3e   : > { %674 = vst [vmem:[%s15129_s22 + $0x190] sm:$0xff] %v673_v50  ;;  %v677_v52 = vld [vmem:[%s15124_s1 + $0x680] sm:$0xff]  ;;  %v679_v53 = vld [vmem:[%s15124_s1 + $0x688] sm:$0xff]  ;;  %676 = vst [vmem:[%s15129_s22 + $0x198] sm:$0xff] %v675_v51 }
  0x3f   : > { %678 = vst [vmem:[%s15129_s22 + $0x1a0] sm:$0xff] %v677_v52  ;;  %680 = vst [vmem:[%s15129_s22 + $0x1a8] sm:$0xff] %v679_v53  ;;  %v681_v54 = vld [vmem:[%s15124_s1 + $0x6c0] sm:$0xff]  ;;  %v683_v55 = vld [vmem:[%s15124_s1 + $0x6c8] sm:$0xff] }
  0x40   : > { %v685_v56 = vld [vmem:[%s15124_s1 + $0x700] sm:$0xff]  ;;  %682 = vst [vmem:[%s15129_s22 + $0x1b0] sm:$0xff] %v681_v54  ;;  %684 = vst [vmem:[%s15129_s22 + $0x1b8] sm:$0xff] %v683_v55  ;;  %v687_v57 = vld [vmem:[%s15124_s1 + $0x708] sm:$0xff] }
  0x41   : > { %686 = vst [vmem:[%s15129_s22 + $0x1c0] sm:$0xff] %v685_v56  ;;  %v689_v58 = vld [vmem:[%s15124_s1 + $0x740] sm:$0xff]  ;;  %v691_v59 = vld [vmem:[%s15124_s1 + $0x748] sm:$0xff]  ;;  %688 = vst [vmem:[%s15129_s22 + $0x1c8] sm:$0xff] %v687_v57 }
  0x42   : > { %690 = vst [vmem:[%s15129_s22 + $0x1d0] sm:$0xff] %v689_v58  ;;  %692 = vst [vmem:[%s15129_s22 + $0x1d8] sm:$0xff] %v691_v59  ;;  %v693_v60 = vld [vmem:[%s15124_s1 + $0x780] sm:$0xff]  ;;  %v695_v61 = vld [vmem:[%s15124_s1 + $0x788] sm:$0xff] }
  0x43   : > { %v697_v62 = vld [vmem:[%s15124_s1 + $0x7c0] sm:$0xff]  ;;  %694 = vst [vmem:[%s15129_s22 + $0x1e0] sm:$0xff] %v693_v60  ;;  %696 = vst [vmem:[%s15129_s22 + $0x1e8] sm:$0xff] %v695_v61  ;;  %v699_v63 = vld [vmem:[%s15124_s1 + $0x7c8] sm:$0xff] }
  0x44   : > { %698 = vst [vmem:[%s15129_s22 + $0x1f0] sm:$0xff] %v697_v62  ;;  %v701_v0 = vld [vmem:[%s15124_s1 + $0x800] sm:$0xff]  ;;  %v703_v1 = vld [vmem:[%s15124_s1 + $0x808] sm:$0xff]  ;;  %700 = vst [vmem:[%s15129_s22 + $0x1f8] sm:$0xff] %v699_v63 }
  0x45   : > { %702 = vst [vmem:[%s15129_s22 + $0x200] sm:$0xff] %v701_v0  ;;  %704 = vst [vmem:[%s15129_s22 + $0x208] sm:$0xff] %v703_v1  ;;  %v705_v2 = vld [vmem:[%s15124_s1 + $0x840] sm:$0xff]  ;;  %v707_v3 = vld [vmem:[%s15124_s1 + $0x848] sm:$0xff] }
  0x46   : > { %v709_v4 = vld [vmem:[%s15124_s1 + $0x880] sm:$0xff]  ;;  %706 = vst [vmem:[%s15129_s22 + $0x210] sm:$0xff] %v705_v2  ;;  %708 = vst [vmem:[%s15129_s22 + $0x218] sm:$0xff] %v707_v3  ;;  %v711_v5 = vld [vmem:[%s15124_s1 + $0x888] sm:$0xff] }
  0x47   : > { %710 = vst [vmem:[%s15129_s22 + $0x220] sm:$0xff] %v709_v4  ;;  %v713_v6 = vld [vmem:[%s15124_s1 + $0x8c0] sm:$0xff]  ;;  %v715_v7 = vld [vmem:[%s15124_s1 + $0x8c8] sm:$0xff]  ;;  %712 = vst [vmem:[%s15129_s22 + $0x228] sm:$0xff] %v711_v5 }
  0x48   : > { %714 = vst [vmem:[%s15129_s22 + $0x230] sm:$0xff] %v713_v6  ;;  %716 = vst [vmem:[%s15129_s22 + $0x238] sm:$0xff] %v715_v7  ;;  %v717_v8 = vld [vmem:[%s15124_s1 + $0x900] sm:$0xff]  ;;  %v719_v9 = vld [vmem:[%s15124_s1 + $0x908] sm:$0xff] }
  0x49   : > { %v721_v10 = vld [vmem:[%s15124_s1 + $0x940] sm:$0xff]  ;;  %718 = vst [vmem:[%s15129_s22 + $0x240] sm:$0xff] %v717_v8  ;;  %720 = vst [vmem:[%s15129_s22 + $0x248] sm:$0xff] %v719_v9  ;;  %v723_v11 = vld [vmem:[%s15124_s1 + $0x948] sm:$0xff] }
  0x4a   : > { %722 = vst [vmem:[%s15129_s22 + $0x250] sm:$0xff] %v721_v10  ;;  %v725_v12 = vld [vmem:[%s15124_s1 + $0x980] sm:$0xff]  ;;  %v727_v13 = vld [vmem:[%s15124_s1 + $0x988] sm:$0xff]  ;;  %724 = vst [vmem:[%s15129_s22 + $0x258] sm:$0xff] %v723_v11 }
  0x4b   : > { %726 = vst [vmem:[%s15129_s22 + $0x260] sm:$0xff] %v725_v12  ;;  %728 = vst [vmem:[%s15129_s22 + $0x268] sm:$0xff] %v727_v13  ;;  %v729_v14 = vld [vmem:[%s15124_s1 + $0x9c0] sm:$0xff]  ;;  %v731_v15 = vld [vmem:[%s15124_s1 + $0x9c8] sm:$0xff] }
  0x4c   : > { %v733_v16 = vld [vmem:[%s15124_s1 + $0xa00] sm:$0xff]  ;;  %730 = vst [vmem:[%s15129_s22 + $0x270] sm:$0xff] %v729_v14  ;;  %732 = vst [vmem:[%s15129_s22 + $0x278] sm:$0xff] %v731_v15  ;;  %v735_v17 = vld [vmem:[%s15124_s1 + $0xa08] sm:$0xff] }
  0x4d   : > { %734 = vst [vmem:[%s15129_s22 + $0x280] sm:$0xff] %v733_v16  ;;  %v737_v18 = vld [vmem:[%s15124_s1 + $0xa40] sm:$0xff]  ;;  %v739_v19 = vld [vmem:[%s15124_s1 + $0xa48] sm:$0xff]  ;;  %736 = vst [vmem:[%s15129_s22 + $0x288] sm:$0xff] %v735_v17 }
  0x4e   : > { %738 = vst [vmem:[%s15129_s22 + $0x290] sm:$0xff] %v737_v18  ;;  %740 = vst [vmem:[%s15129_s22 + $0x298] sm:$0xff] %v739_v19  ;;  %v741_v20 = vld [vmem:[%s15124_s1 + $0xa80] sm:$0xff]  ;;  %v743_v21 = vld [vmem:[%s15124_s1 + $0xa88] sm:$0xff] }
  0x4f   : > { %v745_v22 = vld [vmem:[%s15124_s1 + $0xac0] sm:$0xff]  ;;  %742 = vst [vmem:[%s15129_s22 + $0x2a0] sm:$0xff] %v741_v20  ;;  %744 = vst [vmem:[%s15129_s22 + $0x2a8] sm:$0xff] %v743_v21  ;;  %v747_v23 = vld [vmem:[%s15124_s1 + $0xac8] sm:$0xff] }
  0x50   : > { %746 = vst [vmem:[%s15129_s22 + $0x2b0] sm:$0xff] %v745_v22  ;;  %v749_v24 = vld [vmem:[%s15124_s1 + $0xb00] sm:$0xff]  ;;  %v751_v25 = vld [vmem:[%s15124_s1 + $0xb08] sm:$0xff]  ;;  %748 = vst [vmem:[%s15129_s22 + $0x2b8] sm:$0xff] %v747_v23 }
  0x51   : > { %750 = vst [vmem:[%s15129_s22 + $0x2c0] sm:$0xff] %v749_v24  ;;  %752 = vst [vmem:[%s15129_s22 + $0x2c8] sm:$0xff] %v751_v25  ;;  %v753_v26 = vld [vmem:[%s15124_s1 + $0xb40] sm:$0xff]  ;;  %v755_v27 = vld [vmem:[%s15124_s1 + $0xb48] sm:$0xff] }
  0x52   : > { %v757_v28 = vld [vmem:[%s15124_s1 + $0xb80] sm:$0xff]  ;;  %754 = vst [vmem:[%s15129_s22 + $0x2d0] sm:$0xff] %v753_v26  ;;  %756 = vst [vmem:[%s15129_s22 + $0x2d8] sm:$0xff] %v755_v27  ;;  %v759_v29 = vld [vmem:[%s15124_s1 + $0xb88] sm:$0xff] }
  0x53   : > { %758 = vst [vmem:[%s15129_s22 + $0x2e0] sm:$0xff] %v757_v28  ;;  %v761_v30 = vld [vmem:[%s15124_s1 + $0xbc0] sm:$0xff]  ;;  %v763_v31 = vld [vmem:[%s15124_s1 + $0xbc8] sm:$0xff]  ;;  %760 = vst [vmem:[%s15129_s22 + $0x2e8] sm:$0xff] %v759_v29 }
  0x54   : > { %762 = vst [vmem:[%s15129_s22 + $0x2f0] sm:$0xff] %v761_v30  ;;  %764 = vst [vmem:[%s15129_s22 + $0x2f8] sm:$0xff] %v763_v31  ;;  %v765_v32 = vld [vmem:[%s15124_s1 + $0xc00] sm:$0xff]  ;;  %v767_v33 = vld [vmem:[%s15124_s1 + $0xc08] sm:$0xff] }
  0x55   : > { %v769_v34 = vld [vmem:[%s15124_s1 + $0xc40] sm:$0xff]  ;;  %766 = vst [vmem:[%s15129_s22 + $0x300] sm:$0xff] %v765_v32  ;;  %768 = vst [vmem:[%s15129_s22 + $0x308] sm:$0xff] %v767_v33  ;;  %v771_v35 = vld [vmem:[%s15124_s1 + $0xc48] sm:$0xff] }
  0x56   : > { %770 = vst [vmem:[%s15129_s22 + $0x310] sm:$0xff] %v769_v34  ;;  %v773_v36 = vld [vmem:[%s15124_s1 + $0xc80] sm:$0xff]  ;;  %v775_v37 = vld [vmem:[%s15124_s1 + $0xc88] sm:$0xff]  ;;  %772 = vst [vmem:[%s15129_s22 + $0x318] sm:$0xff] %v771_v35 }
  0x57   : > { %774 = vst [vmem:[%s15129_s22 + $0x320] sm:$0xff] %v773_v36  ;;  %776 = vst [vmem:[%s15129_s22 + $0x328] sm:$0xff] %v775_v37  ;;  %v777_v38 = vld [vmem:[%s15124_s1 + $0xcc0] sm:$0xff]  ;;  %v779_v39 = vld [vmem:[%s15124_s1 + $0xcc8] sm:$0xff] }
  0x58   : > { %v781_v40 = vld [vmem:[%s15124_s1 + $0xd00] sm:$0xff]  ;;  %778 = vst [vmem:[%s15129_s22 + $0x330] sm:$0xff] %v777_v38  ;;  %780 = vst [vmem:[%s15129_s22 + $0x338] sm:$0xff] %v779_v39  ;;  %v783_v41 = vld [vmem:[%s15124_s1 + $0xd08] sm:$0xff] }
  0x59   : > { %782 = vst [vmem:[%s15129_s22 + $0x340] sm:$0xff] %v781_v40  ;;  %v785_v42 = vld [vmem:[%s15124_s1 + $0xd40] sm:$0xff]  ;;  %v787_v43 = vld [vmem:[%s15124_s1 + $0xd48] sm:$0xff]  ;;  %784 = vst [vmem:[%s15129_s22 + $0x348] sm:$0xff] %v783_v41 }
  0x5a   : > { %786 = vst [vmem:[%s15129_s22 + $0x350] sm:$0xff] %v785_v42  ;;  %788 = vst [vmem:[%s15129_s22 + $0x358] sm:$0xff] %v787_v43  ;;  %v789_v44 = vld [vmem:[%s15124_s1 + $0xd80] sm:$0xff]  ;;  %v791_v45 = vld [vmem:[%s15124_s1 + $0xd88] sm:$0xff] }
  0x5b   : > { %v793_v46 = vld [vmem:[%s15124_s1 + $0xdc0] sm:$0xff]  ;;  %790 = vst [vmem:[%s15129_s22 + $0x360] sm:$0xff] %v789_v44  ;;  %792 = vst [vmem:[%s15129_s22 + $0x368] sm:$0xff] %v791_v45  ;;  %v795_v47 = vld [vmem:[%s15124_s1 + $0xdc8] sm:$0xff] }
  0x5c   : > { %794 = vst [vmem:[%s15129_s22 + $0x370] sm:$0xff] %v793_v46  ;;  %v797_v48 = vld [vmem:[%s15124_s1 + $0xe00] sm:$0xff]  ;;  %v799_v49 = vld [vmem:[%s15124_s1 + $0xe08] sm:$0xff]  ;;  %796 = vst [vmem:[%s15129_s22 + $0x378] sm:$0xff] %v795_v47 }
  0x5d   : > { %798 = vst [vmem:[%s15129_s22 + $0x380] sm:$0xff] %v797_v48  ;;  %800 = vst [vmem:[%s15129_s22 + $0x388] sm:$0xff] %v799_v49  ;;  %v801_v50 = vld [vmem:[%s15124_s1 + $0xe40] sm:$0xff]  ;;  %v803_v51 = vld [vmem:[%s15124_s1 + $0xe48] sm:$0xff] }
  0x5e   : > { %v805_v52 = vld [vmem:[%s15124_s1 + $0xe80] sm:$0xff]  ;;  %802 = vst [vmem:[%s15129_s22 + $0x390] sm:$0xff] %v801_v50  ;;  %804 = vst [vmem:[%s15129_s22 + $0x398] sm:$0xff] %v803_v51  ;;  %v807_v53 = vld [vmem:[%s15124_s1 + $0xe88] sm:$0xff] }
  0x5f   : > { %806 = vst [vmem:[%s15129_s22 + $0x3a0] sm:$0xff] %v805_v52  ;;  %v809_v54 = vld [vmem:[%s15124_s1 + $0xec0] sm:$0xff]  ;;  %v811_v55 = vld [vmem:[%s15124_s1 + $0xec8] sm:$0xff]  ;;  %808 = vst [vmem:[%s15129_s22 + $0x3a8] sm:$0xff] %v807_v53 }
  0x60   : > { %810 = vst [vmem:[%s15129_s22 + $0x3b0] sm:$0xff] %v809_v54  ;;  %812 = vst [vmem:[%s15129_s22 + $0x3b8] sm:$0xff] %v811_v55  ;;  %v813_v56 = vld [vmem:[%s15124_s1 + $0xf00] sm:$0xff]  ;;  %v815_v57 = vld [vmem:[%s15124_s1 + $0xf08] sm:$0xff] }
  0x61   : > { %v817_v58 = vld [vmem:[%s15124_s1 + $0xf40] sm:$0xff]  ;;  %814 = vst [vmem:[%s15129_s22 + $0x3c0] sm:$0xff] %v813_v56  ;;  %816 = vst [vmem:[%s15129_s22 + $0x3c8] sm:$0xff] %v815_v57  ;;  %v819_v59 = vld [vmem:[%s15124_s1 + $0xf48] sm:$0xff] }
  0x62   : > { %818 = vst [vmem:[%s15129_s22 + $0x3d0] sm:$0xff] %v817_v58  ;;  %v821_v60 = vld [vmem:[%s15124_s1 + $0xf80] sm:$0xff]  ;;  %v823_v61 = vld [vmem:[%s15124_s1 + $0xf88] sm:$0xff]  ;;  %820 = vst [vmem:[%s15129_s22 + $0x3d8] sm:$0xff] %v819_v59 }
  0x63   : > { %822 = vst [vmem:[%s15129_s22 + $0x3e0] sm:$0xff] %v821_v60  ;;  %824 = vst [vmem:[%s15129_s22 + $0x3e8] sm:$0xff] %v823_v61  ;;  %v825_v62 = vld [vmem:[%s15124_s1 + $0xfc0] sm:$0xff]  ;;  %v827_v63 = vld [vmem:[%s15124_s1 + $0xfc8] sm:$0xff] }
  0x64   : > { %v829_v0 = vld [vmem:[%s15124_s1 + $0x1000] sm:$0xff]  ;;  %826 = vst [vmem:[%s15129_s22 + $0x3f0] sm:$0xff] %v825_v62  ;;  %828 = vst [vmem:[%s15129_s22 + $0x3f8] sm:$0xff] %v827_v63  ;;  %v831_v1 = vld [vmem:[%s15124_s1 + $0x1008] sm:$0xff] }
  0x65   : > { %830 = vst [vmem:[%s15129_s22 + $0x400] sm:$0xff] %v829_v0  ;;  %v833_v2 = vld [vmem:[%s15124_s1 + $0x1040] sm:$0xff]  ;;  %v835_v3 = vld [vmem:[%s15124_s1 + $0x1048] sm:$0xff]  ;;  %832 = vst [vmem:[%s15129_s22 + $0x408] sm:$0xff] %v831_v1 }
  0x66   : > { %834 = vst [vmem:[%s15129_s22 + $0x410] sm:$0xff] %v833_v2  ;;  %836 = vst [vmem:[%s15129_s22 + $0x418] sm:$0xff] %v835_v3  ;;  %v837_v4 = vld [vmem:[%s15124_s1 + $0x1080] sm:$0xff]  ;;  %v839_v5 = vld [vmem:[%s15124_s1 + $0x1088] sm:$0xff] }
  0x67   : > { %v841_v6 = vld [vmem:[%s15124_s1 + $0x10c0] sm:$0xff]  ;;  %838 = vst [vmem:[%s15129_s22 + $0x420] sm:$0xff] %v837_v4  ;;  %840 = vst [vmem:[%s15129_s22 + $0x428] sm:$0xff] %v839_v5  ;;  %v843_v7 = vld [vmem:[%s15124_s1 + $0x10c8] sm:$0xff] }
  0x68   : > { %842 = vst [vmem:[%s15129_s22 + $0x430] sm:$0xff] %v841_v6  ;;  %v845_v8 = vld [vmem:[%s15124_s1 + $0x1100] sm:$0xff]  ;;  %v847_v9 = vld [vmem:[%s15124_s1 + $0x1108] sm:$0xff]  ;;  %844 = vst [vmem:[%s15129_s22 + $0x438] sm:$0xff] %v843_v7 }
  0x69   : > { %846 = vst [vmem:[%s15129_s22 + $0x440] sm:$0xff] %v845_v8  ;;  %848 = vst [vmem:[%s15129_s22 + $0x448] sm:$0xff] %v847_v9  ;;  %v849_v10 = vld [vmem:[%s15124_s1 + $0x1140] sm:$0xff]  ;;  %v851_v11 = vld [vmem:[%s15124_s1 + $0x1148] sm:$0xff] }
  0x6a   : > { %v853_v12 = vld [vmem:[%s15124_s1 + $0x1180] sm:$0xff]  ;;  %850 = vst [vmem:[%s15129_s22 + $0x450] sm:$0xff] %v849_v10  ;;  %852 = vst [vmem:[%s15129_s22 + $0x458] sm:$0xff] %v851_v11  ;;  %v855_v13 = vld [vmem:[%s15124_s1 + $0x1188] sm:$0xff] }
  0x6b   : > { %854 = vst [vmem:[%s15129_s22 + $0x460] sm:$0xff] %v853_v12  ;;  %v857_v14 = vld [vmem:[%s15124_s1 + $0x11c0] sm:$0xff]  ;;  %v859_v15 = vld [vmem:[%s15124_s1 + $0x11c8] sm:$0xff]  ;;  %856 = vst [vmem:[%s15129_s22 + $0x468] sm:$0xff] %v855_v13 }
  0x6c   : > { %858 = vst [vmem:[%s15129_s22 + $0x470] sm:$0xff] %v857_v14  ;;  %860 = vst [vmem:[%s15129_s22 + $0x478] sm:$0xff] %v859_v15  ;;  %v861_v16 = vld [vmem:[%s15124_s1 + $0x1200] sm:$0xff]  ;;  %v863_v17 = vld [vmem:[%s15124_s1 + $0x1208] sm:$0xff] }
  0x6d   : > { %v865_v18 = vld [vmem:[%s15124_s1 + $0x1240] sm:$0xff]  ;;  %862 = vst [vmem:[%s15129_s22 + $0x480] sm:$0xff] %v861_v16  ;;  %864 = vst [vmem:[%s15129_s22 + $0x488] sm:$0xff] %v863_v17  ;;  %v867_v19 = vld [vmem:[%s15124_s1 + $0x1248] sm:$0xff] }
  0x6e   : > { %866 = vst [vmem:[%s15129_s22 + $0x490] sm:$0xff] %v865_v18  ;;  %v869_v20 = vld [vmem:[%s15124_s1 + $0x1280] sm:$0xff]  ;;  %v871_v21 = vld [vmem:[%s15124_s1 + $0x1288] sm:$0xff]  ;;  %868 = vst [vmem:[%s15129_s22 + $0x498] sm:$0xff] %v867_v19 }
  0x6f   : > { %870 = vst [vmem:[%s15129_s22 + $0x4a0] sm:$0xff] %v869_v20  ;;  %872 = vst [vmem:[%s15129_s22 + $0x4a8] sm:$0xff] %v871_v21  ;;  %v873_v22 = vld [vmem:[%s15124_s1 + $0x12c0] sm:$0xff]  ;;  %v875_v23 = vld [vmem:[%s15124_s1 + $0x12c8] sm:$0xff] }
  0x70   : > { %v877_v24 = vld [vmem:[%s15124_s1 + $0x1300] sm:$0xff]  ;;  %874 = vst [vmem:[%s15129_s22 + $0x4b0] sm:$0xff] %v873_v22  ;;  %876 = vst [vmem:[%s15129_s22 + $0x4b8] sm:$0xff] %v875_v23  ;;  %v879_v25 = vld [vmem:[%s15124_s1 + $0x1308] sm:$0xff] }
  0x71   : > { %878 = vst [vmem:[%s15129_s22 + $0x4c0] sm:$0xff] %v877_v24  ;;  %v881_v26 = vld [vmem:[%s15124_s1 + $0x1340] sm:$0xff]  ;;  %v883_v27 = vld [vmem:[%s15124_s1 + $0x1348] sm:$0xff]  ;;  %880 = vst [vmem:[%s15129_s22 + $0x4c8] sm:$0xff] %v879_v25 }
  0x72   : > { %882 = vst [vmem:[%s15129_s22 + $0x4d0] sm:$0xff] %v881_v26  ;;  %884 = vst [vmem:[%s15129_s22 + $0x4d8] sm:$0xff] %v883_v27  ;;  %v885_v28 = vld [vmem:[%s15124_s1 + $0x1380] sm:$0xff]  ;;  %v887_v29 = vld [vmem:[%s15124_s1 + $0x1388] sm:$0xff] }
  0x73   : > { %v889_v30 = vld [vmem:[%s15124_s1 + $0x13c0] sm:$0xff]  ;;  %886 = vst [vmem:[%s15129_s22 + $0x4e0] sm:$0xff] %v885_v28  ;;  %888 = vst [vmem:[%s15129_s22 + $0x4e8] sm:$0xff] %v887_v29  ;;  %v891_v31 = vld [vmem:[%s15124_s1 + $0x13c8] sm:$0xff] }
  0x74   : > { %890 = vst [vmem:[%s15129_s22 + $0x4f0] sm:$0xff] %v889_v30  ;;  %v893_v32 = vld [vmem:[%s15124_s1 + $0x1400] sm:$0xff]  ;;  %v895_v33 = vld [vmem:[%s15124_s1 + $0x1408] sm:$0xff]  ;;  %892 = vst [vmem:[%s15129_s22 + $0x4f8] sm:$0xff] %v891_v31 }
  0x75   : > { %894 = vst [vmem:[%s15129_s22 + $0x500] sm:$0xff] %v893_v32  ;;  %896 = vst [vmem:[%s15129_s22 + $0x508] sm:$0xff] %v895_v33  ;;  %v897_v34 = vld [vmem:[%s15124_s1 + $0x1440] sm:$0xff]  ;;  %v899_v35 = vld [vmem:[%s15124_s1 + $0x1448] sm:$0xff] }
  0x76   : > { %v901_v36 = vld [vmem:[%s15124_s1 + $0x1480] sm:$0xff]  ;;  %898 = vst [vmem:[%s15129_s22 + $0x510] sm:$0xff] %v897_v34  ;;  %900 = vst [vmem:[%s15129_s22 + $0x518] sm:$0xff] %v899_v35  ;;  %v903_v37 = vld [vmem:[%s15124_s1 + $0x1488] sm:$0xff] }
  0x77   : > { %902 = vst [vmem:[%s15129_s22 + $0x520] sm:$0xff] %v901_v36  ;;  %v905_v38 = vld [vmem:[%s15124_s1 + $0x14c0] sm:$0xff]  ;;  %v907_v39 = vld [vmem:[%s15124_s1 + $0x14c8] sm:$0xff]  ;;  %904 = vst [vmem:[%s15129_s22 + $0x528] sm:$0xff] %v903_v37 }
  0x78   : > { %906 = vst [vmem:[%s15129_s22 + $0x530] sm:$0xff] %v905_v38  ;;  %908 = vst [vmem:[%s15129_s22 + $0x538] sm:$0xff] %v907_v39  ;;  %v909_v40 = vld [vmem:[%s15124_s1 + $0x1500] sm:$0xff]  ;;  %v911_v41 = vld [vmem:[%s15124_s1 + $0x1508] sm:$0xff] }
  0x79   : > { %v913_v42 = vld [vmem:[%s15124_s1 + $0x1540] sm:$0xff]  ;;  %910 = vst [vmem:[%s15129_s22 + $0x540] sm:$0xff] %v909_v40  ;;  %912 = vst [vmem:[%s15129_s22 + $0x548] sm:$0xff] %v911_v41  ;;  %v915_v43 = vld [vmem:[%s15124_s1 + $0x1548] sm:$0xff] }
  0x7a   : > { %914 = vst [vmem:[%s15129_s22 + $0x550] sm:$0xff] %v913_v42  ;;  %v917_v44 = vld [vmem:[%s15124_s1 + $0x1580] sm:$0xff]  ;;  %v919_v45 = vld [vmem:[%s15124_s1 + $0x1588] sm:$0xff]  ;;  %916 = vst [vmem:[%s15129_s22 + $0x558] sm:$0xff] %v915_v43 }
  0x7b   : > { %918 = vst [vmem:[%s15129_s22 + $0x560] sm:$0xff] %v917_v44  ;;  %920 = vst [vmem:[%s15129_s22 + $0x568] sm:$0xff] %v919_v45  ;;  %v921_v46 = vld [vmem:[%s15124_s1 + $0x15c0] sm:$0xff]  ;;  %v923_v47 = vld [vmem:[%s15124_s1 + $0x15c8] sm:$0xff] }
  0x7c   : > { %v925_v48 = vld [vmem:[%s15124_s1 + $0x1600] sm:$0xff]  ;;  %922 = vst [vmem:[%s15129_s22 + $0x570] sm:$0xff] %v921_v46  ;;  %924 = vst [vmem:[%s15129_s22 + $0x578] sm:$0xff] %v923_v47  ;;  %v927_v49 = vld [vmem:[%s15124_s1 + $0x1608] sm:$0xff] }
  0x7d   : > { %926 = vst [vmem:[%s15129_s22 + $0x580] sm:$0xff] %v925_v48  ;;  %v929_v50 = vld [vmem:[%s15124_s1 + $0x1640] sm:$0xff]  ;;  %v931_v51 = vld [vmem:[%s15124_s1 + $0x1648] sm:$0xff]  ;;  %928 = vst [vmem:[%s15129_s22 + $0x588] sm:$0xff] %v927_v49 }
  0x7e   : > { %930 = vst [vmem:[%s15129_s22 + $0x590] sm:$0xff] %v929_v50  ;;  %932 = vst [vmem:[%s15129_s22 + $0x598] sm:$0xff] %v931_v51  ;;  %v933_v52 = vld [vmem:[%s15124_s1 + $0x1680] sm:$0xff]  ;;  %v935_v53 = vld [vmem:[%s15124_s1 + $0x1688] sm:$0xff] }
  0x7f   : > { %v937_v54 = vld [vmem:[%s15124_s1 + $0x16c0] sm:$0xff]  ;;  %934 = vst [vmem:[%s15129_s22 + $0x5a0] sm:$0xff] %v933_v52  ;;  %936 = vst [vmem:[%s15129_s22 + $0x5a8] sm:$0xff] %v935_v53  ;;  %v939_v55 = vld [vmem:[%s15124_s1 + $0x16c8] sm:$0xff] }
  0x80   : > { %938 = vst [vmem:[%s15129_s22 + $0x5b0] sm:$0xff] %v937_v54  ;;  %v941_v56 = vld [vmem:[%s15124_s1 + $0x1700] sm:$0xff]  ;;  %v943_v57 = vld [vmem:[%s15124_s1 + $0x1708] sm:$0xff]  ;;  %940 = vst [vmem:[%s15129_s22 + $0x5b8] sm:$0xff] %v939_v55 }
  0x81   : > { %942 = vst [vmem:[%s15129_s22 + $0x5c0] sm:$0xff] %v941_v56  ;;  %944 = vst [vmem:[%s15129_s22 + $0x5c8] sm:$0xff] %v943_v57  ;;  %v945_v58 = vld [vmem:[%s15124_s1 + $0x1740] sm:$0xff]  ;;  %v947_v59 = vld [vmem:[%s15124_s1 + $0x1748] sm:$0xff] }
  0x82   : > { %v949_v60 = vld [vmem:[%s15124_s1 + $0x1780] sm:$0xff]  ;;  %946 = vst [vmem:[%s15129_s22 + $0x5d0] sm:$0xff] %v945_v58  ;;  %948 = vst [vmem:[%s15129_s22 + $0x5d8] sm:$0xff] %v947_v59  ;;  %v951_v61 = vld [vmem:[%s15124_s1 + $0x1788] sm:$0xff] }
  0x83   : > { %950 = vst [vmem:[%s15129_s22 + $0x5e0] sm:$0xff] %v949_v60  ;;  %v953_v62 = vld [vmem:[%s15124_s1 + $0x17c0] sm:$0xff]  ;;  %v955_v63 = vld [vmem:[%s15124_s1 + $0x17c8] sm:$0xff]  ;;  %952 = vst [vmem:[%s15129_s22 + $0x5e8] sm:$0xff] %v951_v61 }
  0x84   : > { %954 = vst [vmem:[%s15129_s22 + $0x5f0] sm:$0xff] %v953_v62  ;;  %956 = vst [vmem:[%s15129_s22 + $0x5f8] sm:$0xff] %v955_v63  ;;  %v957_v0 = vld [vmem:[%s15124_s1 + $0x1800] sm:$0xff]  ;;  %v959_v1 = vld [vmem:[%s15124_s1 + $0x1808] sm:$0xff] }
  0x85   : > { %v961_v2 = vld [vmem:[%s15124_s1 + $0x1840] sm:$0xff]  ;;  %958 = vst [vmem:[%s15129_s22 + $0x600] sm:$0xff] %v957_v0  ;;  %960 = vst [vmem:[%s15129_s22 + $0x608] sm:$0xff] %v959_v1  ;;  %v963_v3 = vld [vmem:[%s15124_s1 + $0x1848] sm:$0xff] }
  0x86   : > { %962 = vst [vmem:[%s15129_s22 + $0x610] sm:$0xff] %v961_v2  ;;  %v965_v4 = vld [vmem:[%s15124_s1 + $0x1880] sm:$0xff]  ;;  %v967_v5 = vld [vmem:[%s15124_s1 + $0x1888] sm:$0xff]  ;;  %964 = vst [vmem:[%s15129_s22 + $0x618] sm:$0xff] %v963_v3 }
  0x87   : > { %966 = vst [vmem:[%s15129_s22 + $0x620] sm:$0xff] %v965_v4  ;;  %968 = vst [vmem:[%s15129_s22 + $0x628] sm:$0xff] %v967_v5  ;;  %v969_v6 = vld [vmem:[%s15124_s1 + $0x18c0] sm:$0xff]  ;;  %v971_v7 = vld [vmem:[%s15124_s1 + $0x18c8] sm:$0xff] }
  0x88   : > { %v973_v8 = vld [vmem:[%s15124_s1 + $0x1900] sm:$0xff]  ;;  %970 = vst [vmem:[%s15129_s22 + $0x630] sm:$0xff] %v969_v6  ;;  %972 = vst [vmem:[%s15129_s22 + $0x638] sm:$0xff] %v971_v7  ;;  %v975_v9 = vld [vmem:[%s15124_s1 + $0x1908] sm:$0xff] }
  0x89   : > { %974 = vst [vmem:[%s15129_s22 + $0x640] sm:$0xff] %v973_v8  ;;  %v977_v10 = vld [vmem:[%s15124_s1 + $0x1940] sm:$0xff]  ;;  %v979_v11 = vld [vmem:[%s15124_s1 + $0x1948] sm:$0xff]  ;;  %976 = vst [vmem:[%s15129_s22 + $0x648] sm:$0xff] %v975_v9 }
  0x8a   : > { %978 = vst [vmem:[%s15129_s22 + $0x650] sm:$0xff] %v977_v10  ;;  %980 = vst [vmem:[%s15129_s22 + $0x658] sm:$0xff] %v979_v11  ;;  %v981_v12 = vld [vmem:[%s15124_s1 + $0x1980] sm:$0xff]  ;;  %v983_v13 = vld [vmem:[%s15124_s1 + $0x1988] sm:$0xff] }
  0x8b   : > { %v985_v14 = vld [vmem:[%s15124_s1 + $0x19c0] sm:$0xff]  ;;  %982 = vst [vmem:[%s15129_s22 + $0x660] sm:$0xff] %v981_v12  ;;  %984 = vst [vmem:[%s15129_s22 + $0x668] sm:$0xff] %v983_v13  ;;  %v987_v15 = vld [vmem:[%s15124_s1 + $0x19c8] sm:$0xff] }
  0x8c   : > { %986 = vst [vmem:[%s15129_s22 + $0x670] sm:$0xff] %v985_v14  ;;  %v989_v16 = vld [vmem:[%s15124_s1 + $0x1a00] sm:$0xff]  ;;  %v991_v17 = vld [vmem:[%s15124_s1 + $0x1a08] sm:$0xff]  ;;  %988 = vst [vmem:[%s15129_s22 + $0x678] sm:$0xff] %v987_v15 }
  0x8d   : > { %990 = vst [vmem:[%s15129_s22 + $0x680] sm:$0xff] %v989_v16  ;;  %992 = vst [vmem:[%s15129_s22 + $0x688] sm:$0xff] %v991_v17  ;;  %v993_v18 = vld [vmem:[%s15124_s1 + $0x1a40] sm:$0xff]  ;;  %v995_v19 = vld [vmem:[%s15124_s1 + $0x1a48] sm:$0xff] }
  0x8e   : > { %v997_v20 = vld [vmem:[%s15124_s1 + $0x1a80] sm:$0xff]  ;;  %994 = vst [vmem:[%s15129_s22 + $0x690] sm:$0xff] %v993_v18  ;;  %996 = vst [vmem:[%s15129_s22 + $0x698] sm:$0xff] %v995_v19  ;;  %v999_v21 = vld [vmem:[%s15124_s1 + $0x1a88] sm:$0xff] }
  0x8f   : > { %998 = vst [vmem:[%s15129_s22 + $0x6a0] sm:$0xff] %v997_v20  ;;  %v1001_v22 = vld [vmem:[%s15124_s1 + $0x1ac0] sm:$0xff]  ;;  %v1003_v23 = vld [vmem:[%s15124_s1 + $0x1ac8] sm:$0xff]  ;;  %1000 = vst [vmem:[%s15129_s22 + $0x6a8] sm:$0xff] %v999_v21 }
  0x90   : > { %1002 = vst [vmem:[%s15129_s22 + $0x6b0] sm:$0xff] %v1001_v22  ;;  %1004 = vst [vmem:[%s15129_s22 + $0x6b8] sm:$0xff] %v1003_v23  ;;  %v1005_v24 = vld [vmem:[%s15124_s1 + $0x1b00] sm:$0xff]  ;;  %v1007_v25 = vld [vmem:[%s15124_s1 + $0x1b08] sm:$0xff] }
  0x91   : > { %v1009_v26 = vld [vmem:[%s15124_s1 + $0x1b40] sm:$0xff]  ;;  %1006 = vst [vmem:[%s15129_s22 + $0x6c0] sm:$0xff] %v1005_v24  ;;  %1008 = vst [vmem:[%s15129_s22 + $0x6c8] sm:$0xff] %v1007_v25  ;;  %v1011_v27 = vld [vmem:[%s15124_s1 + $0x1b48] sm:$0xff] }
  0x92   : > { %1010 = vst [vmem:[%s15129_s22 + $0x6d0] sm:$0xff] %v1009_v26  ;;  %v1013_v28 = vld [vmem:[%s15124_s1 + $0x1b80] sm:$0xff]  ;;  %v1015_v29 = vld [vmem:[%s15124_s1 + $0x1b88] sm:$0xff]  ;;  %1012 = vst [vmem:[%s15129_s22 + $0x6d8] sm:$0xff] %v1011_v27 }
  0x93   : > { %1014 = vst [vmem:[%s15129_s22 + $0x6e0] sm:$0xff] %v1013_v28  ;;  %1016 = vst [vmem:[%s15129_s22 + $0x6e8] sm:$0xff] %v1015_v29  ;;  %v1017_v30 = vld [vmem:[%s15124_s1 + $0x1bc0] sm:$0xff]  ;;  %v1019_v31 = vld [vmem:[%s15124_s1 + $0x1bc8] sm:$0xff] }
  0x94   : > { %v1021_v32 = vld [vmem:[%s15124_s1 + $0x1c00] sm:$0xff]  ;;  %1018 = vst [vmem:[%s15129_s22 + $0x6f0] sm:$0xff] %v1017_v30  ;;  %1020 = vst [vmem:[%s15129_s22 + $0x6f8] sm:$0xff] %v1019_v31  ;;  %v1023_v33 = vld [vmem:[%s15124_s1 + $0x1c08] sm:$0xff] }
  0x95   : > { %1022 = vst [vmem:[%s15129_s22 + $0x700] sm:$0xff] %v1021_v32  ;;  %v1025_v34 = vld [vmem:[%s15124_s1 + $0x1c40] sm:$0xff]  ;;  %v1027_v35 = vld [vmem:[%s15124_s1 + $0x1c48] sm:$0xff]  ;;  %1024 = vst [vmem:[%s15129_s22 + $0x708] sm:$0xff] %v1023_v33 }
  0x96   : > { %1026 = vst [vmem:[%s15129_s22 + $0x710] sm:$0xff] %v1025_v34  ;;  %1028 = vst [vmem:[%s15129_s22 + $0x718] sm:$0xff] %v1027_v35  ;;  %v1029_v36 = vld [vmem:[%s15124_s1 + $0x1c80] sm:$0xff]  ;;  %v1031_v37 = vld [vmem:[%s15124_s1 + $0x1c88] sm:$0xff] }
  0x97   : > { %v1033_v38 = vld [vmem:[%s15124_s1 + $0x1cc0] sm:$0xff]  ;;  %1030 = vst [vmem:[%s15129_s22 + $0x720] sm:$0xff] %v1029_v36  ;;  %1032 = vst [vmem:[%s15129_s22 + $0x728] sm:$0xff] %v1031_v37  ;;  %v1035_v39 = vld [vmem:[%s15124_s1 + $0x1cc8] sm:$0xff] }
  0x98   : > { %1034 = vst [vmem:[%s15129_s22 + $0x730] sm:$0xff] %v1033_v38  ;;  %v1037_v40 = vld [vmem:[%s15124_s1 + $0x1d00] sm:$0xff]  ;;  %v1039_v41 = vld [vmem:[%s15124_s1 + $0x1d08] sm:$0xff]  ;;  %1036 = vst [vmem:[%s15129_s22 + $0x738] sm:$0xff] %v1035_v39 }
  0x99   : > { %1038 = vst [vmem:[%s15129_s22 + $0x740] sm:$0xff] %v1037_v40  ;;  %1040 = vst [vmem:[%s15129_s22 + $0x748] sm:$0xff] %v1039_v41  ;;  %v1041_v42 = vld [vmem:[%s15124_s1 + $0x1d40] sm:$0xff]  ;;  %v1043_v43 = vld [vmem:[%s15124_s1 + $0x1d48] sm:$0xff] }
  0x9a   : > { %v1045_v44 = vld [vmem:[%s15124_s1 + $0x1d80] sm:$0xff]  ;;  %1042 = vst [vmem:[%s15129_s22 + $0x750] sm:$0xff] %v1041_v42  ;;  %1044 = vst [vmem:[%s15129_s22 + $0x758] sm:$0xff] %v1043_v43  ;;  %v1047_v45 = vld [vmem:[%s15124_s1 + $0x1d88] sm:$0xff] }
  0x9b   : > { %1046 = vst [vmem:[%s15129_s22 + $0x760] sm:$0xff] %v1045_v44  ;;  %v1049_v46 = vld [vmem:[%s15124_s1 + $0x1dc0] sm:$0xff]  ;;  %v1051_v47 = vld [vmem:[%s15124_s1 + $0x1dc8] sm:$0xff]  ;;  %1048 = vst [vmem:[%s15129_s22 + $0x768] sm:$0xff] %v1047_v45 }
  0x9c   : > { %1050 = vst [vmem:[%s15129_s22 + $0x770] sm:$0xff] %v1049_v46  ;;  %1052 = vst [vmem:[%s15129_s22 + $0x778] sm:$0xff] %v1051_v47  ;;  %v1053_v48 = vld [vmem:[%s15124_s1 + $0x1e00] sm:$0xff]  ;;  %v1055_v49 = vld [vmem:[%s15124_s1 + $0x1e08] sm:$0xff] }
  0x9d   : > { %v1057_v50 = vld [vmem:[%s15124_s1 + $0x1e40] sm:$0xff]  ;;  %1054 = vst [vmem:[%s15129_s22 + $0x780] sm:$0xff] %v1053_v48  ;;  %1056 = vst [vmem:[%s15129_s22 + $0x788] sm:$0xff] %v1055_v49  ;;  %v1059_v51 = vld [vmem:[%s15124_s1 + $0x1e48] sm:$0xff] }
  0x9e   : > { %1058 = vst [vmem:[%s15129_s22 + $0x790] sm:$0xff] %v1057_v50  ;;  %v1061_v52 = vld [vmem:[%s15124_s1 + $0x1e80] sm:$0xff]  ;;  %v1063_v53 = vld [vmem:[%s15124_s1 + $0x1e88] sm:$0xff]  ;;  %1060 = vst [vmem:[%s15129_s22 + $0x798] sm:$0xff] %v1059_v51 }
  0x9f   : > { %1062 = vst [vmem:[%s15129_s22 + $0x7a0] sm:$0xff] %v1061_v52  ;;  %1064 = vst [vmem:[%s15129_s22 + $0x7a8] sm:$0xff] %v1063_v53  ;;  %v1065_v54 = vld [vmem:[%s15124_s1 + $0x1ec0] sm:$0xff]  ;;  %v1067_v55 = vld [vmem:[%s15124_s1 + $0x1ec8] sm:$0xff] }
  0xa0   : > { %v1069_v56 = vld [vmem:[%s15124_s1 + $0x1f00] sm:$0xff]  ;;  %1066 = vst [vmem:[%s15129_s22 + $0x7b0] sm:$0xff] %v1065_v54  ;;  %1068 = vst [vmem:[%s15129_s22 + $0x7b8] sm:$0xff] %v1067_v55  ;;  %v1071_v57 = vld [vmem:[%s15124_s1 + $0x1f08] sm:$0xff] }
  0xa1   : > { %1070 = vst [vmem:[%s15129_s22 + $0x7c0] sm:$0xff] %v1069_v56  ;;  %v1073_v58 = vld [vmem:[%s15124_s1 + $0x1f40] sm:$0xff]  ;;  %v1075_v59 = vld [vmem:[%s15124_s1 + $0x1f48] sm:$0xff]  ;;  %1072 = vst [vmem:[%s15129_s22 + $0x7c8] sm:$0xff] %v1071_v57 }
  0xa2   : > { %1074 = vst [vmem:[%s15129_s22 + $0x7d0] sm:$0xff] %v1073_v58  ;;  %1076 = vst [vmem:[%s15129_s22 + $0x7d8] sm:$0xff] %v1075_v59  ;;  %v1077_v60 = vld [vmem:[%s15124_s1 + $0x1f80] sm:$0xff]  ;;  %v1079_v61 = vld [vmem:[%s15124_s1 + $0x1f88] sm:$0xff] }
  0xa3   : > { %v1081_v62 = vld [vmem:[%s15124_s1 + $0x1fc0] sm:$0xff]  ;;  %1078 = vst [vmem:[%s15129_s22 + $0x7e0] sm:$0xff] %v1077_v60  ;;  %1080 = vst [vmem:[%s15129_s22 + $0x7e8] sm:$0xff] %v1079_v61  ;;  %v1083_v63 = vld [vmem:[%s15124_s1 + $0x1fc8] sm:$0xff] }
  0xa4   : > { %1082 = vst [vmem:[%s15129_s22 + $0x7f0] sm:$0xff] %v1081_v62  ;;  %1084 = vst [vmem:[%s15129_s22 + $0x7f8] sm:$0xff] %v1083_v63 }
  0xa5 PF: > { %p12071_p9 = scmp.ge.s32.totalorder %s14980_s20, 1  ;;  %p1107_p10 = scmp.lt.s32.totalorder %s14980_s20, 7 }
  0xa7   : > { %p1108_p11 = pnand %p12071_p9, %p1107_p10 }
  0xa8   : > { %s1114_s2 = sand.u32 (!%p1108_p11), 1, %s14972_s0   ;;  %s15644_s23 = sadd.s32 (!%p1108_p11), 4294967295, %s15103_s21 }
  0xa9   : > { %1111 = sbr.rel (%p1108_p11) target bundleno = 2900 (0xb54), region = 115  ;;  %s12072_s24 = sshll.u32 (!%p1108_p11), %s1114_s2, 11 }
  0xaa   : > { %p1180_p12 = scmp.lt.s32.totalorder (!%p1108_p11), %s15644_s23, 3  ;;  %p12074_p13 = scmp.gt.s32.totalorder (!%p1108_p11), %s15644_s23, 0 }
  0xab   : > { %s15655_s0 = scalar_lea.vmem (!%p1108_p11), [#allocation5], %s12072_s24  ;;  %p12080_p1 = scmp.ne.s32.totalorder (!%p1108_p11), %s15103_s21, 0 }
  0xb0   : > { %s1181_s1 = scalar_select %p1180_p12, %s15644_s23, 3 }
  0xb1   : > { %1198 = sbr.rel (%p12080_p1) target bundleno = 1084 (0x43c), region = 123  ;;  %s19310_s22 = sld [smem:[#allocation13_spill]] (!%p12080_p1)  ;;  %v14982_v2 = vmov (!%p12080_p1), 0  }
  0xb2   : > { %s19330_s1 = smov (!%p12074_p13, %s1181_s1), 0  ;;  %1355 = vmatprep.mubr.bf16.mxu0 (!%p12080_p1), %v14982_v2  ;;  %s19311_s30 = sld [smem:[#allocation15_spill]] (!%p12080_p1) }
  0xb3   : > { %s12079_s3 = sshll.u32 %s19330_s1, 2  ;;  %s19313_s2 = sld [smem:[#allocation12_spill]] (!%p12080_p1) }
  0xb4   : > { %p1185_p0 = scmp.lt.s32.totalorder %s12079_s3, 15  ;;  %s19314_s29 = sld [smem:[#allocation14_spill]] (!%p12080_p1) }
  0xb6   : > { %s19332_s3 = smov (!%p1185_p0, %s12079_s3), 15 }
  0xb7   : > { %v13592_v0 = vld [vmem:[%s19310_s22 + $0x4] ss:$8 sps:$4 sm:$0xff] (!%p12080_p1)   ;;  %v13594_v1 = vld [vmem:[%s19310_s22] ss:$8 sps:$4 sm:$0xff] (!%p12080_p1)   ;;  %v13595_v3 = vld [vmem:[%s19310_s22 + $0x14] ss:$8 sps:$4 sm:$0xff] (!%p12080_p1)  }
  0xb8   : > { %1323 = vmatprep.subr.bf16.mxu0 %v13592_v0  ;;  %v13597_v4 = vld [vmem:[%s19310_s22 + $0x10] ss:$8 sps:$4 sm:$0xff]   ;;  %v13598_v5 = vld [vmem:[%s19310_s22 + $0x24] ss:$8 sps:$4 sm:$0xff]   ;;  %v13600_v6 = vld [vmem:[%s19310_s22 + $0x20] ss:$8 sps:$4 sm:$0xff]   ;;  %s19312_s19 = smov %s19311_s30 }
  0xb9   : > { %1324 = vmatpush1.bf16.msra.mxu0 %v13594_v1  ;;  %v13601_v7 = vld [vmem:[%s19310_s22 + $0x34] ss:$8 sps:$4 sm:$0xff]   ;;  %v13603_v8 = vld [vmem:[%s19310_s22 + $0x30] ss:$8 sps:$4 sm:$0xff]   ;;  %v13604_v9 = vld [vmem:[%s19310_s22 + $0x44] ss:$8 sps:$4 sm:$0xff]  }
  0xba   : > { %1325 = vmatprep.subr.bf16.mxu0 %v13595_v3  ;;  %v13618_v10 = vld [vmem:[%s19311_s30 + $0x4] ss:$16 sps:$4 sm:$0xff]   ;;  %v13606_v11 = vld [vmem:[%s19310_s22 + $0x40] ss:$8 sps:$4 sm:$0xff]   ;;  %v13609_v17 = vld [vmem:[%s19310_s22 + $0x50] ss:$8 sps:$4 sm:$0xff]  }
  0xbb   : > { %v13607_v12 = vld [vmem:[%s19310_s22 + $0x54] ss:$8 sps:$4 sm:$0xff]   ;;  %1794 = vmatprep.subr.bf16.mxu1 %v13618_v10  ;;  %v13623_v13 = vld [vmem:[%s19312_s19] ss:$16 sps:$4 sm:$0xff]   ;;  %v13610_v18 = vld [vmem:[%s19310_s22 + $0x64] ss:$8 sps:$4 sm:$0xff]  }
  0xbc   : > { %v13624_v14 = vld [vmem:[%s19312_s19 + $0x24] ss:$16 sps:$4 sm:$0xff]   ;;  %1795 = vmatpush1.bf16.msra.mxu1 %v13623_v13  ;;  %v13629_v15 = vld [vmem:[%s19312_s19 + $0x20] ss:$16 sps:$4 sm:$0xff]   ;;  %v13622_v26 = vld [vmem:[%s19312_s19 + $0xc] ss:$16 sps:$4 sm:$0xff]  }
  0xbd   : > { %1326 = vmatpush1.bf16.msra.mxu0 %v13597_v4  ;;  %1796 = vmatprep.subr.bf16.mxu1 %v13624_v14  ;;  %v13630_v16 = vld [vmem:[%s19312_s19 + $0x44] ss:$16 sps:$4 sm:$0xff]   ;;  %v13635_v19 = vld [vmem:[%s19312_s19 + $0x40] ss:$16 sps:$4 sm:$0xff]   ;;  %v13620_v30 = vld [vmem:[%s19312_s19 + $0x8] ss:$16 sps:$4 sm:$0xff]  }
  0xbe   : > { %1327 = vmatprep.subr.bf16.mxu0 %v13598_v5  ;;  %v13636_v20 = vld [vmem:[%s19312_s19 + $0x64] ss:$16 sps:$4 sm:$0xff]   ;;  %v13612_v21 = vld [vmem:[%s19310_s22 + $0x60] ss:$8 sps:$4 sm:$0xff]   ;;  %v13615_v25 = vld [vmem:[%s19310_s22 + $0x70] ss:$8 sps:$4 sm:$0xff]  }
  0xbf   : > { %v13613_v22 = vld [vmem:[%s19310_s22 + $0x74] ss:$8 sps:$4 sm:$0xff]   ;;  %v13641_v23 = vld [vmem:[%s19312_s19 + $0x60] ss:$16 sps:$4 sm:$0xff]   ;;  %v13626_v34 = vld [vmem:[%s19312_s19 + $0x28] ss:$16 sps:$4 sm:$0xff]  }
  0xc0   : > { %1797 = vmatpush1.bf16.msra.mxu1 %v13629_v15  ;;  %v13642_v24 = vld [vmem:[%s19312_s19 + $0x84] ss:$16 sps:$4 sm:$0xff]   ;;  %v13647_v27 = vld [vmem:[%s19312_s19 + $0x80] ss:$16 sps:$4 sm:$0xff]   ;;  %v13628_v31 = vld [vmem:[%s19312_s19 + $0x2c] ss:$16 sps:$4 sm:$0xff]  }
  0xc1   : > { %1328 = vmatpush1.bf16.msra.mxu0 %v13600_v6  ;;  %1798 = vmatprep.subr.bf16.mxu1 %v13630_v16  ;;  %v13616_v28 = vld [vmem:[%s19313_s2] sm:$0xff]   ;;  %v13634_v35 = vld [vmem:[%s19312_s19 + $0x4c] ss:$16 sps:$4 sm:$0xff]   ;;  %v13632_v39 = vld [vmem:[%s19312_s19 + $0x48] ss:$16 sps:$4 sm:$0xff]  }
  0xc2   : > { %1329 = vmatprep.subr.bf16.mxu0 %v13601_v7  ;;  %v13648_v29 = vld [vmem:[%s19312_s19 + $0xa4] ss:$16 sps:$4 sm:$0xff]   ;;  %v13653_v32 = vld [vmem:[%s19312_s19 + $0xa0] ss:$16 sps:$4 sm:$0xff]   ;;  %v13617_v37 = vld [vmem:[%s19313_s2 + $0x8] sm:$0xff]  }
  0xc3   : > { %v13654_v33 = vld [vmem:[%s19312_s19 + $0xc4] ss:$16 sps:$4 sm:$0xff]   ;;  %v13659_v36 = vld [vmem:[%s19312_s19 + $0xc0] ss:$16 sps:$4 sm:$0xff]   ;;  %v13640_v40 = vld [vmem:[%s19312_s19 + $0x6c] ss:$16 sps:$4 sm:$0xff]  }
  0xc4   : > { %1799 = vmatpush1.bf16.msra.mxu1 %v13635_v19  ;;  %v13660_v38 = vld [vmem:[%s19312_s19 + $0xe4] ss:$16 sps:$4 sm:$0xff]   ;;  %v13665_v41 = vld [vmem:[%s19312_s19 + $0xe0] ss:$16 sps:$4 sm:$0xff]   ;;  %v13638_v43 = vld [vmem:[%s19312_s19 + $0x68] ss:$16 sps:$4 sm:$0xff]  }
  0xc5   : > { %1330 = vmatpush1.bf16.msra.mxu0 %v13603_v8  ;;  %1800 = vmatprep.subr.bf16.mxu1 %v13636_v20  ;;  %v13666_v42 = vld [vmem:[%s19312_s19 + $0x104] ss:$16 sps:$4 sm:$0xff]   ;;  %v13646_v44 = vld [vmem:[%s19312_s19 + $0x8c] ss:$16 sps:$4 sm:$0xff]   ;;  %v13671_v45 = vld [vmem:[%s19312_s19 + $0x100] ss:$16 sps:$4 sm:$0xff]  }
  0xc6   : > { %1331 = vmatprep.subr.bf16.mxu0 %v13604_v9  ;;  %v13672_v46 = vld [vmem:[%s19312_s19 + $0x124] ss:$16 sps:$4 sm:$0xff]   ;;  %v13644_v47 = vld [vmem:[%s19312_s19 + $0x88] ss:$16 sps:$4 sm:$0xff]   ;;  %v13652_v48 = vld [vmem:[%s19312_s19 + $0xac] ss:$16 sps:$4 sm:$0xff]  }
  0xc7   : > { %v13650_v49 = vld [vmem:[%s19312_s19 + $0xa8] ss:$16 sps:$4 sm:$0xff]   ;;  %v13677_v50 = vld [vmem:[%s19312_s19 + $0x120] ss:$16 sps:$4 sm:$0xff]   ;;  %v13678_v51 = vld [vmem:[%s19312_s19 + $0x144] ss:$16 sps:$4 sm:$0xff]  }
  0xc8   : > { %1801 = vmatpush1.bf16.msra.mxu1 %v13641_v23  ;;  %v13658_v52 = vld [vmem:[%s19312_s19 + $0xcc] ss:$16 sps:$4 sm:$0xff]   ;;  %v13683_v53 = vld [vmem:[%s19312_s19 + $0x140] ss:$16 sps:$4 sm:$0xff]   ;;  %v13684_v54 = vld [vmem:[%s19312_s19 + $0x164] ss:$16 sps:$4 sm:$0xff]  }
  0xc9   : > { %1332 = vmatpush1.bf16.msra.mxu0 %v13606_v11  ;;  %1802 = vmatprep.subr.bf16.mxu1 %v13642_v24  ;;  %v13656_v55 = vld [vmem:[%s19312_s19 + $0xc8] ss:$16 sps:$4 sm:$0xff]   ;;  %v13664_v56 = vld [vmem:[%s19312_s19 + $0xec] ss:$16 sps:$4 sm:$0xff]   ;;  %v13689_v57 = vld [vmem:[%s19312_s19 + $0x160] ss:$16 sps:$4 sm:$0xff]  }
  0xca   : > { %1333 = vmatprep.subr.bf16.mxu0 %v13607_v12  ;;  %v13690_v58 = vld [vmem:[%s19312_s19 + $0x184] ss:$16 sps:$4 sm:$0xff]   ;;  %v13662_v59 = vld [vmem:[%s19312_s19 + $0xe8] ss:$16 sps:$4 sm:$0xff]   ;;  %v13670_v60 = vld [vmem:[%s19312_s19 + $0x10c] ss:$16 sps:$4 sm:$0xff]  }
  0xcb   : > { %v13695_v61 = vld [vmem:[%s19312_s19 + $0x180] ss:$16 sps:$4 sm:$0xff]   ;;  %v13696_v62 = vld [vmem:[%s19312_s19 + $0x1a4] ss:$16 sps:$4 sm:$0xff]   ;;  %v13668_v63 = vld [vmem:[%s19312_s19 + $0x108] ss:$16 sps:$4 sm:$0xff]  }
  0xcc   : > { %1803 = vmatpush1.bf16.msra.mxu1 %v13647_v27  ;;  %v13676_v0 = vld [vmem:[%s19312_s19 + $0x12c] ss:$16 sps:$4 sm:$0xff]   ;;  %v13674_v1 = vld [vmem:[%s19312_s19 + $0x128] ss:$16 sps:$4 sm:$0xff]   ;;  %v13701_v10 = vld [vmem:[%s19312_s19 + $0x1a0] ss:$16 sps:$4 sm:$0xff]   ;;  %v1221_v27 = vlaneseq }
  0xcd   : > { %1334 = vmatpush1.bf16.msra.mxu0 %v13609_v17  ;;  %1804 = vmatprep.subr.bf16.mxu1 %v13648_v29  ;;  %v13680_v3 = vld [vmem:[%s19312_s19 + $0x148] ss:$16 sps:$4 sm:$0xff]   ;;  %v13688_v4 = vld [vmem:[%s19312_s19 + $0x16c] ss:$16 sps:$4 sm:$0xff]   ;;  %v13702_v11 = vld [vmem:[%s19312_s19 + $0x1c4] ss:$16 sps:$4 sm:$0xff]  }
  0xce   : > { %1335 = vmatprep.subr.bf16.mxu0 %v13610_v18  ;;  %v13686_v5 = vld [vmem:[%s19312_s19 + $0x168] ss:$16 sps:$4 sm:$0xff]   ;;  %v13694_v6 = vld [vmem:[%s19312_s19 + $0x18c] ss:$16 sps:$4 sm:$0xff]   ;;  %v13707_v14 = vld [vmem:[%s19312_s19 + $0x1c0] ss:$16 sps:$4 sm:$0xff]  }
  0xcf   : > { %v13692_v7 = vld [vmem:[%s19312_s19 + $0x188] ss:$16 sps:$4 sm:$0xff]   ;;  %v13700_v8 = vld [vmem:[%s19312_s19 + $0x1ac] ss:$16 sps:$4 sm:$0xff]   ;;  %v13708_v15 = vld [vmem:[%s19312_s19 + $0x1e4] ss:$16 sps:$4 sm:$0xff]  }
  0xd0   : > { %1805 = vmatpush1.bf16.msra.mxu1 %v13653_v32  ;;  %v13698_v9 = vld [vmem:[%s19312_s19 + $0x1a8] ss:$16 sps:$4 sm:$0xff]   ;;  %v13706_v12 = vld [vmem:[%s19312_s19 + $0x1cc] ss:$16 sps:$4 sm:$0xff]   ;;  %v13713_v18 = vld [vmem:[%s19312_s19 + $0x1e0] ss:$16 sps:$4 sm:$0xff]  }
  0xd1   : > { %1336 = vmatpush1.bf16.msra.mxu0 %v13612_v21  ;;  %1806 = vmatprep.subr.bf16.mxu1 %v13654_v33  ;;  %v13704_v13 = vld [vmem:[%s19312_s19 + $0x1c8] ss:$16 sps:$4 sm:$0xff]   ;;  %v13712_v16 = vld [vmem:[%s19312_s19 + $0x1ec] ss:$16 sps:$4 sm:$0xff]   ;;  %v1924_v19 = vld [vmem:[%s19278_s5] sm:$0xff] }
  0xd2   : > { %1337 = vmatprep.subr.bf16.mxu0 %v13613_v22  ;;  %v13710_v17 = vld [vmem:[%s19312_s19 + $0x1e8] ss:$16 sps:$4 sm:$0xff]   ;;  %v1926_v20 = vld [vmem:[%s19278_s5 + $0x20] sm:$0xff] }
  0xd3   : > { %v1925_v21 = vld [vmem:[%s19278_s5 + $0x8] sm:$0xff]  ;;  %v12163_v22 = vcombine.low %v1924_v19, %v1926_v20  ;;  %v12164_v23 = vcombine.high %v1924_v19, %v1926_v20  ;;  %v1940_v20 = vld [vmem:[%s19278_s5 + $0x100] sm:$0xff] }
  0xd4   : > { %1807 = vmatpush1.bf16.msra.mxu1 %v13659_v36  ;;  %v1927_v24 = vld [vmem:[%s19278_s5 + $0x28] sm:$0xff] }
  0xd5   : > { %1338 = vmatpush1.bf16.msra.mxu0 %v13615_v25  ;;  %1808 = vmatprep.subr.bf16.mxu1 %v13660_v38  ;;  %v12165_v25 = vcombine.low %v1925_v21, %v1927_v24 }
  0xd6   : > { %1847 = vmatprep.subr.bf16.mxu0 %v13622_v26  ;;  %v12166_v26 = vcombine.high %v1925_v21, %v1927_v24  ;;  %v1942_v21 = vld [vmem:[%s19278_s5 + $0x120] sm:$0xff] }
  0xd8   : > { %1356 = vmatmul.mubr.bf16.vlgmr.msra.gmra.mrb[0].mxu0 %v13616_v28  ;;  %1809 = vmatpush1.bf16.msra.mxu1 %v13665_v41  ;;  %v15916_v28 = vshrl.u32 %v1221_v27, 7 }
  0xd9   : > { %1365 = vmatprep.mubr.bf16.mxu0 %v14982_v2  ;;  %1848 = vmatpush1.bf16.msra.mxu0 %v13620_v30  ;;  %v13682_v2 = vld [vmem:[%s19312_s19 + $0x14c] ss:$16 sps:$4 sm:$0xff]   ;;  %v1219_v30 = vld [vmem:[%s19314_s29] sm:$0x3] }
  0xda   : > { %1849 = vmatprep.subr.bf16.mxu0 %v13628_v31  ;;  %1810 = vmatprep.subr.bf16.mxu1 %v13666_v42  ;;  %v15919_v29 = vsub.s32 0, %v15916_v28  ;;  %v15925_v31 = vsub.s32 1, %v15916_v28 }
  0xdc   : > { %1811 = vmatpush1.bf16.msra.mxu1 %v13671_v45  ;;  %v1224_v32 = vrot.slane %v1219_v30, %v15919_v29  ;;  %v1228_v33 = vrot.slane %v1219_v30, %v15925_v31  ;;  %v1944_v30 = vld [vmem:[%s19278_s5 + $0x140] sm:$0xff] }
  0xdd   : > { %1850 = vmatpush1.bf16.msra.mxu0 %v13626_v34  ;;  %1812 = vmatprep.subr.bf16.mxu1 %v13672_v46 }
  0xde   : > { %1851 = vmatprep.subr.bf16.mxu0 %v13634_v35 }
  0xe0   : > { %1366 = vmatmul.mubr.bf16.gmra.mrb[4].mxu0 %v13617_v37  ;;  %1813 = vmatpush1.bf16.msra.mxu1 %v13677_v50 }
  0xe1   : > { %1852 = vmatpush1.bf16.msra.mxu0 %v13632_v39  ;;  %1814 = vmatprep.subr.bf16.mxu1 %v13678_v51 }
  0xe2   : > { %1853 = vmatprep.subr.bf16.mxu0 %v13640_v40 }
  0xe4   : > { %1815 = vmatpush1.bf16.msra.mxu1 %v13683_v53 }
  0xe5   : > { %1854 = vmatpush1.bf16.msra.mxu0 %v13638_v43  ;;  %1816 = vmatprep.subr.bf16.mxu1 %v13684_v54 }
  0xe6   : > { %1855 = vmatprep.subr.bf16.mxu0 %v13646_v44  ;;  %v1928_v44 = vld [vmem:[%s19278_s5 + $0x40] sm:$0xff] }
  0xe8   : > { %1817 = vmatpush1.bf16.msra.mxu1 %v13689_v57  ;;  %v1932_v57 = vld [vmem:[%s19278_s5 + $0x80] sm:$0xff] }
  0xe9   : > { %1856 = vmatpush1.bf16.msra.mxu0 %v13644_v47  ;;  %1818 = vmatprep.subr.bf16.mxu1 %v13690_v58  ;;  %v1930_v47 = vld [vmem:[%s19278_s5 + $0x60] sm:$0xff] }
  0xea   : > { %1857 = vmatprep.subr.bf16.mxu0 %v13652_v48  ;;  %v1929_v48 = vld [vmem:[%s19278_s5 + $0x48] sm:$0xff] }
  0xec   : > { %1819 = vmatpush1.bf16.msra.mxu1 %v13695_v61  ;;  %v1933_v61 = vld [vmem:[%s19278_s5 + $0x88] sm:$0xff] }
  0xed   : > { %1858 = vmatpush1.bf16.msra.mxu0 %v13650_v49  ;;  %1820 = vmatprep.subr.bf16.mxu1 %v13696_v62  ;;  %v1931_v49 = vld [vmem:[%s19278_s5 + $0x68] sm:$0xff] }
  0xee   : > { %1859 = vmatprep.subr.bf16.mxu0 %v13658_v52  ;;  %v1935_v62 = vld [vmem:[%s19278_s5 + $0xa8] sm:$0xff] }
  0xf0   : > { %1821 = vmatpush1.bf16.msra.mxu1 %v13701_v10 }
  0xf1   : > { %1860 = vmatpush1.bf16.msra.mxu0 %v13656_v55  ;;  %1822 = vmatprep.subr.bf16.mxu1 %v13702_v11  ;;  %v12168_v55 = vcombine.high %v1928_v44, %v1930_v47  ;;  %v1938_v11 = vld [vmem:[%s19278_s5 + $0xe0] sm:$0xff] }
  0xf2   : > { %1861 = vmatprep.subr.bf16.mxu0 %v13664_v56  ;;  %v12170_v56 = vcombine.high %v1929_v48, %v1931_v49 }
  0xf4   : > { %1823 = vmatpush1.bf16.msra.mxu1 %v13707_v14 }
  0xf5   : > { %1862 = vmatpush1.bf16.msra.mxu0 %v13662_v59  ;;  %1824 = vmatprep.subr.bf16.mxu1 %v13708_v15 }
  0xf6   : > { %1863 = vmatprep.subr.bf16.mxu0 %v13670_v60  ;;  %v1934_v60 = vld [vmem:[%s19278_s5 + $0xa0] sm:$0xff] }
  0xf8   : > { %1825 = vmatpush1.bf16.msra.mxu1 %v13713_v18 }
  0xf9   : > { %1864 = vmatpush1.bf16.msra.mxu0 %v13668_v63  ;;  %2714 = vmatprep.subr.bf16.mxu1 %v12164_v23  ;;  %v1943_v23 = vld [vmem:[%s19278_s5 + $0x128] sm:$0xff] }
  0xfa   : > { %1865 = vmatprep.subr.bf16.mxu0 %v13676_v0 }
  0xfd   : > { %1866 = vmatpush1.bf16.msra.mxu0 %v13674_v1 }
  0xfe   : > { %1867 = vmatprep.subr.bf16.mxu0 %v13682_v2 }
 0x101   : > { %1868 = vmatpush1.bf16.msra.mxu0 %v13680_v3 }
 0x102   : > { %1869 = vmatprep.subr.bf16.mxu0 %v13688_v4  ;;  %v12167_v4 = vcombine.low %v1928_v44, %v1930_v47  ;;  %v1952_v47 = vld [vmem:[%s19278_s5 + $0x1c0] sm:$0xff] }
 0x105   : > { %1870 = vmatpush1.bf16.msra.mxu0 %v13686_v5  ;;  %v12169_v5 = vcombine.low %v1929_v48, %v1931_v49  ;;  %v1954_v48 = vld [vmem:[%s19278_s5 + $0x1e0] sm:$0xff]  ;;  %v1953_v49 = vld [vmem:[%s19278_s5 + $0x1c8] sm:$0xff] }
 0x106   : > { %1871 = vmatprep.subr.bf16.mxu0 %v13694_v6 }
 0x109   : > { %1872 = vmatpush1.bf16.msra.mxu0 %v13692_v7  ;;  %v12172_v7 = vcombine.high %v1932_v57, %v1934_v60 }
 0x10a   : > { %1873 = vmatprep.subr.bf16.mxu0 %v13700_v8  ;;  %v12174_v8 = vcombine.high %v1933_v61, %v1935_v62 }
 0x10d   : > { %1874 = vmatpush1.bf16.msra.mxu0 %v13698_v9  ;;  %v1936_v9 = vld [vmem:[%s19278_s5 + $0xc0] sm:$0xff] }
 0x10e   : > { %1875 = vmatprep.subr.bf16.mxu0 %v13706_v12  ;;  %v1937_v12 = vld [vmem:[%s19278_s5 + $0xc8] sm:$0xff]  ;;  %v12176_v18 = vcombine.high %v1936_v9, %v1938_v11  ;;  %v12175_v24 = vcombine.low %v1936_v9, %v1938_v11 }
 0x10f   : > { %v1965_v9 = vld [vmem:[%s19278_s5 + $0x288] sm:$0xff] }
 0x111   : > { %1876 = vmatpush1.bf16.msra.mxu0 %v13704_v13  ;;  %v1939_v13 = vld [vmem:[%s19278_s5 + $0xe8] sm:$0xff] }
 0x112   : > { %1877 = vmatprep.subr.bf16.mxu0 %v13712_v16  ;;  %v12171_v16 = vcombine.low %v1932_v57, %v1934_v60  ;;  %v12178_v19 = vcombine.high %v1937_v12, %v1939_v13  ;;  %v1957_v57 = vld [vmem:[%s19278_s5 + $0x208] sm:$0xff] }
 0x115   : > { %1878 = vmatpush1.bf16.msra.mxu0 %v13710_v17  ;;  %v12173_v17 = vcombine.low %v1933_v61, %v1935_v62 }
 0x116   : > { %2820 = vmatprep.subr.bf16.mxu0 %v12166_v26  ;;  %v12180_v26 = vcombine.high %v1940_v20, %v1942_v21 }
 0x1ab   : > { %v1357_v34 = vpop.f32.mrb[0].mxu0 }
 0x1ac   : > { %v1358_v35 = vadd.f32 %v1357_v34, %v1224_v32  ;;  %v1359_v36 = vpop.f32.mrb[1].mxu0  ;;  %v1947_v34 = vld [vmem:[%s19278_s5 + $0x168] sm:$0xff] }
 0x1ad   : > { %v1360_v37 = vadd.f32 %v1359_v36, %v1228_v33  ;;  %v1361_v38 = vpop.f32.mrb[2].mxu0 }
 0x1ae   : > { %v1362_v39 = vadd.f32 %v1361_v38, %v1224_v32  ;;  %v1363_v40 = vpop.f32.mrb[3].mxu0  ;;  %v1376_v42 = vmax.f32 %v1358_v35, 0.0  ;;  %v12179_v35 = vcombine.low %v1940_v20, %v1942_v21 }
 0x1af   : > { %v1364_v41 = vadd.f32 %v1363_v40, %v1228_v33  ;;  %v1377_v45 = vmax.f32 %v1360_v37, 0.0  ;;  %v1950_v40 = vld [vmem:[%s19278_s5 + $0x1a0] sm:$0xff] }
 0x1b0   : > { %v1378_v43 = vmax.f32 %v1362_v39, 0.0  ;;  %v1948_v39 = vld [vmem:[%s19278_s5 + $0x180] sm:$0xff] }
 0x1b1   : > { %v1379_v46 = vmax.f32 %v1364_v41, 0.0  ;;  %v1949_v41 = vld [vmem:[%s19278_s5 + $0x188] sm:$0xff] }
 0x1b2   : > { %v1384_v50 = vpack.c.bf16 %v1378_v43, %v1376_v42  ;;  %v1951_v42 = vld [vmem:[%s19278_s5 + $0x1a8] sm:$0xff] }
 0x1b3   : > { %v1367_v51 = vpop.f32.mrb[4].mxu0  ;;  %v1385_v52 = vpack.c.bf16 %v1379_v46, %v1377_v45  ;;  %v12188_v45 = vcombine.high %v1948_v39, %v1950_v40  ;;  %v12190_v46 = vcombine.high %v1949_v41, %v1951_v42 }
 0x1b4   : > { %v1368_v53 = vadd.f32 %v1367_v51, %v1224_v32  ;;  %v1369_v54 = vpop.f32.mrb[5].mxu0  ;;  %v12187_v51 = vcombine.low %v1948_v39, %v1950_v40 }
 0x1b5   : > { %v1370_v58 = vadd.f32 %v1369_v54, %v1228_v33  ;;  %v1371_v59 = vpop.f32.mrb[6].mxu0  ;;  %1826 = vmatprep.mubr.bf16.mxu1 %v1385_v52  ;;  %1879 = vmatprep.mubr.bf16.mxu0 %v1385_v52  ;;  %v12189_v52 = vcombine.low %v1949_v41, %v1951_v42 }
 0x1b6   : > { %v1380_v63 = vmax.f32 %v1368_v53, 0.0  ;;  %v1372_v0 = vadd.f32 %v1371_v59, %v1224_v32  ;;  %v1373_v1 = vpop.f32.mrb[7].mxu0  ;;  %1827 = vmatmul.mubr.bf16.vlgmr.msra.gmra.mrb[0].mxu1 %v1384_v50  ;;  %1880 = vmatmul.mubr.bf16.vlgmr.msra.gmra.mrb[8].mxu0 %v1384_v50  ;;  %v1946_v32 = vld [vmem:[%s19278_s5 + $0x160] sm:$0xff]  ;;  %v1955_v50 = vld [vmem:[%s19278_s5 + $0x1e8] sm:$0xff]  ;;  %v12192_v53 = vcombine.high %v1952_v47, %v1954_v48  ;;  %v12191_v59 = vcombine.low %v1952_v47, %v1954_v48 }
 0x1b7   : > { %v1381_v2 = vmax.f32 %v1370_v58, 0.0  ;;  %v1374_v3 = vadd.f32 %v1373_v1, %v1228_v33  ;;  %2715 = vmatpush1.bf16.msra.mxu1 %v12163_v22  ;;  %2821 = vmatpush1.bf16.msra.mxu0 %v12165_v25  ;;  %v1941_v22 = vld [vmem:[%s19278_s5 + $0x108] sm:$0xff]  ;;  %v12177_v25 = vcombine.low %v1937_v12, %v1939_v13  ;;  %v12184_v37 = vcombine.high %v1944_v30, %v1946_v32 }
 0x1b8   : > { %v1382_v6 = vmax.f32 %v1372_v0, 0.0  ;;  %2716 = vmatprep.subr.bf16.mxu1 %v12168_v55  ;;  %2822 = vmatprep.subr.bf16.mxu0 %v12170_v56  ;;  %v12182_v27 = vcombine.high %v1941_v22, %v1943_v23  ;;  %v1945_v33 = vld [vmem:[%s19278_s5 + $0x148] sm:$0xff]  ;;  %v12181_v36 = vcombine.low %v1941_v22, %v1943_v23  ;;  %v12183_v43 = vcombine.low %v1944_v30, %v1946_v32  ;;  %v1956_v55 = vld [vmem:[%s19278_s5 + $0x200] sm:$0xff] }
 0x1b9   : > { %v1383_v10 = vmax.f32 %v1374_v3, 0.0  ;;  %v12186_v38 = vcombine.high %v1945_v33, %v1947_v34  ;;  %v12185_v44 = vcombine.low %v1945_v33, %v1947_v34  ;;  %v12194_v54 = vcombine.high %v1953_v49, %v1955_v50  ;;  %v1958_v56 = vld [vmem:[%s19278_s5 + $0x220] sm:$0xff]  ;;  %v1959_v58 = vld [vmem:[%s19278_s5 + $0x228] sm:$0xff] }
 0x1ba   : > { %v1386_v14 = vpack.c.bf16 %v1382_v6, %v1380_v63  ;;  %v12193_v60 = vcombine.low %v1953_v49, %v1955_v50  ;;  %v12196_v61 = vcombine.high %v1956_v55, %v1958_v56  ;;  %v12198_v62 = vcombine.high %v1957_v57, %v1959_v58  ;;  %v1960_v63 = vld [vmem:[%s19278_s5 + $0x240] sm:$0xff]  ;;  %v1961_v1 = vld [vmem:[%s19278_s5 + $0x248] sm:$0xff] }
 0x1bb   : > { %v1387_v15 = vpack.c.bf16 %v1383_v10, %v1381_v2  ;;  %2717 = vmatpush1.bf16.msra.mxu1 %v12167_v4  ;;  %2823 = vmatpush1.bf16.msra.mxu0 %v12169_v5  ;;  %v1962_v0 = vld [vmem:[%s19278_s5 + $0x260] sm:$0xff]  ;;  %v1963_v2 = vld [vmem:[%s19278_s5 + $0x268] sm:$0xff]  ;;  %v12195_v3 = vcombine.low %v1956_v55, %v1958_v56  ;;  %v12197_v4 = vcombine.low %v1957_v57, %v1959_v58 }
 0x1bc   : > { %2718 = vmatprep.subr.bf16.mxu1 %v12172_v7  ;;  %2824 = vmatprep.subr.bf16.mxu0 %v12174_v8  ;;  %v12200_v5 = vcombine.high %v1960_v63, %v1962_v0  ;;  %v12202_v6 = vcombine.high %v1961_v1, %v1963_v2  ;;  %v1964_v7 = vld [vmem:[%s19278_s5 + $0x280] sm:$0xff]  ;;  %v1967_v10 = vld [vmem:[%s19278_s5 + $0x2a8] sm:$0xff]  ;;  %v12199_v11 = vcombine.low %v1960_v63, %v1962_v0 }
 0x1bd   : > { %1836 = vmatprep.mubr.bf16.mxu1 %v1387_v15  ;;  %1889 = vmatprep.mubr.bf16.mxu0 %v1387_v15  ;;  %v1966_v8 = vld [vmem:[%s19278_s5 + $0x2a0] sm:$0xff]  ;;  %v12201_v12 = vcombine.low %v1961_v1, %v1963_v2  ;;  %v12205_v20 = vcombine.low %v1965_v9, %v1967_v10  ;;  %v1983_v48 = vld [vmem:[%s19278_s5 + $0x3a8] sm:$0xff] }
 0x1be   : > { %1837 = vmatmul.mubr.bf16.gmra.mrb[4].mxu1 %v1386_v14  ;;  %1890 = vmatmul.mubr.bf16.gmra.mrb[12].mxu0 %v1386_v14  ;;  %v12204_v13 = vcombine.high %v1964_v7, %v1966_v8  ;;  %v12206_v14 = vcombine.high %v1965_v9, %v1967_v10  ;;  %v1968_v15 = vld [vmem:[%s19278_s5 + $0x2c0] sm:$0xff]  ;;  %v1987_v56 = vld [vmem:[%s19278_s5 + $0x3e8] sm:$0xff] }
 0x1bf   : > { %2719 = vmatpush1.bf16.msra.mxu1 %v12171_v16  ;;  %2825 = vmatpush1.bf16.msra.mxu0 %v12173_v17  ;;  %v1970_v16 = vld [vmem:[%s19278_s5 + $0x2e0] sm:$0xff]  ;;  %v1969_v17 = vld [vmem:[%s19278_s5 + $0x2c8] sm:$0xff] }
 0x1c0   : > { %2720 = vmatprep.subr.bf16.mxu1 %v12176_v18  ;;  %2826 = vmatprep.subr.bf16.mxu0 %v12178_v19  ;;  %v1971_v18 = vld [vmem:[%s19278_s5 + $0x2e8] sm:$0xff]  ;;  %v12203_v19 = vcombine.low %v1964_v7, %v1966_v8  ;;  %v12208_v21 = vcombine.high %v1968_v15, %v1970_v16  ;;  %v1972_v23 = vld [vmem:[%s19278_s5 + $0x300] sm:$0xff] }
 0x1c1   : > { %v12210_v22 = vcombine.high %v1969_v17, %v1971_v18  ;;  %v12209_v30 = vcombine.low %v1969_v17, %v1971_v18  ;;  %v1976_v34 = vld [vmem:[%s19278_s5 + $0x340] sm:$0xff]  ;;  %v16129_v0 = vld [vmem:[%s19278_s5 + $0x428] sm:$0xff] }
 0x1c3   : > { %2721 = vmatpush1.bf16.msra.mxu1 %v12175_v24  ;;  %2827 = vmatpush1.bf16.msra.mxu0 %v12177_v25  ;;  %v1974_v24 = vld [vmem:[%s19278_s5 + $0x320] sm:$0xff]  ;;  %v1973_v25 = vld [vmem:[%s19278_s5 + $0x308] sm:$0xff] }
 0x1c4   : > { %2722 = vmatprep.subr.bf16.mxu1 %v12180_v26  ;;  %2828 = vmatprep.subr.bf16.mxu0 %v12182_v27  ;;  %v1975_v26 = vld [vmem:[%s19278_s5 + $0x328] sm:$0xff]  ;;  %v12207_v27 = vcombine.low %v1968_v15, %v1970_v16  ;;  %v12212_v32 = vcombine.high %v1972_v23, %v1974_v24 }
 0x1c5   : > { %v12214_v33 = vcombine.high %v1973_v25, %v1975_v26  ;;  %v12213_v39 = vcombine.low %v1973_v25, %v1975_v26 }
 0x1c7   : > { %2723 = vmatpush1.bf16.msra.mxu1 %v12179_v35  ;;  %2829 = vmatpush1.bf16.msra.mxu0 %v12181_v36  ;;  %v1978_v35 = vld [vmem:[%s19278_s5 + $0x360] sm:$0xff]  ;;  %v1977_v36 = vld [vmem:[%s19278_s5 + $0x348] sm:$0xff] }
 0x1c8   : > { %2724 = vmatprep.subr.bf16.mxu1 %v12184_v37  ;;  %2830 = vmatprep.subr.bf16.mxu0 %v12186_v38  ;;  %v1979_v37 = vld [vmem:[%s19278_s5 + $0x368] sm:$0xff]  ;;  %v12211_v38 = vcombine.low %v1972_v23, %v1974_v24  ;;  %v12216_v40 = vcombine.high %v1976_v34, %v1978_v35  ;;  %v12215_v42 = vcombine.low %v1976_v34, %v1978_v35  ;;  %v1994_v34 = vld [vmem:[%s19278_s5 + $0x460] sm:$0xff] }
 0x1c9   : > { %v12218_v41 = vcombine.high %v1977_v36, %v1979_v37 }
 0x1cb   : > { %2725 = vmatpush1.bf16.msra.mxu1 %v12183_v43  ;;  %2831 = vmatpush1.bf16.msra.mxu0 %v12185_v44  ;;  %v12217_v43 = vcombine.low %v1977_v36, %v1979_v37  ;;  %v1980_v44 = vld [vmem:[%s19278_s5 + $0x380] sm:$0xff] }
 0x1cc   : > { %2726 = vmatprep.subr.bf16.mxu1 %v12188_v45  ;;  %2832 = vmatprep.subr.bf16.mxu0 %v12190_v46  ;;  %v1982_v45 = vld [vmem:[%s19278_s5 + $0x3a0] sm:$0xff]  ;;  %v1981_v46 = vld [vmem:[%s19278_s5 + $0x388] sm:$0xff] }
 0x1cd   : > { %v12220_v47 = vcombine.high %v1980_v44, %v1982_v45  ;;  %v12219_v49 = vcombine.low %v1980_v44, %v1982_v45  ;;  %v12221_v50 = vcombine.low %v1981_v46, %v1983_v48 }
 0x1cf   : > { %2727 = vmatpush1.bf16.msra.mxu1 %v12187_v51  ;;  %2833 = vmatpush1.bf16.msra.mxu0 %v12189_v52  ;;  %v12222_v51 = vcombine.high %v1981_v46, %v1983_v48  ;;  %v1984_v52 = vld [vmem:[%s19278_s5 + $0x3c0] sm:$0xff] }
 0x1d0   : > { %2728 = vmatprep.subr.bf16.mxu1 %v12192_v53  ;;  %2834 = vmatprep.subr.bf16.mxu0 %v12194_v54  ;;  %v1986_v53 = vld [vmem:[%s19278_s5 + $0x3e0] sm:$0xff]  ;;  %v1985_v54 = vld [vmem:[%s19278_s5 + $0x3c8] sm:$0xff] }
 0x1d1   : > { %v12224_v55 = vcombine.high %v1984_v52, %v1986_v53  ;;  %v12223_v57 = vcombine.low %v1984_v52, %v1986_v53  ;;  %v12225_v58 = vcombine.low %v1985_v54, %v1987_v56  ;;  %v1996_v52 = vld [vmem:[%s19278_s5 + $0x480] sm:$0xff] }
 0x1d3   : > { %2729 = vmatpush1.bf16.msra.mxu1 %v12191_v59  ;;  %2835 = vmatpush1.bf16.msra.mxu0 %v12193_v60  ;;  %v12226_v59 = vcombine.high %v1985_v54, %v1987_v56  ;;  %v16112_v60 = vld [vmem:[%s19278_s5 + $0x400] sm:$0xff] }
 0x1d4   : > { %2730 = vmatprep.subr.bf16.mxu1 %v12196_v61  ;;  %2836 = vmatprep.subr.bf16.mxu0 %v12198_v62  ;;  %v16117_v61 = vld [vmem:[%s19278_s5 + $0x420] sm:$0xff]  ;;  %v16122_v62 = vld [vmem:[%s19278_s5 + $0x408] sm:$0xff] }
 0x1d5   : > { %v12228_v63 = vcombine.high %v16112_v60, %v16117_v61  ;;  %v12227_v1 = vcombine.low %v16112_v60, %v16117_v61  ;;  %v12229_v2 = vcombine.low %v16122_v62, %v16129_v0 }
 0x1d7   : > { %2731 = vmatpush1.bf16.msra.mxu1 %v12195_v3  ;;  %2837 = vmatpush1.bf16.msra.mxu0 %v12197_v4  ;;  %v12230_v3 = vcombine.high %v16122_v62, %v16129_v0  ;;  %v16138_v4 = vsub.s32 2, %v15916_v28  ;;  %v2002_v62 = vld [vmem:[%s19278_s5 + $0x4e0] sm:$0xff]  ;;  %v2001_v0 = vld [vmem:[%s19278_s5 + $0x4c8] sm:$0xff] }
 0x1d8   : > { %2732 = vmatprep.subr.bf16.mxu1 %v12200_v5  ;;  %2838 = vmatprep.subr.bf16.mxu0 %v12202_v6  ;;  %v1452_v5 = vld [vmem:[%s19277_s4] sm:$0xf]  ;;  %v16144_v6 = vsub.s32 3, %v15916_v28 }
 0x1d9   : > { %v1457_v7 = vrot.slane %v1452_v5, %v15919_v29  ;;  %v1465_v8 = vrot.slane %v1452_v5, %v16138_v4  ;;  %v16149_v9 = vrot.slane %v1452_v5, %v15925_v31 }
 0x1da   : > { %v16152_v10 = vrot.slane %v1452_v5, %v16144_v6 }
 0x1db   : > { %2733 = vmatpush1.bf16.msra.mxu1 %v12199_v11  ;;  %2839 = vmatpush1.bf16.msra.mxu0 %v12201_v12 }
 0x1dc   : > { %2734 = vmatprep.subr.bf16.mxu1 %v12204_v13  ;;  %2840 = vmatprep.subr.bf16.mxu0 %v12206_v14 }
 0x1df   : > { %2735 = vmatpush1.bf16.msra.mxu1 %v12203_v19  ;;  %2841 = vmatpush1.bf16.msra.mxu0 %v12205_v20 }
 0x1e0   : > { %2736 = vmatprep.subr.bf16.mxu1 %v12208_v21  ;;  %2842 = vmatprep.subr.bf16.mxu0 %v12210_v22 }
 0x1e3   : > { %2737 = vmatpush1.bf16.msra.mxu1 %v12207_v27  ;;  %2843 = vmatpush1.bf16.msra.mxu0 %v12209_v30 }
 0x1e4   : > { %2738 = vmatprep.subr.bf16.mxu1 %v12212_v32  ;;  %2844 = vmatprep.subr.bf16.mxu0 %v12214_v33  ;;  %v1992_v33 = vld [vmem:[%s19278_s5 + $0x440] sm:$0xff] }
 0x1e5   : > { %v12232_v46 = vcombine.high %v1992_v33, %v1994_v34 }
 0x1e7   : > { %2739 = vmatpush1.bf16.msra.mxu1 %v12211_v38  ;;  %2845 = vmatpush1.bf16.msra.mxu0 %v12213_v39  ;;  %v1993_v39 = vld [vmem:[%s19278_s5 + $0x448] sm:$0xff] }
 0x1e8   : > { %2740 = vmatprep.subr.bf16.mxu1 %v12216_v40  ;;  %2846 = vmatprep.subr.bf16.mxu0 %v12218_v41  ;;  %v1995_v40 = vld [vmem:[%s19278_s5 + $0x468] sm:$0xff] }
 0x1eb   : > { %2741 = vmatpush1.bf16.msra.mxu1 %v12215_v42  ;;  %2847 = vmatpush1.bf16.msra.mxu0 %v12217_v43 }
 0x1ec   : > { %2742 = vmatprep.subr.bf16.mxu1 %v12220_v47  ;;  %2848 = vmatprep.subr.bf16.mxu0 %v12222_v51  ;;  %v12234_v51 = vcombine.high %v1993_v39, %v1995_v40 }
 0x1ef   : > { %2743 = vmatpush1.bf16.msra.mxu1 %v12219_v49  ;;  %2849 = vmatpush1.bf16.msra.mxu0 %v12221_v50  ;;  %v12231_v50 = vcombine.low %v1992_v33, %v1994_v34  ;;  %v2005_v33 = vld [vmem:[%s19278_s5 + $0x508] sm:$0xff] }
 0x1f0   : > { %2744 = vmatprep.subr.bf16.mxu1 %v12224_v55  ;;  %2850 = vmatprep.subr.bf16.mxu0 %v12226_v59  ;;  %v1997_v59 = vld [vmem:[%s19278_s5 + $0x488] sm:$0xff] }
 0x1f1   : > { %v2007_v34 = vld [vmem:[%s19278_s5 + $0x528] sm:$0xff] }
 0x1f3   : > { %2745 = vmatpush1.bf16.msra.mxu1 %v12223_v57  ;;  %2851 = vmatpush1.bf16.msra.mxu0 %v12225_v58  ;;  %v12233_v57 = vcombine.low %v1993_v39, %v1995_v40  ;;  %v1998_v58 = vld [vmem:[%s19278_s5 + $0x4a0] sm:$0xff] }
 0x1f4   : > { %2767 = vmatprep.subr.bf16.mxu1 %v12228_v63  ;;  %2873 = vmatprep.subr.bf16.mxu0 %v12230_v3  ;;  %v1999_v63 = vld [vmem:[%s19278_s5 + $0x4a8] sm:$0xff]  ;;  %v2008_v39 = vld [vmem:[%s19278_s5 + $0x540] sm:$0xff] }
 0x1f5   : > { %v2010_v40 = vld [vmem:[%s19278_s5 + $0x560] sm:$0xff] }
 0x289   : > { %v1828_v11 = vpop.f32.mrb[0].mxu1  ;;  %v1881_v12 = vpop.f32.mrb[8].mxu0 }
 0x28a   : > { %v1829_v13 = vadd.f32 %v1828_v11, %v1457_v7  ;;  %v1882_v14 = vadd.f32 %v1881_v12, %v1465_v8  ;;  %v1830_v15 = vpop.f32.mrb[1].mxu1  ;;  %v1883_v16 = vpop.f32.mrb[9].mxu0 }
 0x28b   : > { %v1831_v17 = vadd.f32 %v1830_v15, %v16149_v9  ;;  %v1884_v28 = vadd.f32 %v1883_v16, %v16152_v10  ;;  %v1832_v18 = vpop.f32.mrb[2].mxu1  ;;  %v1885_v19 = vpop.f32.mrb[10].mxu0 }
 0x28c   : > { %v1833_v20 = vadd.f32 %v1832_v18, %v1457_v7  ;;  %v1886_v21 = vadd.f32 %v1885_v19, %v1465_v8  ;;  %v1834_v22 = vpop.f32.mrb[3].mxu1  ;;  %v1887_v23 = vpop.f32.mrb[11].mxu0  ;;  %v1900_v26 = vmax.f32 %v1829_v13, 0.0  ;;  %v1902_v27 = vmax.f32 %v1882_v14, 0.0 }
 0x28d   : > { %v1835_v24 = vadd.f32 %v1834_v22, %v16149_v9  ;;  %v1888_v25 = vadd.f32 %v1887_v23, %v16152_v10  ;;  %v1901_v35 = vmax.f32 %v1831_v17, 0.0  ;;  %v1903_v36 = vmax.f32 %v1884_v28, 0.0 }
 0x28e   : > { %v1904_v30 = vmax.f32 %v1833_v20, 0.0  ;;  %v1906_v32 = vmax.f32 %v1886_v21, 0.0  ;;  %v12236_v20 = vcombine.high %v1996_v52, %v1998_v58 }
 0x28f   : > { %v1905_v37 = vmax.f32 %v1835_v24, 0.0  ;;  %v1907_v38 = vmax.f32 %v1888_v25, 0.0  ;;  %v12237_v24 = vcombine.low %v1997_v59, %v1999_v63 }
 0x290   : > { %v16170_v41 = vpack.c.bf16 %v1904_v30, %v1900_v26  ;;  %v16172_v42 = vpack.c.bf16 %v1906_v32, %v1902_v27  ;;  %v2004_v26 = vld [vmem:[%s19278_s5 + $0x500] sm:$0xff] }
 0x291   : > { %v16174_v43 = vpack.c.bf16 %v1905_v37, %v1901_v35  ;;  %v16176_v44 = vpack.c.bf16 %v1907_v38, %v1903_v36  ;;  %v1838_v45 = vpop.f32.mrb[4].mxu1  ;;  %v1891_v47 = vpop.f32.mrb[12].mxu0  ;;  %v2006_v32 = vld [vmem:[%s19278_s5 + $0x520] sm:$0xff]  ;;  %v12246_v38 = vcombine.high %v2005_v33, %v2007_v34 }
 0x292   : > { %v1839_v48 = vadd.f32 %v1838_v45, %v1457_v7  ;;  %v1840_v49 = vpop.f32.mrb[5].mxu1  ;;  %v1892_v53 = vadd.f32 %v1891_v47, %v1465_v8  ;;  %v1893_v54 = vpop.f32.mrb[13].mxu0  ;;  %v12244_v37 = vcombine.high %v2004_v26, %v2006_v32  ;;  %v2009_v45 = vld [vmem:[%s19278_s5 + $0x548] sm:$0xff]  ;;  %v12243_v47 = vcombine.low %v2004_v26, %v2006_v32 }
 0x293   : > { %v1841_v55 = vadd.f32 %v1840_v49, %v16149_v9  ;;  %v1842_v56 = vpop.f32.mrb[6].mxu1  ;;  %2746 = vmatprep.mubr.bf16.mxu1 %v16174_v43  ;;  %2852 = vmatprep.mubr.bf16.mxu0 %v16174_v43  ;;  %v1894_v3 = vadd.f32 %v1893_v54, %v16152_v10  ;;  %v1895_v5 = vpop.f32.mrb[14].mxu0  ;;  %v12248_v49 = vcombine.high %v2008_v39, %v2010_v40  ;;  %v2015_v54 = vld [vmem:[%s19278_s5 + $0x5a8] sm:$0xff] }
 0x294   : > { %v1908_v11 = vmax.f32 %v1839_v48, 0.0  ;;  %v1843_v12 = vadd.f32 %v1842_v56, %v1457_v7  ;;  %v1844_v13 = vpop.f32.mrb[7].mxu1  ;;  %2747 = vmatmul.mubr.bf16.vlgmr.msra.gmra.mrb[8].mxu1 %v16170_v41  ;;  %2853 = vmatmul.mubr.bf16.vlgmr.msra.gmra.mrb[16].mxu0 %v16170_v41  ;;  %v1910_v14 = vmax.f32 %v1892_v53, 0.0  ;;  %v1896_v15 = vadd.f32 %v1895_v5, %v1465_v8  ;;  %v1897_v16 = vpop.f32.mrb[15].mxu0  ;;  %v2013_v53 = vld [vmem:[%s19278_s5 + $0x588] sm:$0xff] }
 0x295   : > { %v1909_v17 = vmax.f32 %v1841_v55, 0.0  ;;  %v1845_v28 = vadd.f32 %v1844_v13, %v16149_v9  ;;  %2768 = vmatpush1.bf16.msra.mxu1 %v12227_v1  ;;  %2874 = vmatpush1.bf16.msra.mxu0 %v12229_v2  ;;  %v1911_v7 = vmax.f32 %v1894_v3, 0.0  ;;  %v1898_v18 = vadd.f32 %v1897_v16, %v16152_v10  ;;  %v2000_v9 = vld [vmem:[%s19278_s5 + $0x4c0] sm:$0xff]  ;;  %v2003_v2 = vld [vmem:[%s19278_s5 + $0x4e8] sm:$0xff] }
 0x296   : > { %v1912_v19 = vmax.f32 %v1843_v12, 0.0  ;;  %2769 = vmatprep.subr.bf16.mxu1 %v12232_v46  ;;  %2875 = vmatprep.subr.bf16.mxu0 %v12234_v51  ;;  %v12238_v8 = vcombine.high %v1997_v59, %v1999_v63  ;;  %v1914_v21 = vmax.f32 %v1896_v15, 0.0  ;;  %v12235_v1 = vcombine.low %v1996_v52, %v1998_v58  ;;  %v2011_v46 = vld [vmem:[%s19278_s5 + $0x568] sm:$0xff]  ;;  %v2012_v51 = vld [vmem:[%s19278_s5 + $0x580] sm:$0xff] }
 0x297   : > { %v1913_v22 = vmax.f32 %v1845_v28, 0.0  ;;  %v1915_v60 = vmax.f32 %v1898_v18, 0.0  ;;  %v12240_v27 = vcombine.high %v2000_v9, %v2002_v62  ;;  %v12242_v30 = vcombine.high %v2001_v0, %v2003_v2  ;;  %v2014_v52 = vld [vmem:[%s19278_s5 + $0x5a0] sm:$0xff]  ;;  %v2017_v3 = vld [vmem:[%s19278_s5 + $0x5c8] sm:$0xff] }
 0x298   : > { %v16207_v61 = vpack.c.bf16 %v1912_v19, %v1908_v11  ;;  %v16218_v10 = vpack.c.bf16 %v1914_v21, %v1910_v14  ;;  %v12239_v35 = vcombine.low %v2000_v9, %v2002_v62  ;;  %v12241_v36 = vcombine.low %v2001_v0, %v2003_v2  ;;  %v2016_v59 = vld [vmem:[%s19278_s5 + $0x5c0] sm:$0xff]  ;;  %v2019_v5 = vld [vmem:[%s19278_s5 + $0x5e8] sm:$0xff] }
 0x299   : > { %v16220_v23 = vpack.c.bf16 %v1913_v22, %v1909_v17  ;;  %2770 = vmatpush1.bf16.msra.mxu1 %v12231_v50  ;;  %2876 = vmatpush1.bf16.msra.mxu0 %v12233_v57  ;;  %v16222_v25 = vpack.c.bf16 %v1915_v60, %v1911_v7  ;;  %v12245_v48 = vcombine.low %v2005_v33, %v2007_v34  ;;  %v2018_v63 = vld [vmem:[%s19278_s5 + $0x5e0] sm:$0xff]  ;;  %v2021_v17 = vld [vmem:[%s19278_s5 + $0x608] sm:$0xff] }
 0x29a   : > { %2771 = vmatprep.subr.bf16.mxu1 %v12236_v20  ;;  %2877 = vmatprep.subr.bf16.mxu0 %v12238_v8  ;;  %v12250_v50 = vcombine.high %v2009_v45, %v2011_v46  ;;  %v12247_v55 = vcombine.low %v2008_v39, %v2010_v40  ;;  %v12249_v56 = vcombine.low %v2009_v45, %v2011_v46  ;;  %v2020_v15 = vld [vmem:[%s19278_s5 + $0x600] sm:$0xff]  ;;  %v2023_v28 = vld [vmem:[%s19278_s5 + $0x628] sm:$0xff] }
 0x29b   : > { %2756 = vmatprep.mubr.bf16.mxu1 %v16220_v23  ;;  %2862 = vmatprep.mubr.bf16.mxu0 %v16220_v23  ;;  %v12252_v57 = vcombine.high %v2012_v51, %v2014_v52  ;;  %v12254_v58 = vcombine.high %v2013_v53, %v2015_v54  ;;  %v12251_v11 = vcombine.low %v2012_v51, %v2014_v52  ;;  %v2022_v16 = vld [vmem:[%s19278_s5 + $0x620] sm:$0xff]  ;;  %v2025_v22 = vld [vmem:[%s19278_s5 + $0x648] sm:$0xff] }
 0x29c   : > { %2757 = vmatmul.mubr.bf16.gmra.mrb[12].mxu1 %v16207_v61  ;;  %2863 = vmatmul.mubr.bf16.gmra.mrb[20].mxu0 %v16207_v61  ;;  %v12253_v12 = vcombine.low %v2013_v53, %v2015_v54  ;;  %v12256_v13 = vcombine.high %v2016_v59, %v2018_v63  ;;  %v12258_v14 = vcombine.high %v2017_v3, %v2019_v5  ;;  %v2024_v8 = vld [vmem:[%s19278_s5 + $0x640] sm:$0xff]  ;;  %v2027_v9 = vld [vmem:[%s19278_s5 + $0x668] sm:$0xff] }
 0x29d   : > { %2772 = vmatpush1.bf16.msra.mxu1 %v12235_v1  ;;  %2878 = vmatpush1.bf16.msra.mxu0 %v12237_v24  ;;  %v12255_v7 = vcombine.low %v2016_v59, %v2018_v63  ;;  %v12257_v18 = vcombine.low %v2017_v3, %v2019_v5  ;;  %v12260_v19 = vcombine.high %v2020_v15, %v2022_v16  ;;  %v2026_v21 = vld [vmem:[%s19278_s5 + $0x660] sm:$0xff]  ;;  %v2029_v26 = vld [vmem:[%s19278_s5 + $0x688] sm:$0xff] }
 0x29e   : > { %2799 = vmatprep.mubr.bf16.mxu1 %v16176_v44  ;;  %2905 = vmatprep.mubr.bf16.mxu0 %v16176_v44  ;;  %v12262_v20 = vcombine.high %v2021_v17, %v2023_v28  ;;  %v12259_v60 = vcombine.low %v2020_v15, %v2022_v16  ;;  %v12261_v1 = vcombine.low %v2021_v17, %v2023_v28  ;;  %v2028_v2 = vld [vmem:[%s19278_s5 + $0x680] sm:$0xff] }
 0x29f   : > { %2773 = vmatprep.subr.bf16.mxu1 %v12240_v27  ;;  %2879 = vmatprep.subr.bf16.mxu0 %v12242_v30  ;;  %v12264_v62 = vcombine.high %v2024_v8, %v2026_v21  ;;  %v12266_v0 = vcombine.high %v2025_v22, %v2027_v9  ;;  %v2030_v24 = vld [vmem:[%s19278_s5 + $0x6a0] sm:$0xff]  ;;  %v2031_v27 = vld [vmem:[%s19278_s5 + $0x6a8] sm:$0xff]  ;;  %v12263_v30 = vcombine.low %v2024_v8, %v2026_v21 }
 0x2a0   : > { %v12265_v32 = vcombine.low %v2025_v22, %v2027_v9  ;;  %v12268_v33 = vcombine.high %v2028_v2, %v2030_v24  ;;  %v12270_v34 = vcombine.high %v2029_v26, %v2031_v27  ;;  %v12267_v39 = vcombine.low %v2028_v2, %v2030_v24 }
 0x2a1   : > { %2774 = vmatpush1.bf16.msra.mxu1 %v12239_v35  ;;  %2880 = vmatpush1.bf16.msra.mxu0 %v12241_v36  ;;  %v2032_v35 = vld [vmem:[%s19278_s5 + $0x6c0] sm:$0xff]  ;;  %v12269_v40 = vcombine.low %v2029_v26, %v2031_v27 }
 0x2a2   : > { %2775 = vmatprep.subr.bf16.mxu1 %v12244_v37  ;;  %2881 = vmatprep.subr.bf16.mxu0 %v12246_v38  ;;  %v2034_v36 = vld [vmem:[%s19278_s5 + $0x6e0] sm:$0xff]  ;;  %v2033_v37 = vld [vmem:[%s19278_s5 + $0x6c8] sm:$0xff] }
 0x2a3   : > { %v2035_v38 = vld [vmem:[%s19278_s5 + $0x6e8] sm:$0xff]  ;;  %v12272_v45 = vcombine.high %v2032_v35, %v2034_v36  ;;  %v12271_v51 = vcombine.low %v2032_v35, %v2034_v36 }
 0x2a4   : > { %v12274_v46 = vcombine.high %v2033_v37, %v2035_v38  ;;  %v12273_v52 = vcombine.low %v2033_v37, %v2035_v38 }
 0x2a5   : > { %2776 = vmatpush1.bf16.msra.mxu1 %v12243_v47  ;;  %2882 = vmatpush1.bf16.msra.mxu0 %v12245_v48  ;;  %v2036_v47 = vld [vmem:[%s19278_s5 + $0x700] sm:$0xff] }
 0x2a6   : > { %2777 = vmatprep.subr.bf16.mxu1 %v12248_v49  ;;  %2883 = vmatprep.subr.bf16.mxu0 %v12250_v50  ;;  %v2038_v48 = vld [vmem:[%s19278_s5 + $0x720] sm:$0xff]  ;;  %v2037_v49 = vld [vmem:[%s19278_s5 + $0x708] sm:$0xff] }
 0x2a7   : > { %v2039_v50 = vld [vmem:[%s19278_s5 + $0x728] sm:$0xff]  ;;  %v12276_v53 = vcombine.high %v2036_v47, %v2038_v48  ;;  %v12275_v59 = vcombine.low %v2036_v47, %v2038_v48 }
 0x2a8   : > { %v12278_v54 = vcombine.high %v2037_v49, %v2039_v50  ;;  %v12277_v63 = vcombine.low %v2037_v49, %v2039_v50 }
 0x2a9   : > { %2778 = vmatpush1.bf16.msra.mxu1 %v12247_v55  ;;  %2884 = vmatpush1.bf16.msra.mxu0 %v12249_v56  ;;  %v2040_v55 = vld [vmem:[%s19278_s5 + $0x740] sm:$0xff] }
 0x2aa   : > { %2779 = vmatprep.subr.bf16.mxu1 %v12252_v57  ;;  %2885 = vmatprep.subr.bf16.mxu0 %v12254_v58  ;;  %v2042_v56 = vld [vmem:[%s19278_s5 + $0x760] sm:$0xff]  ;;  %v2041_v57 = vld [vmem:[%s19278_s5 + $0x748] sm:$0xff] }
 0x2ab   : > { %v2043_v58 = vld [vmem:[%s19278_s5 + $0x768] sm:$0xff]  ;;  %v12280_v3 = vcombine.high %v2040_v55, %v2042_v56  ;;  %v12279_v15 = vcombine.low %v2040_v55, %v2042_v56 }
 0x2ac   : > { %v12282_v5 = vcombine.high %v2041_v57, %v2043_v58  ;;  %v12281_v16 = vcombine.low %v2041_v57, %v2043_v58 }
 0x2ad   : > { %2780 = vmatpush1.bf16.msra.mxu1 %v12251_v11  ;;  %2886 = vmatpush1.bf16.msra.mxu0 %v12253_v12  ;;  %v2044_v11 = vld [vmem:[%s19278_s5 + $0x780] sm:$0xff] }
 0x2ae   : > { %2781 = vmatprep.subr.bf16.mxu1 %v12256_v13  ;;  %2887 = vmatprep.subr.bf16.mxu0 %v12258_v14  ;;  %v2046_v12 = vld [vmem:[%s19278_s5 + $0x7a0] sm:$0xff]  ;;  %v2045_v13 = vld [vmem:[%s19278_s5 + $0x788] sm:$0xff] }
 0x2af   : > { %v2047_v14 = vld [vmem:[%s19278_s5 + $0x7a8] sm:$0xff]  ;;  %v12284_v17 = vcombine.high %v2044_v11, %v2046_v12  ;;  %v12283_v8 = vcombine.low %v2044_v11, %v2046_v12 }
 0x2b0   : > { %v12286_v28 = vcombine.high %v2045_v13, %v2047_v14  ;;  %v12285_v21 = vcombine.low %v2045_v13, %v2047_v14 }
 0x2b1   : > { %2782 = vmatpush1.bf16.msra.mxu1 %v12255_v7  ;;  %2888 = vmatpush1.bf16.msra.mxu0 %v12257_v18  ;;  %v2048_v7 = vld [vmem:[%s19278_s5 + $0x7c0] sm:$0xff] }
 0x2b2   : > { %2783 = vmatprep.subr.bf16.mxu1 %v12260_v19  ;;  %2889 = vmatprep.subr.bf16.mxu0 %v12262_v20  ;;  %v2050_v18 = vld [vmem:[%s19278_s5 + $0x7e0] sm:$0xff]  ;;  %v2049_v19 = vld [vmem:[%s19278_s5 + $0x7c8] sm:$0xff] }
 0x2b3   : > { %v2051_v20 = vld [vmem:[%s19278_s5 + $0x7e8] sm:$0xff]  ;;  %v12288_v22 = vcombine.high %v2048_v7, %v2050_v18  ;;  %v12287_v2 = vcombine.low %v2048_v7, %v2050_v18 }
 0x2b4   : > { %v12290_v9 = vcombine.high %v2049_v19, %v2051_v20  ;;  %v12289_v24 = vcombine.low %v2049_v19, %v2051_v20  ;;  %v2982_v20 = vld [vmem:[%s19278_s5 + $0x190] sm:$0xff] }
 0x2b5   : > { %2784 = vmatpush1.bf16.msra.mxu1 %v12259_v60  ;;  %2890 = vmatpush1.bf16.msra.mxu0 %v12261_v1  ;;  %v2958_v60 = vld [vmem:[%s19278_s5 + $0x10] sm:$0xff] }
 0x2b6   : > { %2785 = vmatprep.subr.bf16.mxu1 %v12264_v62  ;;  %2891 = vmatprep.subr.bf16.mxu0 %v12266_v0  ;;  %v2960_v1 = vld [vmem:[%s19278_s5 + $0x30] sm:$0xff]  ;;  %v2959_v62 = vld [vmem:[%s19278_s5 + $0x18] sm:$0xff] }
 0x2b7   : > { %v2961_v0 = vld [vmem:[%s19278_s5 + $0x38] sm:$0xff]  ;;  %v12292_v26 = vcombine.high %v2958_v60, %v2960_v1  ;;  %v12291_v35 = vcombine.low %v2958_v60, %v2960_v1 }
 0x2b8   : > { %v12294_v27 = vcombine.high %v2959_v62, %v2961_v0  ;;  %v12293_v36 = vcombine.low %v2959_v62, %v2961_v0  ;;  %v2986_v0 = vld [vmem:[%s19278_s5 + $0x1d0] sm:$0xff] }
 0x2b9   : > { %2786 = vmatpush1.bf16.msra.mxu1 %v12263_v30  ;;  %2892 = vmatpush1.bf16.msra.mxu0 %v12265_v32  ;;  %v2962_v30 = vld [vmem:[%s19278_s5 + $0x50] sm:$0xff] }
 0x2ba   : > { %2787 = vmatprep.subr.bf16.mxu1 %v12268_v33  ;;  %2893 = vmatprep.subr.bf16.mxu0 %v12270_v34  ;;  %v2964_v32 = vld [vmem:[%s19278_s5 + $0x70] sm:$0xff]  ;;  %v2963_v33 = vld [vmem:[%s19278_s5 + $0x58] sm:$0xff] }
 0x2bb   : > { %v2965_v34 = vld [vmem:[%s19278_s5 + $0x78] sm:$0xff]  ;;  %v12296_v37 = vcombine.high %v2962_v30, %v2964_v32  ;;  %v12295_v47 = vcombine.low %v2962_v30, %v2964_v32 }
 0x2bc   : > { %v12298_v38 = vcombine.high %v2963_v33, %v2965_v34  ;;  %v12297_v48 = vcombine.low %v2963_v33, %v2965_v34  ;;  %v2990_v34 = vld [vmem:[%s19278_s5 + $0x210] sm:$0xff] }
 0x2bd   : > { %2788 = vmatpush1.bf16.msra.mxu1 %v12267_v39  ;;  %2894 = vmatpush1.bf16.msra.mxu0 %v12269_v40  ;;  %v2966_v39 = vld [vmem:[%s19278_s5 + $0x90] sm:$0xff] }
 0x2be   : > { %2789 = vmatprep.subr.bf16.mxu1 %v12272_v45  ;;  %2895 = vmatprep.subr.bf16.mxu0 %v12274_v46  ;;  %v2968_v40 = vld [vmem:[%s19278_s5 + $0xb0] sm:$0xff]  ;;  %v2967_v45 = vld [vmem:[%s19278_s5 + $0x98] sm:$0xff] }
 0x2bf   : > { %v2969_v46 = vld [vmem:[%s19278_s5 + $0xb8] sm:$0xff]  ;;  %v12300_v49 = vcombine.high %v2966_v39, %v2968_v40  ;;  %v12299_v55 = vcombine.low %v2966_v39, %v2968_v40 }
 0x2c0   : > { %v12302_v50 = vcombine.high %v2967_v45, %v2969_v46  ;;  %v12301_v56 = vcombine.low %v2967_v45, %v2969_v46  ;;  %v2994_v46 = vld [vmem:[%s19278_s5 + $0x250] sm:$0xff] }
 0x2c1   : > { %2790 = vmatpush1.bf16.msra.mxu1 %v12271_v51  ;;  %2896 = vmatpush1.bf16.msra.mxu0 %v12273_v52  ;;  %v2970_v51 = vld [vmem:[%s19278_s5 + $0xd0] sm:$0xff] }
 0x2c2   : > { %2791 = vmatprep.subr.bf16.mxu1 %v12276_v53  ;;  %2897 = vmatprep.subr.bf16.mxu0 %v12278_v54  ;;  %v2972_v52 = vld [vmem:[%s19278_s5 + $0xf0] sm:$0xff]  ;;  %v2971_v53 = vld [vmem:[%s19278_s5 + $0xd8] sm:$0xff] }
 0x2c3   : > { %v2973_v54 = vld [vmem:[%s19278_s5 + $0xf8] sm:$0xff]  ;;  %v12304_v57 = vcombine.high %v2970_v51, %v2972_v52  ;;  %v12303_v11 = vcombine.low %v2970_v51, %v2972_v52 }
 0x2c4   : > { %v12306_v58 = vcombine.high %v2971_v53, %v2973_v54  ;;  %v12305_v12 = vcombine.low %v2971_v53, %v2973_v54  ;;  %v2998_v54 = vld [vmem:[%s19278_s5 + $0x290] sm:$0xff] }
 0x2c5   : > { %2792 = vmatpush1.bf16.msra.mxu1 %v12275_v59  ;;  %2898 = vmatpush1.bf16.msra.mxu0 %v12277_v63  ;;  %v2974_v59 = vld [vmem:[%s19278_s5 + $0x110] sm:$0xff] }
 0x2c6   : > { %2793 = vmatprep.subr.bf16.mxu1 %v12280_v3  ;;  %2899 = vmatprep.subr.bf16.mxu0 %v12282_v5  ;;  %v2976_v63 = vld [vmem:[%s19278_s5 + $0x130] sm:$0xff]  ;;  %v2975_v3 = vld [vmem:[%s19278_s5 + $0x118] sm:$0xff] }
 0x2c7   : > { %v2977_v5 = vld [vmem:[%s19278_s5 + $0x138] sm:$0xff]  ;;  %v12308_v13 = vcombine.high %v2974_v59, %v2976_v63 }
 0x2c8   : > { %v12310_v14 = vcombine.high %v2975_v3, %v2977_v5  ;;  %v12309_v7 = vcombine.low %v2975_v3, %v2977_v5  ;;  %v3002_v5 = vld [vmem:[%s19278_s5 + $0x2d0] sm:$0xff] }
 0x2c9   : > { %2794 = vmatpush1.bf16.msra.mxu1 %v12279_v15  ;;  %2900 = vmatpush1.bf16.msra.mxu0 %v12281_v16  ;;  %v2978_v15 = vld [vmem:[%s19278_s5 + $0x150] sm:$0xff] }
 0x2ca   : > { %2795 = vmatprep.subr.bf16.mxu1 %v12284_v17  ;;  %2901 = vmatprep.subr.bf16.mxu0 %v12286_v28  ;;  %v2980_v16 = vld [vmem:[%s19278_s5 + $0x170] sm:$0xff]  ;;  %v2981_v17 = vld [vmem:[%s19278_s5 + $0x178] sm:$0xff]  ;;  %v12307_v28 = vcombine.low %v2974_v59, %v2976_v63 }
 0x2cb   : > { %v12312_v18 = vcombine.high %v2978_v15, %v2980_v16 }
 0x2cd   : > { %2796 = vmatpush1.bf16.msra.mxu1 %v12283_v8  ;;  %2902 = vmatpush1.bf16.msra.mxu0 %v12285_v21  ;;  %v2984_v8 = vld [vmem:[%s19278_s5 + $0x1b0] sm:$0xff]  ;;  %v2983_v21 = vld [vmem:[%s19278_s5 + $0x198] sm:$0xff] }
 0x2ce   : > { %2797 = vmatprep.subr.bf16.mxu1 %v12288_v22  ;;  %2903 = vmatprep.subr.bf16.mxu0 %v12290_v9  ;;  %v2985_v22 = vld [vmem:[%s19278_s5 + $0x1b8] sm:$0xff]  ;;  %v12311_v9 = vcombine.low %v2978_v15, %v2980_v16  ;;  %v12316_v1 = vcombine.high %v2982_v20, %v2984_v8 }
 0x2cf   : > { %v12318_v62 = vcombine.high %v2983_v21, %v2985_v22  ;;  %v12317_v30 = vcombine.low %v2983_v21, %v2985_v22  ;;  %v3010_v22 = vld [vmem:[%s19278_s5 + $0x350] sm:$0xff] }
 0x2d1   : > { %2798 = vmatpush1.bf16.msra.mxu1 %v12287_v2  ;;  %2904 = vmatpush1.bf16.msra.mxu0 %v12289_v24  ;;  %v2988_v2 = vld [vmem:[%s19278_s5 + $0x1f0] sm:$0xff]  ;;  %v2987_v24 = vld [vmem:[%s19278_s5 + $0x1d8] sm:$0xff] }
 0x2d2   : > { %3748 = vmatprep.subr.bf16.mxu1 %v12292_v26  ;;  %3854 = vmatprep.subr.bf16.mxu0 %v12294_v27  ;;  %v2989_v26 = vld [vmem:[%s19278_s5 + $0x1f8] sm:$0xff]  ;;  %v12315_v27 = vcombine.low %v2982_v20, %v2984_v8  ;;  %v12320_v32 = vcombine.high %v2986_v0, %v2988_v2 }
 0x2d3   : > { %v12322_v33 = vcombine.high %v2987_v24, %v2989_v26  ;;  %v12321_v39 = vcombine.low %v2987_v24, %v2989_v26  ;;  %v3014_v26 = vld [vmem:[%s19278_s5 + $0x390] sm:$0xff] }
 0x2d4   : > { %2800 = vmatmul.mubr.bf16.vlgmr.msra.gmra.mrb[8].mxu1 %v16172_v42  ;;  %2906 = vmatmul.mubr.bf16.vlgmr.msra.gmra.mrb[16].mxu0 %v16172_v42 }
 0x2d5   : > { %2809 = vmatprep.mubr.bf16.mxu1 %v16222_v25  ;;  %2915 = vmatprep.mubr.bf16.mxu0 %v16222_v25 }
 0x2d6   : > { %3749 = vmatpush1.bf16.msra.mxu1 %v12291_v35  ;;  %3855 = vmatpush1.bf16.msra.mxu0 %v12293_v36  ;;  %v2992_v35 = vld [vmem:[%s19278_s5 + $0x230] sm:$0xff]  ;;  %v2991_v36 = vld [vmem:[%s19278_s5 + $0x218] sm:$0xff] }
 0x2d7   : > { %3750 = vmatprep.subr.bf16.mxu1 %v12296_v37  ;;  %3856 = vmatprep.subr.bf16.mxu0 %v12298_v38  ;;  %v2993_v37 = vld [vmem:[%s19278_s5 + $0x238] sm:$0xff]  ;;  %v12319_v38 = vcombine.low %v2986_v0, %v2988_v2  ;;  %v12324_v40 = vcombine.high %v2990_v34, %v2992_v35 }
 0x2d8   : > { %v12326_v45 = vcombine.high %v2991_v36, %v2993_v37  ;;  %v12325_v51 = vcombine.low %v2991_v36, %v2993_v37  ;;  %v3018_v37 = vld [vmem:[%s19278_s5 + $0x3d0] sm:$0xff] }
 0x2da   : > { %3751 = vmatpush1.bf16.msra.mxu1 %v12295_v47  ;;  %3857 = vmatpush1.bf16.msra.mxu0 %v12297_v48  ;;  %v2996_v47 = vld [vmem:[%s19278_s5 + $0x270] sm:$0xff]  ;;  %v2995_v48 = vld [vmem:[%s19278_s5 + $0x258] sm:$0xff] }
 0x2db   : > { %3752 = vmatprep.subr.bf16.mxu1 %v12300_v49  ;;  %3858 = vmatprep.subr.bf16.mxu0 %v12302_v50  ;;  %v2997_v49 = vld [vmem:[%s19278_s5 + $0x278] sm:$0xff]  ;;  %v12323_v50 = vcombine.low %v2990_v34, %v2992_v35  ;;  %v12328_v52 = vcombine.high %v2994_v46, %v2996_v47 }
 0x2dc   : > { %2810 = vmatmul.mubr.bf16.gmra.mrb[12].mxu1 %v16218_v10  ;;  %2916 = vmatmul.mubr.bf16.gmra.mrb[20].mxu0 %v16218_v10  ;;  %v12330_v53 = vcombine.high %v2995_v48, %v2997_v49  ;;  %v12329_v59 = vcombine.low %v2995_v48, %v2997_v49  ;;  %v3022_v49 = vld [vmem:[%s19278_s5 + $0x410] sm:$0xff] }
 0x2dd   : > { %3780 = vmatprep.mubr.bf16.mxu1 %v16174_v43  ;;  %3886 = vmatprep.mubr.bf16.mxu0 %v16174_v43  ;;  %v2979_v43 = vld [vmem:[%s19278_s5 + $0x158] sm:$0xff] }
 0x2de   : > { %3753 = vmatpush1.bf16.msra.mxu1 %v12299_v55  ;;  %3859 = vmatpush1.bf16.msra.mxu0 %v12301_v56  ;;  %v12314_v19 = vcombine.high %v2979_v43, %v2981_v17  ;;  %v12313_v60 = vcombine.low %v2979_v43, %v2981_v17  ;;  %v3000_v55 = vld [vmem:[%s19278_s5 + $0x2b0] sm:$0xff]  ;;  %v2999_v56 = vld [vmem:[%s19278_s5 + $0x298] sm:$0xff] }
 0x2df   : > { %3754 = vmatprep.subr.bf16.mxu1 %v12304_v57  ;;  %3860 = vmatprep.subr.bf16.mxu0 %v12306_v58  ;;  %v3001_v57 = vld [vmem:[%s19278_s5 + $0x2b8] sm:$0xff]  ;;  %v12327_v58 = vcombine.low %v2994_v46, %v2996_v47  ;;  %v12332_v63 = vcombine.high %v2998_v54, %v3000_v55  ;;  %v3006_v17 = vld [vmem:[%s19278_s5 + $0x310] sm:$0xff] }
 0x2e0   : > { %v12334_v3 = vcombine.high %v2999_v56, %v3001_v57  ;;  %v12333_v15 = vcombine.low %v2999_v56, %v3001_v57  ;;  %v3026_v57 = vld [vmem:[%s19278_s5 + $0x450] sm:$0xff] }
 0x2e2   : > { %3755 = vmatpush1.bf16.msra.mxu1 %v12303_v11  ;;  %3861 = vmatpush1.bf16.msra.mxu0 %v12305_v12  ;;  %v3004_v11 = vld [vmem:[%s19278_s5 + $0x2f0] sm:$0xff]  ;;  %v3003_v12 = vld [vmem:[%s19278_s5 + $0x2d8] sm:$0xff] }
 0x2e3   : > { %3756 = vmatprep.subr.bf16.mxu1 %v12308_v13  ;;  %3862 = vmatprep.subr.bf16.mxu0 %v12310_v14  ;;  %v3005_v13 = vld [vmem:[%s19278_s5 + $0x2f8] sm:$0xff]  ;;  %v12331_v14 = vcombine.low %v2998_v54, %v3000_v55  ;;  %v12336_v16 = vcombine.high %v3002_v5, %v3004_v11 }
 0x2e4   : > { %v12338_v43 = vcombine.high %v3003_v12, %v3005_v13  ;;  %v12337_v20 = vcombine.low %v3003_v12, %v3005_v13  ;;  %v3030_v13 = vld [vmem:[%s19278_s5 + $0x490] sm:$0xff] }
 0x2e6   : > { %3757 = vmatpush1.bf16.msra.mxu1 %v12307_v28  ;;  %3863 = vmatpush1.bf16.msra.mxu0 %v12309_v7  ;;  %v3008_v28 = vld [vmem:[%s19278_s5 + $0x330] sm:$0xff]  ;;  %v3007_v7 = vld [vmem:[%s19278_s5 + $0x318] sm:$0xff] }
 0x2e7   : > { %3758 = vmatprep.subr.bf16.mxu1 %v12312_v18  ;;  %3864 = vmatprep.subr.bf16.mxu0 %v12314_v19  ;;  %v3009_v18 = vld [vmem:[%s19278_s5 + $0x338] sm:$0xff]  ;;  %v12335_v19 = vcombine.low %v3002_v5, %v3004_v11  ;;  %v12340_v8 = vcombine.high %v3006_v17, %v3008_v28 }
 0x2e8   : > { %v12342_v21 = vcombine.high %v3007_v7, %v3009_v18  ;;  %v12341_v0 = vcombine.low %v3007_v7, %v3009_v18  ;;  %v3034_v7 = vld [vmem:[%s19278_s5 + $0x4d0] sm:$0xff] }
 0x2e9   : > { %v3036_v18 = vld [vmem:[%s19278_s5 + $0x4f0] sm:$0xff] }
 0x2ea   : > { %3759 = vmatpush1.bf16.msra.mxu1 %v12311_v9  ;;  %3865 = vmatpush1.bf16.msra.mxu0 %v12313_v60  ;;  %v3012_v9 = vld [vmem:[%s19278_s5 + $0x370] sm:$0xff]  ;;  %v3011_v60 = vld [vmem:[%s19278_s5 + $0x358] sm:$0xff] }
 0x2eb   : > { %3760 = vmatprep.subr.bf16.mxu1 %v12316_v1  ;;  %3866 = vmatprep.subr.bf16.mxu0 %v12318_v62  ;;  %v3013_v1 = vld [vmem:[%s19278_s5 + $0x378] sm:$0xff]  ;;  %v12339_v62 = vcombine.low %v3006_v17, %v3008_v28  ;;  %v12344_v2 = vcombine.high %v3010_v22, %v3012_v9 }
 0x2ec   : > { %v12346_v24 = vcombine.high %v3011_v60, %v3013_v1  ;;  %v12345_v34 = vcombine.low %v3011_v60, %v3013_v1  ;;  %v3040_v60 = vld [vmem:[%s19278_s5 + $0x530] sm:$0xff]  ;;  %v3039_v1 = vld [vmem:[%s19278_s5 + $0x518] sm:$0xff] }
 0x2ee   : > { %3761 = vmatpush1.bf16.msra.mxu1 %v12315_v27  ;;  %3867 = vmatpush1.bf16.msra.mxu0 %v12317_v30  ;;  %v3016_v27 = vld [vmem:[%s19278_s5 + $0x3b0] sm:$0xff]  ;;  %v3015_v30 = vld [vmem:[%s19278_s5 + $0x398] sm:$0xff] }
 0x2ef   : > { %3762 = vmatprep.subr.bf16.mxu1 %v12320_v32  ;;  %3868 = vmatprep.subr.bf16.mxu0 %v12322_v33  ;;  %v3017_v32 = vld [vmem:[%s19278_s5 + $0x3b8] sm:$0xff]  ;;  %v12343_v33 = vcombine.low %v3010_v22, %v3012_v9  ;;  %v12348_v35 = vcombine.high %v3014_v26, %v3016_v27  ;;  %v3038_v9 = vld [vmem:[%s19278_s5 + $0x510] sm:$0xff] }
 0x2f0   : > { %v12350_v36 = vcombine.high %v3015_v30, %v3017_v32  ;;  %v12349_v46 = vcombine.low %v3015_v30, %v3017_v32  ;;  %v3043_v30 = vld [vmem:[%s19278_s5 + $0x558] sm:$0xff]  ;;  %v12371_v32 = vcombine.low %v3038_v9, %v3040_v60 }
 0x2f2   : > { %3763 = vmatpush1.bf16.msra.mxu1 %v12319_v38  ;;  %3869 = vmatpush1.bf16.msra.mxu0 %v12321_v39  ;;  %v3020_v38 = vld [vmem:[%s19278_s5 + $0x3f0] sm:$0xff]  ;;  %v3019_v39 = vld [vmem:[%s19278_s5 + $0x3d8] sm:$0xff] }
 0x2f3   : > { %3764 = vmatprep.subr.bf16.mxu1 %v12324_v40  ;;  %3870 = vmatprep.subr.bf16.mxu0 %v12326_v45  ;;  %v3021_v40 = vld [vmem:[%s19278_s5 + $0x3f8] sm:$0xff]  ;;  %v12347_v45 = vcombine.low %v3014_v26, %v3016_v27  ;;  %v12352_v47 = vcombine.high %v3018_v37, %v3020_v38  ;;  %v3042_v26 = vld [vmem:[%s19278_s5 + $0x550] sm:$0xff] }
 0x2f4   : > { %v12354_v48 = vcombine.high %v3019_v39, %v3021_v40  ;;  %v12353_v54 = vcombine.low %v3019_v39, %v3021_v40  ;;  %v3044_v27 = vld [vmem:[%s19278_s5 + $0x570] sm:$0xff]  ;;  %v3049_v39 = vld [vmem:[%s19278_s5 + $0x5b8] sm:$0xff] }
 0x2f5   : > { %v12375_v40 = vcombine.low %v3042_v26, %v3044_v27 }
 0x2f6   : > { %3765 = vmatpush1.bf16.msra.mxu1 %v12323_v50  ;;  %3871 = vmatpush1.bf16.msra.mxu0 %v12325_v51  ;;  %v3024_v50 = vld [vmem:[%s19278_s5 + $0x430] sm:$0xff]  ;;  %v3023_v51 = vld [vmem:[%s19278_s5 + $0x418] sm:$0xff] }
 0x2f7   : > { %3766 = vmatprep.subr.bf16.mxu1 %v12328_v52  ;;  %3872 = vmatprep.subr.bf16.mxu0 %v12330_v53  ;;  %v3025_v52 = vld [vmem:[%s19278_s5 + $0x438] sm:$0xff]  ;;  %v12351_v53 = vcombine.low %v3018_v37, %v3020_v38  ;;  %v12356_v55 = vcombine.high %v3022_v49, %v3024_v50  ;;  %v3048_v37 = vld [vmem:[%s19278_s5 + $0x5b0] sm:$0xff] }
 0x2f8   : > { %v12358_v56 = vcombine.high %v3023_v51, %v3025_v52  ;;  %v12357_v5 = vcombine.low %v3023_v51, %v3025_v52  ;;  %v3047_v38 = vld [vmem:[%s19278_s5 + $0x598] sm:$0xff] }
 0x2f9   : > { %v3053_v51 = vld [vmem:[%s19278_s5 + $0x5f8] sm:$0xff] }
 0x2fa   : > { %3767 = vmatpush1.bf16.msra.mxu1 %v12327_v58  ;;  %3873 = vmatpush1.bf16.msra.mxu0 %v12329_v59  ;;  %v3028_v58 = vld [vmem:[%s19278_s5 + $0x470] sm:$0xff]  ;;  %v3027_v59 = vld [vmem:[%s19278_s5 + $0x458] sm:$0xff] }
 0x2fb   : > { %3768 = vmatprep.subr.bf16.mxu1 %v12332_v63  ;;  %3874 = vmatprep.subr.bf16.mxu0 %v12334_v3  ;;  %v3029_v63 = vld [vmem:[%s19278_s5 + $0x478] sm:$0xff]  ;;  %v12355_v3 = vcombine.low %v3022_v49, %v3024_v50  ;;  %v12360_v11 = vcombine.high %v3026_v57, %v3028_v58  ;;  %v3052_v49 = vld [vmem:[%s19278_s5 + $0x5f0] sm:$0xff] }
 0x2fc   : > { %v12362_v12 = vcombine.high %v3027_v59, %v3029_v63  ;;  %v12361_v17 = vcombine.low %v3027_v59, %v3029_v63  ;;  %v3051_v50 = vld [vmem:[%s19278_s5 + $0x5d8] sm:$0xff] }
 0x2fd   : > { %v3057_v59 = vld [vmem:[%s19278_s5 + $0x638] sm:$0xff] }
 0x2fe   : > { %3769 = vmatpush1.bf16.msra.mxu1 %v12331_v14  ;;  %3875 = vmatpush1.bf16.msra.mxu0 %v12333_v15  ;;  %v3032_v14 = vld [vmem:[%s19278_s5 + $0x4b0] sm:$0xff]  ;;  %v3031_v15 = vld [vmem:[%s19278_s5 + $0x498] sm:$0xff] }
 0x2ff   : > { %3770 = vmatprep.subr.bf16.mxu1 %v12336_v16  ;;  %3876 = vmatprep.subr.bf16.mxu0 %v12338_v43  ;;  %v3033_v16 = vld [vmem:[%s19278_s5 + $0x4b8] sm:$0xff]  ;;  %v12359_v43 = vcombine.low %v3026_v57, %v3028_v58  ;;  %v12364_v28 = vcombine.high %v3030_v13, %v3032_v14  ;;  %v3056_v57 = vld [vmem:[%s19278_s5 + $0x630] sm:$0xff] }
 0x300   : > { %v3055_v58 = vld [vmem:[%s19278_s5 + $0x618] sm:$0xff] }
 0x302   : > { %3771 = vmatpush1.bf16.msra.mxu1 %v12335_v19  ;;  %3877 = vmatpush1.bf16.msra.mxu0 %v12337_v20  ;;  %v3035_v19 = vld [vmem:[%s19278_s5 + $0x4d8] sm:$0xff]  ;;  %v12363_v20 = vcombine.low %v3030_v13, %v3032_v14  ;;  %v3060_v13 = vld [vmem:[%s19278_s5 + $0x670] sm:$0xff] }
 0x303   : > { %3772 = vmatprep.subr.bf16.mxu1 %v12340_v8  ;;  %3878 = vmatprep.subr.bf16.mxu0 %v12342_v21  ;;  %v12365_v8 = vcombine.low %v3031_v15, %v3033_v16  ;;  %v12368_v21 = vcombine.high %v3034_v7, %v3036_v18  ;;  %v3059_v14 = vld [vmem:[%s19278_s5 + $0x658] sm:$0xff] }
 0x306   : > { %3773 = vmatpush1.bf16.msra.mxu1 %v12339_v62  ;;  %3879 = vmatpush1.bf16.msra.mxu0 %v12341_v0  ;;  %v3041_v62 = vld [vmem:[%s19278_s5 + $0x538] sm:$0xff]  ;;  %v12367_v0 = vcombine.low %v3034_v7, %v3036_v18  ;;  %v3064_v7 = vld [vmem:[%s19278_s5 + $0x6b0] sm:$0xff] }
 0x307   : > { %3774 = vmatprep.subr.bf16.mxu1 %v12344_v2  ;;  %3880 = vmatprep.subr.bf16.mxu0 %v12346_v24  ;;  %v12372_v24 = vcombine.high %v3038_v9, %v3040_v60  ;;  %v3063_v18 = vld [vmem:[%s19278_s5 + $0x698] sm:$0xff]  ;;  %v3068_v9 = vld [vmem:[%s19278_s5 + $0x6f0] sm:$0xff] }
 0x308   : > { %v3067_v60 = vld [vmem:[%s19278_s5 + $0x6d8] sm:$0xff] }
 0x30a   : > { %3775 = vmatpush1.bf16.msra.mxu1 %v12343_v33  ;;  %3881 = vmatpush1.bf16.msra.mxu0 %v12345_v34  ;;  %v12373_v33 = vcombine.low %v3039_v1, %v3041_v62  ;;  %v12376_v34 = vcombine.high %v3042_v26, %v3044_v27  ;;  %v3072_v26 = vld [vmem:[%s19278_s5 + $0x730] sm:$0xff]  ;;  %v3071_v27 = vld [vmem:[%s19278_s5 + $0x718] sm:$0xff] }
 0x30b   : > { %3776 = vmatprep.subr.bf16.mxu1 %v12348_v35  ;;  %3882 = vmatprep.subr.bf16.mxu0 %v12350_v36  ;;  %v3046_v36 = vld [vmem:[%s19278_s5 + $0x590] sm:$0xff] }
 0x30c   : > { %v12379_v52 = vcombine.low %v3046_v36, %v3048_v37 }
 0x30e   : > { %3777 = vmatpush1.bf16.msra.mxu1 %v12347_v45  ;;  %3883 = vmatpush1.bf16.msra.mxu0 %v12349_v46  ;;  %v12380_v46 = vcombine.high %v3046_v36, %v3048_v37  ;;  %v3076_v36 = vld [vmem:[%s19278_s5 + $0x770] sm:$0xff]  ;;  %v3075_v37 = vld [vmem:[%s19278_s5 + $0x758] sm:$0xff] }
 0x30f   : > { %3778 = vmatprep.subr.bf16.mxu1 %v12352_v47  ;;  %3884 = vmatprep.subr.bf16.mxu0 %v12354_v48  ;;  %v12382_v47 = vcombine.high %v3047_v38, %v3049_v39  ;;  %v3050_v48 = vld [vmem:[%s19278_s5 + $0x5d0] sm:$0xff] }
 0x310   : > { %v12383_v63 = vcombine.low %v3050_v48, %v3052_v49 }
 0x312   : > { %3779 = vmatpush1.bf16.msra.mxu1 %v12351_v53  ;;  %3885 = vmatpush1.bf16.msra.mxu0 %v12353_v54  ;;  %v12381_v53 = vcombine.low %v3047_v38, %v3049_v39  ;;  %v12384_v54 = vcombine.high %v3050_v48, %v3052_v49  ;;  %v3077_v38 = vld [vmem:[%s19278_s5 + $0x778] sm:$0xff]  ;;  %v3080_v48 = vld [vmem:[%s19278_s5 + $0x7b0] sm:$0xff] }
 0x313   : > { %3801 = vmatprep.subr.bf16.mxu1 %v12356_v55  ;;  %3907 = vmatprep.subr.bf16.mxu0 %v12358_v56  ;;  %v12386_v55 = vcombine.high %v3051_v50, %v3053_v51  ;;  %v3054_v56 = vld [vmem:[%s19278_s5 + $0x610] sm:$0xff]  ;;  %v3079_v49 = vld [vmem:[%s19278_s5 + $0x798] sm:$0xff] }
 0x315   : > { %3781 = vmatmul.mubr.bf16.vlgmr.msra.gmra.mrb[16].mxu1 %v16170_v41  ;;  %3887 = vmatmul.mubr.bf16.vlgmr.msra.gmra.mrb[24].mxu0 %v16170_v41  ;;  %v12366_v41 = vcombine.high %v3031_v15, %v3033_v16  ;;  %v3061_v15 = vld [vmem:[%s19278_s5 + $0x678] sm:$0xff]  ;;  %v12387_v16 = vcombine.low %v3054_v56, %v3056_v57 }
 0x316   : > { %3790 = vmatprep.mubr.bf16.mxu1 %v16220_v23  ;;  %3802 = vmatpush1.bf16.msra.mxu1 %v12355_v3  ;;  %v12385_v3 = vcombine.low %v3051_v50, %v3053_v51  ;;  %v3081_v50 = vld [vmem:[%s19278_s5 + $0x7b8] sm:$0xff] }
 0x317   : > { %3896 = vmatprep.mubr.bf16.mxu0 %v16220_v23  ;;  %3908 = vmatpush1.bf16.msra.mxu0 %v12357_v5  ;;  %v3037_v23 = vld [vmem:[%s19278_s5 + $0x4f8] sm:$0xff]  ;;  %v12388_v5 = vcombine.high %v3054_v56, %v3056_v57  ;;  %v3084_v56 = vld [vmem:[%s19278_s5 + $0x7f0] sm:$0xff] }
 0x318   : > { %3803 = vmatprep.subr.bf16.mxu1 %v12360_v11  ;;  %3909 = vmatprep.subr.bf16.mxu0 %v12362_v12  ;;  %v12370_v22 = vcombine.high %v3035_v19, %v3037_v23  ;;  %v12369_v2 = vcombine.low %v3035_v19, %v3037_v23  ;;  %v12390_v11 = vcombine.high %v3055_v58, %v3057_v59  ;;  %v3058_v12 = vld [vmem:[%s19278_s5 + $0x650] sm:$0xff]  ;;  %v3065_v19 = vld [vmem:[%s19278_s5 + $0x6b8] sm:$0xff] }
 0x319   : > { %v12391_v23 = vcombine.low %v3058_v12, %v3060_v13  ;;  %v3083_v57 = vld [vmem:[%s19278_s5 + $0x7d8] sm:$0xff] }
 0x31a   : > { %3804 = vmatpush1.bf16.msra.mxu1 %v12359_v43  ;;  %v12389_v43 = vcombine.low %v3055_v58, %v3057_v59  ;;  %v3085_v58 = vld [vmem:[%s19278_s5 + $0x7f8] sm:$0xff] }
 0x31b   : > { %3910 = vmatpush1.bf16.msra.mxu0 %v12361_v17  ;;  %3805 = vmatprep.subr.bf16.mxu1 %v12364_v28  ;;  %v12392_v17 = vcombine.high %v3058_v12, %v3060_v13  ;;  %v12394_v28 = vcombine.high %v3059_v14, %v3061_v15  ;;  %v12417_v12 = vcombine.low %v3083_v57, %v3085_v58  ;;  %v2052_v13 = vld [vmem:[%s19279_s6] sm:$0xf] }
 0x31c   : > { %3911 = vmatprep.subr.bf16.mxu0 %v12366_v41  ;;  %v3062_v41 = vld [vmem:[%s19278_s5 + $0x690] sm:$0xff] }
 0x31d   : > { %3791 = vmatmul.mubr.bf16.gmra.mrb[20].mxu1 %v16207_v61  ;;  %3897 = vmatmul.mubr.bf16.gmra.mrb[28].mxu0 %v16207_v61  ;;  %v12374_v61 = vcombine.high %v3039_v1, %v3041_v62  ;;  %v3069_v1 = vld [vmem:[%s19278_s5 + $0x6f8] sm:$0xff]  ;;  %v12395_v62 = vcombine.low %v3062_v41, %v3064_v7 }
 0x31e   : > { %3806 = vmatpush1.bf16.msra.mxu1 %v12363_v20  ;;  %3833 = vmatprep.mubr.bf16.mxu1 %v16176_v44  ;;  %v12393_v20 = vcombine.low %v3059_v14, %v3061_v15  ;;  %v2057_v14 = vrot.slane %v2052_v13, %v15919_v29  ;;  %v2065_v15 = vrot.slane %v2052_v13, %v16138_v4 }
 0x31f   : > { %3912 = vmatpush1.bf16.msra.mxu0 %v12365_v8  ;;  %3939 = vmatprep.mubr.bf16.mxu0 %v16176_v44  ;;  %v3045_v44 = vld [vmem:[%s19278_s5 + $0x578] sm:$0xff]  ;;  %v12396_v8 = vcombine.high %v3062_v41, %v3064_v7 }
 0x320   : > { %3807 = vmatprep.subr.bf16.mxu1 %v12368_v21  ;;  %3913 = vmatprep.subr.bf16.mxu0 %v12370_v22  ;;  %v12378_v35 = vcombine.high %v3043_v30, %v3045_v44  ;;  %v12377_v45 = vcombine.low %v3043_v30, %v3045_v44  ;;  %v12398_v21 = vcombine.high %v3063_v18, %v3065_v19  ;;  %v3066_v22 = vld [vmem:[%s19278_s5 + $0x6d0] sm:$0xff]  ;;  %v3073_v30 = vld [vmem:[%s19278_s5 + $0x738] sm:$0xff] }
 0x321   : > { %v12399_v44 = vcombine.low %v3066_v22, %v3068_v9 }
 0x322   : > { %3808 = vmatpush1.bf16.msra.mxu1 %v12367_v0  ;;  %v12397_v0 = vcombine.low %v3063_v18, %v3065_v19 }
 0x323   : > { %3914 = vmatpush1.bf16.msra.mxu0 %v12369_v2  ;;  %3809 = vmatprep.subr.bf16.mxu1 %v12372_v24  ;;  %v12400_v2 = vcombine.high %v3066_v22, %v3068_v9  ;;  %v12402_v24 = vcombine.high %v3067_v60, %v3069_v1 }
 0x324   : > { %3915 = vmatprep.subr.bf16.mxu0 %v12374_v61  ;;  %v3070_v61 = vld [vmem:[%s19278_s5 + $0x710] sm:$0xff] }
 0x325   : > { %v12403_v39 = vcombine.low %v3070_v61, %v3072_v26 }
 0x326   : > { %3810 = vmatpush1.bf16.msra.mxu1 %v12371_v32  ;;  %v12401_v32 = vcombine.low %v3067_v60, %v3069_v1 }
 0x327   : > { %3916 = vmatpush1.bf16.msra.mxu0 %v12373_v33  ;;  %3811 = vmatprep.subr.bf16.mxu1 %v12376_v34  ;;  %v12404_v33 = vcombine.high %v3070_v61, %v3072_v26  ;;  %v12406_v34 = vcombine.high %v3071_v27, %v3073_v30 }
 0x328   : > { %3917 = vmatprep.subr.bf16.mxu0 %v12378_v35  ;;  %v3074_v35 = vld [vmem:[%s19278_s5 + $0x750] sm:$0xff] }
 0x329   : > { %v12407_v51 = vcombine.low %v3074_v35, %v3076_v36 }
 0x32a   : > { %3812 = vmatpush1.bf16.msra.mxu1 %v12375_v40  ;;  %v12405_v40 = vcombine.low %v3071_v27, %v3073_v30 }
 0x32b   : > { %3918 = vmatpush1.bf16.msra.mxu0 %v12377_v45  ;;  %3813 = vmatprep.subr.bf16.mxu1 %v12380_v46  ;;  %v12408_v45 = vcombine.high %v3074_v35, %v3076_v36  ;;  %v12410_v46 = vcombine.high %v3075_v37, %v3077_v38 }
 0x32c   : > { %3919 = vmatprep.subr.bf16.mxu0 %v12382_v47  ;;  %v3078_v47 = vld [vmem:[%s19278_s5 + $0x790] sm:$0xff] }
 0x32d   : > { %v12411_v59 = vcombine.low %v3078_v47, %v3080_v48 }
 0x32e   : > { %3814 = vmatpush1.bf16.msra.mxu1 %v12379_v52  ;;  %v12409_v52 = vcombine.low %v3075_v37, %v3077_v38 }
 0x32f   : > { %3920 = vmatpush1.bf16.msra.mxu0 %v12381_v53  ;;  %3815 = vmatprep.subr.bf16.mxu1 %v12384_v54  ;;  %v12412_v53 = vcombine.high %v3078_v47, %v3080_v48  ;;  %v12414_v54 = vcombine.high %v3079_v49, %v3081_v50 }
 0x330   : > { %3921 = vmatprep.subr.bf16.mxu0 %v12386_v55  ;;  %v3082_v55 = vld [vmem:[%s19278_s5 + $0x7d0] sm:$0xff] }
 0x332   : > { %3816 = vmatpush1.bf16.msra.mxu1 %v12383_v63  ;;  %v12413_v63 = vcombine.low %v3079_v49, %v3081_v50 }
 0x333   : > { %3922 = vmatpush1.bf16.msra.mxu0 %v12385_v3  ;;  %3817 = vmatprep.subr.bf16.mxu1 %v12388_v5  ;;  %v12416_v3 = vcombine.high %v3082_v55, %v3084_v56  ;;  %v12418_v5 = vcombine.high %v3083_v57, %v3085_v58 }
 0x334   : > { %3923 = vmatprep.subr.bf16.mxu0 %v12390_v11  ;;  %v12415_v11 = vcombine.low %v3082_v55, %v3084_v56 }
 0x336   : > { %3818 = vmatpush1.bf16.msra.mxu1 %v12387_v16  ;;  %v2061_v16 = vrot.slane %v2052_v13, %v15925_v31 }
 0x337   : > { %3924 = vmatpush1.bf16.msra.mxu0 %v12389_v43  ;;  %3819 = vmatprep.subr.bf16.mxu1 %v12392_v17 }
 0x338   : > { %3925 = vmatprep.subr.bf16.mxu0 %v12394_v28 }
 0x33a   : > { %3820 = vmatpush1.bf16.msra.mxu1 %v12391_v23 }
 0x33b   : > { %3926 = vmatpush1.bf16.msra.mxu0 %v12393_v20  ;;  %3821 = vmatprep.subr.bf16.mxu1 %v12396_v8 }
 0x33c   : > { %3927 = vmatprep.subr.bf16.mxu0 %v12398_v21 }
 0x33e   : > { %3822 = vmatpush1.bf16.msra.mxu1 %v12395_v62 }
 0x33f   : > { %3928 = vmatpush1.bf16.msra.mxu0 %v12397_v0  ;;  %3823 = vmatprep.subr.bf16.mxu1 %v12400_v2 }
 0x340   : > { %3929 = vmatprep.subr.bf16.mxu0 %v12402_v24 }
 0x342   : > { %3824 = vmatpush1.bf16.msra.mxu1 %v12399_v44 }
 0x343   : > { %3930 = vmatpush1.bf16.msra.mxu0 %v12401_v32  ;;  %3825 = vmatprep.subr.bf16.mxu1 %v12404_v33 }
 0x344   : > { %3931 = vmatprep.subr.bf16.mxu0 %v12406_v34 }
 0x346   : > { %3826 = vmatpush1.bf16.msra.mxu1 %v12403_v39 }
 0x347   : > { %3932 = vmatpush1.bf16.msra.mxu0 %v12405_v40  ;;  %3827 = vmatprep.subr.bf16.mxu1 %v12408_v45 }
 0x348   : > { %3933 = vmatprep.subr.bf16.mxu0 %v12410_v46 }
 0x34a   : > { %3828 = vmatpush1.bf16.msra.mxu1 %v12407_v51 }
 0x34b   : > { %3934 = vmatpush1.bf16.msra.mxu0 %v12409_v52  ;;  %3829 = vmatprep.subr.bf16.mxu1 %v12412_v53 }
 0x34c   : > { %3935 = vmatprep.subr.bf16.mxu0 %v12414_v54 }
 0x34e   : > { %3830 = vmatpush1.bf16.msra.mxu1 %v12411_v59 }
 0x34f   : > { %3936 = vmatpush1.bf16.msra.mxu0 %v12413_v63  ;;  %3831 = vmatprep.subr.bf16.mxu1 %v12416_v3 }
 0x350   : > { %3937 = vmatprep.subr.bf16.mxu0 %v12418_v5 }
 0x352   : > { %3832 = vmatpush1.bf16.msra.mxu1 %v12415_v11 }
 0x353   : > { %3938 = vmatpush1.bf16.msra.mxu0 %v12417_v12 }
 0x355   : > { %3834 = vmatmul.mubr.bf16.vlgmr.msra.gmra.mrb[16].mxu1 %v16172_v42 }
 0x356   : > { %3940 = vmatmul.mubr.bf16.vlgmr.msra.gmra.mrb[24].mxu0 %v16172_v42  ;;  %3843 = vmatprep.mubr.bf16.mxu1 %v16222_v25  ;;  %v2069_v42 = vrot.slane %v2052_v13, %v16144_v6 }
 0x357   : > { %3949 = vmatprep.mubr.bf16.mxu0 %v16222_v25 }
 0x35d   : > { %3844 = vmatmul.mubr.bf16.gmra.mrb[20].mxu1 %v16218_v10 }
 0x35e   : > { %3950 = vmatmul.mubr.bf16.gmra.mrb[28].mxu0 %v16218_v10 }
 0x3a7   : > { %v2801_v43 = vpop.f32.mrb[8].mxu1  ;;  %v2907_v17 = vpop.f32.mrb[16].mxu0 }
 0x3a8   : > { %v13301_v28 = vadd.f32 %v2801_v43, %v2057_v14  ;;  %v13309_v25 = vadd.f32 %v2907_v17, %v2065_v15  ;;  %v2803_v41 = vpop.f32.mrb[9].mxu1  ;;  %v2909_v7 = vpop.f32.mrb[17].mxu0 }
 0x3a9   : > { %v13302_v18 = vadd.f32 %v2803_v41, %v2061_v16  ;;  %v13310_v10 = vadd.f32 %v2909_v7, %v2069_v42  ;;  %v2805_v19 = vpop.f32.mrb[10].mxu1  ;;  %v2911_v23 = vpop.f32.mrb[18].mxu0 }
 0x3aa   : > { %v13303_v20 = vadd.f32 %v2805_v19, %v2057_v14  ;;  %v13311_v8 = vadd.f32 %v2911_v23, %v2065_v15  ;;  %v2807_v21 = vpop.f32.mrb[11].mxu1  ;;  %v2913_v22 = vpop.f32.mrb[19].mxu0  ;;  %v2926_v1 = vmax.f32 %v13301_v28, 0.0  ;;  %v2928_v62 = vmax.f32 %v13309_v25, 0.0 }
 0x3ab   : > { %v13304_v9 = vadd.f32 %v2807_v21, %v2061_v16  ;;  %v13312_v60 = vadd.f32 %v2913_v22, %v2069_v42  ;;  %v2927_v24 = vmax.f32 %v13302_v18, 0.0  ;;  %v2929_v61 = vmax.f32 %v13310_v10, 0.0 }
 0x3ac   : > { %v2930_v0 = vmax.f32 %v13303_v20, 0.0  ;;  %v2932_v2 = vmax.f32 %v13311_v8, 0.0 }
 0x3ad   : > { %v2931_v26 = vmax.f32 %v13304_v9, 0.0  ;;  %v2933_v27 = vmax.f32 %v13312_v60, 0.0 }
 0x3ae   : > { %v2942_v30 = vpack.c.bf16 %v2930_v0, %v2926_v1  ;;  %v2944_v44 = vpack.c.bf16 %v2932_v2, %v2928_v62 }
 0x3af   : > { %v2943_v32 = vpack.c.bf16 %v2931_v26, %v2927_v24  ;;  %v2945_v33 = vpack.c.bf16 %v2933_v27, %v2929_v61  ;;  %v2811_v34 = vpop.f32.mrb[12].mxu1  ;;  %v2917_v35 = vpop.f32.mrb[20].mxu0 }
 0x3b0   : > { %2950 = vst [vmem:[#allocation2] sm:$0xff] %v2942_v30  ;;  %2952 = vst [vmem:[#allocation2 + $0x10] sm:$0xff] %v2944_v44  ;;  %v13305_v36 = vadd.f32 %v2811_v34, %v2057_v14  ;;  %v13313_v37 = vadd.f32 %v2917_v35, %v2065_v15  ;;  %v2813_v38 = vpop.f32.mrb[13].mxu1  ;;  %v2919_v39 = vpop.f32.mrb[21].mxu0 }
 0x3b1   : > { %2951 = vst [vmem:[#allocation2 + $0x8] sm:$0xff] %v2943_v32  ;;  %2953 = vst [vmem:[#allocation2 + $0x18] sm:$0xff] %v2945_v33  ;;  %v13306_v40 = vadd.f32 %v2813_v38, %v2061_v16  ;;  %v13314_v45 = vadd.f32 %v2919_v39, %v2069_v42  ;;  %v2815_v46 = vpop.f32.mrb[14].mxu1  ;;  %v2921_v47 = vpop.f32.mrb[22].mxu0 }
 0x3b2   : > { %v13307_v48 = vadd.f32 %v2815_v46, %v2057_v14  ;;  %v13315_v49 = vadd.f32 %v2921_v47, %v2065_v15  ;;  %v2817_v50 = vpop.f32.mrb[15].mxu1  ;;  %v2923_v51 = vpop.f32.mrb[23].mxu0  ;;  %v2934_v54 = vmax.f32 %v13305_v36, 0.0  ;;  %v2936_v55 = vmax.f32 %v13313_v37, 0.0  ;;  %v3086_v14 = vld [vmem:[%s19279_s6 + $0x4] sm:$0xf] }
 0x3b3   : > { %v13308_v52 = vadd.f32 %v2817_v50, %v2061_v16  ;;  %v13316_v53 = vadd.f32 %v2923_v51, %v2069_v42  ;;  %v2935_v58 = vmax.f32 %v13306_v40, 0.0  ;;  %v2937_v59 = vmax.f32 %v13314_v45, 0.0 }
 0x3b4   : > { %v2938_v56 = vmax.f32 %v13307_v48, 0.0  ;;  %v2940_v57 = vmax.f32 %v13315_v49, 0.0  ;;  %v3091_v15 = vrot.slane %v3086_v14, %v15919_v29  ;;  %v3099_v16 = vrot.slane %v3086_v14, %v16138_v4 }
 0x3b5   : > { %v2939_v63 = vmax.f32 %v13308_v52, 0.0  ;;  %v2941_v3 = vmax.f32 %v13316_v53, 0.0  ;;  %v3095_v42 = vrot.slane %v3086_v14, %v15925_v31  ;;  %v3103_v43 = vrot.slane %v3086_v14, %v16144_v6 }
 0x3b6   : > { %v2946_v5 = vpack.c.bf16 %v2938_v56, %v2934_v54  ;;  %v2948_v11 = vpack.c.bf16 %v2940_v57, %v2936_v55 }
 0x3b7   : > { %v2947_v12 = vpack.c.bf16 %v2939_v63, %v2935_v58  ;;  %v2949_v13 = vpack.c.bf16 %v2941_v3, %v2937_v59 }
 0x3b8   : > { %2954 = vst [vmem:[#allocation2 + $0x40] sm:$0xff] %v2946_v5  ;;  %2956 = vst [vmem:[#allocation2 + $0x50] sm:$0xff] %v2948_v11 }
 0x3b9   : > { %2955 = vst [vmem:[#allocation2 + $0x48] sm:$0xff] %v2947_v12  ;;  %2957 = vst [vmem:[#allocation2 + $0x58] sm:$0xff] %v2949_v13 }
 0x428   : > { %v3835_v17 = vpop.f32.mrb[16].mxu1 }
 0x429   : > { %v13317_v28 = vadd.f32 %v3835_v17, %v3091_v15  ;;  %v3941_v25 = vpop.f32.mrb[24].mxu0  ;;  %v3837_v41 = vpop.f32.mrb[17].mxu1 }
 0x42a   : > { %v13325_v7 = vadd.f32 %v3941_v25, %v3099_v16  ;;  %v13318_v18 = vadd.f32 %v3837_v41, %v3095_v42  ;;  %v3943_v10 = vpop.f32.mrb[25].mxu0  ;;  %v3839_v19 = vpop.f32.mrb[18].mxu1 }
 0x42b   : > { %v13326_v23 = vadd.f32 %v3943_v10, %v3103_v43  ;;  %v13319_v20 = vadd.f32 %v3839_v19, %v3091_v15  ;;  %v3945_v8 = vpop.f32.mrb[26].mxu0  ;;  %v3841_v21 = vpop.f32.mrb[19].mxu1  ;;  %v3960_v4 = vmax.f32 %v13317_v28, 0.0 }
 0x42c   : > { %v13327_v22 = vadd.f32 %v3945_v8, %v3099_v16  ;;  %v13320_v29 = vadd.f32 %v3841_v21, %v3095_v42  ;;  %v3947_v9 = vpop.f32.mrb[27].mxu0  ;;  %v3962_v1 = vmax.f32 %v13325_v7, 0.0  ;;  %v3961_v6 = vmax.f32 %v13318_v18, 0.0 }
 0x42d   : > { %v3964_v60 = vmax.f32 %v13319_v20, 0.0  ;;  %v13328_v31 = vadd.f32 %v3947_v9, %v3103_v43  ;;  %v3963_v2 = vmax.f32 %v13326_v23, 0.0 }
 0x42e   : > { %v3966_v62 = vmax.f32 %v13327_v22, 0.0  ;;  %v3965_v0 = vmax.f32 %v13320_v29, 0.0 }
 0x42f   : > { %v3976_v24 = vpack.c.bf16 %v3964_v60, %v3960_v4  ;;  %v3967_v61 = vmax.f32 %v13328_v31, 0.0 }
 0x430   : > { %v3978_v26 = vpack.c.bf16 %v3966_v62, %v3962_v1  ;;  %v3977_v27 = vpack.c.bf16 %v3965_v0, %v3961_v6  ;;  %v3845_v30 = vpop.f32.mrb[20].mxu1 }
 0x431   : > { %3984 = vst [vmem:[#allocation2 + $0x20] sm:$0xff] %v3976_v24  ;;  %v3979_v44 = vpack.c.bf16 %v3967_v61, %v3963_v2  ;;  %v13321_v32 = vadd.f32 %v3845_v30, %v3091_v15  ;;  %v3951_v33 = vpop.f32.mrb[28].mxu0  ;;  %v3847_v34 = vpop.f32.mrb[21].mxu1 }
 0x432   : > { %3986 = vst [vmem:[#allocation2 + $0x30] sm:$0xff] %v3978_v26  ;;  %3985 = vst [vmem:[#allocation2 + $0x28] sm:$0xff] %v3977_v27  ;;  %v13329_v35 = vadd.f32 %v3951_v33, %v3099_v16  ;;  %v13322_v36 = vadd.f32 %v3847_v34, %v3095_v42  ;;  %v3953_v37 = vpop.f32.mrb[29].mxu0  ;;  %v3849_v38 = vpop.f32.mrb[22].mxu1 }
 0x433   : > { %3987 = vst [vmem:[#allocation2 + $0x38] sm:$0xff] %v3979_v44  ;;  %v13330_v39 = vadd.f32 %v3953_v37, %v3103_v43  ;;  %v13323_v40 = vadd.f32 %v3849_v38, %v3091_v15  ;;  %v3955_v45 = vpop.f32.mrb[30].mxu0  ;;  %v3851_v46 = vpop.f32.mrb[23].mxu1  ;;  %v3968_v50 = vmax.f32 %v13321_v32, 0.0 }
 0x434   : > { %v13331_v47 = vadd.f32 %v3955_v45, %v3099_v16  ;;  %v13324_v48 = vadd.f32 %v3851_v46, %v3095_v42  ;;  %v3957_v49 = vpop.f32.mrb[31].mxu0  ;;  %v3970_v53 = vmax.f32 %v13329_v35, 0.0  ;;  %v3969_v54 = vmax.f32 %v13322_v36, 0.0 }
 0x435   : > { %v3972_v51 = vmax.f32 %v13323_v40, 0.0  ;;  %v13332_v52 = vadd.f32 %v3957_v49, %v3103_v43  ;;  %v3971_v57 = vmax.f32 %v13330_v39, 0.0 }
 0x436   : > { %v3974_v55 = vmax.f32 %v13331_v47, 0.0  ;;  %v3973_v56 = vmax.f32 %v13324_v48, 0.0 }
 0x437   : > { %v3980_v58 = vpack.c.bf16 %v3972_v51, %v3968_v50  ;;  %v3975_v59 = vmax.f32 %v13332_v52, 0.0 }
 0x438   : > { %v3982_v63 = vpack.c.bf16 %v3974_v55, %v3970_v53  ;;  %v3981_v3 = vpack.c.bf16 %v3973_v56, %v3969_v54 }
 0x439   : > { %3988 = vst [vmem:[#allocation2 + $0x60] sm:$0xff] %v3980_v58  ;;  %v3983_v5 = vpack.c.bf16 %v3975_v59, %v3971_v57 }
 0x43a   : > { %3990 = vst [vmem:[#allocation2 + $0x70] sm:$0xff] %v3982_v63  ;;  %3989 = vst [vmem:[#allocation2 + $0x68] sm:$0xff] %v3981_v3 }
 0x43b   : > { %3991 = vst [vmem:[#allocation2 + $0x78] sm:$0xff] %v3983_v5 }
 0x43c PF: > { %p3992_p2 = scmp.ge.s32.totalorder %s15103_s21, 1  ;;  %p3993_p3 = scmp.le.s32.totalorder %s15103_s21, 4 }
 0x43e   : > { %p3994_p4 = pnand %p3993_p3, %p3992_p2 }
 0x43f   : > { %v13714_v11 = vld [vmem:[%s15655_s0 + $0x4] ss:$16 sps:$4 sm:$0xff] (!%p3994_p4)   ;;  %v13716_v12 = vld [vmem:[%s15655_s0 + $0xc] ss:$16 sps:$4 sm:$0xff] (!%p3994_p4)   ;;  %v13718_v13 = vld [vmem:[%s15655_s0] ss:$16 sps:$4 sm:$0xff] (!%p3994_p4)   ;;  %s19315_s25 = scalar_lea.vmem (!%p3994_p4), %s19281_s8, %s19332_s3 }
 0x440   : > { %3997 = sbr.rel (%p3994_p4) target bundleno = 1574 (0x626), region = 127  ;;  %5574 = vmatprep.subr.bf16.mxu0 (!%p3994_p4), %v13714_v11  ;;  %v13719_v14 = vld [vmem:[%s15655_s0 + $0x8] ss:$16 sps:$4 sm:$0xff] (!%p3994_p4)   ;;  %5786 = vmatprep.subr.bf16.mxu1 (!%p3994_p4), %v13716_v12  ;;  %v13720_v15 = vld [vmem:[%s15655_s0 + $0x24] ss:$16 sps:$4 sm:$0xff] (!%p3994_p4)   ;;  %s12420_s1 = sshll.u32 (!%p3994_p4), %s15644_s23, 9 }
 0x441   : > { %5575 = vmatpush1.bf16.msra.mxu0 (!%p3994_p4), %v13718_v13  ;;  %5787 = vmatpush1.bf16.msra.mxu1 (!%p3994_p4), %v13719_v14  ;;  %v13722_v16 = vld [vmem:[%s15655_s0 + $0x2c] ss:$16 sps:$4 sm:$0xff] (!%p3994_p4)   ;;  %v13724_v42 = vld [vmem:[%s15655_s0 + $0x20] ss:$16 sps:$4 sm:$0xff] (!%p3994_p4)   ;;  %v13725_v43 = vld [vmem:[%s15655_s0 + $0x28] ss:$16 sps:$4 sm:$0xff] (!%p3994_p4)  }
 0x442   : > { %5576 = vmatprep.subr.bf16.mxu0 (!%p3994_p4), %v13720_v15  ;;  %5788 = vmatprep.subr.bf16.mxu1 (!%p3994_p4), %v13722_v16  ;;  %v13726_v17 = vld [vmem:[%s15655_s0 + $0x44] ss:$16 sps:$4 sm:$0xff] (!%p3994_p4)   ;;  %v13728_v28 = vld [vmem:[%s15655_s0 + $0x4c] ss:$16 sps:$4 sm:$0xff] (!%p3994_p4)   ;;  %v13730_v25 = vld [vmem:[%s15655_s0 + $0x40] ss:$16 sps:$4 sm:$0xff] (!%p3994_p4)  }
 0x443   : > { %v13731_v41 = vld [vmem:[%s15655_s0 + $0x48] ss:$16 sps:$4 sm:$0xff] (!%p3994_p4)   ;;  %v13732_v7 = vld [vmem:[%s15655_s0 + $0x64] ss:$16 sps:$4 sm:$0xff] (!%p3994_p4)   ;;  %v13734_v18 = vld [vmem:[%s15655_s0 + $0x6c] ss:$16 sps:$4 sm:$0xff] (!%p3994_p4)  }
 0x444   : > { %v13736_v10 = vld [vmem:[%s15655_s0 + $0x60] ss:$16 sps:$4 sm:$0xff] (!%p3994_p4)   ;;  %v13737_v19 = vld [vmem:[%s15655_s0 + $0x68] ss:$16 sps:$4 sm:$0xff] (!%p3994_p4)   ;;  %v13738_v23 = vld [vmem:[%s15655_s0 + $0x84] ss:$16 sps:$4 sm:$0xff] (!%p3994_p4)  }
 0x445   : > { %5577 = vmatpush1.bf16.msra.mxu0 (!%p3994_p4), %v13724_v42  ;;  %5789 = vmatpush1.bf16.msra.mxu1 (!%p3994_p4), %v13725_v43  ;;  %v13740_v20 = vld [vmem:[%s15655_s0 + $0x8c] ss:$16 sps:$4 sm:$0xff] (!%p3994_p4)   ;;  %v13742_v8 = vld [vmem:[%s15655_s0 + $0x80] ss:$16 sps:$4 sm:$0xff] (!%p3994_p4)   ;;  %v13743_v21 = vld [vmem:[%s15655_s0 + $0x88] ss:$16 sps:$4 sm:$0xff] (!%p3994_p4)  }
 0x446   : > { %5578 = vmatprep.subr.bf16.mxu0 (!%p3994_p4), %v13726_v17  ;;  %5790 = vmatprep.subr.bf16.mxu1 (!%p3994_p4), %v13728_v28  ;;  %v13744_v22 = vld [vmem:[%s15655_s0 + $0xa4] ss:$16 sps:$4 sm:$0xff] (!%p3994_p4)   ;;  %v13746_v29 = vld [vmem:[%s15655_s0 + $0xac] ss:$16 sps:$4 sm:$0xff] (!%p3994_p4)   ;;  %v13748_v9 = vld [vmem:[%s15655_s0 + $0xa0] ss:$16 sps:$4 sm:$0xff] (!%p3994_p4)  }
 0x447   : > { %v13749_v4 = vld [vmem:[%s15655_s0 + $0xa8] ss:$16 sps:$4 sm:$0xff]   ;;  %v13750_v60 = vld [vmem:[%s15655_s0 + $0xc4] ss:$16 sps:$4 sm:$0xff]   ;;  %v13752_v31 = vld [vmem:[%s15655_s0 + $0xcc] ss:$16 sps:$4 sm:$0xff]  }
 0x448   : > { %v13754_v1 = vld [vmem:[%s15655_s0 + $0xc0] ss:$16 sps:$4 sm:$0xff]   ;;  %v13755_v6 = vld [vmem:[%s15655_s0 + $0xc8] ss:$16 sps:$4 sm:$0xff]   ;;  %v13756_v62 = vld [vmem:[%s15655_s0 + $0xe4] ss:$16 sps:$4 sm:$0xff]  }
 0x449   : > { %5579 = vmatpush1.bf16.msra.mxu0 %v13730_v25  ;;  %5791 = vmatpush1.bf16.msra.mxu1 %v13731_v41  ;;  %v13758_v0 = vld [vmem:[%s15655_s0 + $0xec] ss:$16 sps:$4 sm:$0xff]   ;;  %v13760_v2 = vld [vmem:[%s15655_s0 + $0xe0] ss:$16 sps:$4 sm:$0xff]   ;;  %v13761_v24 = vld [vmem:[%s15655_s0 + $0xe8] ss:$16 sps:$4 sm:$0xff]  }
 0x44a   : > { %5580 = vmatprep.subr.bf16.mxu0 %v13732_v7  ;;  %5792 = vmatprep.subr.bf16.mxu1 %v13734_v18  ;;  %v13762_v61 = vld [vmem:[%s15655_s0 + $0x104] ss:$16 sps:$4 sm:$0xff]   ;;  %v13764_v26 = vld [vmem:[%s15655_s0 + $0x10c] ss:$16 sps:$4 sm:$0xff]   ;;  %v13766_v27 = vld [vmem:[%s15655_s0 + $0x100] ss:$16 sps:$4 sm:$0xff]  }
 0x44b   : > { %v13767_v30 = vld [vmem:[%s15655_s0 + $0x108] ss:$16 sps:$4 sm:$0xff]   ;;  %v13768_v44 = vld [vmem:[%s15655_s0 + $0x124] ss:$16 sps:$4 sm:$0xff]   ;;  %v13770_v32 = vld [vmem:[%s15655_s0 + $0x12c] ss:$16 sps:$4 sm:$0xff]  }
 0x44c   : > { %v13772_v33 = vld [vmem:[%s15655_s0 + $0x120] ss:$16 sps:$4 sm:$0xff]   ;;  %v13773_v34 = vld [vmem:[%s15655_s0 + $0x128] ss:$16 sps:$4 sm:$0xff]   ;;  %v13774_v35 = vld [vmem:[%s15655_s0 + $0x144] ss:$16 sps:$4 sm:$0xff]  }
 0x44d   : > { %5581 = vmatpush1.bf16.msra.mxu0 %v13736_v10  ;;  %5793 = vmatpush1.bf16.msra.mxu1 %v13737_v19  ;;  %v13776_v36 = vld [vmem:[%s15655_s0 + $0x14c] ss:$16 sps:$4 sm:$0xff]   ;;  %v13778_v37 = vld [vmem:[%s15655_s0 + $0x140] ss:$16 sps:$4 sm:$0xff]   ;;  %v13779_v38 = vld [vmem:[%s15655_s0 + $0x148] ss:$16 sps:$4 sm:$0xff]  }
 0x44e   : > { %5582 = vmatprep.subr.bf16.mxu0 %v13738_v23  ;;  %5794 = vmatprep.subr.bf16.mxu1 %v13740_v20  ;;  %v13780_v39 = vld [vmem:[%s15655_s0 + $0x164] ss:$16 sps:$4 sm:$0xff]   ;;  %v13782_v40 = vld [vmem:[%s15655_s0 + $0x16c] ss:$16 sps:$4 sm:$0xff]   ;;  %v13784_v46 = vld [vmem:[%s15655_s0 + $0x160] ss:$16 sps:$4 sm:$0xff]  }
 0x44f   : > { %v4001_v45 = vld [vmem:[#allocation2 + $0x8] sm:$0xff]  ;;  %v13786_v48 = vld [vmem:[%s15655_s0 + $0x184] ss:$16 sps:$4 sm:$0xff]   ;;  %v13790_v50 = vld [vmem:[%s15655_s0 + $0x180] ss:$16 sps:$4 sm:$0xff]   ;;  %s17058_s24 = sshra.s32 %s12420_s1, 7 }
 0x450   : > { %5606 = vmatprep.mubr.bf16.mxu0 %v4001_v45  ;;  %5818 = vmatprep.mubr.bf16.mxu1 %v4001_v45  ;;  %v13785_v47 = vld [vmem:[%s15655_s0 + $0x168] ss:$16 sps:$4 sm:$0xff]   ;;  %v13788_v49 = vld [vmem:[%s15655_s0 + $0x18c] ss:$16 sps:$4 sm:$0xff]   ;;  %v13792_v52 = vld [vmem:[%s15655_s0 + $0x1a4] ss:$16 sps:$4 sm:$0xff]  }
 0x451   : > { %5583 = vmatpush1.bf16.msra.mxu0 %v13742_v8  ;;  %5795 = vmatpush1.bf16.msra.mxu1 %v13743_v21  ;;  %v13791_v51 = vld [vmem:[%s15655_s0 + $0x188] ss:$16 sps:$4 sm:$0xff]   ;;  %v13794_v53 = vld [vmem:[%s15655_s0 + $0x1ac] ss:$16 sps:$4 sm:$0xff]   ;;  %v13796_v54 = vld [vmem:[%s15655_s0 + $0x1a0] ss:$16 sps:$4 sm:$0xff]  }
 0x452   : > { %5584 = vmatprep.subr.bf16.mxu0 %v13744_v22  ;;  %5796 = vmatprep.subr.bf16.mxu1 %v13746_v29  ;;  %v13797_v55 = vld [vmem:[%s15655_s0 + $0x1a8] ss:$16 sps:$4 sm:$0xff]   ;;  %v13798_v56 = vld [vmem:[%s15655_s0 + $0x1c4] ss:$16 sps:$4 sm:$0xff]   ;;  %v13800_v57 = vld [vmem:[%s15655_s0 + $0x1cc] ss:$16 sps:$4 sm:$0xff]  }
 0x453   : > { %v13802_v58 = vld [vmem:[%s15655_s0 + $0x1c0] ss:$16 sps:$4 sm:$0xff]   ;;  %v13803_v59 = vld [vmem:[%s15655_s0 + $0x1c8] ss:$16 sps:$4 sm:$0xff]   ;;  %v13804_v63 = vld [vmem:[%s15655_s0 + $0x1e4] ss:$16 sps:$4 sm:$0xff]  }
 0x454   : > { %v13806_v3 = vld [vmem:[%s15655_s0 + $0x1ec] ss:$16 sps:$4 sm:$0xff]   ;;  %v13808_v5 = vld [vmem:[%s15655_s0 + $0x1e0] ss:$16 sps:$4 sm:$0xff]   ;;  %v13809_v11 = vld [vmem:[%s15655_s0 + $0x1e8] ss:$16 sps:$4 sm:$0xff]  }
 0x455   : > { %5585 = vmatpush1.bf16.msra.mxu0 %v13748_v9  ;;  %5797 = vmatpush1.bf16.msra.mxu1 %v13749_v4  ;;  %v13812_v12 = vld [vmem:[%s15655_s0 + $0x204] ss:$16 sps:$4 sm:$0xff]   ;;  %v13815_v13 = vld [vmem:[%s15655_s0 + $0x20c] ss:$16 sps:$4 sm:$0xff]   ;;  %v13810_v14 = vld [vmem:[%s15655_s0 + $0x200] ss:$16 sps:$4 sm:$0xff]  }
 0x456   : > { %5586 = vmatprep.subr.bf16.mxu0 %v13750_v60  ;;  %5798 = vmatprep.subr.bf16.mxu1 %v13752_v31  ;;  %v13813_v15 = vld [vmem:[%s15655_s0 + $0x208] ss:$16 sps:$4 sm:$0xff]   ;;  %v4000_v16 = vld [vmem:[#allocation2] sm:$0xff]  ;;  %v13821_v43 = vld [vmem:[%s15655_s0 + $0x22c] ss:$16 sps:$4 sm:$0xff]   ;;  %s12677_s3 = sshll.u32 %s17058_s24, 3 }
 0x457   : > { %v13818_v42 = vld [vmem:[%s15655_s0 + $0x224] ss:$16 sps:$4 sm:$0xff]   ;;  %v13816_v17 = vld [vmem:[%s15655_s0 + $0x220] ss:$16 sps:$4 sm:$0xff]   ;;  %v13819_v28 = vld [vmem:[%s15655_s0 + $0x228] ss:$16 sps:$4 sm:$0xff]  }
 0x458   : > { %v13824_v25 = vld [vmem:[%s15655_s0 + $0x244] ss:$16 sps:$4 sm:$0xff]   ;;  %v13827_v41 = vld [vmem:[%s15655_s0 + $0x24c] ss:$16 sps:$4 sm:$0xff]   ;;  %v13822_v7 = vld [vmem:[%s15655_s0 + $0x240] ss:$16 sps:$4 sm:$0xff]  }
 0x459   : > { %5587 = vmatpush1.bf16.msra.mxu0 %v13754_v1  ;;  %5799 = vmatpush1.bf16.msra.mxu1 %v13755_v6  ;;  %v13825_v18 = vld [vmem:[%s15655_s0 + $0x248] ss:$16 sps:$4 sm:$0xff]   ;;  %v13830_v10 = vld [vmem:[%s15655_s0 + $0x264] ss:$16 sps:$4 sm:$0xff]   ;;  %v13833_v19 = vld [vmem:[%s15655_s0 + $0x26c] ss:$16 sps:$4 sm:$0xff]  }
 0x45a   : > { %5588 = vmatprep.subr.bf16.mxu0 %v13756_v62  ;;  %5800 = vmatprep.subr.bf16.mxu1 %v13758_v0  ;;  %v13828_v23 = vld [vmem:[%s15655_s0 + $0x260] ss:$16 sps:$4 sm:$0xff]   ;;  %v13831_v20 = vld [vmem:[%s15655_s0 + $0x268] ss:$16 sps:$4 sm:$0xff]   ;;  %v13836_v8 = vld [vmem:[%s15655_s0 + $0x284] ss:$16 sps:$4 sm:$0xff]  }
 0x45b   : > { %v13839_v21 = vld [vmem:[%s15655_s0 + $0x28c] ss:$16 sps:$4 sm:$0xff]   ;;  %v13834_v22 = vld [vmem:[%s15655_s0 + $0x280] ss:$16 sps:$4 sm:$0xff]   ;;  %v13837_v29 = vld [vmem:[%s15655_s0 + $0x288] ss:$16 sps:$4 sm:$0xff]  }
 0x45c   : > { %v13842_v9 = vld [vmem:[%s15655_s0 + $0x2a4] ss:$16 sps:$4 sm:$0xff]   ;;  %v4009_v4 = vld [vmem:[#allocation2 + $0x48] sm:$0xff]  ;;  %v13840_v31 = vld [vmem:[%s15655_s0 + $0x2a0] ss:$16 sps:$4 sm:$0xff]   ;;  %s17061_s23 = scalar_lea.vmem [#allocation3], %s12677_s3 }
 0x45d   : > { %5589 = vmatpush1.bf16.msra.mxu0 %v13760_v2  ;;  %5801 = vmatpush1.bf16.msra.mxu1 %v13761_v24  ;;  %v13845_v60 = vld [vmem:[%s15655_s0 + $0x2ac] ss:$16 sps:$4 sm:$0xff]   ;;  %v13843_v1 = vld [vmem:[%s15655_s0 + $0x2a8] ss:$16 sps:$4 sm:$0xff]   ;;  %v4008_v6 = vld [vmem:[#allocation2 + $0x40] sm:$0xff] }
 0x45e   : > { %5590 = vmatprep.subr.bf16.mxu0 %v13762_v61  ;;  %5802 = vmatprep.subr.bf16.mxu1 %v13764_v26  ;;  %v13848_v62 = vld [vmem:[%s15655_s0 + $0x2c4] ss:$16 sps:$4 sm:$0xff]   ;;  %v13851_v0 = vld [vmem:[%s15655_s0 + $0x2cc] ss:$16 sps:$4 sm:$0xff]   ;;  %v13846_v24 = vld [vmem:[%s15655_s0 + $0x2c0] ss:$16 sps:$4 sm:$0xff]  }
 0x45f   : > { %v4003_v2 = vld [vmem:[#allocation2 + $0x18] sm:$0xff]  ;;  %v13854_v26 = vld [vmem:[%s15655_s0 + $0x2e4] ss:$16 sps:$4 sm:$0xff]  }
 0x460   : > { %v13849_v61 = vld [vmem:[%s15655_s0 + $0x2c8] ss:$16 sps:$4 sm:$0xff]   ;;  %v13875_v45 = vld [vmem:[%s15655_s0 + $0x34c] ss:$16 sps:$4 sm:$0xff]  }
 0x461   : > { %5591 = vmatpush1.bf16.msra.mxu0 %v13766_v27  ;;  %5803 = vmatpush1.bf16.msra.mxu1 %v13767_v30  ;;  %v13857_v27 = vld [vmem:[%s15655_s0 + $0x2ec] ss:$16 sps:$4 sm:$0xff]   ;;  %v13852_v30 = vld [vmem:[%s15655_s0 + $0x2e0] ss:$16 sps:$4 sm:$0xff]  }
 0x462   : > { %5592 = vmatprep.subr.bf16.mxu0 %v13768_v44  ;;  %5804 = vmatprep.subr.bf16.mxu1 %v13770_v32  ;;  %v13855_v44 = vld [vmem:[%s15655_s0 + $0x2e8] ss:$16 sps:$4 sm:$0xff]   ;;  %v13860_v32 = vld [vmem:[%s15655_s0 + $0x304] ss:$16 sps:$4 sm:$0xff]  }
 0x465   : > { %5593 = vmatpush1.bf16.msra.mxu0 %v13772_v33  ;;  %5805 = vmatpush1.bf16.msra.mxu1 %v13773_v34  ;;  %v13863_v33 = vld [vmem:[%s15655_s0 + $0x30c] ss:$16 sps:$4 sm:$0xff]   ;;  %v13858_v34 = vld [vmem:[%s15655_s0 + $0x300] ss:$16 sps:$4 sm:$0xff]  }
 0x466   : > { %5594 = vmatprep.subr.bf16.mxu0 %v13774_v35  ;;  %5806 = vmatprep.subr.bf16.mxu1 %v13776_v36  ;;  %v13861_v35 = vld [vmem:[%s15655_s0 + $0x308] ss:$16 sps:$4 sm:$0xff]   ;;  %v13866_v36 = vld [vmem:[%s15655_s0 + $0x324] ss:$16 sps:$4 sm:$0xff]  }
 0x469   : > { %5595 = vmatpush1.bf16.msra.mxu0 %v13778_v37  ;;  %5807 = vmatpush1.bf16.msra.mxu1 %v13779_v38  ;;  %v13869_v37 = vld [vmem:[%s15655_s0 + $0x32c] ss:$16 sps:$4 sm:$0xff]   ;;  %v13864_v38 = vld [vmem:[%s15655_s0 + $0x320] ss:$16 sps:$4 sm:$0xff]  }
 0x46a   : > { %5596 = vmatprep.subr.bf16.mxu0 %v13780_v39  ;;  %5808 = vmatprep.subr.bf16.mxu1 %v13782_v40  ;;  %v13867_v39 = vld [vmem:[%s15655_s0 + $0x328] ss:$16 sps:$4 sm:$0xff]   ;;  %v13872_v40 = vld [vmem:[%s15655_s0 + $0x344] ss:$16 sps:$4 sm:$0xff]  }
 0x46d   : > { %5597 = vmatpush1.bf16.msra.mxu0 %v13784_v46  ;;  %5809 = vmatpush1.bf16.msra.mxu1 %v13785_v47  ;;  %v13870_v46 = vld [vmem:[%s15655_s0 + $0x340] ss:$16 sps:$4 sm:$0xff]   ;;  %v13873_v47 = vld [vmem:[%s15655_s0 + $0x348] ss:$16 sps:$4 sm:$0xff]  }
 0x46e   : > { %5598 = vmatprep.subr.bf16.mxu0 %v13786_v48  ;;  %5810 = vmatprep.subr.bf16.mxu1 %v13788_v49  ;;  %v13878_v48 = vld [vmem:[%s15655_s0 + $0x364] ss:$16 sps:$4 sm:$0xff]   ;;  %v13881_v49 = vld [vmem:[%s15655_s0 + $0x36c] ss:$16 sps:$4 sm:$0xff]  }
 0x471   : > { %5599 = vmatpush1.bf16.msra.mxu0 %v13790_v50  ;;  %5811 = vmatpush1.bf16.msra.mxu1 %v13791_v51  ;;  %v13876_v50 = vld [vmem:[%s15655_s0 + $0x360] ss:$16 sps:$4 sm:$0xff]   ;;  %v13879_v51 = vld [vmem:[%s15655_s0 + $0x368] ss:$16 sps:$4 sm:$0xff]  }
 0x472   : > { %5600 = vmatprep.subr.bf16.mxu0 %v13792_v52  ;;  %5812 = vmatprep.subr.bf16.mxu1 %v13794_v53  ;;  %v13884_v52 = vld [vmem:[%s15655_s0 + $0x384] ss:$16 sps:$4 sm:$0xff]   ;;  %v13887_v53 = vld [vmem:[%s15655_s0 + $0x38c] ss:$16 sps:$4 sm:$0xff]  }
 0x475   : > { %5601 = vmatpush1.bf16.msra.mxu0 %v13796_v54  ;;  %5813 = vmatpush1.bf16.msra.mxu1 %v13797_v55  ;;  %v13882_v54 = vld [vmem:[%s15655_s0 + $0x380] ss:$16 sps:$4 sm:$0xff]   ;;  %v13885_v55 = vld [vmem:[%s15655_s0 + $0x388] ss:$16 sps:$4 sm:$0xff]  }
 0x476   : > { %5602 = vmatprep.subr.bf16.mxu0 %v13798_v56  ;;  %5814 = vmatprep.subr.bf16.mxu1 %v13800_v57  ;;  %v13890_v56 = vld [vmem:[%s15655_s0 + $0x3a4] ss:$16 sps:$4 sm:$0xff]   ;;  %v13893_v57 = vld [vmem:[%s15655_s0 + $0x3ac] ss:$16 sps:$4 sm:$0xff]  }
 0x479   : > { %5603 = vmatpush1.bf16.msra.mxu0 %v13802_v58  ;;  %5815 = vmatpush1.bf16.msra.mxu1 %v13803_v59  ;;  %v13888_v58 = vld [vmem:[%s15655_s0 + $0x3a0] ss:$16 sps:$4 sm:$0xff]   ;;  %v13891_v59 = vld [vmem:[%s15655_s0 + $0x3a8] ss:$16 sps:$4 sm:$0xff]  }
 0x47a   : > { %5604 = vmatprep.subr.bf16.mxu0 %v13804_v63  ;;  %5816 = vmatprep.subr.bf16.mxu1 %v13806_v3  ;;  %v13896_v63 = vld [vmem:[%s15655_s0 + $0x3c4] ss:$16 sps:$4 sm:$0xff]   ;;  %v13899_v3 = vld [vmem:[%s15655_s0 + $0x3cc] ss:$16 sps:$4 sm:$0xff]  }
 0x47d   : > { %5605 = vmatpush1.bf16.msra.mxu0 %v13808_v5  ;;  %5817 = vmatpush1.bf16.msra.mxu1 %v13809_v11  ;;  %v13894_v5 = vld [vmem:[%s15655_s0 + $0x3c0] ss:$16 sps:$4 sm:$0xff]   ;;  %v13897_v11 = vld [vmem:[%s15655_s0 + $0x3c8] ss:$16 sps:$4 sm:$0xff]  }
 0x47e   : > { %5627 = vmatprep.subr.bf16.mxu0 %v13812_v12  ;;  %5839 = vmatprep.subr.bf16.mxu1 %v13815_v13  ;;  %v13902_v12 = vld [vmem:[%s15655_s0 + $0x3e4] ss:$16 sps:$4 sm:$0xff]   ;;  %v13905_v13 = vld [vmem:[%s15655_s0 + $0x3ec] ss:$16 sps:$4 sm:$0xff]  }
 0x480   : > { %5607 = vmatmul.mubr.bf16.vlgmr.msra.gmra.mrb[0].mxu0 %v4000_v16  ;;  %5819 = vmatmul.mubr.bf16.vlgmr.msra.gmra.mrb[0].mxu1 %v4000_v16  ;;  %v13908_v16 = vld [vmem:[%s15655_s0 + $0x404] ss:$16 sps:$4 sm:$0xff]  }
 0x481   : > { %5628 = vmatpush1.bf16.msra.mxu0 %v13810_v14  ;;  %5840 = vmatpush1.bf16.msra.mxu1 %v13813_v15  ;;  %v13900_v14 = vld [vmem:[%s15655_s0 + $0x3e0] ss:$16 sps:$4 sm:$0xff]   ;;  %v13903_v15 = vld [vmem:[%s15655_s0 + $0x3e8] ss:$16 sps:$4 sm:$0xff]  }
 0x482   : > { %5629 = vmatprep.subr.bf16.mxu0 %v13818_v42  ;;  %5841 = vmatprep.subr.bf16.mxu1 %v13821_v43  ;;  %v13911_v42 = vld [vmem:[%s15655_s0 + $0x40c] ss:$16 sps:$4 sm:$0xff]   ;;  %v13906_v43 = vld [vmem:[%s15655_s0 + $0x400] ss:$16 sps:$4 sm:$0xff]  }
 0x483   : > { %5616 = vmatprep.mubr.bf16.mxu0 %v4009_v4  ;;  %5828 = vmatprep.mubr.bf16.mxu1 %v4009_v4  ;;  %v13924_v4 = vld [vmem:[%s15655_s0 + $0x460] ss:$16 sps:$4 sm:$0xff]  }
 0x485   : > { %5630 = vmatpush1.bf16.msra.mxu0 %v13816_v17  ;;  %5842 = vmatpush1.bf16.msra.mxu1 %v13819_v28  ;;  %v13909_v17 = vld [vmem:[%s15655_s0 + $0x408] ss:$16 sps:$4 sm:$0xff]   ;;  %v4002_v28 = vld [vmem:[#allocation2 + $0x10] sm:$0xff] }
 0x486   : > { %5631 = vmatprep.subr.bf16.mxu0 %v13824_v25  ;;  %5843 = vmatprep.subr.bf16.mxu1 %v13827_v41  ;;  %v13914_v25 = vld [vmem:[%s15655_s0 + $0x424] ss:$16 sps:$4 sm:$0xff]   ;;  %v13917_v41 = vld [vmem:[%s15655_s0 + $0x42c] ss:$16 sps:$4 sm:$0xff]  }
 0x488   : > { %5617 = vmatmul.mubr.bf16.gmra.mrb[4].mxu0 %v4008_v6  ;;  %5829 = vmatmul.mubr.bf16.gmra.mrb[4].mxu1 %v4008_v6  ;;  %v13930_v6 = vld [vmem:[%s15655_s0 + $0x480] ss:$16 sps:$4 sm:$0xff]  }
 0x489   : > { %5632 = vmatpush1.bf16.msra.mxu0 %v13822_v7  ;;  %5844 = vmatpush1.bf16.msra.mxu1 %v13825_v18  ;;  %v13912_v7 = vld [vmem:[%s15655_s0 + $0x420] ss:$16 sps:$4 sm:$0xff]   ;;  %v4011_v18 = vld [vmem:[#allocation2 + $0x58] sm:$0xff] }
 0x48a   : > { %5633 = vmatprep.subr.bf16.mxu0 %v13830_v10  ;;  %5845 = vmatprep.subr.bf16.mxu1 %v13833_v19  ;;  %v13915_v10 = vld [vmem:[%s15655_s0 + $0x428] ss:$16 sps:$4 sm:$0xff]   ;;  %v13920_v19 = vld [vmem:[%s15655_s0 + $0x444] ss:$16 sps:$4 sm:$0xff]  }
 0x48b   : > { %5659 = vmatprep.mubr.bf16.mxu0 %v4003_v2  ;;  %5871 = vmatprep.mubr.bf16.mxu1 %v4003_v2  ;;  %v13941_v2 = vld [vmem:[%s15655_s0 + $0x4ac] ss:$16 sps:$4 sm:$0xff]  }
 0x48d   : > { %5634 = vmatpush1.bf16.msra.mxu0 %v13828_v23  ;;  %5846 = vmatpush1.bf16.msra.mxu1 %v13831_v20  ;;  %v13923_v23 = vld [vmem:[%s15655_s0 + $0x44c] ss:$16 sps:$4 sm:$0xff]   ;;  %v13918_v20 = vld [vmem:[%s15655_s0 + $0x440] ss:$16 sps:$4 sm:$0xff]  }
 0x48e   : > { %5635 = vmatprep.subr.bf16.mxu0 %v13836_v8  ;;  %5847 = vmatprep.subr.bf16.mxu1 %v13839_v21  ;;  %v13921_v8 = vld [vmem:[%s15655_s0 + $0x448] ss:$16 sps:$4 sm:$0xff]   ;;  %v4010_v21 = vld [vmem:[#allocation2 + $0x50] sm:$0xff] }
 0x491   : > { %5636 = vmatpush1.bf16.msra.mxu0 %v13834_v22  ;;  %5848 = vmatpush1.bf16.msra.mxu1 %v13837_v29  ;;  %v13926_v22 = vld [vmem:[%s15655_s0 + $0x464] ss:$16 sps:$4 sm:$0xff]   ;;  %v13929_v29 = vld [vmem:[%s15655_s0 + $0x46c] ss:$16 sps:$4 sm:$0xff]  }
 0x492   : > { %5637 = vmatprep.subr.bf16.mxu0 %v13842_v9  ;;  %5849 = vmatprep.subr.bf16.mxu1 %v13845_v60  ;;  %v4005_v9 = vld [vmem:[#allocation2 + $0x28] sm:$0xff] }
 0x493   : > { %v13927_v60 = vld [vmem:[%s15655_s0 + $0x468] ss:$16 sps:$4 sm:$0xff]  }
 0x495   : > { %5638 = vmatpush1.bf16.msra.mxu0 %v13840_v31  ;;  %5850 = vmatpush1.bf16.msra.mxu1 %v13843_v1  ;;  %v13932_v31 = vld [vmem:[%s15655_s0 + $0x484] ss:$16 sps:$4 sm:$0xff]   ;;  %v13935_v1 = vld [vmem:[%s15655_s0 + $0x48c] ss:$16 sps:$4 sm:$0xff]  }
 0x496   : > { %5639 = vmatprep.subr.bf16.mxu0 %v13848_v62  ;;  %5851 = vmatprep.subr.bf16.mxu1 %v13851_v0  ;;  %v13933_v62 = vld [vmem:[%s15655_s0 + $0x488] ss:$16 sps:$4 sm:$0xff]   ;;  %v13938_v0 = vld [vmem:[%s15655_s0 + $0x4a4] ss:$16 sps:$4 sm:$0xff]  }
 0x499   : > { %5640 = vmatpush1.bf16.msra.mxu0 %v13846_v24  ;;  %5852 = vmatpush1.bf16.msra.mxu1 %v13849_v61  ;;  %v13936_v24 = vld [vmem:[%s15655_s0 + $0x4a0] ss:$16 sps:$4 sm:$0xff]   ;;  %v13939_v61 = vld [vmem:[%s15655_s0 + $0x4a8] ss:$16 sps:$4 sm:$0xff]  }
 0x49a   : > { %5641 = vmatprep.subr.bf16.mxu0 %v13854_v26  ;;  %5853 = vmatprep.subr.bf16.mxu1 %v13857_v27  ;;  %v13944_v26 = vld [vmem:[%s15655_s0 + $0x4c4] ss:$16 sps:$4 sm:$0xff]   ;;  %v13947_v27 = vld [vmem:[%s15655_s0 + $0x4cc] ss:$16 sps:$4 sm:$0xff]  }
 0x49d   : > { %5642 = vmatpush1.bf16.msra.mxu0 %v13852_v30  ;;  %5854 = vmatpush1.bf16.msra.mxu1 %v13855_v44  ;;  %v13942_v30 = vld [vmem:[%s15655_s0 + $0x4c0] ss:$16 sps:$4 sm:$0xff]   ;;  %v13945_v44 = vld [vmem:[%s15655_s0 + $0x4c8] ss:$16 sps:$4 sm:$0xff]  }
 0x49e   : > { %5643 = vmatprep.subr.bf16.mxu0 %v13860_v32  ;;  %5855 = vmatprep.subr.bf16.mxu1 %v13863_v33  ;;  %v13950_v32 = vld [vmem:[%s15655_s0 + $0x4e4] ss:$16 sps:$4 sm:$0xff]   ;;  %v13953_v33 = vld [vmem:[%s15655_s0 + $0x4ec] ss:$16 sps:$4 sm:$0xff]  }
 0x4a1   : > { %5644 = vmatpush1.bf16.msra.mxu0 %v13858_v34  ;;  %5856 = vmatpush1.bf16.msra.mxu1 %v13861_v35  ;;  %v13948_v34 = vld [vmem:[%s15655_s0 + $0x4e0] ss:$16 sps:$4 sm:$0xff]   ;;  %v13951_v35 = vld [vmem:[%s15655_s0 + $0x4e8] ss:$16 sps:$4 sm:$0xff]  }
 0x4a2   : > { %5645 = vmatprep.subr.bf16.mxu0 %v13866_v36  ;;  %5857 = vmatprep.subr.bf16.mxu1 %v13869_v37  ;;  %v13956_v36 = vld [vmem:[%s15655_s0 + $0x504] ss:$16 sps:$4 sm:$0xff]   ;;  %v13959_v37 = vld [vmem:[%s15655_s0 + $0x50c] ss:$16 sps:$4 sm:$0xff]  }
 0x4a5   : > { %5646 = vmatpush1.bf16.msra.mxu0 %v13864_v38  ;;  %5858 = vmatpush1.bf16.msra.mxu1 %v13867_v39  ;;  %v13954_v38 = vld [vmem:[%s15655_s0 + $0x500] ss:$16 sps:$4 sm:$0xff]   ;;  %v13957_v39 = vld [vmem:[%s15655_s0 + $0x508] ss:$16 sps:$4 sm:$0xff]  }
 0x4a6   : > { %5647 = vmatprep.subr.bf16.mxu0 %v13872_v40  ;;  %5859 = vmatprep.subr.bf16.mxu1 %v13875_v45  ;;  %v13962_v40 = vld [vmem:[%s15655_s0 + $0x524] ss:$16 sps:$4 sm:$0xff]   ;;  %v13965_v45 = vld [vmem:[%s15655_s0 + $0x52c] ss:$16 sps:$4 sm:$0xff]  }
 0x4a9   : > { %5648 = vmatpush1.bf16.msra.mxu0 %v13870_v46  ;;  %5860 = vmatpush1.bf16.msra.mxu1 %v13873_v47  ;;  %v13960_v46 = vld [vmem:[%s15655_s0 + $0x520] ss:$16 sps:$4 sm:$0xff]   ;;  %v13963_v47 = vld [vmem:[%s15655_s0 + $0x528] ss:$16 sps:$4 sm:$0xff]  }
 0x4aa   : > { %5649 = vmatprep.subr.bf16.mxu0 %v13878_v48  ;;  %5861 = vmatprep.subr.bf16.mxu1 %v13881_v49  ;;  %v13968_v48 = vld [vmem:[%s15655_s0 + $0x544] ss:$16 sps:$4 sm:$0xff]   ;;  %v13971_v49 = vld [vmem:[%s15655_s0 + $0x54c] ss:$16 sps:$4 sm:$0xff]  }
 0x4ad   : > { %5650 = vmatpush1.bf16.msra.mxu0 %v13876_v50  ;;  %5862 = vmatpush1.bf16.msra.mxu1 %v13879_v51  ;;  %v13966_v50 = vld [vmem:[%s15655_s0 + $0x540] ss:$16 sps:$4 sm:$0xff]   ;;  %v13969_v51 = vld [vmem:[%s15655_s0 + $0x548] ss:$16 sps:$4 sm:$0xff]  }
 0x4ae   : > { %5651 = vmatprep.subr.bf16.mxu0 %v13884_v52  ;;  %5863 = vmatprep.subr.bf16.mxu1 %v13887_v53  ;;  %v13974_v52 = vld [vmem:[%s15655_s0 + $0x564] ss:$16 sps:$4 sm:$0xff]   ;;  %v13977_v53 = vld [vmem:[%s15655_s0 + $0x56c] ss:$16 sps:$4 sm:$0xff]  }
 0x4b1   : > { %5652 = vmatpush1.bf16.msra.mxu0 %v13882_v54  ;;  %5864 = vmatpush1.bf16.msra.mxu1 %v13885_v55  ;;  %v13972_v54 = vld [vmem:[%s15655_s0 + $0x560] ss:$16 sps:$4 sm:$0xff]   ;;  %v13975_v55 = vld [vmem:[%s15655_s0 + $0x568] ss:$16 sps:$4 sm:$0xff]  }
 0x4b2   : > { %5653 = vmatprep.subr.bf16.mxu0 %v13890_v56  ;;  %5865 = vmatprep.subr.bf16.mxu1 %v13893_v57  ;;  %v13980_v56 = vld [vmem:[%s15655_s0 + $0x584] ss:$16 sps:$4 sm:$0xff]   ;;  %v13983_v57 = vld [vmem:[%s15655_s0 + $0x58c] ss:$16 sps:$4 sm:$0xff]  }
 0x4b5   : > { %5654 = vmatpush1.bf16.msra.mxu0 %v13888_v58  ;;  %5866 = vmatpush1.bf16.msra.mxu1 %v13891_v59  ;;  %v13978_v58 = vld [vmem:[%s15655_s0 + $0x580] ss:$16 sps:$4 sm:$0xff]   ;;  %v13981_v59 = vld [vmem:[%s15655_s0 + $0x588] ss:$16 sps:$4 sm:$0xff]  }
 0x4b6   : > { %5655 = vmatprep.subr.bf16.mxu0 %v13896_v63  ;;  %5867 = vmatprep.subr.bf16.mxu1 %v13899_v3  ;;  %v13986_v63 = vld [vmem:[%s15655_s0 + $0x5a4] ss:$16 sps:$4 sm:$0xff]   ;;  %v13989_v3 = vld [vmem:[%s15655_s0 + $0x5ac] ss:$16 sps:$4 sm:$0xff]  }
 0x4b9   : > { %5656 = vmatpush1.bf16.msra.mxu0 %v13894_v5  ;;  %5868 = vmatpush1.bf16.msra.mxu1 %v13897_v11  ;;  %v13984_v5 = vld [vmem:[%s15655_s0 + $0x5a0] ss:$16 sps:$4 sm:$0xff]   ;;  %v13987_v11 = vld [vmem:[%s15655_s0 + $0x5a8] ss:$16 sps:$4 sm:$0xff]  }
 0x4ba   : > { %5657 = vmatprep.subr.bf16.mxu0 %v13902_v12  ;;  %5869 = vmatprep.subr.bf16.mxu1 %v13905_v13  ;;  %v13992_v12 = vld [vmem:[%s15655_s0 + $0x5c4] ss:$16 sps:$4 sm:$0xff]   ;;  %v13995_v13 = vld [vmem:[%s15655_s0 + $0x5cc] ss:$16 sps:$4 sm:$0xff]  }
 0x4bd   : > { %5658 = vmatpush1.bf16.msra.mxu0 %v13900_v14  ;;  %5870 = vmatpush1.bf16.msra.mxu1 %v13903_v15  ;;  %v13990_v14 = vld [vmem:[%s15655_s0 + $0x5c0] ss:$16 sps:$4 sm:$0xff]   ;;  %v13993_v15 = vld [vmem:[%s15655_s0 + $0x5c8] ss:$16 sps:$4 sm:$0xff]  }
 0x4be   : > { %5680 = vmatprep.subr.bf16.mxu0 %v13908_v16  ;;  %5892 = vmatprep.subr.bf16.mxu1 %v13911_v42  ;;  %v13998_v16 = vld [vmem:[%s15655_s0 + $0x5e4] ss:$16 sps:$4 sm:$0xff]   ;;  %v14001_v42 = vld [vmem:[%s15655_s0 + $0x5ec] ss:$16 sps:$4 sm:$0xff]  }
 0x4c0   : > { %5660 = vmatmul.mubr.bf16.vlgmr.msra.gmra.mrb[0].mxu0 %v4002_v28  ;;  %5872 = vmatmul.mubr.bf16.vlgmr.msra.gmra.mrb[0].mxu1 %v4002_v28  ;;  %v14004_v28 = vld [vmem:[%s15655_s0 + $0x604] ss:$16 sps:$4 sm:$0xff]  }
 0x4c1   : > { %5681 = vmatpush1.bf16.msra.mxu0 %v13906_v43  ;;  %5893 = vmatpush1.bf16.msra.mxu1 %v13909_v17  ;;  %v13996_v43 = vld [vmem:[%s15655_s0 + $0x5e0] ss:$16 sps:$4 sm:$0xff]   ;;  %v13999_v17 = vld [vmem:[%s15655_s0 + $0x5e8] ss:$16 sps:$4 sm:$0xff]  }
 0x4c2   : > { %5682 = vmatprep.subr.bf16.mxu0 %v13914_v25  ;;  %5894 = vmatprep.subr.bf16.mxu1 %v13917_v41  ;;  %v14007_v25 = vld [vmem:[%s15655_s0 + $0x60c] ss:$16 sps:$4 sm:$0xff]   ;;  %v14002_v41 = vld [vmem:[%s15655_s0 + $0x600] ss:$16 sps:$4 sm:$0xff]  }
 0x4c3   : > { %5669 = vmatprep.mubr.bf16.mxu0 %v4011_v18  ;;  %5881 = vmatprep.mubr.bf16.mxu1 %v4011_v18  ;;  %v4004_v18 = vld [vmem:[#allocation2 + $0x20] sm:$0xff] }
 0x4c5   : > { %5683 = vmatpush1.bf16.msra.mxu0 %v13912_v7  ;;  %5895 = vmatpush1.bf16.msra.mxu1 %v13915_v10  ;;  %v14005_v7 = vld [vmem:[%s15655_s0 + $0x608] ss:$16 sps:$4 sm:$0xff]   ;;  %v14010_v10 = vld [vmem:[%s15655_s0 + $0x624] ss:$16 sps:$4 sm:$0xff]  }
 0x4c6   : > { %5684 = vmatprep.subr.bf16.mxu0 %v13920_v19  ;;  %5896 = vmatprep.subr.bf16.mxu1 %v13923_v23  ;;  %v14013_v19 = vld [vmem:[%s15655_s0 + $0x62c] ss:$16 sps:$4 sm:$0xff]  }
 0x4c7   : > { %v4013_v23 = vld [vmem:[#allocation2 + $0x68] sm:$0xff] }
 0x4c8   : > { %5670 = vmatmul.mubr.bf16.gmra.mrb[4].mxu0 %v4010_v21  ;;  %5882 = vmatmul.mubr.bf16.gmra.mrb[4].mxu1 %v4010_v21  ;;  %v14016_v21 = vld [vmem:[%s15655_s0 + $0x644] ss:$16 sps:$4 sm:$0xff]  }
 0x4c9   : > { %5685 = vmatpush1.bf16.msra.mxu0 %v13918_v20  ;;  %5897 = vmatpush1.bf16.msra.mxu1 %v13921_v8  ;;  %v14008_v20 = vld [vmem:[%s15655_s0 + $0x620] ss:$16 sps:$4 sm:$0xff]   ;;  %v14011_v8 = vld [vmem:[%s15655_s0 + $0x628] ss:$16 sps:$4 sm:$0xff]  }
 0x4ca   : > { %5686 = vmatprep.subr.bf16.mxu0 %v13926_v22  ;;  %5898 = vmatprep.subr.bf16.mxu1 %v13929_v29  ;;  %v14019_v22 = vld [vmem:[%s15655_s0 + $0x64c] ss:$16 sps:$4 sm:$0xff]   ;;  %v14014_v29 = vld [vmem:[%s15655_s0 + $0x640] ss:$16 sps:$4 sm:$0xff]  }
 0x4cb   : > { %5712 = vmatprep.mubr.bf16.mxu0 %v4005_v9  ;;  %5924 = vmatprep.mubr.bf16.mxu1 %v4005_v9  ;;  %v14017_v9 = vld [vmem:[%s15655_s0 + $0x648] ss:$16 sps:$4 sm:$0xff]  }
 0x4cd   : > { %5687 = vmatpush1.bf16.msra.mxu0 %v13924_v4  ;;  %5899 = vmatpush1.bf16.msra.mxu1 %v13927_v60  ;;  %v4012_v4 = vld [vmem:[#allocation2 + $0x60] sm:$0xff] }
 0x4ce   : > { %5688 = vmatprep.subr.bf16.mxu0 %v13932_v31  ;;  %5900 = vmatprep.subr.bf16.mxu1 %v13935_v1  ;;  %v14022_v60 = vld [vmem:[%s15655_s0 + $0x664] ss:$16 sps:$4 sm:$0xff]   ;;  %v14025_v31 = vld [vmem:[%s15655_s0 + $0x66c] ss:$16 sps:$4 sm:$0xff]  }
 0x4cf   : > { %v4007_v1 = vld [vmem:[#allocation2 + $0x38] sm:$0xff] }
 0x4d1   : > { %5689 = vmatpush1.bf16.msra.mxu0 %v13930_v6  ;;  %5901 = vmatpush1.bf16.msra.mxu1 %v13933_v62  ;;  %v14020_v6 = vld [vmem:[%s15655_s0 + $0x660] ss:$16 sps:$4 sm:$0xff]   ;;  %v14023_v62 = vld [vmem:[%s15655_s0 + $0x668] ss:$16 sps:$4 sm:$0xff]  }
 0x4d2   : > { %5690 = vmatprep.subr.bf16.mxu0 %v13938_v0  ;;  %5902 = vmatprep.subr.bf16.mxu1 %v13941_v2  ;;  %v14028_v0 = vld [vmem:[%s15655_s0 + $0x684] ss:$16 sps:$4 sm:$0xff]   ;;  %v14031_v2 = vld [vmem:[%s15655_s0 + $0x68c] ss:$16 sps:$4 sm:$0xff]  }
 0x4d5   : > { %5691 = vmatpush1.bf16.msra.mxu0 %v13936_v24  ;;  %5903 = vmatpush1.bf16.msra.mxu1 %v13939_v61  ;;  %v14026_v24 = vld [vmem:[%s15655_s0 + $0x680] ss:$16 sps:$4 sm:$0xff]   ;;  %v14029_v61 = vld [vmem:[%s15655_s0 + $0x688] ss:$16 sps:$4 sm:$0xff]  }
 0x4d6   : > { %5692 = vmatprep.subr.bf16.mxu0 %v13944_v26  ;;  %5904 = vmatprep.subr.bf16.mxu1 %v13947_v27  ;;  %v14034_v26 = vld [vmem:[%s15655_s0 + $0x6a4] ss:$16 sps:$4 sm:$0xff]   ;;  %v14037_v27 = vld [vmem:[%s15655_s0 + $0x6ac] ss:$16 sps:$4 sm:$0xff]  }
 0x4d9   : > { %5693 = vmatpush1.bf16.msra.mxu0 %v13942_v30  ;;  %5905 = vmatpush1.bf16.msra.mxu1 %v13945_v44  ;;  %v14032_v30 = vld [vmem:[%s15655_s0 + $0x6a0] ss:$16 sps:$4 sm:$0xff]   ;;  %v14035_v44 = vld [vmem:[%s15655_s0 + $0x6a8] ss:$16 sps:$4 sm:$0xff]  }
 0x4da   : > { %5694 = vmatprep.subr.bf16.mxu0 %v13950_v32  ;;  %5906 = vmatprep.subr.bf16.mxu1 %v13953_v33  ;;  %v14040_v32 = vld [vmem:[%s15655_s0 + $0x6c4] ss:$16 sps:$4 sm:$0xff]   ;;  %v14043_v33 = vld [vmem:[%s15655_s0 + $0x6cc] ss:$16 sps:$4 sm:$0xff]  }
 0x4dd   : > { %5695 = vmatpush1.bf16.msra.mxu0 %v13948_v34  ;;  %5907 = vmatpush1.bf16.msra.mxu1 %v13951_v35  ;;  %v14038_v34 = vld [vmem:[%s15655_s0 + $0x6c0] ss:$16 sps:$4 sm:$0xff]   ;;  %v14041_v35 = vld [vmem:[%s15655_s0 + $0x6c8] ss:$16 sps:$4 sm:$0xff]  }
 0x4de   : > { %5696 = vmatprep.subr.bf16.mxu0 %v13956_v36  ;;  %5908 = vmatprep.subr.bf16.mxu1 %v13959_v37  ;;  %v14046_v36 = vld [vmem:[%s15655_s0 + $0x6e4] ss:$16 sps:$4 sm:$0xff]   ;;  %v14049_v37 = vld [vmem:[%s15655_s0 + $0x6ec] ss:$16 sps:$4 sm:$0xff]  }
 0x4e1   : > { %5697 = vmatpush1.bf16.msra.mxu0 %v13954_v38  ;;  %5909 = vmatpush1.bf16.msra.mxu1 %v13957_v39  ;;  %v14044_v38 = vld [vmem:[%s15655_s0 + $0x6e0] ss:$16 sps:$4 sm:$0xff]   ;;  %v14047_v39 = vld [vmem:[%s15655_s0 + $0x6e8] ss:$16 sps:$4 sm:$0xff]  }
 0x4e2   : > { %5698 = vmatprep.subr.bf16.mxu0 %v13962_v40  ;;  %5910 = vmatprep.subr.bf16.mxu1 %v13965_v45  ;;  %v14052_v40 = vld [vmem:[%s15655_s0 + $0x704] ss:$16 sps:$4 sm:$0xff]   ;;  %v14055_v45 = vld [vmem:[%s15655_s0 + $0x70c] ss:$16 sps:$4 sm:$0xff]  }
 0x4e5   : > { %5699 = vmatpush1.bf16.msra.mxu0 %v13960_v46  ;;  %5911 = vmatpush1.bf16.msra.mxu1 %v13963_v47  ;;  %v14050_v46 = vld [vmem:[%s15655_s0 + $0x700] ss:$16 sps:$4 sm:$0xff]   ;;  %v14053_v47 = vld [vmem:[%s15655_s0 + $0x708] ss:$16 sps:$4 sm:$0xff]  }
 0x4e6   : > { %5700 = vmatprep.subr.bf16.mxu0 %v13968_v48  ;;  %5912 = vmatprep.subr.bf16.mxu1 %v13971_v49  ;;  %v14058_v48 = vld [vmem:[%s15655_s0 + $0x724] ss:$16 sps:$4 sm:$0xff]   ;;  %v14061_v49 = vld [vmem:[%s15655_s0 + $0x72c] ss:$16 sps:$4 sm:$0xff]  }
 0x4e9   : > { %5701 = vmatpush1.bf16.msra.mxu0 %v13966_v50  ;;  %5913 = vmatpush1.bf16.msra.mxu1 %v13969_v51  ;;  %v14056_v50 = vld [vmem:[%s15655_s0 + $0x720] ss:$16 sps:$4 sm:$0xff]   ;;  %v14059_v51 = vld [vmem:[%s15655_s0 + $0x728] ss:$16 sps:$4 sm:$0xff]  }
 0x4ea   : > { %5702 = vmatprep.subr.bf16.mxu0 %v13974_v52  ;;  %5914 = vmatprep.subr.bf16.mxu1 %v13977_v53  ;;  %v14064_v52 = vld [vmem:[%s15655_s0 + $0x744] ss:$16 sps:$4 sm:$0xff]   ;;  %v14067_v53 = vld [vmem:[%s15655_s0 + $0x74c] ss:$16 sps:$4 sm:$0xff]  }
 0x4ed   : > { %5703 = vmatpush1.bf16.msra.mxu0 %v13972_v54  ;;  %5915 = vmatpush1.bf16.msra.mxu1 %v13975_v55  ;;  %v14062_v54 = vld [vmem:[%s15655_s0 + $0x740] ss:$16 sps:$4 sm:$0xff]   ;;  %v14065_v55 = vld [vmem:[%s15655_s0 + $0x748] ss:$16 sps:$4 sm:$0xff]  }
 0x4ee   : > { %5704 = vmatprep.subr.bf16.mxu0 %v13980_v56  ;;  %5916 = vmatprep.subr.bf16.mxu1 %v13983_v57  ;;  %v14070_v56 = vld [vmem:[%s15655_s0 + $0x764] ss:$16 sps:$4 sm:$0xff]   ;;  %v14073_v57 = vld [vmem:[%s15655_s0 + $0x76c] ss:$16 sps:$4 sm:$0xff]  }
 0x4f1   : > { %5705 = vmatpush1.bf16.msra.mxu0 %v13978_v58  ;;  %5917 = vmatpush1.bf16.msra.mxu1 %v13981_v59  ;;  %v14068_v58 = vld [vmem:[%s15655_s0 + $0x760] ss:$16 sps:$4 sm:$0xff]   ;;  %v14071_v59 = vld [vmem:[%s15655_s0 + $0x768] ss:$16 sps:$4 sm:$0xff]  }
 0x4f2   : > { %5706 = vmatprep.subr.bf16.mxu0 %v13986_v63  ;;  %5918 = vmatprep.subr.bf16.mxu1 %v13989_v3  ;;  %v14076_v63 = vld [vmem:[%s15655_s0 + $0x784] ss:$16 sps:$4 sm:$0xff]   ;;  %v14079_v3 = vld [vmem:[%s15655_s0 + $0x78c] ss:$16 sps:$4 sm:$0xff]  }
 0x4f5   : > { %5707 = vmatpush1.bf16.msra.mxu0 %v13984_v5  ;;  %5919 = vmatpush1.bf16.msra.mxu1 %v13987_v11  ;;  %v14074_v5 = vld [vmem:[%s15655_s0 + $0x780] ss:$16 sps:$4 sm:$0xff]   ;;  %v14077_v11 = vld [vmem:[%s15655_s0 + $0x788] ss:$16 sps:$4 sm:$0xff]  }
 0x4f6   : > { %5708 = vmatprep.subr.bf16.mxu0 %v13992_v12  ;;  %5920 = vmatprep.subr.bf16.mxu1 %v13995_v13  ;;  %v14082_v12 = vld [vmem:[%s15655_s0 + $0x7a4] ss:$16 sps:$4 sm:$0xff]   ;;  %v14085_v13 = vld [vmem:[%s15655_s0 + $0x7ac] ss:$16 sps:$4 sm:$0xff]  }
 0x4f9   : > { %5709 = vmatpush1.bf16.msra.mxu0 %v13990_v14  ;;  %5921 = vmatpush1.bf16.msra.mxu1 %v13993_v15  ;;  %v14080_v14 = vld [vmem:[%s15655_s0 + $0x7a0] ss:$16 sps:$4 sm:$0xff]   ;;  %v14083_v15 = vld [vmem:[%s15655_s0 + $0x7a8] ss:$16 sps:$4 sm:$0xff]  }
 0x4fa   : > { %5710 = vmatprep.subr.bf16.mxu0 %v13998_v16  ;;  %5922 = vmatprep.subr.bf16.mxu1 %v14001_v42  ;;  %v14088_v16 = vld [vmem:[%s15655_s0 + $0x7c4] ss:$16 sps:$4 sm:$0xff]   ;;  %v14091_v42 = vld [vmem:[%s15655_s0 + $0x7cc] ss:$16 sps:$4 sm:$0xff]  }
 0x4fd   : > { %5711 = vmatpush1.bf16.msra.mxu0 %v13996_v43  ;;  %5923 = vmatpush1.bf16.msra.mxu1 %v13999_v17  ;;  %v14086_v43 = vld [vmem:[%s15655_s0 + $0x7c0] ss:$16 sps:$4 sm:$0xff]   ;;  %v14089_v17 = vld [vmem:[%s15655_s0 + $0x7c8] ss:$16 sps:$4 sm:$0xff]  }
 0x4fe   : > { %5733 = vmatprep.subr.bf16.mxu0 %v14004_v28  ;;  %5945 = vmatprep.subr.bf16.mxu1 %v14007_v25  ;;  %v14094_v28 = vld [vmem:[%s15655_s0 + $0x7e4] ss:$16 sps:$4 sm:$0xff]   ;;  %v14097_v25 = vld [vmem:[%s15655_s0 + $0x7ec] ss:$16 sps:$4 sm:$0xff]  }
 0x500   : > { %5713 = vmatmul.mubr.bf16.vlgmr.msra.gmra.mrb[0].mxu0 %v4004_v18  ;;  %5925 = vmatmul.mubr.bf16.vlgmr.msra.gmra.mrb[0].mxu1 %v4004_v18  ;;  %v4006_v18 = vld [vmem:[#allocation2 + $0x30] sm:$0xff] }
 0x501   : > { %5734 = vmatpush1.bf16.msra.mxu0 %v14002_v41  ;;  %5946 = vmatpush1.bf16.msra.mxu1 %v14005_v7  ;;  %v14092_v41 = vld [vmem:[%s15655_s0 + $0x7e0] ss:$16 sps:$4 sm:$0xff]   ;;  %v14095_v7 = vld [vmem:[%s15655_s0 + $0x7e8] ss:$16 sps:$4 sm:$0xff]  }
 0x502   : > { %5735 = vmatprep.subr.bf16.mxu0 %v14010_v10  ;;  %5947 = vmatprep.subr.bf16.mxu1 %v14013_v19  ;;  %v4015_v10 = vld [vmem:[#allocation2 + $0x78] sm:$0xff]  ;;  %v4014_v19 = vld [vmem:[#allocation2 + $0x70] sm:$0xff] }
 0x503   : > { %5722 = vmatprep.mubr.bf16.mxu0 %v4013_v23  ;;  %5934 = vmatprep.mubr.bf16.mxu1 %v4013_v23  ;;  %v4274_v23 = vlaneseq }
 0x505   : > { %5736 = vmatpush1.bf16.msra.mxu0 %v14008_v20  ;;  %5948 = vmatpush1.bf16.msra.mxu1 %v14011_v8  ;;  %v4275_v20 = vshrl.u32 %v4274_v23, 7 }
 0x506   : > { %5737 = vmatprep.subr.bf16.mxu0 %v14016_v21  ;;  %5949 = vmatprep.subr.bf16.mxu1 %v14019_v22  ;;  %v4272_v22 = vld [vmem:[%s19315_s25] sm:$0xf] }
 0x507   : > { %v4276_v8 = vsub.s32 0, %v4275_v20  ;;  %v4284_v21 = vsub.s32 2, %v4275_v20 }
 0x508   : > { %5723 = vmatmul.mubr.bf16.gmra.mrb[4].mxu0 %v4012_v4  ;;  %5935 = vmatmul.mubr.bf16.gmra.mrb[4].mxu1 %v4012_v4 }
 0x509   : > { %5738 = vmatpush1.bf16.msra.mxu0 %v14014_v29  ;;  %5950 = vmatpush1.bf16.msra.mxu1 %v14017_v9  ;;  %v4280_v29 = vsub.s32 1, %v4275_v20  ;;  %v4288_v9 = vsub.s32 3, %v4275_v20  ;;  %v4277_v4 = vrot.slane %v4272_v22, %v4276_v8 }
 0x50a   : > { %5739 = vmatprep.subr.bf16.mxu0 %v14022_v60  ;;  %5951 = vmatprep.subr.bf16.mxu1 %v14025_v31  ;;  %v4285_v60 = vrot.slane %v4272_v22, %v4284_v21 }
 0x50b   : > { %5765 = vmatprep.mubr.bf16.mxu0 %v4007_v1  ;;  %5977 = vmatprep.mubr.bf16.mxu1 %v4007_v1  ;;  %v4281_v31 = vrot.slane %v4272_v22, %v4280_v29  ;;  %v4289_v1 = vrot.slane %v4272_v22, %v4288_v9 }
 0x50d   : > { %5740 = vmatpush1.bf16.msra.mxu0 %v14020_v6  ;;  %5952 = vmatpush1.bf16.msra.mxu1 %v14023_v62 }
 0x50e   : > { %5741 = vmatprep.subr.bf16.mxu0 %v14028_v0  ;;  %5953 = vmatprep.subr.bf16.mxu1 %v14031_v2 }
 0x511   : > { %5742 = vmatpush1.bf16.msra.mxu0 %v14026_v24  ;;  %5954 = vmatpush1.bf16.msra.mxu1 %v14029_v61 }
 0x512   : > { %5743 = vmatprep.subr.bf16.mxu0 %v14034_v26  ;;  %5955 = vmatprep.subr.bf16.mxu1 %v14037_v27 }
 0x515   : > { %5744 = vmatpush1.bf16.msra.mxu0 %v14032_v30  ;;  %5956 = vmatpush1.bf16.msra.mxu1 %v14035_v44 }
 0x516   : > { %5745 = vmatprep.subr.bf16.mxu0 %v14040_v32  ;;  %5957 = vmatprep.subr.bf16.mxu1 %v14043_v33 }
 0x519   : > { %5746 = vmatpush1.bf16.msra.mxu0 %v14038_v34  ;;  %5958 = vmatpush1.bf16.msra.mxu1 %v14041_v35 }
 0x51a   : > { %5747 = vmatprep.subr.bf16.mxu0 %v14046_v36  ;;  %5959 = vmatprep.subr.bf16.mxu1 %v14049_v37 }
 0x51d   : > { %5748 = vmatpush1.bf16.msra.mxu0 %v14044_v38  ;;  %5960 = vmatpush1.bf16.msra.mxu1 %v14047_v39 }
 0x51e   : > { %5749 = vmatprep.subr.bf16.mxu0 %v14052_v40  ;;  %5961 = vmatprep.subr.bf16.mxu1 %v14055_v45 }
 0x521   : > { %5750 = vmatpush1.bf16.msra.mxu0 %v14050_v46  ;;  %5962 = vmatpush1.bf16.msra.mxu1 %v14053_v47 }
 0x522   : > { %5751 = vmatprep.subr.bf16.mxu0 %v14058_v48  ;;  %5963 = vmatprep.subr.bf16.mxu1 %v14061_v49 }
 0x525   : > { %5752 = vmatpush1.bf16.msra.mxu0 %v14056_v50  ;;  %5964 = vmatpush1.bf16.msra.mxu1 %v14059_v51 }
 0x526   : > { %5753 = vmatprep.subr.bf16.mxu0 %v14064_v52  ;;  %5965 = vmatprep.subr.bf16.mxu1 %v14067_v53 }
 0x529   : > { %5754 = vmatpush1.bf16.msra.mxu0 %v14062_v54  ;;  %5966 = vmatpush1.bf16.msra.mxu1 %v14065_v55 }
 0x52a   : > { %5755 = vmatprep.subr.bf16.mxu0 %v14070_v56  ;;  %5967 = vmatprep.subr.bf16.mxu1 %v14073_v57 }
 0x52d   : > { %5756 = vmatpush1.bf16.msra.mxu0 %v14068_v58  ;;  %5968 = vmatpush1.bf16.msra.mxu1 %v14071_v59 }
 0x52e   : > { %5757 = vmatprep.subr.bf16.mxu0 %v14076_v63  ;;  %5969 = vmatprep.subr.bf16.mxu1 %v14079_v3 }
 0x531   : > { %5758 = vmatpush1.bf16.msra.mxu0 %v14074_v5  ;;  %5970 = vmatpush1.bf16.msra.mxu1 %v14077_v11 }
 0x532   : > { %5759 = vmatprep.subr.bf16.mxu0 %v14082_v12  ;;  %5971 = vmatprep.subr.bf16.mxu1 %v14085_v13 }
 0x535   : > { %5760 = vmatpush1.bf16.msra.mxu0 %v14080_v14  ;;  %5972 = vmatpush1.bf16.msra.mxu1 %v14083_v15 }
 0x536   : > { %5761 = vmatprep.subr.bf16.mxu0 %v14088_v16  ;;  %5973 = vmatprep.subr.bf16.mxu1 %v14091_v42 }
 0x539   : > { %5762 = vmatpush1.bf16.msra.mxu0 %v14086_v43  ;;  %5974 = vmatpush1.bf16.msra.mxu1 %v14089_v17 }
 0x53a   : > { %5763 = vmatprep.subr.bf16.mxu0 %v14094_v28  ;;  %5975 = vmatprep.subr.bf16.mxu1 %v14097_v25 }
 0x53d   : > { %5764 = vmatpush1.bf16.msra.mxu0 %v14092_v41  ;;  %5976 = vmatpush1.bf16.msra.mxu1 %v14095_v7 }
 0x540   : > { %5766 = vmatmul.mubr.bf16.vlgmr.msra.gmra.mrb[0].mxu0 %v4006_v18  ;;  %5978 = vmatmul.mubr.bf16.vlgmr.msra.gmra.mrb[0].mxu1 %v4006_v18 }
 0x541   : > { %5775 = vmatprep.mubr.bf16.mxu0 %v4015_v10  ;;  %5987 = vmatprep.mubr.bf16.mxu1 %v4015_v10 }
 0x548   : > { %5776 = vmatmul.mubr.bf16.gmra.mrb[4].mxu0 %v4014_v19  ;;  %5988 = vmatmul.mubr.bf16.gmra.mrb[4].mxu1 %v4014_v19 }
 0x613   : > { %v5767_v6 = vpop.f32.mrb[0].mxu0  ;;  %v5979_v62 = vpop.f32.mrb[0].mxu1 }
 0x614   : > { %v13365_v0 = vadd.f32 %v5767_v6, %v4277_v4  ;;  %v13373_v2 = vadd.f32 %v5979_v62, %v4285_v60  ;;  %v5769_v24 = vpop.f32.mrb[1].mxu0  ;;  %v5981_v61 = vpop.f32.mrb[1].mxu1 }
 0x615   : > { %v13366_v26 = vadd.f32 %v5769_v24, %v4281_v31  ;;  %v13374_v27 = vadd.f32 %v5981_v61, %v4289_v1  ;;  %v5771_v30 = vpop.f32.mrb[2].mxu0  ;;  %v5983_v44 = vpop.f32.mrb[2].mxu1 }
 0x616   : > { %v13367_v32 = vadd.f32 %v5771_v30, %v4277_v4  ;;  %v13375_v33 = vadd.f32 %v5983_v44, %v4285_v60  ;;  %v5773_v34 = vpop.f32.mrb[3].mxu0  ;;  %v5985_v35 = vpop.f32.mrb[3].mxu1  ;;  %v5998_v38 = vmax.f32 %v13365_v0, 0.0  ;;  %v6000_v39 = vmax.f32 %v13373_v2, 0.0 }
 0x617   : > { %v13368_v36 = vadd.f32 %v5773_v34, %v4281_v31  ;;  %v13376_v37 = vadd.f32 %v5985_v35, %v4289_v1  ;;  %v5999_v46 = vmax.f32 %v13366_v26, 0.0  ;;  %v6001_v47 = vmax.f32 %v13374_v27, 0.0 }
 0x618   : > { %v6002_v40 = vmax.f32 %v13367_v32, 0.0  ;;  %v6004_v45 = vmax.f32 %v13375_v33, 0.0 }
 0x619   : > { %v6003_v48 = vmax.f32 %v13368_v36, 0.0  ;;  %v6005_v49 = vmax.f32 %v13376_v37, 0.0 }
 0x61a   : > { %v6014_v50 = vpack.c.bf16 %v6002_v40, %v5998_v38  ;;  %v6016_v51 = vpack.c.bf16 %v6004_v45, %v6000_v39 }
 0x61b   : > { %v6015_v52 = vpack.c.bf16 %v6003_v48, %v5999_v46  ;;  %v6017_v53 = vpack.c.bf16 %v6005_v49, %v6001_v47  ;;  %v5777_v54 = vpop.f32.mrb[4].mxu0  ;;  %v5989_v55 = vpop.f32.mrb[4].mxu1 }
 0x61c   : > { %6026 = vst [vmem:[%s17061_s23] sm:$0xff] %v6014_v50  ;;  %6028 = vst [vmem:[%s17061_s23 + $0x10] sm:$0xff] %v6016_v51  ;;  %v13369_v56 = vadd.f32 %v5777_v54, %v4277_v4  ;;  %v13377_v57 = vadd.f32 %v5989_v55, %v4285_v60  ;;  %v5779_v58 = vpop.f32.mrb[5].mxu0  ;;  %v5991_v59 = vpop.f32.mrb[5].mxu1 }
 0x61d   : > { %6027 = vst [vmem:[%s17061_s23 + $0x8] sm:$0xff] %v6015_v52  ;;  %6029 = vst [vmem:[%s17061_s23 + $0x18] sm:$0xff] %v6017_v53  ;;  %v13370_v63 = vadd.f32 %v5779_v58, %v4281_v31  ;;  %v13378_v3 = vadd.f32 %v5991_v59, %v4289_v1  ;;  %v5781_v5 = vpop.f32.mrb[6].mxu0  ;;  %v5993_v11 = vpop.f32.mrb[6].mxu1 }
 0x61e   : > { %v13371_v12 = vadd.f32 %v5781_v5, %v4277_v4  ;;  %v13379_v13 = vadd.f32 %v5993_v11, %v4285_v60  ;;  %v5783_v14 = vpop.f32.mrb[7].mxu0  ;;  %v5995_v15 = vpop.f32.mrb[7].mxu1  ;;  %v6006_v43 = vmax.f32 %v13369_v56, 0.0  ;;  %v6008_v17 = vmax.f32 %v13377_v57, 0.0 }
 0x61f   : > { %v13372_v16 = vadd.f32 %v5783_v14, %v4281_v31  ;;  %v13380_v42 = vadd.f32 %v5995_v15, %v4289_v1  ;;  %v6007_v41 = vmax.f32 %v13370_v63, 0.0  ;;  %v6009_v7 = vmax.f32 %v13378_v3, 0.0 }
 0x620   : > { %v6010_v28 = vmax.f32 %v13371_v12, 0.0  ;;  %v6012_v25 = vmax.f32 %v13379_v13, 0.0 }
 0x621   : > { %v6011_v18 = vmax.f32 %v13372_v16, 0.0  ;;  %v6013_v10 = vmax.f32 %v13380_v42, 0.0 }
 0x622   : > { %v6018_v19 = vpack.c.bf16 %v6010_v28, %v6006_v43  ;;  %v6020_v23 = vpack.c.bf16 %v6012_v25, %v6008_v17 }
 0x623   : > { %v6019_v20 = vpack.c.bf16 %v6011_v18, %v6007_v41  ;;  %v6021_v8 = vpack.c.bf16 %v6013_v10, %v6009_v7 }
 0x624   : > { %6030 = vst [vmem:[%s17061_s23 + $0x80] sm:$0xff] %v6018_v19  ;;  %6032 = vst [vmem:[%s17061_s23 + $0x90] sm:$0xff] %v6020_v23 }
 0x625   : > { %6031 = vst [vmem:[%s17061_s23 + $0x88] sm:$0xff] %v6019_v20  ;;  %6033 = vst [vmem:[%s17061_s23 + $0x98] sm:$0xff] %v6021_v8 }
 0x626 PF: > { %p12678_p5 = scmp.ne.s32.totalorder %s15103_s21, 5 }
 0x627   : > { %v14098_v21 = vld [vmem:[%s19282_s9 + $0x4] ss:$16 sps:$4 sm:$0xff] (!%p12678_p5)   ;;  %v14100_v22 = vld [vmem:[%s19282_s9 + $0xc] ss:$16 sps:$4 sm:$0xff] (!%p12678_p5)   ;;  %v14102_v29 = vld [vmem:[%s19282_s9] ss:$16 sps:$4 sm:$0xff] (!%p12678_p5)  }
 0x628   : > { %6037 = sbr.rel (%p12678_p5) target bundleno = 2869 (0xb35), region = 131  ;;  %9164 = vmatprep.subr.bf16.mxu0 (!%p12678_p5), %v14098_v21  ;;  %v14103_v9 = vld [vmem:[%s19282_s9 + $0x8] ss:$16 sps:$4 sm:$0xff] (!%p12678_p5)   ;;  %9588 = vmatprep.subr.bf16.mxu1 (!%p12678_p5), %v14100_v22  ;;  %v14104_v4 = vld [vmem:[%s19282_s9 + $0x24] ss:$16 sps:$4 sm:$0xff] (!%p12678_p5)   ;;  %vm10695_vm1 = vcmask (!%p12678_p5), 261120  }
 0x629   : > { %9165 = vmatpush1.bf16.msra.mxu0 (!%p12678_p5), %v14102_v29  ;;  %9589 = vmatpush1.bf16.msra.mxu1 (!%p12678_p5), %v14103_v9  ;;  %v14106_v60 = vld [vmem:[%s19282_s9 + $0x2c] ss:$16 sps:$4 sm:$0xff] (!%p12678_p5)   ;;  %v14108_v31 = vld [vmem:[%s19282_s9 + $0x20] ss:$16 sps:$4 sm:$0xff] (!%p12678_p5)   ;;  %v14109_v1 = vld [vmem:[%s19282_s9 + $0x28] ss:$16 sps:$4 sm:$0xff] (!%p12678_p5)  }
 0x62a   : > { %9166 = vmatprep.subr.bf16.mxu0 (!%p12678_p5), %v14104_v4  ;;  %9590 = vmatprep.subr.bf16.mxu1 (!%p12678_p5), %v14106_v60  ;;  %v14110_v6 = vld [vmem:[%s19282_s9 + $0x44] ss:$16 sps:$4 sm:$0xff] (!%p12678_p5)   ;;  %v14112_v62 = vld [vmem:[%s19282_s9 + $0x4c] ss:$16 sps:$4 sm:$0xff] (!%p12678_p5)   ;;  %v14114_v0 = vld [vmem:[%s19282_s9 + $0x40] ss:$16 sps:$4 sm:$0xff] (!%p12678_p5)  }
 0x62b   : > { %v14115_v2 = vld [vmem:[%s19282_s9 + $0x48] ss:$16 sps:$4 sm:$0xff] (!%p12678_p5)   ;;  %v14116_v24 = vld [vmem:[%s19282_s9 + $0x64] ss:$16 sps:$4 sm:$0xff] (!%p12678_p5)   ;;  %v14118_v61 = vld [vmem:[%s19282_s9 + $0x6c] ss:$16 sps:$4 sm:$0xff] (!%p12678_p5)  }
 0x62c   : > { %v14120_v26 = vld [vmem:[%s19282_s9 + $0x60] ss:$16 sps:$4 sm:$0xff] (!%p12678_p5)   ;;  %v14121_v27 = vld [vmem:[%s19282_s9 + $0x68] ss:$16 sps:$4 sm:$0xff] (!%p12678_p5)   ;;  %v14122_v30 = vld [vmem:[%s19282_s9 + $0x84] ss:$16 sps:$4 sm:$0xff] (!%p12678_p5)  }
 0x62d   : > { %9167 = vmatpush1.bf16.msra.mxu0 (!%p12678_p5), %v14108_v31  ;;  %9591 = vmatpush1.bf16.msra.mxu1 (!%p12678_p5), %v14109_v1  ;;  %v14124_v44 = vld [vmem:[%s19282_s9 + $0x8c] ss:$16 sps:$4 sm:$0xff] (!%p12678_p5)   ;;  %v14126_v32 = vld [vmem:[%s19282_s9 + $0x80] ss:$16 sps:$4 sm:$0xff] (!%p12678_p5)   ;;  %v14127_v33 = vld [vmem:[%s19282_s9 + $0x88] ss:$16 sps:$4 sm:$0xff] (!%p12678_p5)  }
 0x62e   : > { %9168 = vmatprep.subr.bf16.mxu0 (!%p12678_p5), %v14110_v6  ;;  %9592 = vmatprep.subr.bf16.mxu1 (!%p12678_p5), %v14112_v62  ;;  %v14128_v34 = vld [vmem:[%s19282_s9 + $0xa4] ss:$16 sps:$4 sm:$0xff] (!%p12678_p5)   ;;  %v14130_v35 = vld [vmem:[%s19282_s9 + $0xac] ss:$16 sps:$4 sm:$0xff] (!%p12678_p5)   ;;  %v14132_v36 = vld [vmem:[%s19282_s9 + $0xa0] ss:$16 sps:$4 sm:$0xff] (!%p12678_p5)  }
 0x62f   : > { %v14133_v37 = vld [vmem:[%s19282_s9 + $0xa8] ss:$16 sps:$4 sm:$0xff]   ;;  %v14134_v38 = vld [vmem:[%s19282_s9 + $0xc4] ss:$16 sps:$4 sm:$0xff]   ;;  %v14136_v39 = vld [vmem:[%s19282_s9 + $0xcc] ss:$16 sps:$4 sm:$0xff]  }
 0x630   : > { %v14138_v40 = vld [vmem:[%s19282_s9 + $0xc0] ss:$16 sps:$4 sm:$0xff]   ;;  %v14139_v45 = vld [vmem:[%s19282_s9 + $0xc8] ss:$16 sps:$4 sm:$0xff]   ;;  %v14140_v46 = vld [vmem:[%s19282_s9 + $0xe4] ss:$16 sps:$4 sm:$0xff]  }
 0x631   : > { %9169 = vmatpush1.bf16.msra.mxu0 %v14114_v0  ;;  %9593 = vmatpush1.bf16.msra.mxu1 %v14115_v2  ;;  %v14142_v47 = vld [vmem:[%s19282_s9 + $0xec] ss:$16 sps:$4 sm:$0xff]   ;;  %v14144_v48 = vld [vmem:[%s19282_s9 + $0xe0] ss:$16 sps:$4 sm:$0xff]   ;;  %v14145_v49 = vld [vmem:[%s19282_s9 + $0xe8] ss:$16 sps:$4 sm:$0xff]  }
 0x632   : > { %9170 = vmatprep.subr.bf16.mxu0 %v14116_v24  ;;  %9594 = vmatprep.subr.bf16.mxu1 %v14118_v61  ;;  %v14146_v50 = vld [vmem:[%s19282_s9 + $0x104] ss:$16 sps:$4 sm:$0xff]   ;;  %v14148_v51 = vld [vmem:[%s19282_s9 + $0x10c] ss:$16 sps:$4 sm:$0xff]   ;;  %v14150_v52 = vld [vmem:[%s19282_s9 + $0x100] ss:$16 sps:$4 sm:$0xff]  }
 0x633   : > { %v14151_v53 = vld [vmem:[%s19282_s9 + $0x108] ss:$16 sps:$4 sm:$0xff]   ;;  %v14152_v54 = vld [vmem:[%s19282_s9 + $0x124] ss:$16 sps:$4 sm:$0xff]   ;;  %v14154_v55 = vld [vmem:[%s19282_s9 + $0x12c] ss:$16 sps:$4 sm:$0xff]  }
 0x634   : > { %v14156_v56 = vld [vmem:[%s19282_s9 + $0x120] ss:$16 sps:$4 sm:$0xff]   ;;  %v14157_v57 = vld [vmem:[%s19282_s9 + $0x128] ss:$16 sps:$4 sm:$0xff]   ;;  %v14158_v58 = vld [vmem:[%s19282_s9 + $0x144] ss:$16 sps:$4 sm:$0xff]  }
 0x635   : > { %9171 = vmatpush1.bf16.msra.mxu0 %v14120_v26  ;;  %9595 = vmatpush1.bf16.msra.mxu1 %v14121_v27  ;;  %v14160_v59 = vld [vmem:[%s19282_s9 + $0x14c] ss:$16 sps:$4 sm:$0xff]   ;;  %v14162_v63 = vld [vmem:[%s19282_s9 + $0x140] ss:$16 sps:$4 sm:$0xff]   ;;  %v14163_v3 = vld [vmem:[%s19282_s9 + $0x148] ss:$16 sps:$4 sm:$0xff]  }
 0x636   : > { %9172 = vmatprep.subr.bf16.mxu0 %v14122_v30  ;;  %9596 = vmatprep.subr.bf16.mxu1 %v14124_v44  ;;  %v14164_v5 = vld [vmem:[%s19282_s9 + $0x164] ss:$16 sps:$4 sm:$0xff]   ;;  %v14166_v11 = vld [vmem:[%s19282_s9 + $0x16c] ss:$16 sps:$4 sm:$0xff]   ;;  %v14168_v13 = vld [vmem:[%s19282_s9 + $0x160] ss:$16 sps:$4 sm:$0xff]  }
 0x637   : > { %v6039_v12 = vld [vmem:[#allocation3 + $0x8] sm:$0xff]  ;;  %v14170_v15 = vld [vmem:[%s19282_s9 + $0x184] ss:$16 sps:$4 sm:$0xff]   ;;  %v14174_v42 = vld [vmem:[%s19282_s9 + $0x180] ss:$16 sps:$4 sm:$0xff]  }
 0x638   : > { %9196 = vmatprep.mubr.bf16.mxu0 %v6039_v12  ;;  %9620 = vmatprep.mubr.bf16.mxu1 %v6039_v12  ;;  %v14169_v14 = vld [vmem:[%s19282_s9 + $0x168] ss:$16 sps:$4 sm:$0xff]   ;;  %v14172_v16 = vld [vmem:[%s19282_s9 + $0x18c] ss:$16 sps:$4 sm:$0xff]   ;;  %v14176_v17 = vld [vmem:[%s19282_s9 + $0x1a4] ss:$16 sps:$4 sm:$0xff]  }
 0x639   : > { %9173 = vmatpush1.bf16.msra.mxu0 %v14126_v32  ;;  %9597 = vmatpush1.bf16.msra.mxu1 %v14127_v33  ;;  %v14175_v43 = vld [vmem:[%s19282_s9 + $0x188] ss:$16 sps:$4 sm:$0xff]   ;;  %v14178_v28 = vld [vmem:[%s19282_s9 + $0x1ac] ss:$16 sps:$4 sm:$0xff]   ;;  %v14180_v25 = vld [vmem:[%s19282_s9 + $0x1a0] ss:$16 sps:$4 sm:$0xff]  }
 0x63a   : > { %9174 = vmatprep.subr.bf16.mxu0 %v14128_v34  ;;  %9598 = vmatprep.subr.bf16.mxu1 %v14130_v35  ;;  %v14181_v41 = vld [vmem:[%s19282_s9 + $0x1a8] ss:$16 sps:$4 sm:$0xff]   ;;  %v14182_v7 = vld [vmem:[%s19282_s9 + $0x1c4] ss:$16 sps:$4 sm:$0xff]   ;;  %v14184_v18 = vld [vmem:[%s19282_s9 + $0x1cc] ss:$16 sps:$4 sm:$0xff]  }
 0x63b   : > { %v14186_v10 = vld [vmem:[%s19282_s9 + $0x1c0] ss:$16 sps:$4 sm:$0xff]   ;;  %v14187_v19 = vld [vmem:[%s19282_s9 + $0x1c8] ss:$16 sps:$4 sm:$0xff]   ;;  %v14188_v23 = vld [vmem:[%s19282_s9 + $0x1e4] ss:$16 sps:$4 sm:$0xff]  }
 0x63c   : > { %v14190_v20 = vld [vmem:[%s19282_s9 + $0x1ec] ss:$16 sps:$4 sm:$0xff]   ;;  %v14192_v8 = vld [vmem:[%s19282_s9 + $0x1e0] ss:$16 sps:$4 sm:$0xff]   ;;  %v14193_v21 = vld [vmem:[%s19282_s9 + $0x1e8] ss:$16 sps:$4 sm:$0xff]  }
 0x63d   : > { %9175 = vmatpush1.bf16.msra.mxu0 %v14132_v36  ;;  %9599 = vmatpush1.bf16.msra.mxu1 %v14133_v37  ;;  %v14196_v22 = vld [vmem:[%s19282_s9 + $0x204] ss:$16 sps:$4 sm:$0xff]   ;;  %v14199_v29 = vld [vmem:[%s19282_s9 + $0x20c] ss:$16 sps:$4 sm:$0xff]   ;;  %v14194_v9 = vld [vmem:[%s19282_s9 + $0x200] ss:$16 sps:$4 sm:$0xff]  }
 0x63e   : > { %9176 = vmatprep.subr.bf16.mxu0 %v14134_v38  ;;  %9600 = vmatprep.subr.bf16.mxu1 %v14136_v39  ;;  %v14197_v4 = vld [vmem:[%s19282_s9 + $0x208] ss:$16 sps:$4 sm:$0xff]   ;;  %v6038_v60 = vld [vmem:[#allocation3] sm:$0xff]  ;;  %v14205_v1 = vld [vmem:[%s19282_s9 + $0x22c] ss:$16 sps:$4 sm:$0xff]  }
 0x63f   : > { %v14202_v31 = vld [vmem:[%s19282_s9 + $0x224] ss:$16 sps:$4 sm:$0xff]   ;;  %v14200_v6 = vld [vmem:[%s19282_s9 + $0x220] ss:$16 sps:$4 sm:$0xff]   ;;  %v14203_v62 = vld [vmem:[%s19282_s9 + $0x228] ss:$16 sps:$4 sm:$0xff]  }
 0x640   : > { %v14208_v0 = vld [vmem:[%s19282_s9 + $0x244] ss:$16 sps:$4 sm:$0xff]   ;;  %v14211_v2 = vld [vmem:[%s19282_s9 + $0x24c] ss:$16 sps:$4 sm:$0xff]   ;;  %v14206_v24 = vld [vmem:[%s19282_s9 + $0x240] ss:$16 sps:$4 sm:$0xff]  }
 0x641   : > { %9177 = vmatpush1.bf16.msra.mxu0 %v14138_v40  ;;  %9601 = vmatpush1.bf16.msra.mxu1 %v14139_v45  ;;  %v14209_v61 = vld [vmem:[%s19282_s9 + $0x248] ss:$16 sps:$4 sm:$0xff]   ;;  %v14214_v26 = vld [vmem:[%s19282_s9 + $0x264] ss:$16 sps:$4 sm:$0xff]   ;;  %v14217_v27 = vld [vmem:[%s19282_s9 + $0x26c] ss:$16 sps:$4 sm:$0xff]  }
 0x642   : > { %9178 = vmatprep.subr.bf16.mxu0 %v14140_v46  ;;  %9602 = vmatprep.subr.bf16.mxu1 %v14142_v47  ;;  %v14212_v30 = vld [vmem:[%s19282_s9 + $0x260] ss:$16 sps:$4 sm:$0xff]   ;;  %v14215_v44 = vld [vmem:[%s19282_s9 + $0x268] ss:$16 sps:$4 sm:$0xff]   ;;  %v14220_v32 = vld [vmem:[%s19282_s9 + $0x284] ss:$16 sps:$4 sm:$0xff]  }
 0x643   : > { %v14223_v33 = vld [vmem:[%s19282_s9 + $0x28c] ss:$16 sps:$4 sm:$0xff]   ;;  %v14218_v34 = vld [vmem:[%s19282_s9 + $0x280] ss:$16 sps:$4 sm:$0xff]   ;;  %v14221_v35 = vld [vmem:[%s19282_s9 + $0x288] ss:$16 sps:$4 sm:$0xff]  }
 0x644   : > { %v14226_v36 = vld [vmem:[%s19282_s9 + $0x2a4] ss:$16 sps:$4 sm:$0xff]   ;;  %v6055_v37 = vld [vmem:[#allocation3 + $0x88] sm:$0xff]  ;;  %v14224_v39 = vld [vmem:[%s19282_s9 + $0x2a0] ss:$16 sps:$4 sm:$0xff]  }
 0x645   : > { %9179 = vmatpush1.bf16.msra.mxu0 %v14144_v48  ;;  %9603 = vmatpush1.bf16.msra.mxu1 %v14145_v49  ;;  %v14229_v38 = vld [vmem:[%s19282_s9 + $0x2ac] ss:$16 sps:$4 sm:$0xff]   ;;  %v14227_v40 = vld [vmem:[%s19282_s9 + $0x2a8] ss:$16 sps:$4 sm:$0xff]   ;;  %v6054_v45 = vld [vmem:[#allocation3 + $0x80] sm:$0xff] }
 0x646   : > { %9180 = vmatprep.subr.bf16.mxu0 %v14146_v50  ;;  %9604 = vmatprep.subr.bf16.mxu1 %v14148_v51  ;;  %v14232_v46 = vld [vmem:[%s19282_s9 + $0x2c4] ss:$16 sps:$4 sm:$0xff]   ;;  %v14235_v47 = vld [vmem:[%s19282_s9 + $0x2cc] ss:$16 sps:$4 sm:$0xff]   ;;  %v14230_v49 = vld [vmem:[%s19282_s9 + $0x2c0] ss:$16 sps:$4 sm:$0xff]  }
 0x647   : > { %v6041_v48 = vld [vmem:[#allocation3 + $0x18] sm:$0xff]  ;;  %v14238_v51 = vld [vmem:[%s19282_s9 + $0x2e4] ss:$16 sps:$4 sm:$0xff]  }
 0x648   : > { %v14233_v50 = vld [vmem:[%s19282_s9 + $0x2c8] ss:$16 sps:$4 sm:$0xff]   ;;  %v14259_v12 = vld [vmem:[%s19282_s9 + $0x34c] ss:$16 sps:$4 sm:$0xff]  }
 0x649   : > { %9181 = vmatpush1.bf16.msra.mxu0 %v14150_v52  ;;  %9605 = vmatpush1.bf16.msra.mxu1 %v14151_v53  ;;  %v14241_v52 = vld [vmem:[%s19282_s9 + $0x2ec] ss:$16 sps:$4 sm:$0xff]   ;;  %v14236_v53 = vld [vmem:[%s19282_s9 + $0x2e0] ss:$16 sps:$4 sm:$0xff]  }
 0x64a   : > { %9182 = vmatprep.subr.bf16.mxu0 %v14152_v54  ;;  %9606 = vmatprep.subr.bf16.mxu1 %v14154_v55  ;;  %v14239_v54 = vld [vmem:[%s19282_s9 + $0x2e8] ss:$16 sps:$4 sm:$0xff]   ;;  %v14244_v55 = vld [vmem:[%s19282_s9 + $0x304] ss:$16 sps:$4 sm:$0xff]  }
 0x64d   : > { %9183 = vmatpush1.bf16.msra.mxu0 %v14156_v56  ;;  %9607 = vmatpush1.bf16.msra.mxu1 %v14157_v57  ;;  %v14247_v56 = vld [vmem:[%s19282_s9 + $0x30c] ss:$16 sps:$4 sm:$0xff]   ;;  %v14242_v57 = vld [vmem:[%s19282_s9 + $0x300] ss:$16 sps:$4 sm:$0xff]  }
 0x64e   : > { %9184 = vmatprep.subr.bf16.mxu0 %v14158_v58  ;;  %9608 = vmatprep.subr.bf16.mxu1 %v14160_v59  ;;  %v14245_v58 = vld [vmem:[%s19282_s9 + $0x308] ss:$16 sps:$4 sm:$0xff]   ;;  %v14250_v59 = vld [vmem:[%s19282_s9 + $0x324] ss:$16 sps:$4 sm:$0xff]  }
 0x651   : > { %9185 = vmatpush1.bf16.msra.mxu0 %v14162_v63  ;;  %9609 = vmatpush1.bf16.msra.mxu1 %v14163_v3  ;;  %v14253_v63 = vld [vmem:[%s19282_s9 + $0x32c] ss:$16 sps:$4 sm:$0xff]   ;;  %v14248_v3 = vld [vmem:[%s19282_s9 + $0x320] ss:$16 sps:$4 sm:$0xff]  }
 0x652   : > { %9186 = vmatprep.subr.bf16.mxu0 %v14164_v5  ;;  %9610 = vmatprep.subr.bf16.mxu1 %v14166_v11  ;;  %v14251_v5 = vld [vmem:[%s19282_s9 + $0x328] ss:$16 sps:$4 sm:$0xff]   ;;  %v14256_v11 = vld [vmem:[%s19282_s9 + $0x344] ss:$16 sps:$4 sm:$0xff]  }
 0x655   : > { %9187 = vmatpush1.bf16.msra.mxu0 %v14168_v13  ;;  %9611 = vmatpush1.bf16.msra.mxu1 %v14169_v14  ;;  %v14254_v13 = vld [vmem:[%s19282_s9 + $0x340] ss:$16 sps:$4 sm:$0xff]   ;;  %v14257_v14 = vld [vmem:[%s19282_s9 + $0x348] ss:$16 sps:$4 sm:$0xff]  }
 0x656   : > { %9188 = vmatprep.subr.bf16.mxu0 %v14170_v15  ;;  %9612 = vmatprep.subr.bf16.mxu1 %v14172_v16  ;;  %v14262_v15 = vld [vmem:[%s19282_s9 + $0x364] ss:$16 sps:$4 sm:$0xff]   ;;  %v14265_v16 = vld [vmem:[%s19282_s9 + $0x36c] ss:$16 sps:$4 sm:$0xff]  }
 0x659   : > { %9189 = vmatpush1.bf16.msra.mxu0 %v14174_v42  ;;  %9613 = vmatpush1.bf16.msra.mxu1 %v14175_v43  ;;  %v14260_v42 = vld [vmem:[%s19282_s9 + $0x360] ss:$16 sps:$4 sm:$0xff]   ;;  %v14263_v43 = vld [vmem:[%s19282_s9 + $0x368] ss:$16 sps:$4 sm:$0xff]  }
 0x65a   : > { %9190 = vmatprep.subr.bf16.mxu0 %v14176_v17  ;;  %9614 = vmatprep.subr.bf16.mxu1 %v14178_v28  ;;  %v14268_v17 = vld [vmem:[%s19282_s9 + $0x384] ss:$16 sps:$4 sm:$0xff]   ;;  %v14271_v28 = vld [vmem:[%s19282_s9 + $0x38c] ss:$16 sps:$4 sm:$0xff]  }
 0x65d   : > { %9191 = vmatpush1.bf16.msra.mxu0 %v14180_v25  ;;  %9615 = vmatpush1.bf16.msra.mxu1 %v14181_v41  ;;  %v14266_v25 = vld [vmem:[%s19282_s9 + $0x380] ss:$16 sps:$4 sm:$0xff]   ;;  %v14269_v41 = vld [vmem:[%s19282_s9 + $0x388] ss:$16 sps:$4 sm:$0xff]  }
 0x65e   : > { %9192 = vmatprep.subr.bf16.mxu0 %v14182_v7  ;;  %9616 = vmatprep.subr.bf16.mxu1 %v14184_v18  ;;  %v14274_v7 = vld [vmem:[%s19282_s9 + $0x3a4] ss:$16 sps:$4 sm:$0xff]   ;;  %v14277_v18 = vld [vmem:[%s19282_s9 + $0x3ac] ss:$16 sps:$4 sm:$0xff]  }
 0x661   : > { %9193 = vmatpush1.bf16.msra.mxu0 %v14186_v10  ;;  %9617 = vmatpush1.bf16.msra.mxu1 %v14187_v19  ;;  %v14272_v10 = vld [vmem:[%s19282_s9 + $0x3a0] ss:$16 sps:$4 sm:$0xff]   ;;  %v14275_v19 = vld [vmem:[%s19282_s9 + $0x3a8] ss:$16 sps:$4 sm:$0xff]  }
 0x662   : > { %9194 = vmatprep.subr.bf16.mxu0 %v14188_v23  ;;  %9618 = vmatprep.subr.bf16.mxu1 %v14190_v20  ;;  %v14280_v23 = vld [vmem:[%s19282_s9 + $0x3c4] ss:$16 sps:$4 sm:$0xff]   ;;  %v14283_v20 = vld [vmem:[%s19282_s9 + $0x3cc] ss:$16 sps:$4 sm:$0xff]  }
 0x665   : > { %9195 = vmatpush1.bf16.msra.mxu0 %v14192_v8  ;;  %9619 = vmatpush1.bf16.msra.mxu1 %v14193_v21  ;;  %v14278_v8 = vld [vmem:[%s19282_s9 + $0x3c0] ss:$16 sps:$4 sm:$0xff]   ;;  %v14281_v21 = vld [vmem:[%s19282_s9 + $0x3c8] ss:$16 sps:$4 sm:$0xff]  }
 0x666   : > { %9217 = vmatprep.subr.bf16.mxu0 %v14196_v22  ;;  %9641 = vmatprep.subr.bf16.mxu1 %v14199_v29  ;;  %v14286_v22 = vld [vmem:[%s19282_s9 + $0x3e4] ss:$16 sps:$4 sm:$0xff]   ;;  %v14289_v29 = vld [vmem:[%s19282_s9 + $0x3ec] ss:$16 sps:$4 sm:$0xff]  }
 0x668   : > { %9197 = vmatmul.mubr.bf16.vlgmr.msra.gmra.mrb[0].mxu0 %v6038_v60  ;;  %9621 = vmatmul.mubr.bf16.vlgmr.msra.gmra.mrb[0].mxu1 %v6038_v60  ;;  %v14292_v60 = vld [vmem:[%s19282_s9 + $0x404] ss:$16 sps:$4 sm:$0xff]  }
 0x669   : > { %9218 = vmatpush1.bf16.msra.mxu0 %v14194_v9  ;;  %9642 = vmatpush1.bf16.msra.mxu1 %v14197_v4  ;;  %v14284_v9 = vld [vmem:[%s19282_s9 + $0x3e0] ss:$16 sps:$4 sm:$0xff]   ;;  %v14287_v4 = vld [vmem:[%s19282_s9 + $0x3e8] ss:$16 sps:$4 sm:$0xff]  }
 0x66a   : > { %9219 = vmatprep.subr.bf16.mxu0 %v14202_v31  ;;  %9643 = vmatprep.subr.bf16.mxu1 %v14205_v1  ;;  %v14295_v31 = vld [vmem:[%s19282_s9 + $0x40c] ss:$16 sps:$4 sm:$0xff]   ;;  %v14290_v1 = vld [vmem:[%s19282_s9 + $0x400] ss:$16 sps:$4 sm:$0xff]  }
 0x66b   : > { %9206 = vmatprep.mubr.bf16.mxu0 %v6055_v37  ;;  %9630 = vmatprep.mubr.bf16.mxu1 %v6055_v37  ;;  %v14308_v37 = vld [vmem:[%s19282_s9 + $0x460] ss:$16 sps:$4 sm:$0xff]  }
 0x66d   : > { %9220 = vmatpush1.bf16.msra.mxu0 %v14200_v6  ;;  %9644 = vmatpush1.bf16.msra.mxu1 %v14203_v62  ;;  %v14293_v6 = vld [vmem:[%s19282_s9 + $0x408] ss:$16 sps:$4 sm:$0xff]   ;;  %v6040_v62 = vld [vmem:[#allocation3 + $0x10] sm:$0xff] }
 0x66e   : > { %9221 = vmatprep.subr.bf16.mxu0 %v14208_v0  ;;  %9645 = vmatprep.subr.bf16.mxu1 %v14211_v2  ;;  %v14298_v0 = vld [vmem:[%s19282_s9 + $0x424] ss:$16 sps:$4 sm:$0xff]   ;;  %v14301_v2 = vld [vmem:[%s19282_s9 + $0x42c] ss:$16 sps:$4 sm:$0xff]  }
 0x670   : > { %9207 = vmatmul.mubr.bf16.gmra.mrb[4].mxu0 %v6054_v45  ;;  %9631 = vmatmul.mubr.bf16.gmra.mrb[4].mxu1 %v6054_v45  ;;  %v14314_v45 = vld [vmem:[%s19282_s9 + $0x480] ss:$16 sps:$4 sm:$0xff]  }
 0x671   : > { %9222 = vmatpush1.bf16.msra.mxu0 %v14206_v24  ;;  %9646 = vmatpush1.bf16.msra.mxu1 %v14209_v61  ;;  %v14296_v24 = vld [vmem:[%s19282_s9 + $0x420] ss:$16 sps:$4 sm:$0xff]   ;;  %v6057_v61 = vld [vmem:[#allocation3 + $0x98] sm:$0xff] }
 0x672   : > { %9223 = vmatprep.subr.bf16.mxu0 %v14214_v26  ;;  %9647 = vmatprep.subr.bf16.mxu1 %v14217_v27  ;;  %v14299_v26 = vld [vmem:[%s19282_s9 + $0x428] ss:$16 sps:$4 sm:$0xff]   ;;  %v14304_v27 = vld [vmem:[%s19282_s9 + $0x444] ss:$16 sps:$4 sm:$0xff]  }
 0x673   : > { %9249 = vmatprep.mubr.bf16.mxu0 %v6041_v48  ;;  %9673 = vmatprep.mubr.bf16.mxu1 %v6041_v48  ;;  %v14325_v48 = vld [vmem:[%s19282_s9 + $0x4ac] ss:$16 sps:$4 sm:$0xff]  }
 0x675   : > { %9224 = vmatpush1.bf16.msra.mxu0 %v14212_v30  ;;  %9648 = vmatpush1.bf16.msra.mxu1 %v14215_v44  ;;  %v14307_v30 = vld [vmem:[%s19282_s9 + $0x44c] ss:$16 sps:$4 sm:$0xff]   ;;  %v14302_v44 = vld [vmem:[%s19282_s9 + $0x440] ss:$16 sps:$4 sm:$0xff]  }
 0x676   : > { %9225 = vmatprep.subr.bf16.mxu0 %v14220_v32  ;;  %9649 = vmatprep.subr.bf16.mxu1 %v14223_v33  ;;  %v14305_v32 = vld [vmem:[%s19282_s9 + $0x448] ss:$16 sps:$4 sm:$0xff]   ;;  %v6056_v33 = vld [vmem:[#allocation3 + $0x90] sm:$0xff] }
 0x679   : > { %9226 = vmatpush1.bf16.msra.mxu0 %v14218_v34  ;;  %9650 = vmatpush1.bf16.msra.mxu1 %v14221_v35  ;;  %v14310_v34 = vld [vmem:[%s19282_s9 + $0x464] ss:$16 sps:$4 sm:$0xff]   ;;  %v14313_v35 = vld [vmem:[%s19282_s9 + $0x46c] ss:$16 sps:$4 sm:$0xff]  }
 0x67a   : > { %9227 = vmatprep.subr.bf16.mxu0 %v14226_v36  ;;  %9651 = vmatprep.subr.bf16.mxu1 %v14229_v38  ;;  %v6043_v36 = vld [vmem:[#allocation3 + $0x28] sm:$0xff] }
 0x67b   : > { %v14311_v38 = vld [vmem:[%s19282_s9 + $0x468] ss:$16 sps:$4 sm:$0xff]  }
 0x67d   : > { %9228 = vmatpush1.bf16.msra.mxu0 %v14224_v39  ;;  %9652 = vmatpush1.bf16.msra.mxu1 %v14227_v40  ;;  %v14316_v39 = vld [vmem:[%s19282_s9 + $0x484] ss:$16 sps:$4 sm:$0xff]   ;;  %v14319_v40 = vld [vmem:[%s19282_s9 + $0x48c] ss:$16 sps:$4 sm:$0xff]  }
 0x67e   : > { %9229 = vmatprep.subr.bf16.mxu0 %v14232_v46  ;;  %9653 = vmatprep.subr.bf16.mxu1 %v14235_v47  ;;  %v14317_v46 = vld [vmem:[%s19282_s9 + $0x488] ss:$16 sps:$4 sm:$0xff]   ;;  %v14322_v47 = vld [vmem:[%s19282_s9 + $0x4a4] ss:$16 sps:$4 sm:$0xff]  }
 0x681   : > { %9230 = vmatpush1.bf16.msra.mxu0 %v14230_v49  ;;  %9654 = vmatpush1.bf16.msra.mxu1 %v14233_v50  ;;  %v14320_v49 = vld [vmem:[%s19282_s9 + $0x4a0] ss:$16 sps:$4 sm:$0xff]   ;;  %v14323_v50 = vld [vmem:[%s19282_s9 + $0x4a8] ss:$16 sps:$4 sm:$0xff]  }
 0x682   : > { %9231 = vmatprep.subr.bf16.mxu0 %v14238_v51  ;;  %9655 = vmatprep.subr.bf16.mxu1 %v14241_v52  ;;  %v14328_v51 = vld [vmem:[%s19282_s9 + $0x4c4] ss:$16 sps:$4 sm:$0xff]   ;;  %v14331_v52 = vld [vmem:[%s19282_s9 + $0x4cc] ss:$16 sps:$4 sm:$0xff]  }
 0x685   : > { %9232 = vmatpush1.bf16.msra.mxu0 %v14236_v53  ;;  %9656 = vmatpush1.bf16.msra.mxu1 %v14239_v54  ;;  %v14326_v53 = vld [vmem:[%s19282_s9 + $0x4c0] ss:$16 sps:$4 sm:$0xff]   ;;  %v14329_v54 = vld [vmem:[%s19282_s9 + $0x4c8] ss:$16 sps:$4 sm:$0xff]  }
 0x686   : > { %9233 = vmatprep.subr.bf16.mxu0 %v14244_v55  ;;  %9657 = vmatprep.subr.bf16.mxu1 %v14247_v56  ;;  %v14334_v55 = vld [vmem:[%s19282_s9 + $0x4e4] ss:$16 sps:$4 sm:$0xff]   ;;  %v14337_v56 = vld [vmem:[%s19282_s9 + $0x4ec] ss:$16 sps:$4 sm:$0xff]  }
 0x689   : > { %9234 = vmatpush1.bf16.msra.mxu0 %v14242_v57  ;;  %9658 = vmatpush1.bf16.msra.mxu1 %v14245_v58  ;;  %v14332_v57 = vld [vmem:[%s19282_s9 + $0x4e0] ss:$16 sps:$4 sm:$0xff]   ;;  %v14335_v58 = vld [vmem:[%s19282_s9 + $0x4e8] ss:$16 sps:$4 sm:$0xff]  }
 0x68a   : > { %9235 = vmatprep.subr.bf16.mxu0 %v14250_v59  ;;  %9659 = vmatprep.subr.bf16.mxu1 %v14253_v63  ;;  %v14340_v59 = vld [vmem:[%s19282_s9 + $0x504] ss:$16 sps:$4 sm:$0xff]   ;;  %v14343_v63 = vld [vmem:[%s19282_s9 + $0x50c] ss:$16 sps:$4 sm:$0xff]  }
 0x68d   : > { %9236 = vmatpush1.bf16.msra.mxu0 %v14248_v3  ;;  %9660 = vmatpush1.bf16.msra.mxu1 %v14251_v5  ;;  %v14338_v3 = vld [vmem:[%s19282_s9 + $0x500] ss:$16 sps:$4 sm:$0xff]   ;;  %v14341_v5 = vld [vmem:[%s19282_s9 + $0x508] ss:$16 sps:$4 sm:$0xff]  }
 0x68e   : > { %9237 = vmatprep.subr.bf16.mxu0 %v14256_v11  ;;  %9661 = vmatprep.subr.bf16.mxu1 %v14259_v12  ;;  %v14346_v11 = vld [vmem:[%s19282_s9 + $0x524] ss:$16 sps:$4 sm:$0xff]   ;;  %v14349_v12 = vld [vmem:[%s19282_s9 + $0x52c] ss:$16 sps:$4 sm:$0xff]  }
 0x691   : > { %9238 = vmatpush1.bf16.msra.mxu0 %v14254_v13  ;;  %9662 = vmatpush1.bf16.msra.mxu1 %v14257_v14  ;;  %v14344_v13 = vld [vmem:[%s19282_s9 + $0x520] ss:$16 sps:$4 sm:$0xff]   ;;  %v14347_v14 = vld [vmem:[%s19282_s9 + $0x528] ss:$16 sps:$4 sm:$0xff]  }
 0x692   : > { %9239 = vmatprep.subr.bf16.mxu0 %v14262_v15  ;;  %9663 = vmatprep.subr.bf16.mxu1 %v14265_v16  ;;  %v14352_v15 = vld [vmem:[%s19282_s9 + $0x544] ss:$16 sps:$4 sm:$0xff]   ;;  %v14355_v16 = vld [vmem:[%s19282_s9 + $0x54c] ss:$16 sps:$4 sm:$0xff]  }
 0x695   : > { %9240 = vmatpush1.bf16.msra.mxu0 %v14260_v42  ;;  %9664 = vmatpush1.bf16.msra.mxu1 %v14263_v43  ;;  %v14350_v42 = vld [vmem:[%s19282_s9 + $0x540] ss:$16 sps:$4 sm:$0xff]   ;;  %v14353_v43 = vld [vmem:[%s19282_s9 + $0x548] ss:$16 sps:$4 sm:$0xff]  }
 0x696   : > { %9241 = vmatprep.subr.bf16.mxu0 %v14268_v17  ;;  %9665 = vmatprep.subr.bf16.mxu1 %v14271_v28  ;;  %v14358_v17 = vld [vmem:[%s19282_s9 + $0x564] ss:$16 sps:$4 sm:$0xff]   ;;  %v14361_v28 = vld [vmem:[%s19282_s9 + $0x56c] ss:$16 sps:$4 sm:$0xff]  }
 0x699   : > { %9242 = vmatpush1.bf16.msra.mxu0 %v14266_v25  ;;  %9666 = vmatpush1.bf16.msra.mxu1 %v14269_v41  ;;  %v14356_v25 = vld [vmem:[%s19282_s9 + $0x560] ss:$16 sps:$4 sm:$0xff]   ;;  %v14359_v41 = vld [vmem:[%s19282_s9 + $0x568] ss:$16 sps:$4 sm:$0xff]  }
 0x69a   : > { %9243 = vmatprep.subr.bf16.mxu0 %v14274_v7  ;;  %9667 = vmatprep.subr.bf16.mxu1 %v14277_v18  ;;  %v14364_v7 = vld [vmem:[%s19282_s9 + $0x584] ss:$16 sps:$4 sm:$0xff]   ;;  %v14367_v18 = vld [vmem:[%s19282_s9 + $0x58c] ss:$16 sps:$4 sm:$0xff]  }
 0x69d   : > { %9244 = vmatpush1.bf16.msra.mxu0 %v14272_v10  ;;  %9668 = vmatpush1.bf16.msra.mxu1 %v14275_v19  ;;  %v14362_v10 = vld [vmem:[%s19282_s9 + $0x580] ss:$16 sps:$4 sm:$0xff]   ;;  %v14365_v19 = vld [vmem:[%s19282_s9 + $0x588] ss:$16 sps:$4 sm:$0xff]  }
 0x69e   : > { %9245 = vmatprep.subr.bf16.mxu0 %v14280_v23  ;;  %9669 = vmatprep.subr.bf16.mxu1 %v14283_v20  ;;  %v14370_v23 = vld [vmem:[%s19282_s9 + $0x5a4] ss:$16 sps:$4 sm:$0xff]   ;;  %v14373_v20 = vld [vmem:[%s19282_s9 + $0x5ac] ss:$16 sps:$4 sm:$0xff]  }
 0x6a1   : > { %9246 = vmatpush1.bf16.msra.mxu0 %v14278_v8  ;;  %9670 = vmatpush1.bf16.msra.mxu1 %v14281_v21  ;;  %v14368_v8 = vld [vmem:[%s19282_s9 + $0x5a0] ss:$16 sps:$4 sm:$0xff]   ;;  %v14371_v21 = vld [vmem:[%s19282_s9 + $0x5a8] ss:$16 sps:$4 sm:$0xff]  }
 0x6a2   : > { %9247 = vmatprep.subr.bf16.mxu0 %v14286_v22  ;;  %9671 = vmatprep.subr.bf16.mxu1 %v14289_v29  ;;  %v14376_v22 = vld [vmem:[%s19282_s9 + $0x5c4] ss:$16 sps:$4 sm:$0xff]   ;;  %v14379_v29 = vld [vmem:[%s19282_s9 + $0x5cc] ss:$16 sps:$4 sm:$0xff]  }
 0x6a5   : > { %9248 = vmatpush1.bf16.msra.mxu0 %v14284_v9  ;;  %9672 = vmatpush1.bf16.msra.mxu1 %v14287_v4  ;;  %v14374_v9 = vld [vmem:[%s19282_s9 + $0x5c0] ss:$16 sps:$4 sm:$0xff]   ;;  %v14377_v4 = vld [vmem:[%s19282_s9 + $0x5c8] ss:$16 sps:$4 sm:$0xff]  }
 0x6a6   : > { %9270 = vmatprep.subr.bf16.mxu0 %v14292_v60  ;;  %9694 = vmatprep.subr.bf16.mxu1 %v14295_v31  ;;  %v14382_v60 = vld [vmem:[%s19282_s9 + $0x5e4] ss:$16 sps:$4 sm:$0xff]   ;;  %v14385_v31 = vld [vmem:[%s19282_s9 + $0x5ec] ss:$16 sps:$4 sm:$0xff]  }
 0x6a8   : > { %9250 = vmatmul.mubr.bf16.vlgmr.msra.gmra.mrb[0].mxu0 %v6040_v62  ;;  %9674 = vmatmul.mubr.bf16.vlgmr.msra.gmra.mrb[0].mxu1 %v6040_v62  ;;  %v14388_v62 = vld [vmem:[%s19282_s9 + $0x604] ss:$16 sps:$4 sm:$0xff]  }
 0x6a9   : > { %9271 = vmatpush1.bf16.msra.mxu0 %v14290_v1  ;;  %9695 = vmatpush1.bf16.msra.mxu1 %v14293_v6  ;;  %v14380_v1 = vld [vmem:[%s19282_s9 + $0x5e0] ss:$16 sps:$4 sm:$0xff]   ;;  %v14383_v6 = vld [vmem:[%s19282_s9 + $0x5e8] ss:$16 sps:$4 sm:$0xff]  }
 0x6aa   : > { %9272 = vmatprep.subr.bf16.mxu0 %v14298_v0  ;;  %9696 = vmatprep.subr.bf16.mxu1 %v14301_v2  ;;  %v14391_v0 = vld [vmem:[%s19282_s9 + $0x60c] ss:$16 sps:$4 sm:$0xff]   ;;  %v14386_v2 = vld [vmem:[%s19282_s9 + $0x600] ss:$16 sps:$4 sm:$0xff]  }
 0x6ab   : > { %9259 = vmatprep.mubr.bf16.mxu0 %v6057_v61  ;;  %9683 = vmatprep.mubr.bf16.mxu1 %v6057_v61  ;;  %v6042_v61 = vld [vmem:[#allocation3 + $0x20] sm:$0xff] }
 0x6ad   : > { %9273 = vmatpush1.bf16.msra.mxu0 %v14296_v24  ;;  %9697 = vmatpush1.bf16.msra.mxu1 %v14299_v26  ;;  %v14389_v24 = vld [vmem:[%s19282_s9 + $0x608] ss:$16 sps:$4 sm:$0xff]   ;;  %v14394_v26 = vld [vmem:[%s19282_s9 + $0x624] ss:$16 sps:$4 sm:$0xff]  }
 0x6ae   : > { %9274 = vmatprep.subr.bf16.mxu0 %v14304_v27  ;;  %9698 = vmatprep.subr.bf16.mxu1 %v14307_v30  ;;  %v14397_v27 = vld [vmem:[%s19282_s9 + $0x62c] ss:$16 sps:$4 sm:$0xff]  }
 0x6af   : > { %v6059_v30 = vld [vmem:[#allocation3 + $0xa8] sm:$0xff] }
 0x6b0   : > { %9260 = vmatmul.mubr.bf16.gmra.mrb[4].mxu0 %v6056_v33  ;;  %9684 = vmatmul.mubr.bf16.gmra.mrb[4].mxu1 %v6056_v33  ;;  %v14400_v33 = vld [vmem:[%s19282_s9 + $0x644] ss:$16 sps:$4 sm:$0xff]  }
 0x6b1   : > { %9275 = vmatpush1.bf16.msra.mxu0 %v14302_v44  ;;  %9699 = vmatpush1.bf16.msra.mxu1 %v14305_v32  ;;  %v14392_v44 = vld [vmem:[%s19282_s9 + $0x620] ss:$16 sps:$4 sm:$0xff]   ;;  %v14395_v32 = vld [vmem:[%s19282_s9 + $0x628] ss:$16 sps:$4 sm:$0xff]  }
 0x6b2   : > { %9276 = vmatprep.subr.bf16.mxu0 %v14310_v34  ;;  %9700 = vmatprep.subr.bf16.mxu1 %v14313_v35  ;;  %v14403_v34 = vld [vmem:[%s19282_s9 + $0x64c] ss:$16 sps:$4 sm:$0xff]   ;;  %v14398_v35 = vld [vmem:[%s19282_s9 + $0x640] ss:$16 sps:$4 sm:$0xff]  }
 0x6b3   : > { %9302 = vmatprep.mubr.bf16.mxu0 %v6043_v36  ;;  %9726 = vmatprep.mubr.bf16.mxu1 %v6043_v36  ;;  %v14401_v36 = vld [vmem:[%s19282_s9 + $0x648] ss:$16 sps:$4 sm:$0xff]  }
 0x6b5   : > { %9277 = vmatpush1.bf16.msra.mxu0 %v14308_v37  ;;  %9701 = vmatpush1.bf16.msra.mxu1 %v14311_v38  ;;  %v6058_v37 = vld [vmem:[#allocation3 + $0xa0] sm:$0xff] }
 0x6b6   : > { %9278 = vmatprep.subr.bf16.mxu0 %v14316_v39  ;;  %9702 = vmatprep.subr.bf16.mxu1 %v14319_v40  ;;  %v14406_v38 = vld [vmem:[%s19282_s9 + $0x664] ss:$16 sps:$4 sm:$0xff]   ;;  %v14409_v39 = vld [vmem:[%s19282_s9 + $0x66c] ss:$16 sps:$4 sm:$0xff]  }
 0x6b7   : > { %v6045_v40 = vld [vmem:[#allocation3 + $0x38] sm:$0xff] }
 0x6b9   : > { %9279 = vmatpush1.bf16.msra.mxu0 %v14314_v45  ;;  %9703 = vmatpush1.bf16.msra.mxu1 %v14317_v46  ;;  %v14404_v45 = vld [vmem:[%s19282_s9 + $0x660] ss:$16 sps:$4 sm:$0xff]   ;;  %v14407_v46 = vld [vmem:[%s19282_s9 + $0x668] ss:$16 sps:$4 sm:$0xff]  }
 0x6ba   : > { %9280 = vmatprep.subr.bf16.mxu0 %v14322_v47  ;;  %9704 = vmatprep.subr.bf16.mxu1 %v14325_v48  ;;  %v14412_v47 = vld [vmem:[%s19282_s9 + $0x684] ss:$16 sps:$4 sm:$0xff]   ;;  %v14415_v48 = vld [vmem:[%s19282_s9 + $0x68c] ss:$16 sps:$4 sm:$0xff]  }
 0x6bd   : > { %9281 = vmatpush1.bf16.msra.mxu0 %v14320_v49  ;;  %9705 = vmatpush1.bf16.msra.mxu1 %v14323_v50  ;;  %v14410_v49 = vld [vmem:[%s19282_s9 + $0x680] ss:$16 sps:$4 sm:$0xff]   ;;  %v14413_v50 = vld [vmem:[%s19282_s9 + $0x688] ss:$16 sps:$4 sm:$0xff]  }
 0x6be   : > { %9282 = vmatprep.subr.bf16.mxu0 %v14328_v51  ;;  %9706 = vmatprep.subr.bf16.mxu1 %v14331_v52  ;;  %v14418_v51 = vld [vmem:[%s19282_s9 + $0x6a4] ss:$16 sps:$4 sm:$0xff]   ;;  %v14421_v52 = vld [vmem:[%s19282_s9 + $0x6ac] ss:$16 sps:$4 sm:$0xff]  }
 0x6c1   : > { %9283 = vmatpush1.bf16.msra.mxu0 %v14326_v53  ;;  %9707 = vmatpush1.bf16.msra.mxu1 %v14329_v54  ;;  %v14416_v53 = vld [vmem:[%s19282_s9 + $0x6a0] ss:$16 sps:$4 sm:$0xff]   ;;  %v14419_v54 = vld [vmem:[%s19282_s9 + $0x6a8] ss:$16 sps:$4 sm:$0xff]  }
 0x6c2   : > { %9284 = vmatprep.subr.bf16.mxu0 %v14334_v55  ;;  %9708 = vmatprep.subr.bf16.mxu1 %v14337_v56  ;;  %v14424_v55 = vld [vmem:[%s19282_s9 + $0x6c4] ss:$16 sps:$4 sm:$0xff]   ;;  %v14427_v56 = vld [vmem:[%s19282_s9 + $0x6cc] ss:$16 sps:$4 sm:$0xff]  }
 0x6c5   : > { %9285 = vmatpush1.bf16.msra.mxu0 %v14332_v57  ;;  %9709 = vmatpush1.bf16.msra.mxu1 %v14335_v58  ;;  %v14422_v57 = vld [vmem:[%s19282_s9 + $0x6c0] ss:$16 sps:$4 sm:$0xff]   ;;  %v14425_v58 = vld [vmem:[%s19282_s9 + $0x6c8] ss:$16 sps:$4 sm:$0xff]  }
 0x6c6   : > { %9286 = vmatprep.subr.bf16.mxu0 %v14340_v59  ;;  %9710 = vmatprep.subr.bf16.mxu1 %v14343_v63  ;;  %v14430_v59 = vld [vmem:[%s19282_s9 + $0x6e4] ss:$16 sps:$4 sm:$0xff]   ;;  %v14433_v63 = vld [vmem:[%s19282_s9 + $0x6ec] ss:$16 sps:$4 sm:$0xff]  }
 0x6c9   : > { %9287 = vmatpush1.bf16.msra.mxu0 %v14338_v3  ;;  %9711 = vmatpush1.bf16.msra.mxu1 %v14341_v5  ;;  %v14428_v3 = vld [vmem:[%s19282_s9 + $0x6e0] ss:$16 sps:$4 sm:$0xff]   ;;  %v14431_v5 = vld [vmem:[%s19282_s9 + $0x6e8] ss:$16 sps:$4 sm:$0xff]  }
 0x6ca   : > { %9288 = vmatprep.subr.bf16.mxu0 %v14346_v11  ;;  %9712 = vmatprep.subr.bf16.mxu1 %v14349_v12  ;;  %v14436_v11 = vld [vmem:[%s19282_s9 + $0x704] ss:$16 sps:$4 sm:$0xff]   ;;  %v14439_v12 = vld [vmem:[%s19282_s9 + $0x70c] ss:$16 sps:$4 sm:$0xff]  }
 0x6cd   : > { %9289 = vmatpush1.bf16.msra.mxu0 %v14344_v13  ;;  %9713 = vmatpush1.bf16.msra.mxu1 %v14347_v14  ;;  %v14434_v13 = vld [vmem:[%s19282_s9 + $0x700] ss:$16 sps:$4 sm:$0xff]   ;;  %v14437_v14 = vld [vmem:[%s19282_s9 + $0x708] ss:$16 sps:$4 sm:$0xff]  }
 0x6ce   : > { %9290 = vmatprep.subr.bf16.mxu0 %v14352_v15  ;;  %9714 = vmatprep.subr.bf16.mxu1 %v14355_v16  ;;  %v14442_v15 = vld [vmem:[%s19282_s9 + $0x724] ss:$16 sps:$4 sm:$0xff]   ;;  %v14445_v16 = vld [vmem:[%s19282_s9 + $0x72c] ss:$16 sps:$4 sm:$0xff]  }
 0x6d1   : > { %9291 = vmatpush1.bf16.msra.mxu0 %v14350_v42  ;;  %9715 = vmatpush1.bf16.msra.mxu1 %v14353_v43  ;;  %v14440_v42 = vld [vmem:[%s19282_s9 + $0x720] ss:$16 sps:$4 sm:$0xff]   ;;  %v14443_v43 = vld [vmem:[%s19282_s9 + $0x728] ss:$16 sps:$4 sm:$0xff]  }
 0x6d2   : > { %9292 = vmatprep.subr.bf16.mxu0 %v14358_v17  ;;  %9716 = vmatprep.subr.bf16.mxu1 %v14361_v28  ;;  %v14448_v17 = vld [vmem:[%s19282_s9 + $0x744] ss:$16 sps:$4 sm:$0xff]   ;;  %v14451_v28 = vld [vmem:[%s19282_s9 + $0x74c] ss:$16 sps:$4 sm:$0xff]  }
 0x6d5   : > { %9293 = vmatpush1.bf16.msra.mxu0 %v14356_v25  ;;  %9717 = vmatpush1.bf16.msra.mxu1 %v14359_v41  ;;  %v14446_v25 = vld [vmem:[%s19282_s9 + $0x740] ss:$16 sps:$4 sm:$0xff]   ;;  %v14449_v41 = vld [vmem:[%s19282_s9 + $0x748] ss:$16 sps:$4 sm:$0xff]  }
 0x6d6   : > { %9294 = vmatprep.subr.bf16.mxu0 %v14364_v7  ;;  %9718 = vmatprep.subr.bf16.mxu1 %v14367_v18  ;;  %v14454_v7 = vld [vmem:[%s19282_s9 + $0x764] ss:$16 sps:$4 sm:$0xff]   ;;  %v14457_v18 = vld [vmem:[%s19282_s9 + $0x76c] ss:$16 sps:$4 sm:$0xff]  }
 0x6d9   : > { %9295 = vmatpush1.bf16.msra.mxu0 %v14362_v10  ;;  %9719 = vmatpush1.bf16.msra.mxu1 %v14365_v19  ;;  %v14452_v10 = vld [vmem:[%s19282_s9 + $0x760] ss:$16 sps:$4 sm:$0xff]   ;;  %v14455_v19 = vld [vmem:[%s19282_s9 + $0x768] ss:$16 sps:$4 sm:$0xff]  }
 0x6da   : > { %9296 = vmatprep.subr.bf16.mxu0 %v14370_v23  ;;  %9720 = vmatprep.subr.bf16.mxu1 %v14373_v20  ;;  %v14460_v23 = vld [vmem:[%s19282_s9 + $0x784] ss:$16 sps:$4 sm:$0xff]   ;;  %v14463_v20 = vld [vmem:[%s19282_s9 + $0x78c] ss:$16 sps:$4 sm:$0xff]  }
 0x6dd   : > { %9297 = vmatpush1.bf16.msra.mxu0 %v14368_v8  ;;  %9721 = vmatpush1.bf16.msra.mxu1 %v14371_v21  ;;  %v14458_v8 = vld [vmem:[%s19282_s9 + $0x780] ss:$16 sps:$4 sm:$0xff]   ;;  %v14461_v21 = vld [vmem:[%s19282_s9 + $0x788] ss:$16 sps:$4 sm:$0xff]  }
 0x6de   : > { %9298 = vmatprep.subr.bf16.mxu0 %v14376_v22  ;;  %9722 = vmatprep.subr.bf16.mxu1 %v14379_v29  ;;  %v14466_v22 = vld [vmem:[%s19282_s9 + $0x7a4] ss:$16 sps:$4 sm:$0xff]   ;;  %v14469_v29 = vld [vmem:[%s19282_s9 + $0x7ac] ss:$16 sps:$4 sm:$0xff]  }
 0x6e1   : > { %9299 = vmatpush1.bf16.msra.mxu0 %v14374_v9  ;;  %9723 = vmatpush1.bf16.msra.mxu1 %v14377_v4  ;;  %v14464_v9 = vld [vmem:[%s19282_s9 + $0x7a0] ss:$16 sps:$4 sm:$0xff]   ;;  %v14467_v4 = vld [vmem:[%s19282_s9 + $0x7a8] ss:$16 sps:$4 sm:$0xff]  }
 0x6e2   : > { %9300 = vmatprep.subr.bf16.mxu0 %v14382_v60  ;;  %9724 = vmatprep.subr.bf16.mxu1 %v14385_v31  ;;  %v14472_v60 = vld [vmem:[%s19282_s9 + $0x7c4] ss:$16 sps:$4 sm:$0xff]   ;;  %v14475_v31 = vld [vmem:[%s19282_s9 + $0x7cc] ss:$16 sps:$4 sm:$0xff]  }
 0x6e5   : > { %9301 = vmatpush1.bf16.msra.mxu0 %v14380_v1  ;;  %9725 = vmatpush1.bf16.msra.mxu1 %v14383_v6  ;;  %v14470_v1 = vld [vmem:[%s19282_s9 + $0x7c0] ss:$16 sps:$4 sm:$0xff]   ;;  %v14473_v6 = vld [vmem:[%s19282_s9 + $0x7c8] ss:$16 sps:$4 sm:$0xff]  }
 0x6e6   : > { %9323 = vmatprep.subr.bf16.mxu0 %v14388_v62  ;;  %9747 = vmatprep.subr.bf16.mxu1 %v14391_v0  ;;  %v14478_v62 = vld [vmem:[%s19282_s9 + $0x7e4] ss:$16 sps:$4 sm:$0xff]   ;;  %v14481_v0 = vld [vmem:[%s19282_s9 + $0x7ec] ss:$16 sps:$4 sm:$0xff]  }
 0x6e8   : > { %9303 = vmatmul.mubr.bf16.vlgmr.msra.gmra.mrb[0].mxu0 %v6042_v61  ;;  %9727 = vmatmul.mubr.bf16.vlgmr.msra.gmra.mrb[0].mxu1 %v6042_v61  ;;  %v14484_v61 = vld [vmem:[%s19282_s9 + $0x804] ss:$16 sps:$4 sm:$0xff]  }
 0x6e9   : > { %9324 = vmatpush1.bf16.msra.mxu0 %v14386_v2  ;;  %9748 = vmatpush1.bf16.msra.mxu1 %v14389_v24  ;;  %v14476_v2 = vld [vmem:[%s19282_s9 + $0x7e0] ss:$16 sps:$4 sm:$0xff]   ;;  %v14479_v24 = vld [vmem:[%s19282_s9 + $0x7e8] ss:$16 sps:$4 sm:$0xff]  }
 0x6ea   : > { %9325 = vmatprep.subr.bf16.mxu0 %v14394_v26  ;;  %9749 = vmatprep.subr.bf16.mxu1 %v14397_v27  ;;  %v14487_v26 = vld [vmem:[%s19282_s9 + $0x80c] ss:$16 sps:$4 sm:$0xff]   ;;  %v14482_v27 = vld [vmem:[%s19282_s9 + $0x800] ss:$16 sps:$4 sm:$0xff]  }
 0x6eb   : > { %9312 = vmatprep.mubr.bf16.mxu0 %v6059_v30  ;;  %9736 = vmatprep.mubr.bf16.mxu1 %v6059_v30  ;;  %v14485_v30 = vld [vmem:[%s19282_s9 + $0x808] ss:$16 sps:$4 sm:$0xff]  }
 0x6ed   : > { %9326 = vmatpush1.bf16.msra.mxu0 %v14392_v44  ;;  %9750 = vmatpush1.bf16.msra.mxu1 %v14395_v32  ;;  %v6044_v44 = vld [vmem:[#allocation3 + $0x30] sm:$0xff] }
 0x6ee   : > { %9327 = vmatprep.subr.bf16.mxu0 %v14400_v33  ;;  %9751 = vmatprep.subr.bf16.mxu1 %v14403_v34  ;;  %v14490_v32 = vld [vmem:[%s19282_s9 + $0x824] ss:$16 sps:$4 sm:$0xff]   ;;  %v14493_v33 = vld [vmem:[%s19282_s9 + $0x82c] ss:$16 sps:$4 sm:$0xff]   ;;  %v14488_v34 = vld [vmem:[%s19282_s9 + $0x820] ss:$16 sps:$4 sm:$0xff]  }
 0x6f0   : > { %9313 = vmatmul.mubr.bf16.gmra.mrb[4].mxu0 %v6058_v37  ;;  %9737 = vmatmul.mubr.bf16.gmra.mrb[4].mxu1 %v6058_v37  ;;  %v14496_v37 = vld [vmem:[%s19282_s9 + $0x844] ss:$16 sps:$4 sm:$0xff]  }
 0x6f1   : > { %9328 = vmatpush1.bf16.msra.mxu0 %v14398_v35  ;;  %9752 = vmatpush1.bf16.msra.mxu1 %v14401_v36  ;;  %v14491_v35 = vld [vmem:[%s19282_s9 + $0x828] ss:$16 sps:$4 sm:$0xff]  }
 0x6f2   : > { %9329 = vmatprep.subr.bf16.mxu0 %v14406_v38  ;;  %9753 = vmatprep.subr.bf16.mxu1 %v14409_v39  ;;  %v6061_v36 = vld [vmem:[#allocation3 + $0xb8] sm:$0xff]  ;;  %v14494_v39 = vld [vmem:[%s19282_s9 + $0x840] ss:$16 sps:$4 sm:$0xff]  }
 0x6f3   : > { %9355 = vmatprep.mubr.bf16.mxu0 %v6045_v40  ;;  %9779 = vmatprep.mubr.bf16.mxu1 %v6045_v40  ;;  %v14499_v38 = vld [vmem:[%s19282_s9 + $0x84c] ss:$16 sps:$4 sm:$0xff]   ;;  %v14497_v40 = vld [vmem:[%s19282_s9 + $0x848] ss:$16 sps:$4 sm:$0xff]  }
 0x6f5   : > { %9330 = vmatpush1.bf16.msra.mxu0 %v14404_v45  ;;  %9754 = vmatpush1.bf16.msra.mxu1 %v14407_v46  ;;  %v6060_v45 = vld [vmem:[#allocation3 + $0xb0] sm:$0xff] }
 0x6f6   : > { %9331 = vmatprep.subr.bf16.mxu0 %v14412_v47  ;;  %9755 = vmatprep.subr.bf16.mxu1 %v14415_v48  ;;  %v14502_v46 = vld [vmem:[%s19282_s9 + $0x864] ss:$16 sps:$4 sm:$0xff]   ;;  %v14505_v47 = vld [vmem:[%s19282_s9 + $0x86c] ss:$16 sps:$4 sm:$0xff]  }
 0x6f7   : > { %v6047_v48 = vld [vmem:[#allocation3 + $0x48] sm:$0xff] }
 0x6f9   : > { %9332 = vmatpush1.bf16.msra.mxu0 %v14410_v49  ;;  %9756 = vmatpush1.bf16.msra.mxu1 %v14413_v50  ;;  %v14500_v49 = vld [vmem:[%s19282_s9 + $0x860] ss:$16 sps:$4 sm:$0xff]   ;;  %v14503_v50 = vld [vmem:[%s19282_s9 + $0x868] ss:$16 sps:$4 sm:$0xff]  }
 0x6fa   : > { %9333 = vmatprep.subr.bf16.mxu0 %v14418_v51  ;;  %9757 = vmatprep.subr.bf16.mxu1 %v14421_v52  ;;  %v14508_v51 = vld [vmem:[%s19282_s9 + $0x884] ss:$16 sps:$4 sm:$0xff]   ;;  %v14511_v52 = vld [vmem:[%s19282_s9 + $0x88c] ss:$16 sps:$4 sm:$0xff]  }
 0x6fd   : > { %9334 = vmatpush1.bf16.msra.mxu0 %v14416_v53  ;;  %9758 = vmatpush1.bf16.msra.mxu1 %v14419_v54  ;;  %v14506_v53 = vld [vmem:[%s19282_s9 + $0x880] ss:$16 sps:$4 sm:$0xff]   ;;  %v14509_v54 = vld [vmem:[%s19282_s9 + $0x888] ss:$16 sps:$4 sm:$0xff]  }
 0x6fe   : > { %9335 = vmatprep.subr.bf16.mxu0 %v14424_v55  ;;  %9759 = vmatprep.subr.bf16.mxu1 %v14427_v56  ;;  %v14514_v55 = vld [vmem:[%s19282_s9 + $0x8a4] ss:$16 sps:$4 sm:$0xff]   ;;  %v14517_v56 = vld [vmem:[%s19282_s9 + $0x8ac] ss:$16 sps:$4 sm:$0xff]  }
 0x701   : > { %9336 = vmatpush1.bf16.msra.mxu0 %v14422_v57  ;;  %9760 = vmatpush1.bf16.msra.mxu1 %v14425_v58  ;;  %v14512_v57 = vld [vmem:[%s19282_s9 + $0x8a0] ss:$16 sps:$4 sm:$0xff]   ;;  %v14515_v58 = vld [vmem:[%s19282_s9 + $0x8a8] ss:$16 sps:$4 sm:$0xff]  }
 0x702   : > { %9337 = vmatprep.subr.bf16.mxu0 %v14430_v59  ;;  %9761 = vmatprep.subr.bf16.mxu1 %v14433_v63  ;;  %v14520_v59 = vld [vmem:[%s19282_s9 + $0x8c4] ss:$16 sps:$4 sm:$0xff]   ;;  %v14523_v63 = vld [vmem:[%s19282_s9 + $0x8cc] ss:$16 sps:$4 sm:$0xff]  }
 0x705   : > { %9338 = vmatpush1.bf16.msra.mxu0 %v14428_v3  ;;  %9762 = vmatpush1.bf16.msra.mxu1 %v14431_v5  ;;  %v14518_v3 = vld [vmem:[%s19282_s9 + $0x8c0] ss:$16 sps:$4 sm:$0xff]   ;;  %v14521_v5 = vld [vmem:[%s19282_s9 + $0x8c8] ss:$16 sps:$4 sm:$0xff]  }
 0x706   : > { %9339 = vmatprep.subr.bf16.mxu0 %v14436_v11  ;;  %9763 = vmatprep.subr.bf16.mxu1 %v14439_v12  ;;  %v14526_v11 = vld [vmem:[%s19282_s9 + $0x8e4] ss:$16 sps:$4 sm:$0xff]   ;;  %v14529_v12 = vld [vmem:[%s19282_s9 + $0x8ec] ss:$16 sps:$4 sm:$0xff]  }
 0x709   : > { %9340 = vmatpush1.bf16.msra.mxu0 %v14434_v13  ;;  %9764 = vmatpush1.bf16.msra.mxu1 %v14437_v14  ;;  %v14524_v13 = vld [vmem:[%s19282_s9 + $0x8e0] ss:$16 sps:$4 sm:$0xff]   ;;  %v14527_v14 = vld [vmem:[%s19282_s9 + $0x8e8] ss:$16 sps:$4 sm:$0xff]  }
 0x70a   : > { %9341 = vmatprep.subr.bf16.mxu0 %v14442_v15  ;;  %9765 = vmatprep.subr.bf16.mxu1 %v14445_v16  ;;  %v14532_v15 = vld [vmem:[%s19282_s9 + $0x904] ss:$16 sps:$4 sm:$0xff]   ;;  %v14535_v16 = vld [vmem:[%s19282_s9 + $0x90c] ss:$16 sps:$4 sm:$0xff]  }
 0x70d   : > { %9342 = vmatpush1.bf16.msra.mxu0 %v14440_v42  ;;  %9766 = vmatpush1.bf16.msra.mxu1 %v14443_v43  ;;  %v14530_v42 = vld [vmem:[%s19282_s9 + $0x900] ss:$16 sps:$4 sm:$0xff]   ;;  %v14533_v43 = vld [vmem:[%s19282_s9 + $0x908] ss:$16 sps:$4 sm:$0xff]  }
 0x70e   : > { %9343 = vmatprep.subr.bf16.mxu0 %v14448_v17  ;;  %9767 = vmatprep.subr.bf16.mxu1 %v14451_v28  ;;  %v14538_v17 = vld [vmem:[%s19282_s9 + $0x924] ss:$16 sps:$4 sm:$0xff]   ;;  %v14541_v28 = vld [vmem:[%s19282_s9 + $0x92c] ss:$16 sps:$4 sm:$0xff]  }
 0x711   : > { %9344 = vmatpush1.bf16.msra.mxu0 %v14446_v25  ;;  %9768 = vmatpush1.bf16.msra.mxu1 %v14449_v41  ;;  %v14536_v25 = vld [vmem:[%s19282_s9 + $0x920] ss:$16 sps:$4 sm:$0xff]   ;;  %v14539_v41 = vld [vmem:[%s19282_s9 + $0x928] ss:$16 sps:$4 sm:$0xff]  }
 0x712   : > { %9345 = vmatprep.subr.bf16.mxu0 %v14454_v7  ;;  %9769 = vmatprep.subr.bf16.mxu1 %v14457_v18  ;;  %v14544_v7 = vld [vmem:[%s19282_s9 + $0x944] ss:$16 sps:$4 sm:$0xff]   ;;  %v14547_v18 = vld [vmem:[%s19282_s9 + $0x94c] ss:$16 sps:$4 sm:$0xff]  }
 0x715   : > { %9346 = vmatpush1.bf16.msra.mxu0 %v14452_v10  ;;  %9770 = vmatpush1.bf16.msra.mxu1 %v14455_v19  ;;  %v14542_v10 = vld [vmem:[%s19282_s9 + $0x940] ss:$16 sps:$4 sm:$0xff]   ;;  %v14545_v19 = vld [vmem:[%s19282_s9 + $0x948] ss:$16 sps:$4 sm:$0xff]  }
 0x716   : > { %9347 = vmatprep.subr.bf16.mxu0 %v14460_v23  ;;  %9771 = vmatprep.subr.bf16.mxu1 %v14463_v20  ;;  %v14550_v23 = vld [vmem:[%s19282_s9 + $0x964] ss:$16 sps:$4 sm:$0xff]   ;;  %v14553_v20 = vld [vmem:[%s19282_s9 + $0x96c] ss:$16 sps:$4 sm:$0xff]  }
 0x719   : > { %9348 = vmatpush1.bf16.msra.mxu0 %v14458_v8  ;;  %9772 = vmatpush1.bf16.msra.mxu1 %v14461_v21  ;;  %v14548_v8 = vld [vmem:[%s19282_s9 + $0x960] ss:$16 sps:$4 sm:$0xff]   ;;  %v14551_v21 = vld [vmem:[%s19282_s9 + $0x968] ss:$16 sps:$4 sm:$0xff]  }
 0x71a   : > { %9349 = vmatprep.subr.bf16.mxu0 %v14466_v22  ;;  %9773 = vmatprep.subr.bf16.mxu1 %v14469_v29  ;;  %v14556_v22 = vld [vmem:[%s19282_s9 + $0x984] ss:$16 sps:$4 sm:$0xff]   ;;  %v14559_v29 = vld [vmem:[%s19282_s9 + $0x98c] ss:$16 sps:$4 sm:$0xff]  }
 0x71d   : > { %9350 = vmatpush1.bf16.msra.mxu0 %v14464_v9  ;;  %9774 = vmatpush1.bf16.msra.mxu1 %v14467_v4  ;;  %v14554_v9 = vld [vmem:[%s19282_s9 + $0x980] ss:$16 sps:$4 sm:$0xff]   ;;  %v14557_v4 = vld [vmem:[%s19282_s9 + $0x988] ss:$16 sps:$4 sm:$0xff]  }
 0x71e   : > { %9351 = vmatprep.subr.bf16.mxu0 %v14472_v60  ;;  %9775 = vmatprep.subr.bf16.mxu1 %v14475_v31  ;;  %v14562_v60 = vld [vmem:[%s19282_s9 + $0x9a4] ss:$16 sps:$4 sm:$0xff]   ;;  %v14565_v31 = vld [vmem:[%s19282_s9 + $0x9ac] ss:$16 sps:$4 sm:$0xff]  }
 0x721   : > { %9352 = vmatpush1.bf16.msra.mxu0 %v14470_v1  ;;  %9776 = vmatpush1.bf16.msra.mxu1 %v14473_v6  ;;  %v14560_v1 = vld [vmem:[%s19282_s9 + $0x9a0] ss:$16 sps:$4 sm:$0xff]   ;;  %v14563_v6 = vld [vmem:[%s19282_s9 + $0x9a8] ss:$16 sps:$4 sm:$0xff]  }
 0x722   : > { %9353 = vmatprep.subr.bf16.mxu0 %v14478_v62  ;;  %9777 = vmatprep.subr.bf16.mxu1 %v14481_v0  ;;  %v14568_v62 = vld [vmem:[%s19282_s9 + $0x9c4] ss:$16 sps:$4 sm:$0xff]   ;;  %v14571_v0 = vld [vmem:[%s19282_s9 + $0x9cc] ss:$16 sps:$4 sm:$0xff]  }
 0x725   : > { %9354 = vmatpush1.bf16.msra.mxu0 %v14476_v2  ;;  %9778 = vmatpush1.bf16.msra.mxu1 %v14479_v24  ;;  %v14566_v2 = vld [vmem:[%s19282_s9 + $0x9c0] ss:$16 sps:$4 sm:$0xff]   ;;  %v14569_v24 = vld [vmem:[%s19282_s9 + $0x9c8] ss:$16 sps:$4 sm:$0xff]  }
 0x726   : > { %9376 = vmatprep.subr.bf16.mxu0 %v14484_v61  ;;  %9800 = vmatprep.subr.bf16.mxu1 %v14487_v26  ;;  %v14574_v61 = vld [vmem:[%s19282_s9 + $0x9e4] ss:$16 sps:$4 sm:$0xff]   ;;  %v14577_v26 = vld [vmem:[%s19282_s9 + $0x9ec] ss:$16 sps:$4 sm:$0xff]  }
 0x728   : > { %9356 = vmatmul.mubr.bf16.vlgmr.msra.gmra.mrb[0].mxu0 %v6044_v44  ;;  %9780 = vmatmul.mubr.bf16.vlgmr.msra.gmra.mrb[0].mxu1 %v6044_v44  ;;  %v14580_v44 = vld [vmem:[%s19282_s9 + $0xa04] ss:$16 sps:$4 sm:$0xff]  }
 0x729   : > { %9377 = vmatpush1.bf16.msra.mxu0 %v14482_v27  ;;  %9801 = vmatpush1.bf16.msra.mxu1 %v14485_v30  ;;  %v14572_v27 = vld [vmem:[%s19282_s9 + $0x9e0] ss:$16 sps:$4 sm:$0xff]   ;;  %v14575_v30 = vld [vmem:[%s19282_s9 + $0x9e8] ss:$16 sps:$4 sm:$0xff]  }
 0x72a   : > { %9378 = vmatprep.subr.bf16.mxu0 %v14490_v32  ;;  %9802 = vmatprep.subr.bf16.mxu1 %v14493_v33  ;;  %v14583_v32 = vld [vmem:[%s19282_s9 + $0xa0c] ss:$16 sps:$4 sm:$0xff]   ;;  %v14578_v33 = vld [vmem:[%s19282_s9 + $0xa00] ss:$16 sps:$4 sm:$0xff]  }
 0x72b   : > { %9365 = vmatprep.mubr.bf16.mxu0 %v6061_v36  ;;  %9789 = vmatprep.mubr.bf16.mxu1 %v6061_v36  ;;  %v14586_v36 = vld [vmem:[%s19282_s9 + $0xa24] ss:$16 sps:$4 sm:$0xff]  }
 0x72d   : > { %9379 = vmatpush1.bf16.msra.mxu0 %v14488_v34  ;;  %9803 = vmatpush1.bf16.msra.mxu1 %v14491_v35  ;;  %v14581_v34 = vld [vmem:[%s19282_s9 + $0xa08] ss:$16 sps:$4 sm:$0xff]   ;;  %v6046_v35 = vld [vmem:[#allocation3 + $0x40] sm:$0xff] }
 0x72e   : > { %9380 = vmatprep.subr.bf16.mxu0 %v14496_v37  ;;  %9804 = vmatprep.subr.bf16.mxu1 %v14499_v38  ;;  %v14589_v37 = vld [vmem:[%s19282_s9 + $0xa2c] ss:$16 sps:$4 sm:$0xff]  }
 0x72f   : > { %v6063_v38 = vld [vmem:[#allocation3 + $0xc8] sm:$0xff] }
 0x730   : > { %9366 = vmatmul.mubr.bf16.gmra.mrb[4].mxu0 %v6060_v45  ;;  %9790 = vmatmul.mubr.bf16.gmra.mrb[4].mxu1 %v6060_v45  ;;  %v14592_v45 = vld [vmem:[%s19282_s9 + $0xa44] ss:$16 sps:$4 sm:$0xff]  }
 0x731   : > { %9381 = vmatpush1.bf16.msra.mxu0 %v14494_v39  ;;  %9805 = vmatpush1.bf16.msra.mxu1 %v14497_v40  ;;  %v14584_v39 = vld [vmem:[%s19282_s9 + $0xa20] ss:$16 sps:$4 sm:$0xff]   ;;  %v14587_v40 = vld [vmem:[%s19282_s9 + $0xa28] ss:$16 sps:$4 sm:$0xff]  }
 0x732   : > { %9382 = vmatprep.subr.bf16.mxu0 %v14502_v46  ;;  %9806 = vmatprep.subr.bf16.mxu1 %v14505_v47  ;;  %v14595_v46 = vld [vmem:[%s19282_s9 + $0xa4c] ss:$16 sps:$4 sm:$0xff]   ;;  %v14590_v47 = vld [vmem:[%s19282_s9 + $0xa40] ss:$16 sps:$4 sm:$0xff]  }
 0x733   : > { %9408 = vmatprep.mubr.bf16.mxu0 %v6047_v48  ;;  %9832 = vmatprep.mubr.bf16.mxu1 %v6047_v48  ;;  %v14593_v48 = vld [vmem:[%s19282_s9 + $0xa48] ss:$16 sps:$4 sm:$0xff]  }
 0x735   : > { %9383 = vmatpush1.bf16.msra.mxu0 %v14500_v49  ;;  %9807 = vmatpush1.bf16.msra.mxu1 %v14503_v50  ;;  %v14598_v49 = vld [vmem:[%s19282_s9 + $0xa64] ss:$16 sps:$4 sm:$0xff]  }
 0x736   : > { %9384 = vmatprep.subr.bf16.mxu0 %v14508_v51  ;;  %9808 = vmatprep.subr.bf16.mxu1 %v14511_v52  ;;  %v6062_v50 = vld [vmem:[#allocation3 + $0xc0] sm:$0xff]  ;;  %v14601_v51 = vld [vmem:[%s19282_s9 + $0xa6c] ss:$16 sps:$4 sm:$0xff]  }
 0x737   : > { %v6049_v52 = vld [vmem:[#allocation3 + $0x58] sm:$0xff] }
 0x739   : > { %9385 = vmatpush1.bf16.msra.mxu0 %v14506_v53  ;;  %9809 = vmatpush1.bf16.msra.mxu1 %v14509_v54  ;;  %v14596_v53 = vld [vmem:[%s19282_s9 + $0xa60] ss:$16 sps:$4 sm:$0xff]   ;;  %v14599_v54 = vld [vmem:[%s19282_s9 + $0xa68] ss:$16 sps:$4 sm:$0xff]  }
 0x73a   : > { %9386 = vmatprep.subr.bf16.mxu0 %v14514_v55  ;;  %9810 = vmatprep.subr.bf16.mxu1 %v14517_v56  ;;  %v14604_v55 = vld [vmem:[%s19282_s9 + $0xa84] ss:$16 sps:$4 sm:$0xff]   ;;  %v14607_v56 = vld [vmem:[%s19282_s9 + $0xa8c] ss:$16 sps:$4 sm:$0xff]  }
 0x73d   : > { %9387 = vmatpush1.bf16.msra.mxu0 %v14512_v57  ;;  %9811 = vmatpush1.bf16.msra.mxu1 %v14515_v58  ;;  %v14602_v57 = vld [vmem:[%s19282_s9 + $0xa80] ss:$16 sps:$4 sm:$0xff]   ;;  %v14605_v58 = vld [vmem:[%s19282_s9 + $0xa88] ss:$16 sps:$4 sm:$0xff]  }
 0x73e   : > { %9388 = vmatprep.subr.bf16.mxu0 %v14520_v59  ;;  %9812 = vmatprep.subr.bf16.mxu1 %v14523_v63  ;;  %v14610_v59 = vld [vmem:[%s19282_s9 + $0xaa4] ss:$16 sps:$4 sm:$0xff]   ;;  %v14613_v63 = vld [vmem:[%s19282_s9 + $0xaac] ss:$16 sps:$4 sm:$0xff]  }
 0x741   : > { %9389 = vmatpush1.bf16.msra.mxu0 %v14518_v3  ;;  %9813 = vmatpush1.bf16.msra.mxu1 %v14521_v5  ;;  %v14608_v3 = vld [vmem:[%s19282_s9 + $0xaa0] ss:$16 sps:$4 sm:$0xff]   ;;  %v14611_v5 = vld [vmem:[%s19282_s9 + $0xaa8] ss:$16 sps:$4 sm:$0xff]  }
 0x742   : > { %9390 = vmatprep.subr.bf16.mxu0 %v14526_v11  ;;  %9814 = vmatprep.subr.bf16.mxu1 %v14529_v12  ;;  %v14616_v11 = vld [vmem:[%s19282_s9 + $0xac4] ss:$16 sps:$4 sm:$0xff]   ;;  %v14619_v12 = vld [vmem:[%s19282_s9 + $0xacc] ss:$16 sps:$4 sm:$0xff]  }
 0x745   : > { %9391 = vmatpush1.bf16.msra.mxu0 %v14524_v13  ;;  %9815 = vmatpush1.bf16.msra.mxu1 %v14527_v14  ;;  %v14614_v13 = vld [vmem:[%s19282_s9 + $0xac0] ss:$16 sps:$4 sm:$0xff]   ;;  %v14617_v14 = vld [vmem:[%s19282_s9 + $0xac8] ss:$16 sps:$4 sm:$0xff]  }
 0x746   : > { %9392 = vmatprep.subr.bf16.mxu0 %v14532_v15  ;;  %9816 = vmatprep.subr.bf16.mxu1 %v14535_v16  ;;  %v14622_v15 = vld [vmem:[%s19282_s9 + $0xae4] ss:$16 sps:$4 sm:$0xff]   ;;  %v14625_v16 = vld [vmem:[%s19282_s9 + $0xaec] ss:$16 sps:$4 sm:$0xff]  }
 0x749   : > { %9393 = vmatpush1.bf16.msra.mxu0 %v14530_v42  ;;  %9817 = vmatpush1.bf16.msra.mxu1 %v14533_v43  ;;  %v14620_v42 = vld [vmem:[%s19282_s9 + $0xae0] ss:$16 sps:$4 sm:$0xff]   ;;  %v14623_v43 = vld [vmem:[%s19282_s9 + $0xae8] ss:$16 sps:$4 sm:$0xff]  }
 0x74a   : > { %9394 = vmatprep.subr.bf16.mxu0 %v14538_v17  ;;  %9818 = vmatprep.subr.bf16.mxu1 %v14541_v28  ;;  %v14628_v17 = vld [vmem:[%s19282_s9 + $0xb04] ss:$16 sps:$4 sm:$0xff]   ;;  %v14631_v28 = vld [vmem:[%s19282_s9 + $0xb0c] ss:$16 sps:$4 sm:$0xff]  }
 0x74d   : > { %9395 = vmatpush1.bf16.msra.mxu0 %v14536_v25  ;;  %9819 = vmatpush1.bf16.msra.mxu1 %v14539_v41  ;;  %v14626_v25 = vld [vmem:[%s19282_s9 + $0xb00] ss:$16 sps:$4 sm:$0xff]   ;;  %v14629_v41 = vld [vmem:[%s19282_s9 + $0xb08] ss:$16 sps:$4 sm:$0xff]  }
 0x74e   : > { %9396 = vmatprep.subr.bf16.mxu0 %v14544_v7  ;;  %9820 = vmatprep.subr.bf16.mxu1 %v14547_v18  ;;  %v14634_v7 = vld [vmem:[%s19282_s9 + $0xb24] ss:$16 sps:$4 sm:$0xff]   ;;  %v14637_v18 = vld [vmem:[%s19282_s9 + $0xb2c] ss:$16 sps:$4 sm:$0xff]  }
 0x751   : > { %9397 = vmatpush1.bf16.msra.mxu0 %v14542_v10  ;;  %9821 = vmatpush1.bf16.msra.mxu1 %v14545_v19  ;;  %v14632_v10 = vld [vmem:[%s19282_s9 + $0xb20] ss:$16 sps:$4 sm:$0xff]   ;;  %v14635_v19 = vld [vmem:[%s19282_s9 + $0xb28] ss:$16 sps:$4 sm:$0xff]  }
 0x752   : > { %9398 = vmatprep.subr.bf16.mxu0 %v14550_v23  ;;  %9822 = vmatprep.subr.bf16.mxu1 %v14553_v20  ;;  %v14640_v23 = vld [vmem:[%s19282_s9 + $0xb44] ss:$16 sps:$4 sm:$0xff]   ;;  %v14643_v20 = vld [vmem:[%s19282_s9 + $0xb4c] ss:$16 sps:$4 sm:$0xff]  }
 0x755   : > { %9399 = vmatpush1.bf16.msra.mxu0 %v14548_v8  ;;  %9823 = vmatpush1.bf16.msra.mxu1 %v14551_v21  ;;  %v14638_v8 = vld [vmem:[%s19282_s9 + $0xb40] ss:$16 sps:$4 sm:$0xff]   ;;  %v14641_v21 = vld [vmem:[%s19282_s9 + $0xb48] ss:$16 sps:$4 sm:$0xff]  }
 0x756   : > { %9400 = vmatprep.subr.bf16.mxu0 %v14556_v22  ;;  %9824 = vmatprep.subr.bf16.mxu1 %v14559_v29  ;;  %v14646_v22 = vld [vmem:[%s19282_s9 + $0xb64] ss:$16 sps:$4 sm:$0xff]   ;;  %v14649_v29 = vld [vmem:[%s19282_s9 + $0xb6c] ss:$16 sps:$4 sm:$0xff]  }
 0x759   : > { %9401 = vmatpush1.bf16.msra.mxu0 %v14554_v9  ;;  %9825 = vmatpush1.bf16.msra.mxu1 %v14557_v4  ;;  %v14644_v9 = vld [vmem:[%s19282_s9 + $0xb60] ss:$16 sps:$4 sm:$0xff]   ;;  %v14647_v4 = vld [vmem:[%s19282_s9 + $0xb68] ss:$16 sps:$4 sm:$0xff]  }
 0x75a   : > { %9402 = vmatprep.subr.bf16.mxu0 %v14562_v60  ;;  %9826 = vmatprep.subr.bf16.mxu1 %v14565_v31  ;;  %v14652_v60 = vld [vmem:[%s19282_s9 + $0xb84] ss:$16 sps:$4 sm:$0xff]   ;;  %v14655_v31 = vld [vmem:[%s19282_s9 + $0xb8c] ss:$16 sps:$4 sm:$0xff]  }
 0x75d   : > { %9403 = vmatpush1.bf16.msra.mxu0 %v14560_v1  ;;  %9827 = vmatpush1.bf16.msra.mxu1 %v14563_v6  ;;  %v14650_v1 = vld [vmem:[%s19282_s9 + $0xb80] ss:$16 sps:$4 sm:$0xff]   ;;  %v14653_v6 = vld [vmem:[%s19282_s9 + $0xb88] ss:$16 sps:$4 sm:$0xff]  }
 0x75e   : > { %9404 = vmatprep.subr.bf16.mxu0 %v14568_v62  ;;  %9828 = vmatprep.subr.bf16.mxu1 %v14571_v0  ;;  %v14658_v62 = vld [vmem:[%s19282_s9 + $0xba4] ss:$16 sps:$4 sm:$0xff]   ;;  %v14661_v0 = vld [vmem:[%s19282_s9 + $0xbac] ss:$16 sps:$4 sm:$0xff]  }
 0x761   : > { %9405 = vmatpush1.bf16.msra.mxu0 %v14566_v2  ;;  %9829 = vmatpush1.bf16.msra.mxu1 %v14569_v24  ;;  %v14656_v2 = vld [vmem:[%s19282_s9 + $0xba0] ss:$16 sps:$4 sm:$0xff]   ;;  %v14659_v24 = vld [vmem:[%s19282_s9 + $0xba8] ss:$16 sps:$4 sm:$0xff]  }
 0x762   : > { %9406 = vmatprep.subr.bf16.mxu0 %v14574_v61  ;;  %9830 = vmatprep.subr.bf16.mxu1 %v14577_v26  ;;  %v14664_v61 = vld [vmem:[%s19282_s9 + $0xbc4] ss:$16 sps:$4 sm:$0xff]   ;;  %v14667_v26 = vld [vmem:[%s19282_s9 + $0xbcc] ss:$16 sps:$4 sm:$0xff]  }
 0x765   : > { %9407 = vmatpush1.bf16.msra.mxu0 %v14572_v27  ;;  %9831 = vmatpush1.bf16.msra.mxu1 %v14575_v30  ;;  %v14662_v27 = vld [vmem:[%s19282_s9 + $0xbc0] ss:$16 sps:$4 sm:$0xff]   ;;  %v14665_v30 = vld [vmem:[%s19282_s9 + $0xbc8] ss:$16 sps:$4 sm:$0xff]  }
 0x766   : > { %9429 = vmatprep.subr.bf16.mxu0 %v14580_v44  ;;  %9853 = vmatprep.subr.bf16.mxu1 %v14583_v32  ;;  %v14670_v44 = vld [vmem:[%s19282_s9 + $0xbe4] ss:$16 sps:$4 sm:$0xff]   ;;  %v14673_v32 = vld [vmem:[%s19282_s9 + $0xbec] ss:$16 sps:$4 sm:$0xff]  }
 0x768   : > { %9409 = vmatmul.mubr.bf16.vlgmr.msra.gmra.mrb[0].mxu0 %v6046_v35  ;;  %9833 = vmatmul.mubr.bf16.vlgmr.msra.gmra.mrb[0].mxu1 %v6046_v35  ;;  %v14676_v35 = vld [vmem:[%s19282_s9 + $0xc04] ss:$16 sps:$4 sm:$0xff]  }
 0x769   : > { %9430 = vmatpush1.bf16.msra.mxu0 %v14578_v33  ;;  %9854 = vmatpush1.bf16.msra.mxu1 %v14581_v34  ;;  %v14668_v33 = vld [vmem:[%s19282_s9 + $0xbe0] ss:$16 sps:$4 sm:$0xff]   ;;  %v14671_v34 = vld [vmem:[%s19282_s9 + $0xbe8] ss:$16 sps:$4 sm:$0xff]  }
 0x76a   : > { %9431 = vmatprep.subr.bf16.mxu0 %v14586_v36  ;;  %9855 = vmatprep.subr.bf16.mxu1 %v14589_v37  ;;  %v14679_v36 = vld [vmem:[%s19282_s9 + $0xc0c] ss:$16 sps:$4 sm:$0xff]   ;;  %v14674_v37 = vld [vmem:[%s19282_s9 + $0xc00] ss:$16 sps:$4 sm:$0xff]  }
 0x76b   : > { %9418 = vmatprep.mubr.bf16.mxu0 %v6063_v38  ;;  %9842 = vmatprep.mubr.bf16.mxu1 %v6063_v38  ;;  %v14677_v38 = vld [vmem:[%s19282_s9 + $0xc08] ss:$16 sps:$4 sm:$0xff]  }
 0x76d   : > { %9432 = vmatpush1.bf16.msra.mxu0 %v14584_v39  ;;  %9856 = vmatpush1.bf16.msra.mxu1 %v14587_v40  ;;  %v6048_v39 = vld [vmem:[#allocation3 + $0x50] sm:$0xff] }
 0x76e   : > { %9433 = vmatprep.subr.bf16.mxu0 %v14592_v45  ;;  %9857 = vmatprep.subr.bf16.mxu1 %v14595_v46  ;;  %v14682_v40 = vld [vmem:[%s19282_s9 + $0xc24] ss:$16 sps:$4 sm:$0xff]   ;;  %v14685_v45 = vld [vmem:[%s19282_s9 + $0xc2c] ss:$16 sps:$4 sm:$0xff]  }
 0x76f   : > { %v6065_v46 = vld [vmem:[#allocation3 + $0xd8] sm:$0xff] }
 0x770   : > { %9419 = vmatmul.mubr.bf16.gmra.mrb[4].mxu0 %v6062_v50  ;;  %9843 = vmatmul.mubr.bf16.gmra.mrb[4].mxu1 %v6062_v50  ;;  %v14691_v50 = vld [vmem:[%s19282_s9 + $0xc4c] ss:$16 sps:$4 sm:$0xff]  }
 0x771   : > { %9434 = vmatpush1.bf16.msra.mxu0 %v14590_v47  ;;  %9858 = vmatpush1.bf16.msra.mxu1 %v14593_v48  ;;  %v14680_v47 = vld [vmem:[%s19282_s9 + $0xc20] ss:$16 sps:$4 sm:$0xff]   ;;  %v14683_v48 = vld [vmem:[%s19282_s9 + $0xc28] ss:$16 sps:$4 sm:$0xff]  }
 0x772   : > { %9435 = vmatprep.subr.bf16.mxu0 %v14598_v49  ;;  %9859 = vmatprep.subr.bf16.mxu1 %v14601_v51  ;;  %v14688_v49 = vld [vmem:[%s19282_s9 + $0xc44] ss:$16 sps:$4 sm:$0xff]   ;;  %v14686_v51 = vld [vmem:[%s19282_s9 + $0xc40] ss:$16 sps:$4 sm:$0xff]  }
 0x773   : > { %9461 = vmatprep.mubr.bf16.mxu0 %v6049_v52  ;;  %9885 = vmatprep.mubr.bf16.mxu1 %v6049_v52  ;;  %v14689_v52 = vld [vmem:[%s19282_s9 + $0xc48] ss:$16 sps:$4 sm:$0xff]  }
 0x775   : > { %9436 = vmatpush1.bf16.msra.mxu0 %v14596_v53  ;;  %9860 = vmatpush1.bf16.msra.mxu1 %v14599_v54  ;;  %v6064_v53 = vld [vmem:[#allocation3 + $0xd0] sm:$0xff] }
 0x776   : > { %9437 = vmatprep.subr.bf16.mxu0 %v14604_v55  ;;  %9861 = vmatprep.subr.bf16.mxu1 %v14607_v56  ;;  %v14694_v54 = vld [vmem:[%s19282_s9 + $0xc64] ss:$16 sps:$4 sm:$0xff]   ;;  %v14697_v55 = vld [vmem:[%s19282_s9 + $0xc6c] ss:$16 sps:$4 sm:$0xff]  }
 0x777   : > { %v18266_v56 = vld [vmem:[#allocation3 + $0x68] sm:$0xff] }
 0x779   : > { %9438 = vmatpush1.bf16.msra.mxu0 %v14602_v57  ;;  %9862 = vmatpush1.bf16.msra.mxu1 %v14605_v58  ;;  %v14692_v57 = vld [vmem:[%s19282_s9 + $0xc60] ss:$16 sps:$4 sm:$0xff]   ;;  %v14695_v58 = vld [vmem:[%s19282_s9 + $0xc68] ss:$16 sps:$4 sm:$0xff]  }
 0x77a   : > { %9439 = vmatprep.subr.bf16.mxu0 %v14610_v59  ;;  %9863 = vmatprep.subr.bf16.mxu1 %v14613_v63  ;;  %v14700_v59 = vld [vmem:[%s19282_s9 + $0xc84] ss:$16 sps:$4 sm:$0xff]   ;;  %v14703_v63 = vld [vmem:[%s19282_s9 + $0xc8c] ss:$16 sps:$4 sm:$0xff]  }
 0x77d   : > { %9440 = vmatpush1.bf16.msra.mxu0 %v14608_v3  ;;  %9864 = vmatpush1.bf16.msra.mxu1 %v14611_v5  ;;  %v14698_v3 = vld [vmem:[%s19282_s9 + $0xc80] ss:$16 sps:$4 sm:$0xff]   ;;  %v14701_v5 = vld [vmem:[%s19282_s9 + $0xc88] ss:$16 sps:$4 sm:$0xff]  }
 0x77e   : > { %9441 = vmatprep.subr.bf16.mxu0 %v14616_v11  ;;  %9865 = vmatprep.subr.bf16.mxu1 %v14619_v12  ;;  %v14706_v11 = vld [vmem:[%s19282_s9 + $0xca4] ss:$16 sps:$4 sm:$0xff]   ;;  %v14709_v12 = vld [vmem:[%s19282_s9 + $0xcac] ss:$16 sps:$4 sm:$0xff]  }
 0x781   : > { %9442 = vmatpush1.bf16.msra.mxu0 %v14614_v13  ;;  %9866 = vmatpush1.bf16.msra.mxu1 %v14617_v14  ;;  %v14704_v13 = vld [vmem:[%s19282_s9 + $0xca0] ss:$16 sps:$4 sm:$0xff]   ;;  %v14707_v14 = vld [vmem:[%s19282_s9 + $0xca8] ss:$16 sps:$4 sm:$0xff]  }
 0x782   : > { %9443 = vmatprep.subr.bf16.mxu0 %v14622_v15  ;;  %9867 = vmatprep.subr.bf16.mxu1 %v14625_v16  ;;  %v14712_v15 = vld [vmem:[%s19282_s9 + $0xcc4] ss:$16 sps:$4 sm:$0xff]   ;;  %v14715_v16 = vld [vmem:[%s19282_s9 + $0xccc] ss:$16 sps:$4 sm:$0xff]  }
 0x785   : > { %9444 = vmatpush1.bf16.msra.mxu0 %v14620_v42  ;;  %9868 = vmatpush1.bf16.msra.mxu1 %v14623_v43  ;;  %v14710_v42 = vld [vmem:[%s19282_s9 + $0xcc0] ss:$16 sps:$4 sm:$0xff]   ;;  %v14713_v43 = vld [vmem:[%s19282_s9 + $0xcc8] ss:$16 sps:$4 sm:$0xff]  }
 0x786   : > { %9445 = vmatprep.subr.bf16.mxu0 %v14628_v17  ;;  %9869 = vmatprep.subr.bf16.mxu1 %v14631_v28  ;;  %v14718_v17 = vld [vmem:[%s19282_s9 + $0xce4] ss:$16 sps:$4 sm:$0xff]   ;;  %v14721_v28 = vld [vmem:[%s19282_s9 + $0xcec] ss:$16 sps:$4 sm:$0xff]  }
 0x789   : > { %9446 = vmatpush1.bf16.msra.mxu0 %v14626_v25  ;;  %9870 = vmatpush1.bf16.msra.mxu1 %v14629_v41  ;;  %v14716_v25 = vld [vmem:[%s19282_s9 + $0xce0] ss:$16 sps:$4 sm:$0xff]   ;;  %v14719_v41 = vld [vmem:[%s19282_s9 + $0xce8] ss:$16 sps:$4 sm:$0xff]  }
 0x78a   : > { %9447 = vmatprep.subr.bf16.mxu0 %v14634_v7  ;;  %9871 = vmatprep.subr.bf16.mxu1 %v14637_v18  ;;  %v14724_v7 = vld [vmem:[%s19282_s9 + $0xd04] ss:$16 sps:$4 sm:$0xff]   ;;  %v14727_v18 = vld [vmem:[%s19282_s9 + $0xd0c] ss:$16 sps:$4 sm:$0xff]  }
 0x78d   : > { %9448 = vmatpush1.bf16.msra.mxu0 %v14632_v10  ;;  %9872 = vmatpush1.bf16.msra.mxu1 %v14635_v19  ;;  %v14722_v10 = vld [vmem:[%s19282_s9 + $0xd00] ss:$16 sps:$4 sm:$0xff]   ;;  %v14725_v19 = vld [vmem:[%s19282_s9 + $0xd08] ss:$16 sps:$4 sm:$0xff]  }
 0x78e   : > { %9449 = vmatprep.subr.bf16.mxu0 %v14640_v23  ;;  %9873 = vmatprep.subr.bf16.mxu1 %v14643_v20  ;;  %v14730_v23 = vld [vmem:[%s19282_s9 + $0xd24] ss:$16 sps:$4 sm:$0xff]   ;;  %v14733_v20 = vld [vmem:[%s19282_s9 + $0xd2c] ss:$16 sps:$4 sm:$0xff]  }
 0x791   : > { %9450 = vmatpush1.bf16.msra.mxu0 %v14638_v8  ;;  %9874 = vmatpush1.bf16.msra.mxu1 %v14641_v21  ;;  %v14728_v8 = vld [vmem:[%s19282_s9 + $0xd20] ss:$16 sps:$4 sm:$0xff]   ;;  %v14731_v21 = vld [vmem:[%s19282_s9 + $0xd28] ss:$16 sps:$4 sm:$0xff]  }
 0x792   : > { %9451 = vmatprep.subr.bf16.mxu0 %v14646_v22  ;;  %9875 = vmatprep.subr.bf16.mxu1 %v14649_v29  ;;  %v14736_v22 = vld [vmem:[%s19282_s9 + $0xd44] ss:$16 sps:$4 sm:$0xff]   ;;  %v14739_v29 = vld [vmem:[%s19282_s9 + $0xd4c] ss:$16 sps:$4 sm:$0xff]  }
 0x795   : > { %9452 = vmatpush1.bf16.msra.mxu0 %v14644_v9  ;;  %9876 = vmatpush1.bf16.msra.mxu1 %v14647_v4  ;;  %v14734_v9 = vld [vmem:[%s19282_s9 + $0xd40] ss:$16 sps:$4 sm:$0xff]   ;;  %v14737_v4 = vld [vmem:[%s19282_s9 + $0xd48] ss:$16 sps:$4 sm:$0xff]  }
 0x796   : > { %9453 = vmatprep.subr.bf16.mxu0 %v14652_v60  ;;  %9877 = vmatprep.subr.bf16.mxu1 %v14655_v31  ;;  %v14742_v60 = vld [vmem:[%s19282_s9 + $0xd64] ss:$16 sps:$4 sm:$0xff]   ;;  %v14745_v31 = vld [vmem:[%s19282_s9 + $0xd6c] ss:$16 sps:$4 sm:$0xff]  }
 0x799   : > { %9454 = vmatpush1.bf16.msra.mxu0 %v14650_v1  ;;  %9878 = vmatpush1.bf16.msra.mxu1 %v14653_v6  ;;  %v14740_v1 = vld [vmem:[%s19282_s9 + $0xd60] ss:$16 sps:$4 sm:$0xff]   ;;  %v14743_v6 = vld [vmem:[%s19282_s9 + $0xd68] ss:$16 sps:$4 sm:$0xff]  }
 0x79a   : > { %9455 = vmatprep.subr.bf16.mxu0 %v14658_v62  ;;  %9879 = vmatprep.subr.bf16.mxu1 %v14661_v0  ;;  %v14748_v62 = vld [vmem:[%s19282_s9 + $0xd84] ss:$16 sps:$4 sm:$0xff]   ;;  %v14751_v0 = vld [vmem:[%s19282_s9 + $0xd8c] ss:$16 sps:$4 sm:$0xff]  }
 0x79d   : > { %9456 = vmatpush1.bf16.msra.mxu0 %v14656_v2  ;;  %9880 = vmatpush1.bf16.msra.mxu1 %v14659_v24  ;;  %v14746_v2 = vld [vmem:[%s19282_s9 + $0xd80] ss:$16 sps:$4 sm:$0xff]   ;;  %v14749_v24 = vld [vmem:[%s19282_s9 + $0xd88] ss:$16 sps:$4 sm:$0xff]  }
 0x79e   : > { %9457 = vmatprep.subr.bf16.mxu0 %v14664_v61  ;;  %9881 = vmatprep.subr.bf16.mxu1 %v14667_v26  ;;  %v14754_v61 = vld [vmem:[%s19282_s9 + $0xda4] ss:$16 sps:$4 sm:$0xff]   ;;  %v14757_v26 = vld [vmem:[%s19282_s9 + $0xdac] ss:$16 sps:$4 sm:$0xff]  }
 0x7a1   : > { %9458 = vmatpush1.bf16.msra.mxu0 %v14662_v27  ;;  %9882 = vmatpush1.bf16.msra.mxu1 %v14665_v30  ;;  %v14752_v27 = vld [vmem:[%s19282_s9 + $0xda0] ss:$16 sps:$4 sm:$0xff]   ;;  %v14755_v30 = vld [vmem:[%s19282_s9 + $0xda8] ss:$16 sps:$4 sm:$0xff]  }
 0x7a2   : > { %9459 = vmatprep.subr.bf16.mxu0 %v14670_v44  ;;  %9883 = vmatprep.subr.bf16.mxu1 %v14673_v32  ;;  %v14760_v44 = vld [vmem:[%s19282_s9 + $0xdc4] ss:$16 sps:$4 sm:$0xff]   ;;  %v14763_v32 = vld [vmem:[%s19282_s9 + $0xdcc] ss:$16 sps:$4 sm:$0xff]  }
 0x7a5   : > { %9460 = vmatpush1.bf16.msra.mxu0 %v14668_v33  ;;  %9884 = vmatpush1.bf16.msra.mxu1 %v14671_v34  ;;  %v14758_v33 = vld [vmem:[%s19282_s9 + $0xdc0] ss:$16 sps:$4 sm:$0xff]   ;;  %v14761_v34 = vld [vmem:[%s19282_s9 + $0xdc8] ss:$16 sps:$4 sm:$0xff]  }
 0x7a6   : > { %9482 = vmatprep.subr.bf16.mxu0 %v14676_v35  ;;  %9906 = vmatprep.subr.bf16.mxu1 %v14679_v36  ;;  %v14766_v35 = vld [vmem:[%s19282_s9 + $0xde4] ss:$16 sps:$4 sm:$0xff]   ;;  %v14769_v36 = vld [vmem:[%s19282_s9 + $0xdec] ss:$16 sps:$4 sm:$0xff]  }
 0x7a8   : > { %9462 = vmatmul.mubr.bf16.vlgmr.msra.gmra.mrb[0].mxu0 %v6048_v39  ;;  %9886 = vmatmul.mubr.bf16.vlgmr.msra.gmra.mrb[0].mxu1 %v6048_v39  ;;  %v14772_v39 = vld [vmem:[%s19282_s9 + $0xe04] ss:$16 sps:$4 sm:$0xff]  }
 0x7a9   : > { %9483 = vmatpush1.bf16.msra.mxu0 %v14674_v37  ;;  %9907 = vmatpush1.bf16.msra.mxu1 %v14677_v38  ;;  %v14764_v37 = vld [vmem:[%s19282_s9 + $0xde0] ss:$16 sps:$4 sm:$0xff]   ;;  %v14767_v38 = vld [vmem:[%s19282_s9 + $0xde8] ss:$16 sps:$4 sm:$0xff]  }
 0x7aa   : > { %9484 = vmatprep.subr.bf16.mxu0 %v14682_v40  ;;  %9908 = vmatprep.subr.bf16.mxu1 %v14685_v45  ;;  %v14775_v40 = vld [vmem:[%s19282_s9 + $0xe0c] ss:$16 sps:$4 sm:$0xff]   ;;  %v14770_v45 = vld [vmem:[%s19282_s9 + $0xe00] ss:$16 sps:$4 sm:$0xff]  }
 0x7ab   : > { %9471 = vmatprep.mubr.bf16.mxu0 %v6065_v46  ;;  %9895 = vmatprep.mubr.bf16.mxu1 %v6065_v46  ;;  %v14773_v46 = vld [vmem:[%s19282_s9 + $0xe08] ss:$16 sps:$4 sm:$0xff]  }
 0x7ad   : > { %9485 = vmatpush1.bf16.msra.mxu0 %v14680_v47  ;;  %9909 = vmatpush1.bf16.msra.mxu1 %v14683_v48  ;;  %v18432_v47 = vld [vmem:[#allocation3 + $0x60] sm:$0xff] }
 0x7ae   : > { %9486 = vmatprep.subr.bf16.mxu0 %v14688_v49  ;;  %9910 = vmatprep.subr.bf16.mxu1 %v14691_v50  ;;  %v14778_v48 = vld [vmem:[%s19282_s9 + $0xe24] ss:$16 sps:$4 sm:$0xff]   ;;  %v14781_v49 = vld [vmem:[%s19282_s9 + $0xe2c] ss:$16 sps:$4 sm:$0xff]  }
 0x7af   : > { %v6067_v50 = vld [vmem:[#allocation3 + $0xe8] sm:$0xff] }
 0x7b0   : > { %9472 = vmatmul.mubr.bf16.gmra.mrb[4].mxu0 %v6064_v53  ;;  %9896 = vmatmul.mubr.bf16.gmra.mrb[4].mxu1 %v6064_v53  ;;  %v14784_v53 = vld [vmem:[%s19282_s9 + $0xe44] ss:$16 sps:$4 sm:$0xff]  }
 0x7b1   : > { %9487 = vmatpush1.bf16.msra.mxu0 %v14686_v51  ;;  %9911 = vmatpush1.bf16.msra.mxu1 %v14689_v52  ;;  %v14776_v51 = vld [vmem:[%s19282_s9 + $0xe20] ss:$16 sps:$4 sm:$0xff]   ;;  %v14779_v52 = vld [vmem:[%s19282_s9 + $0xe28] ss:$16 sps:$4 sm:$0xff]  }
 0x7b2   : > { %9488 = vmatprep.subr.bf16.mxu0 %v14694_v54  ;;  %9912 = vmatprep.subr.bf16.mxu1 %v14697_v55  ;;  %v14787_v54 = vld [vmem:[%s19282_s9 + $0xe4c] ss:$16 sps:$4 sm:$0xff]   ;;  %v14782_v55 = vld [vmem:[%s19282_s9 + $0xe40] ss:$16 sps:$4 sm:$0xff]  }
 0x7b3   : > { %9514 = vmatprep.mubr.bf16.mxu0 %v18266_v56  ;;  %9938 = vmatprep.mubr.bf16.mxu1 %v18266_v56 }
 0x7b5   : > { %9489 = vmatpush1.bf16.msra.mxu0 %v14692_v57  ;;  %9913 = vmatpush1.bf16.msra.mxu1 %v14695_v58  ;;  %v14785_v57 = vld [vmem:[%s19282_s9 + $0xe48] ss:$16 sps:$4 sm:$0xff]   ;;  %v6066_v58 = vld [vmem:[#allocation3 + $0xe0] sm:$0xff] }
 0x7b6   : > { %9490 = vmatprep.subr.bf16.mxu0 %v14700_v59  ;;  %9914 = vmatprep.subr.bf16.mxu1 %v14703_v63  ;;  %v14790_v59 = vld [vmem:[%s19282_s9 + $0xe64] ss:$16 sps:$4 sm:$0xff]   ;;  %v14793_v63 = vld [vmem:[%s19282_s9 + $0xe6c] ss:$16 sps:$4 sm:$0xff]  }
 0x7b9   : > { %9491 = vmatpush1.bf16.msra.mxu0 %v14698_v3  ;;  %9915 = vmatpush1.bf16.msra.mxu1 %v14701_v5  ;;  %v18466_v3 = vld [vmem:[#allocation3 + $0x78] sm:$0xff]  ;;  %v14788_v5 = vld [vmem:[%s19282_s9 + $0xe60] ss:$16 sps:$4 sm:$0xff]  }
 0x7ba   : > { %9492 = vmatprep.subr.bf16.mxu0 %v14706_v11  ;;  %9916 = vmatprep.subr.bf16.mxu1 %v14709_v12  ;;  %v14791_v11 = vld [vmem:[%s19282_s9 + $0xe68] ss:$16 sps:$4 sm:$0xff]   ;;  %v14796_v12 = vld [vmem:[%s19282_s9 + $0xe84] ss:$16 sps:$4 sm:$0xff]  }
 0x7bd   : > { %9493 = vmatpush1.bf16.msra.mxu0 %v14704_v13  ;;  %9917 = vmatpush1.bf16.msra.mxu1 %v14707_v14  ;;  %v14799_v13 = vld [vmem:[%s19282_s9 + $0xe8c] ss:$16 sps:$4 sm:$0xff]   ;;  %v14794_v14 = vld [vmem:[%s19282_s9 + $0xe80] ss:$16 sps:$4 sm:$0xff]  }
 0x7be   : > { %9494 = vmatprep.subr.bf16.mxu0 %v14712_v15  ;;  %9918 = vmatprep.subr.bf16.mxu1 %v14715_v16  ;;  %v14797_v15 = vld [vmem:[%s19282_s9 + $0xe88] ss:$16 sps:$4 sm:$0xff]   ;;  %v14802_v16 = vld [vmem:[%s19282_s9 + $0xea4] ss:$16 sps:$4 sm:$0xff]  }
 0x7c1   : > { %9495 = vmatpush1.bf16.msra.mxu0 %v14710_v42  ;;  %9919 = vmatpush1.bf16.msra.mxu1 %v14713_v43  ;;  %v14805_v42 = vld [vmem:[%s19282_s9 + $0xeac] ss:$16 sps:$4 sm:$0xff]   ;;  %v14800_v43 = vld [vmem:[%s19282_s9 + $0xea0] ss:$16 sps:$4 sm:$0xff]  }
 0x7c2   : > { %9496 = vmatprep.subr.bf16.mxu0 %v14718_v17  ;;  %9920 = vmatprep.subr.bf16.mxu1 %v14721_v28  ;;  %v14803_v17 = vld [vmem:[%s19282_s9 + $0xea8] ss:$16 sps:$4 sm:$0xff]   ;;  %v14808_v28 = vld [vmem:[%s19282_s9 + $0xec4] ss:$16 sps:$4 sm:$0xff]  }
 0x7c5   : > { %9497 = vmatpush1.bf16.msra.mxu0 %v14716_v25  ;;  %9921 = vmatpush1.bf16.msra.mxu1 %v14719_v41  ;;  %v14811_v25 = vld [vmem:[%s19282_s9 + $0xecc] ss:$16 sps:$4 sm:$0xff]   ;;  %v14806_v41 = vld [vmem:[%s19282_s9 + $0xec0] ss:$16 sps:$4 sm:$0xff]  }
 0x7c6   : > { %9498 = vmatprep.subr.bf16.mxu0 %v14724_v7  ;;  %9922 = vmatprep.subr.bf16.mxu1 %v14727_v18  ;;  %v14809_v7 = vld [vmem:[%s19282_s9 + $0xec8] ss:$16 sps:$4 sm:$0xff]   ;;  %v14814_v18 = vld [vmem:[%s19282_s9 + $0xee4] ss:$16 sps:$4 sm:$0xff]  }
 0x7c9   : > { %9499 = vmatpush1.bf16.msra.mxu0 %v14722_v10  ;;  %9923 = vmatpush1.bf16.msra.mxu1 %v14725_v19  ;;  %v14817_v10 = vld [vmem:[%s19282_s9 + $0xeec] ss:$16 sps:$4 sm:$0xff]   ;;  %v14812_v19 = vld [vmem:[%s19282_s9 + $0xee0] ss:$16 sps:$4 sm:$0xff]  }
 0x7ca   : > { %9500 = vmatprep.subr.bf16.mxu0 %v14730_v23  ;;  %9924 = vmatprep.subr.bf16.mxu1 %v14733_v20  ;;  %v14815_v23 = vld [vmem:[%s19282_s9 + $0xee8] ss:$16 sps:$4 sm:$0xff]   ;;  %v14820_v20 = vld [vmem:[%s19282_s9 + $0xf04] ss:$16 sps:$4 sm:$0xff]  }
 0x7cd   : > { %9501 = vmatpush1.bf16.msra.mxu0 %v14728_v8  ;;  %9925 = vmatpush1.bf16.msra.mxu1 %v14731_v21  ;;  %v14823_v8 = vld [vmem:[%s19282_s9 + $0xf0c] ss:$16 sps:$4 sm:$0xff]   ;;  %v14818_v21 = vld [vmem:[%s19282_s9 + $0xf00] ss:$16 sps:$4 sm:$0xff]  }
 0x7ce   : > { %9502 = vmatprep.subr.bf16.mxu0 %v14736_v22  ;;  %9926 = vmatprep.subr.bf16.mxu1 %v14739_v29  ;;  %v14821_v22 = vld [vmem:[%s19282_s9 + $0xf08] ss:$16 sps:$4 sm:$0xff]   ;;  %v14826_v29 = vld [vmem:[%s19282_s9 + $0xf24] ss:$16 sps:$4 sm:$0xff]  }
 0x7d1   : > { %9503 = vmatpush1.bf16.msra.mxu0 %v14734_v9  ;;  %9927 = vmatpush1.bf16.msra.mxu1 %v14737_v4  ;;  %v14829_v9 = vld [vmem:[%s19282_s9 + $0xf2c] ss:$16 sps:$4 sm:$0xff]   ;;  %v14824_v4 = vld [vmem:[%s19282_s9 + $0xf20] ss:$16 sps:$4 sm:$0xff]  }
 0x7d2   : > { %9504 = vmatprep.subr.bf16.mxu0 %v14742_v60  ;;  %9928 = vmatprep.subr.bf16.mxu1 %v14745_v31  ;;  %v14827_v60 = vld [vmem:[%s19282_s9 + $0xf28] ss:$16 sps:$4 sm:$0xff]   ;;  %v14832_v31 = vld [vmem:[%s19282_s9 + $0xf44] ss:$16 sps:$4 sm:$0xff]  }
 0x7d5   : > { %9505 = vmatpush1.bf16.msra.mxu0 %v14740_v1  ;;  %9929 = vmatpush1.bf16.msra.mxu1 %v14743_v6  ;;  %v14835_v1 = vld [vmem:[%s19282_s9 + $0xf4c] ss:$16 sps:$4 sm:$0xff]   ;;  %v14830_v6 = vld [vmem:[%s19282_s9 + $0xf40] ss:$16 sps:$4 sm:$0xff]  }
 0x7d6   : > { %9506 = vmatprep.subr.bf16.mxu0 %v14748_v62  ;;  %9930 = vmatprep.subr.bf16.mxu1 %v14751_v0  ;;  %v14833_v62 = vld [vmem:[%s19282_s9 + $0xf48] ss:$16 sps:$4 sm:$0xff]   ;;  %v14838_v0 = vld [vmem:[%s19282_s9 + $0xf64] ss:$16 sps:$4 sm:$0xff]  }
 0x7d9   : > { %9507 = vmatpush1.bf16.msra.mxu0 %v14746_v2  ;;  %9931 = vmatpush1.bf16.msra.mxu1 %v14749_v24  ;;  %v14841_v2 = vld [vmem:[%s19282_s9 + $0xf6c] ss:$16 sps:$4 sm:$0xff]   ;;  %v14836_v24 = vld [vmem:[%s19282_s9 + $0xf60] ss:$16 sps:$4 sm:$0xff]  }
 0x7da   : > { %9508 = vmatprep.subr.bf16.mxu0 %v14754_v61  ;;  %9932 = vmatprep.subr.bf16.mxu1 %v14757_v26  ;;  %v14839_v61 = vld [vmem:[%s19282_s9 + $0xf68] ss:$16 sps:$4 sm:$0xff]   ;;  %v14844_v26 = vld [vmem:[%s19282_s9 + $0xf84] ss:$16 sps:$4 sm:$0xff]  }
 0x7dd   : > { %9509 = vmatpush1.bf16.msra.mxu0 %v14752_v27  ;;  %9933 = vmatpush1.bf16.msra.mxu1 %v14755_v30  ;;  %v14847_v27 = vld [vmem:[%s19282_s9 + $0xf8c] ss:$16 sps:$4 sm:$0xff]   ;;  %v14842_v30 = vld [vmem:[%s19282_s9 + $0xf80] ss:$16 sps:$4 sm:$0xff]  }
 0x7de   : > { %9510 = vmatprep.subr.bf16.mxu0 %v14760_v44  ;;  %9934 = vmatprep.subr.bf16.mxu1 %v14763_v32  ;;  %v14845_v44 = vld [vmem:[%s19282_s9 + $0xf88] ss:$16 sps:$4 sm:$0xff]   ;;  %v14850_v32 = vld [vmem:[%s19282_s9 + $0xfa4] ss:$16 sps:$4 sm:$0xff]  }
 0x7e1   : > { %9511 = vmatpush1.bf16.msra.mxu0 %v14758_v33  ;;  %9935 = vmatpush1.bf16.msra.mxu1 %v14761_v34  ;;  %v14853_v33 = vld [vmem:[%s19282_s9 + $0xfac] ss:$16 sps:$4 sm:$0xff]   ;;  %v14848_v34 = vld [vmem:[%s19282_s9 + $0xfa0] ss:$16 sps:$4 sm:$0xff]  }
 0x7e2   : > { %9512 = vmatprep.subr.bf16.mxu0 %v14766_v35  ;;  %9936 = vmatprep.subr.bf16.mxu1 %v14769_v36  ;;  %v14851_v35 = vld [vmem:[%s19282_s9 + $0xfa8] ss:$16 sps:$4 sm:$0xff]   ;;  %v14856_v36 = vld [vmem:[%s19282_s9 + $0xfc4] ss:$16 sps:$4 sm:$0xff]  }
 0x7e5   : > { %9513 = vmatpush1.bf16.msra.mxu0 %v14764_v37  ;;  %9937 = vmatpush1.bf16.msra.mxu1 %v14767_v38  ;;  %v14859_v37 = vld [vmem:[%s19282_s9 + $0xfcc] ss:$16 sps:$4 sm:$0xff]   ;;  %v14854_v38 = vld [vmem:[%s19282_s9 + $0xfc0] ss:$16 sps:$4 sm:$0xff]  }
 0x7e6   : > { %9535 = vmatprep.subr.bf16.mxu0 %v14772_v39  ;;  %9959 = vmatprep.subr.bf16.mxu1 %v14775_v40  ;;  %v14857_v39 = vld [vmem:[%s19282_s9 + $0xfc8] ss:$16 sps:$4 sm:$0xff]   ;;  %v14862_v40 = vld [vmem:[%s19282_s9 + $0xfe4] ss:$16 sps:$4 sm:$0xff]  }
 0x7e8   : > { %9515 = vmatmul.mubr.bf16.vlgmr.msra.gmra.mrb[0].mxu0 %v18432_v47  ;;  %9939 = vmatmul.mubr.bf16.vlgmr.msra.gmra.mrb[0].mxu1 %v18432_v47 }
 0x7e9   : > { %9536 = vmatpush1.bf16.msra.mxu0 %v14770_v45  ;;  %9960 = vmatpush1.bf16.msra.mxu1 %v14773_v46  ;;  %v14865_v45 = vld [vmem:[%s19282_s9 + $0xfec] ss:$16 sps:$4 sm:$0xff]   ;;  %v14860_v46 = vld [vmem:[%s19282_s9 + $0xfe0] ss:$16 sps:$4 sm:$0xff]  }
 0x7ea   : > { %9537 = vmatprep.subr.bf16.mxu0 %v14778_v48  ;;  %9961 = vmatprep.subr.bf16.mxu1 %v14781_v49  ;;  %v14863_v48 = vld [vmem:[%s19282_s9 + $0xfe8] ss:$16 sps:$4 sm:$0xff]   ;;  %v18620_v49 = vld [vmem:[#allocation3 + $0x70] sm:$0xff] }
 0x7eb   : > { %9524 = vmatprep.mubr.bf16.mxu0 %v6067_v50  ;;  %9948 = vmatprep.mubr.bf16.mxu1 %v6067_v50  ;;  %v6069_v50 = vld [vmem:[#allocation3 + $0xf8] sm:$0xff] }
 0x7ed   : > { %9538 = vmatpush1.bf16.msra.mxu0 %v14776_v51  ;;  %9962 = vmatpush1.bf16.msra.mxu1 %v14779_v52  ;;  %v6068_v51 = vld [vmem:[#allocation3 + $0xf0] sm:$0xff]  ;;  %v6584_v52 = vlaneseq }
 0x7ee   : > { %9539 = vmatprep.subr.bf16.mxu0 %v14784_v53  ;;  %9963 = vmatprep.subr.bf16.mxu1 %v14787_v54  ;;  %v14983_v54 = vmov 1966171168  }
 0x7ef   : > { %v18625_v53 = vshrl.u32 %v6584_v52, 7  ;;  %vm18715_vm0 = vcmp.lt.s32.totalorder %v6584_v52, 512 }
 0x7f0   : > { %9525 = vmatmul.mubr.bf16.gmra.mrb[4].mxu0 %v6066_v58  ;;  %9949 = vmatmul.mubr.bf16.gmra.mrb[4].mxu1 %v6066_v58  ;;  %v6582_v58 = vld [vmem:[%s19283_s10] sm:$0xf] }
 0x7f1   : > { %9540 = vmatpush1.bf16.msra.mxu0 %v14782_v55  ;;  %9964 = vmatpush1.bf16.msra.mxu1 %v14785_v57  ;;  %v10064_v55 = vunpack.c.l.s4 %v14983_v54  ;;  %v18628_v57 = vsub.s32 0, %v18625_v53 }
 0x7f2   : > { %9541 = vmatprep.subr.bf16.mxu0 %v14790_v59  ;;  %9965 = vmatprep.subr.bf16.mxu1 %v14793_v63  ;;  %v18634_v63 = vsub.s32 2, %v18625_v53 }
 0x7f3   : > { %9567 = vmatprep.mubr.bf16.mxu0 %v18466_v3  ;;  %9991 = vmatprep.mubr.bf16.mxu1 %v18466_v3  ;;  %v10065_v59 = vunpack.c.0.s8 %v10064_v55 }
 0x7f5   : > { %9542 = vmatpush1.bf16.msra.mxu0 %v14788_v5  ;;  %9966 = vmatpush1.bf16.msra.mxu1 %v14791_v11  ;;  %v18637_v5 = vsub.s32 1, %v18625_v53  ;;  %v18640_v11 = vsub.s32 3, %v18625_v53 }
 0x7f6   : > { %9543 = vmatprep.subr.bf16.mxu0 %v14796_v12  ;;  %9967 = vmatprep.subr.bf16.mxu1 %v14799_v13  ;;  %v18643_v12 = vrot.slane %v6582_v58, %v18628_v57  ;;  %v18646_v13 = vsub.s32 %v10065_v59, %v18625_v53 }
 0x7f9   : > { %9544 = vmatpush1.bf16.msra.mxu0 %v14794_v14  ;;  %9968 = vmatpush1.bf16.msra.mxu1 %v14797_v15  ;;  %v18649_v14 = vrot.slane %v6582_v58, %v18634_v63  ;;  %v18652_v15 = vrot.slane %v6582_v58, %v18637_v5 }
 0x7fa   : > { %9545 = vmatprep.subr.bf16.mxu0 %v14802_v16  ;;  %9969 = vmatprep.subr.bf16.mxu1 %v14805_v42  ;;  %v18655_v16 = vrot.slane %v6582_v58, %v18640_v11  ;;  %v10955_v42 = vld [vmem:[#allocation3] sm:$0xff] }
 0x7fd   : > { %9546 = vmatpush1.bf16.msra.mxu0 %v14800_v43  ;;  %9970 = vmatpush1.bf16.msra.mxu1 %v14803_v17  ;;  %v10956_v43 = vld [vmem:[#allocation3 + $0x8] sm:$0xff]  ;;  %v10957_v17 = vld [vmem:[#allocation3 + $0x10] sm:$0xff] }
 0x7fe   : > { %9547 = vmatprep.subr.bf16.mxu0 %v14808_v28  ;;  %9971 = vmatprep.subr.bf16.mxu1 %v14811_v25  ;;  %v11341_v28 = vunpack.c.l.bf16 %v18432_v47  ;;  %v11342_v25 = vunpack.c.l.bf16 %v18266_v56 }
 0x801   : > { %9548 = vmatpush1.bf16.msra.mxu0 %v14806_v41  ;;  %9972 = vmatpush1.bf16.msra.mxu1 %v14809_v7  ;;  %v11343_v41 = vunpack.c.l.bf16 %v18620_v49 }
 0x802   : > { %9549 = vmatprep.subr.bf16.mxu0 %v14814_v18  ;;  %9973 = vmatprep.subr.bf16.mxu1 %v14817_v10  ;;  %v10958_v18 = vld [vmem:[#allocation3 + $0x18] sm:$0xff]  ;;  %v10959_v10 = vunpack.c.l.bf16 %v10955_v42 }
 0x805   : > { %9550 = vmatpush1.bf16.msra.mxu0 %v14812_v19  ;;  %9974 = vmatpush1.bf16.msra.mxu1 %v14815_v23  ;;  %v10960_v19 = vunpack.c.l.bf16 %v10956_v43  ;;  %v10961_v23 = vunpack.c.l.bf16 %v10957_v17 }
 0x806   : > { %9551 = vmatprep.subr.bf16.mxu0 %v14820_v20  ;;  %9975 = vmatprep.subr.bf16.mxu1 %v14823_v8  ;;  %v10963_v20 = vunpack.c.h.bf16 %v10955_v42  ;;  %v18664_v8 = vld [vmem:[%s19288_s15] sm:$0xf] }
 0x809   : > { %9552 = vmatpush1.bf16.msra.mxu0 %v14818_v21  ;;  %9976 = vmatpush1.bf16.msra.mxu1 %v14821_v22  ;;  %v10962_v21 = vunpack.c.l.bf16 %v10958_v18  ;;  %v10964_v22 = vunpack.c.h.bf16 %v10956_v43 }
 0x80a   : > { %9553 = vmatprep.subr.bf16.mxu0 %v14826_v29  ;;  %9977 = vmatprep.subr.bf16.mxu1 %v14829_v9  ;;  %v10965_v29 = vunpack.c.h.bf16 %v10957_v17  ;;  %v10966_v9 = vunpack.c.h.bf16 %v10958_v18 }
 0x80d   : > { %9554 = vmatpush1.bf16.msra.mxu0 %v14824_v4  ;;  %9978 = vmatpush1.bf16.msra.mxu1 %v14827_v60  ;;  %v18669_v4 = vld [vmem:[%s19289_s16] sm:$0xf]  ;;  %v10967_v60 = vadd.f32 %v10963_v20, %v10959_v10 }
 0x80e   : > { %9555 = vmatprep.subr.bf16.mxu0 %v14832_v31  ;;  %9979 = vmatprep.subr.bf16.mxu1 %v14835_v1  ;;  %v11005_v31 = vrot.slane %v18664_v8, %v18628_v57  ;;  %v11009_v1 = vrot.slane %v18664_v8, %v18637_v5 }
 0x811   : > { %9556 = vmatpush1.bf16.msra.mxu0 %v14830_v6  ;;  %9980 = vmatpush1.bf16.msra.mxu1 %v14833_v62  ;;  %v11013_v6 = vrot.slane %v18664_v8, %v18634_v63  ;;  %v10974_v62 = vadd.f32 %v10964_v22, %v10960_v19 }
 0x812   : > { %9557 = vmatprep.subr.bf16.mxu0 %v14838_v0  ;;  %9981 = vmatprep.subr.bf16.mxu1 %v14841_v2  ;;  %v10981_v0 = vadd.f32 %v10965_v29, %v10961_v23  ;;  %v10988_v2 = vadd.f32 %v10966_v9, %v10962_v21 }
 0x815   : > { %9558 = vmatpush1.bf16.msra.mxu0 %v14836_v24  ;;  %9982 = vmatpush1.bf16.msra.mxu1 %v14839_v61  ;;  %v11017_v24 = vrot.slane %v18664_v8, %v18640_v11  ;;  %v11083_v61 = vld [vmem:[#allocation3 + $0x20] sm:$0xff] }
 0x816   : > { %9559 = vmatprep.subr.bf16.mxu0 %v14844_v26  ;;  %9983 = vmatprep.subr.bf16.mxu1 %v14847_v27  ;;  %v11084_v26 = vld [vmem:[#allocation3 + $0x28] sm:$0xff]  ;;  %v11085_v27 = vld [vmem:[#allocation3 + $0x30] sm:$0xff]  ;;  %v11091_v58 = vunpack.c.h.bf16 %v11083_v61 }
 0x817   : > { %v11092_v59 = vunpack.c.h.bf16 %v11084_v26  ;;  %v11093_v42 = vunpack.c.h.bf16 %v11085_v27 }
 0x819   : > { %9560 = vmatpush1.bf16.msra.mxu0 %v14842_v30  ;;  %9984 = vmatpush1.bf16.msra.mxu1 %v14845_v44  ;;  %v10968_v30 = vrot.slane %v10967_v60, 4  ;;  %v11031_v44 = vrot.slane %v18669_v4, %v18628_v57 }
 0x81a   : > { %9561 = vmatprep.subr.bf16.mxu0 %v14850_v32  ;;  %9985 = vmatprep.subr.bf16.mxu1 %v14853_v33  ;;  %v11035_v32 = vrot.slane %v18669_v4, %v18637_v5  ;;  %v11039_v33 = vrot.slane %v18669_v4, %v18634_v63 }
 0x81d   : > { %9562 = vmatpush1.bf16.msra.mxu0 %v14848_v34  ;;  %9986 = vmatpush1.bf16.msra.mxu1 %v14851_v35  ;;  %v11086_v34 = vld [vmem:[#allocation3 + $0x38] sm:$0xff]  ;;  %v10975_v35 = vrot.slane %v10974_v62, 4 }
 0x81e   : > { %9563 = vmatprep.subr.bf16.mxu0 %v14856_v36  ;;  %9987 = vmatprep.subr.bf16.mxu1 %v14859_v37  ;;  %v10982_v36 = vrot.slane %v10981_v0, 4  ;;  %v10989_v37 = vrot.slane %v10988_v2, 4  ;;  %v11090_v54 = vunpack.c.l.bf16 %v11086_v34  ;;  %v11094_v10 = vunpack.c.h.bf16 %v11086_v34 }
 0x821   : > { %9564 = vmatpush1.bf16.msra.mxu0 %v14854_v38  ;;  %9988 = vmatpush1.bf16.msra.mxu1 %v14857_v39  ;;  %v11043_v38 = vrot.slane %v18669_v4, %v18640_v11  ;;  %v10969_v39 = vadd.f32 %v10968_v30, %v10967_v60  ;;  %v11116_v60 = vadd.f32 %v11094_v10, %v11090_v54  ;;  %v11153_v4 = vld [vmem:[%s19289_s16 + $0x4] sm:$0xf] }
 0x822   : > { %9565 = vmatprep.subr.bf16.mxu0 %v14862_v40  ;;  %9989 = vmatprep.subr.bf16.mxu1 %v14865_v45  ;;  %v11087_v40 = vunpack.c.l.bf16 %v11083_v61  ;;  %v11088_v45 = vunpack.c.l.bf16 %v11084_v26 }
 0x823   : > { %v10970_v55 = vrot.slane %v10969_v39, 2 }
 0x824   : > { %v11095_v23 = vadd.f32 %v11091_v58, %v11087_v40  ;;  %v11102_v20 = vadd.f32 %v11092_v59, %v11088_v45 }
 0x825   : > { %9566 = vmatpush1.bf16.msra.mxu0 %v14860_v46  ;;  %9990 = vmatpush1.bf16.msra.mxu1 %v14863_v48  ;;  %v11089_v46 = vunpack.c.l.bf16 %v11085_v27  ;;  %v10976_v48 = vadd.f32 %v10975_v35, %v10974_v62  ;;  %v10971_v19 = vadd.f32 %v10970_v55, %v10969_v39  ;;  %v11117_v27 = vrot.slane %v11116_v60, 4 }
 0x827   : > { %v10977_v43 = vrot.slane %v10976_v48, 2  ;;  %v11109_v21 = vadd.f32 %v11093_v42, %v11089_v46  ;;  %v10972_v62 = vrot.slane %v10971_v19, 1  ;;  %v11118_v46 = vadd.f32 %v11117_v27, %v11116_v60  ;;  %v14902_v60 = vld [vmem:[%s19286_s13 + $0x4] ss:$16 sps:$4 sm:$0xff]  }
 0x828   : > { %9568 = vmatmul.mubr.bf16.vlgmr.msra.gmra.mrb[0].mxu0 %v18620_v49  ;;  %9992 = vmatmul.mubr.bf16.vlgmr.msra.gmra.mrb[0].mxu1 %v18620_v49 }
 0x829   : > { %9577 = vmatprep.mubr.bf16.mxu0 %v6069_v50  ;;  %10001 = vmatprep.mubr.bf16.mxu1 %v6069_v50  ;;  %v10983_v50 = vadd.f32 %v10982_v36, %v10981_v0  ;;  %v10978_v22 = vadd.f32 %v10977_v43, %v10976_v48  ;;  %v11096_v0 = vrot.slane %v11095_v23, 4  ;;  %v11110_v30 = vrot.slane %v11109_v21, 4 }
 0x82a   : > { %v10973_v36 = vadd.f32 %v10972_v62, %v10971_v19  ;;  %v11119_v42 = vrot.slane %v11118_v46, 2 }
 0x82b   : > { %v10984_v17 = vrot.slane %v10983_v50, 2  ;;  %v10979_v35 = vrot.slane %v10978_v22, 1  ;;  %v11111_v34 = vadd.f32 %v11110_v30, %v11109_v21 }
 0x82c   : > { %v10996_v48 = vmul.f32 0.0625, %v10973_v36  ;;  %v11120_v21 = vadd.f32 %v11119_v42, %v11118_v46  ;;  %v11213_v42 = vld [vmem:[#allocation3 + $0x58] sm:$0xff] }
 0x82d   : > { %v10985_v29 = vadd.f32 %v10984_v17, %v10983_v50  ;;  %v10980_v39 = vadd.f32 %v10979_v35, %v10978_v22  ;;  %v11112_v54 = vrot.slane %v11111_v34, 2 }
 0x82e   : > { %v11022_v43 = vmul.f32 %v11005_v31, %v10996_v48  ;;  %v11127_v31 = vld [vmem:[%s19288_s15 + $0x4] sm:$0xf] }
 0x82f   : > { %v10986_v61 = vrot.slane %v10985_v29, 1  ;;  %v10997_v55 = vmul.f32 0.0625, %v10980_v39  ;;  %v11113_v10 = vadd.f32 %v11112_v54, %v11111_v34  ;;  %v11144_v34 = vrot.slane %v11127_v31, %v18640_v11  ;;  %v11210_v39 = vld [vmem:[#allocation3 + $0x40] sm:$0xff] }
 0x830   : > { %9578 = vmatmul.mubr.bf16.gmra.mrb[4].mxu0 %v6068_v51  ;;  %10002 = vmatmul.mubr.bf16.gmra.mrb[4].mxu1 %v6068_v51  ;;  %v10990_v51 = vadd.f32 %v10989_v37, %v10988_v2  ;;  %v11103_v2 = vrot.slane %v11102_v20, 4  ;;  %v11097_v37 = vadd.f32 %v11096_v0, %v11095_v23 }
 0x831   : > { %v10987_v40 = vadd.f32 %v10986_v61, %v10985_v29  ;;  %v11023_v19 = vmul.f32 %v11009_v1, %v10997_v55  ;;  %v11114_v1 = vrot.slane %v11113_v10, 1 }
 0x832   : > { %v10991_v18 = vrot.slane %v10990_v51, 2  ;;  %v11104_v7 = vadd.f32 %v11103_v2, %v11102_v20  ;;  %v11098_v50 = vrot.slane %v11097_v37, 2  ;;  %v11132_v2 = vrot.slane %v11127_v31, %v18628_v57 }
 0x833   : > { %v10998_v58 = vmul.f32 0.0625, %v10987_v40  ;;  %v11115_v0 = vadd.f32 %v11114_v1, %v11113_v10  ;;  %v11211_v40 = vld [vmem:[#allocation3 + $0x48] sm:$0xff] }
 0x834   : > { %v10992_v9 = vadd.f32 %v10991_v18, %v10990_v51  ;;  %v11105_v51 = vrot.slane %v11104_v7, 2  ;;  %v11099_v17 = vadd.f32 %v11098_v50, %v11097_v37  ;;  %v11158_v50 = vrot.slane %v11153_v4, %v18628_v57 }
 0x835   : > { %v11024_v23 = vmul.f32 %v11013_v6, %v10998_v58  ;;  %v11049_v6 = vadd.f32 %v11035_v32, %v11023_v19  ;;  %v11125_v52 = vmul.f32 0.0625, %v11115_v0  ;;  %v11162_v58 = vrot.slane %v11153_v4, %v18637_v5  ;;  %v18735_v19 = vld [vmem:[%s19288_s15 + $0x8] sm:$0xf]  ;;  %v14868_v0 = vld [vmem:[%s19284_s11] sm:$0xff]  }
 0x836   : > { %v10993_v26 = vrot.slane %v10992_v9, 1  ;;  %v11106_v18 = vadd.f32 %v11105_v51, %v11104_v7  ;;  %v11048_v7 = vadd.f32 %v11031_v44, %v11022_v43  ;;  %v11100_v22 = vrot.slane %v11099_v17, 1  ;;  %v11212_v51 = vld [vmem:[#allocation3 + $0x50] sm:$0xff] }
 0x837   : > { %v11050_v8 = vadd.f32 %v11039_v33, %v11024_v23  ;;  %v11136_v33 = vrot.slane %v11127_v31, %v18637_v5  ;;  %v11170_v43 = vrot.slane %v11153_v4, %v18640_v11  ;;  %v11215_v10 = vunpack.c.l.bf16 %v11211_v40 }
 0x838   : > { %v10994_v45 = vadd.f32 %v10993_v26, %v10992_v9  ;;  %v11107_v29 = vrot.slane %v11106_v18, 1  ;;  %v11121_v9 = vrot.slane %v11120_v21, 1  ;;  %v11101_v44 = vadd.f32 %v11100_v22, %v11099_v17 }
 0x839   : > { %v11056_v32 = vcombine.low %v11048_v7, %v11049_v6  ;;  %v11140_v26 = vrot.slane %v11127_v31, %v18634_v63  ;;  %v11216_v31 = vunpack.c.l.bf16 %v11212_v51  ;;  %v11217_v22 = vunpack.c.l.bf16 %v11213_v42  ;;  %v14866_v6 = vld [vmem:[%s19284_s11 + $0x40] sm:$0xff]  }
 0x83a   : > { %v10999_v59 = vmul.f32 0.0625, %v10994_v45  ;;  %v11108_v62 = vadd.f32 %v11107_v29, %v11106_v18  ;;  %v11122_v35 = vadd.f32 %v11121_v9, %v11120_v21  ;;  %v11214_v18 = vunpack.c.l.bf16 %v11210_v39  ;;  %13257 = vmatprep.subr.bf16.mxu0 %v14866_v6 }
 0x83b   : > { %v11064_v27 = vrot.slane %v11056_v32, %v18646_v13  ;;  %v11151_v48 = vmul.f32 %v11140_v26, %v11125_v52  ;;  %v11218_v29 = vunpack.c.h.bf16 %v11210_v39  ;;  %v11219_v1 = vunpack.c.h.bf16 %v11211_v40  ;;  %13258 = vmatpush3.bf16.msra.mxu0 %v14868_v0  ;;  %v14870_v39 = vld [vmem:[%s19284_s11 + $0x48] sm:$0xff]  }
 0x83c   : > { %v11025_v20 = vmul.f32 %v11017_v24, %v10999_v59  ;;  %v11124_v61 = vmul.f32 0.0625, %v11108_v62  ;;  %v11126_v37 = vmul.f32 0.0625, %v11122_v35  ;;  %v11166_v59 = vrot.slane %v11153_v4, %v18634_v63  ;;  %v18759_v4 = vld [vmem:[%s19289_s16 + $0x8] sm:$0xf]  ;;  %13259 = vmatprep.subr.bf16.mxu0 %v14870_v39 }
 0x83d   : > { %v11220_v9 = vunpack.c.h.bf16 %v11212_v51  ;;  %v11259_v62 = vrot.slane %v18735_v19, %v18628_v57  ;;  %v11229_v35 = vadd.f32 %v11219_v1, %v11215_v10  ;;  %v11267_v26 = vrot.slane %v18735_v19, %v18634_v63  ;;  %v14871_v40 = vld [vmem:[%s19284_s11 + $0xc8] sm:$0xff]  }
 0x83e   : > { %v11051_v24 = vadd.f32 %v11043_v38, %v11025_v20  ;;  %v11123_v38 = vmul.f32 0.0625, %v11101_v44  ;;  %v11150_v46 = vmul.f32 %v11136_v33, %v11124_v61  ;;  %v11152_v55 = vmul.f32 %v11144_v34, %v11126_v37  ;;  %v14872_v51 = vld [vmem:[%s19284_s11 + $0x8] sm:$0xff]  }
 0x83f   : > { %v11177_v21 = vadd.f32 %v11166_v59, %v11151_v48  ;;  %v11221_v44 = vunpack.c.h.bf16 %v11213_v42  ;;  %v11263_v33 = vrot.slane %v18735_v19, %v18637_v5  ;;  %v11236_v61 = vadd.f32 %v11220_v9, %v11216_v31  ;;  %13260 = vmatpush3.bf16.msra.mxu0 %v14872_v51  ;;  %v14877_v9 = vld [vmem:[%s19284_s11 + $0x90] sm:$0xff]  }
 0x840   : > { %v11057_v30 = vcombine.low %v11050_v8, %v11051_v24  ;;  %v11149_v45 = vmul.f32 %v11132_v2, %v11123_v38  ;;  %v11176_v20 = vadd.f32 %v11162_v58, %v11150_v46  ;;  %v11178_v7 = vadd.f32 %v11170_v43, %v11152_v55  ;;  %v14867_v8 = vld [vmem:[%s19284_s11 + $0xc0] sm:$0xff]  }
 0x841   : > { %v14869_v2 = vld [vmem:[%s19284_s11 + $0x80] sm:$0xff]   ;;  %v11243_v52 = vadd.f32 %v11221_v44, %v11217_v22  ;;  %13279 = vmatprep.subr.bf16.mxu1 %v14867_v8  ;;  %v11230_v37 = vrot.slane %v11229_v35, 4  ;;  %v11271_v34 = vrot.slane %v18735_v19, %v18640_v11  ;;  %v11285_v48 = vrot.slane %v18759_v4, %v18628_v57  ;;  %v14875_v22 = vld [vmem:[%s19284_s11 + $0xd0] sm:$0xff]   ;;  %v14886_v19 = vld [vmem:[%s19284_s11 + $0x68] sm:$0xff]  }
 0x842   : > { %v11071_v36 = vrot.slane %v11057_v30, %v18646_v13  ;;  %v11175_v17 = vadd.f32 %v11158_v50, %v11149_v45  ;;  %v11184_v32 = vcombine.low %v11177_v21, %v11178_v7  ;;  %v11222_v30 = vadd.f32 %v11218_v29, %v11214_v18  ;;  %13280 = vmatpush3.bf16.msra.mxu1 %v14869_v2  ;;  %v14874_v7 = vld [vmem:[%s19284_s11 + $0x50] sm:$0xff]  }
 0x843   : > { %v11237_v45 = vrot.slane %v11236_v61, 4  ;;  %v11244_v46 = vrot.slane %v11243_v52, 4  ;;  %v11289_v50 = vrot.slane %v18759_v4, %v18637_v5  ;;  %v11231_v59 = vadd.f32 %v11230_v37, %v11229_v35  ;;  %13281 = vmatprep.subr.bf16.mxu1 %v14871_v40  ;;  %13261 = vmatprep.subr.bf16.mxu0 %v14874_v7  ;;  %v14881_v40 = vld [vmem:[%s19284_s11 + $0x98] sm:$0xff]  }
 0x844   : > { %v11072_v54 = vcombine.low %v11064_v27, %v11071_v36  ;;  %v11183_v24 = vcombine.low %v11175_v17, %v11176_v20  ;;  %v11198_v27 = vrot.slane %v11184_v32, %v18646_v13  ;;  %v11223_v36 = vrot.slane %v11222_v30, 4 }
 0x845   : > { %v11293_v42 = vrot.slane %v18759_v4, %v18634_v63  ;;  %v11238_v43 = vadd.f32 %v11237_v45, %v11236_v61  ;;  %v11245_v17 = vadd.f32 %v11244_v46, %v11243_v52  ;;  %v11297_v18 = vrot.slane %v18759_v4, %v18640_v11 }
 0x846   : > { %v11079_v23 = vrot.slane %v11072_v54, %v18646_v13  ;;  %v11191_v38 = vrot.slane %v11183_v24, %v18646_v13  ;;  %v14873_v54 = vld [vmem:[%s19284_s11 + $0x88] sm:$0xff]   ;;  %v11224_v58 = vadd.f32 %v11223_v36, %v11222_v30  ;;  %v11345_v10 = vunpack.c.h.bf16 %v18432_v47  ;;  %v14876_v24 = vld [vmem:[%s19284_s11 + $0x10] sm:$0xff]   ;;  %v14879_v47 = vld [vmem:[%s19284_s11 + $0xd8] sm:$0xff]  }
 0x847   : > { %v11232_v21 = vrot.slane %v11231_v59, 2  ;;  %v11346_v31 = vunpack.c.h.bf16 %v18266_v56  ;;  %13282 = vmatpush3.bf16.msra.mxu1 %v14873_v54  ;;  %v11239_v29 = vrot.slane %v11238_v43, 2  ;;  %v11246_v1 = vrot.slane %v11245_v17, 2  ;;  %13262 = vmatpush3.bf16.msra.mxu0 %v14876_v24  ;;  %v14878_v56 = vld [vmem:[%s19284_s11 + $0x58] sm:$0xff]  }
 0x848   : > { %11082 = vst.msk [vmem:[#allocation6 + $0x10] ss:$2 sm:$0xf] %vm18715_vm0, %v11079_v23  ;;  %v11199_v55 = vcombine.low %v11191_v38, %v11198_v27  ;;  %v11225_v20 = vrot.slane %v11224_v58, 2  ;;  %v11347_v6 = vunpack.c.h.bf16 %v18620_v49  ;;  %v11348_v8 = vunpack.c.h.bf16 %v18466_v3  ;;  %13283 = vmatprep.subr.bf16.mxu1 %v14875_v22  ;;  %13263 = vmatprep.subr.bf16.mxu0 %v14878_v56 }
 0x849   : > { %v11233_v0 = vadd.f32 %v11232_v21, %v11231_v59  ;;  %v11349_v2 = vadd.f32 %v11345_v10, %v11341_v28  ;;  %v11356_v32 = vadd.f32 %v11346_v31, %v11342_v25  ;;  %v11240_v30 = vadd.f32 %v11239_v29, %v11238_v43  ;;  %v14882_v21 = vld [vmem:[%s19284_s11 + $0x60] sm:$0xff]  }
 0x84a   : > { %v11206_v23 = vrot.slane %v11199_v55, %v18646_v13  ;;  %v11226_v44 = vadd.f32 %v11225_v20, %v11224_v58  ;;  %v11247_v35 = vadd.f32 %v11246_v1, %v11245_v17  ;;  %v11363_v38 = vadd.f32 %v11347_v6, %v11343_v41  ;;  %v14880_v41 = vld [vmem:[%s19284_s11 + $0x18] sm:$0xff]   ;;  %v14883_v31 = vld [vmem:[%s19284_s11 + $0xe0] sm:$0xff]  }
 0x84b   : > { %v19318_v61 = vunpack.c.l.bf16 %v18466_v3  ;;  %v11234_v36 = vrot.slane %v11233_v0, 1  ;;  %v11350_v37 = vrot.slane %v11349_v2, 4  ;;  %v11357_v39 = vrot.slane %v11356_v32, 4  ;;  %13284 = vmatpush3.bf16.msra.mxu1 %v14877_v9  ;;  %13264 = vmatpush3.bf16.msra.mxu0 %v14880_v41  ;;  %v14884_v6 = vld [vmem:[%s19284_s11 + $0x20] sm:$0xff]   ;;  %v11407_v41 = vld [vmem:[%s19289_s16 + $0xc] sm:$0xf] }
 0x84c   : > { %11209 = vst.msk [vmem:[#allocation6 + $0x18] ss:$2 sm:$0xf] %vm18715_vm0, %v11206_v23  ;;  %v11227_v27 = vrot.slane %v11226_v44, 1  ;;  %v11241_v49 = vrot.slane %v11240_v30, 1  ;;  %v11248_v28 = vrot.slane %v11247_v35, 1  ;;  %13285 = vmatprep.subr.bf16.mxu1 %v14879_v47  ;;  %13265 = vmatprep.subr.bf16.mxu0 %v14882_v21 }
 0x84d   : > { %v11370_v52 = vadd.f32 %v11348_v8, %v19318_v61  ;;  %v11364_v25 = vrot.slane %v11363_v38, 4  ;;  %v11235_v46 = vadd.f32 %v11234_v36, %v11233_v0  ;;  %v11351_v51 = vadd.f32 %v11350_v37, %v11349_v2  ;;  %v14885_v8 = vld [vmem:[%s19284_s11 + $0xa0] sm:$0xff]   ;;  %v14888_v36 = vld [vmem:[%s19284_s11 + $0x28] sm:$0xff]  }
 0x84e   : > { %v11228_v45 = vadd.f32 %v11227_v27, %v11226_v44  ;;  %v11358_v54 = vadd.f32 %v11357_v39, %v11356_v32  ;;  %v11242_v55 = vadd.f32 %v11241_v49, %v11240_v30  ;;  %v11249_v58 = vadd.f32 %v11248_v28, %v11247_v35  ;;  %v14889_v37 = vld [vmem:[%s19284_s11 + $0xa8] sm:$0xff]   ;;  %v14890_v39 = vld [vmem:[%s19284_s11 + $0x70] sm:$0xff]  }
 0x84f   : > { %v11371_v3 = vrot.slane %v11370_v52, 4  ;;  %v11365_v59 = vadd.f32 %v11364_v25, %v11363_v38  ;;  %v11251_v10 = vmul.f32 0.0625, %v11235_v46  ;;  %v11352_v23 = vrot.slane %v11351_v51, 2  ;;  %13286 = vmatpush3.bf16.msra.mxu1 %v14881_v40  ;;  %13266 = vmatpush3.bf16.msra.mxu0 %v14884_v6 }
 0x850   : > { %v11250_v17 = vmul.f32 0.0625, %v11228_v45  ;;  %v11359_v20 = vrot.slane %v11358_v54, 2  ;;  %v11252_v7 = vmul.f32 0.0625, %v11242_v55  ;;  %v11253_v22 = vmul.f32 0.0625, %v11249_v58  ;;  %13287 = vmatprep.subr.bf16.mxu1 %v14883_v31  ;;  %13267 = vmatprep.subr.bf16.mxu0 %v14886_v19  ;;  %v14893_v55 = vld [vmem:[%s19284_s11 + $0xb0] sm:$0xff]   ;;  %v14897_v19 = vld [vmem:[%s19284_s11 + $0xb8] sm:$0xff]  }
 0x851   : > { %v11372_v43 = vadd.f32 %v11371_v3, %v11370_v52  ;;  %v11366_v29 = vrot.slane %v11365_v59, 2  ;;  %v11277_v9 = vmul.f32 %v11263_v33, %v11251_v10  ;;  %v11353_v44 = vadd.f32 %v11352_v23, %v11351_v51  ;;  %v11464_v10 = vld [vmem:[#allocation3 + $0x80] sm:$0xff]  ;;  %v14894_v23 = vld [vmem:[%s19284_s11 + $0x78] sm:$0xff]  }
 0x852   : > { %v11276_v24 = vmul.f32 %v11259_v62, %v11250_v17  ;;  %v11360_v0 = vadd.f32 %v11359_v20, %v11358_v54  ;;  %v11278_v2 = vmul.f32 %v11267_v26, %v11252_v7  ;;  %v11279_v32 = vmul.f32 %v11271_v34, %v11253_v22  ;;  %v11381_v62 = vld [vmem:[%s19288_s15 + $0xc] sm:$0xf]  ;;  %v14892_v54 = vld [vmem:[%s19284_s11 + $0x30] sm:$0xff]   ;;  %v14895_v20 = vld [vmem:[%s19284_s11 + $0xf8] sm:$0xff]  }
 0x853   : > { %v11373_v1 = vrot.slane %v11372_v43, 2  ;;  %v11367_v30 = vadd.f32 %v11366_v29, %v11365_v59  ;;  %v11303_v38 = vadd.f32 %v11289_v50, %v11277_v9  ;;  %v11354_v26 = vrot.slane %v11353_v44, 1  ;;  %13288 = vmatpush3.bf16.msra.mxu1 %v14885_v8  ;;  %v14887_v34 = vld [vmem:[%s19284_s11 + $0xe8] sm:$0xff]   ;;  %13268 = vmatpush3.bf16.msra.mxu0 %v14888_v36 }
 0x854   : > { %v11302_v33 = vadd.f32 %v11285_v48, %v11276_v24  ;;  %v11361_v61 = vrot.slane %v11360_v0, 1  ;;  %v11304_v48 = vadd.f32 %v11293_v42, %v11278_v2  ;;  %v11305_v50 = vadd.f32 %v11297_v18, %v11279_v32  ;;  %v14891_v18 = vld [vmem:[%s19284_s11 + $0xf0] sm:$0xff]   ;;  %13289 = vmatprep.subr.bf16.mxu1 %v14887_v34  ;;  %13269 = vmatprep.subr.bf16.mxu0 %v14890_v39  ;;  %v11465_v29 = vld [vmem:[#allocation3 + $0x88] sm:$0xff] }
 0x855   : > { %v11374_v35 = vadd.f32 %v11373_v1, %v11372_v43  ;;  %v11368_v52 = vrot.slane %v11367_v30, 1  ;;  %v11355_v42 = vadd.f32 %v11354_v26, %v11353_v44  ;;  %v11386_v4 = vrot.slane %v11381_v62, %v18628_v57  ;;  %v11466_v1 = vld [vmem:[#allocation3 + $0x90] sm:$0xff]  ;;  %v11467_v44 = vld [vmem:[#allocation3 + $0x98] sm:$0xff] }
 0x856   : > { %v11310_v56 = vcombine.low %v11302_v33, %v11303_v38  ;;  %v11362_v47 = vadd.f32 %v11361_v61, %v11360_v0  ;;  %v11311_v49 = vcombine.low %v11304_v48, %v11305_v50  ;;  %v11390_v3 = vrot.slane %v11381_v62, %v18637_v5 }
 0x857   : > { %v11375_v27 = vrot.slane %v11374_v35, 1  ;;  %v11369_v28 = vadd.f32 %v11368_v52, %v11367_v30  ;;  %v11377_v45 = vmul.f32 0.0625, %v11355_v42  ;;  %v11394_v51 = vrot.slane %v11381_v62, %v18634_v63  ;;  %13290 = vmatpush3.bf16.msra.mxu1 %v14889_v37  ;;  %13270 = vmatpush3.bf16.msra.mxu0 %v14892_v54 }
 0x858   : > { %v11318_v40 = vrot.slane %v11310_v56, %v18646_v13  ;;  %v11378_v46 = vmul.f32 0.0625, %v11362_v47  ;;  %v11325_v58 = vrot.slane %v11311_v49, %v18646_v13  ;;  %v11398_v17 = vrot.slane %v11381_v62, %v18640_v11  ;;  %13291 = vmatprep.subr.bf16.mxu1 %v14891_v18  ;;  %v14896_v62 = vld [vmem:[%s19284_s11 + $0x38] sm:$0xff]   ;;  %13271 = vmatprep.subr.bf16.mxu0 %v14894_v23  ;;  %v18927_v56 = vld [vmem:[%s19289_s16] sm:$0xf] }
 0x859   : > { %v11376_v25 = vadd.f32 %v11375_v27, %v11374_v35  ;;  %v11379_v59 = vmul.f32 0.0625, %v11369_v28  ;;  %v11403_v21 = vmul.f32 %v11386_v4, %v11377_v45  ;;  %v11412_v7 = vrot.slane %v11407_v41, %v18628_v57  ;;  %v18911_v35 = vld [vmem:[%s19288_s15] sm:$0xf] }
 0x85a   : > { %v11404_v31 = vmul.f32 %v11390_v3, %v11378_v46  ;;  %v11416_v22 = vrot.slane %v11407_v41, %v18637_v5  ;;  %v11326_v6 = vcombine.low %v11318_v40, %v11325_v58  ;;  %v11420_v9 = vrot.slane %v11407_v41, %v18634_v63 }
 0x85b   : > { %v11380_v43 = vmul.f32 0.0625, %v11376_v25  ;;  %v11405_v8 = vmul.f32 %v11394_v51, %v11379_v59  ;;  %v11424_v0 = vrot.slane %v11407_v41, %v18640_v11  ;;  %v11429_v2 = vadd.f32 %v11412_v7, %v11403_v21  ;;  %13292 = vmatpush3.bf16.msra.mxu1 %v14893_v55  ;;  %13272 = vmatpush3.bf16.msra.mxu0 %v14896_v62  ;;  %v11591_v51 = vld [vmem:[#allocation3 + $0xa0] sm:$0xff] }
 0x85c   : > { %v11430_v32 = vadd.f32 %v11416_v22, %v11404_v31  ;;  %v11468_v30 = vunpack.c.l.bf16 %v11464_v10  ;;  %v11333_v33 = vrot.slane %v11326_v6, %v18646_v13  ;;  %v11469_v26 = vunpack.c.l.bf16 %v11465_v29  ;;  %13293 = vmatprep.subr.bf16.mxu1 %v14895_v20  ;;  %v11594_v31 = vld [vmem:[#allocation3 + $0xb8] sm:$0xff]  ;;  %10699 = vmatprep.subr.bf16.mxu0 %v14902_v60  ;;  %v10815_v60 = vld [vmem:[%s19290_s17] ss:$2 sm:$0xf] }
 0x85d   : > { %v11406_v24 = vmul.f32 %v11398_v17, %v11380_v43  ;;  %v11431_v38 = vadd.f32 %v11420_v9, %v11405_v8  ;;  %v11470_v61 = vunpack.c.l.bf16 %v11466_v1  ;;  %v11471_v50 = vunpack.c.l.bf16 %v11467_v44  ;;  %v11592_v43 = vld [vmem:[#allocation3 + $0xa8] sm:$0xff]  ;;  %v11593_v17 = vld [vmem:[#allocation3 + $0xb0] sm:$0xff] }
 0x85e   : > { %v11437_v48 = vcombine.low %v11429_v2, %v11430_v32  ;;  %v11472_v52 = vunpack.c.h.bf16 %v11464_v10  ;;  %11336 = vst.msk [vmem:[#allocation6 + $0x20] ss:$2 sm:$0xf] %vm18715_vm0, %v11333_v33  ;;  %v11473_v27 = vunpack.c.h.bf16 %v11465_v29  ;;  %v11474_v36 = vunpack.c.h.bf16 %v11466_v1 }
 0x85f   : > { %v11432_v34 = vadd.f32 %v11424_v0, %v11406_v24  ;;  %v11475_v37 = vunpack.c.h.bf16 %v11467_v44  ;;  %v11513_v39 = vrot.slane %v18911_v35, %v18628_v57  ;;  %v11517_v18 = vrot.slane %v18911_v35, %v18637_v5  ;;  %13294 = vmatpush3.bf16.msra.mxu1 %v14897_v19 }
 0x860   : > { %v11445_v47 = vrot.slane %v11437_v48, %v18646_v13  ;;  %v11476_v4 = vadd.f32 %v11472_v52, %v11468_v30  ;;  %v11483_v49 = vadd.f32 %v11473_v27, %v11469_v26  ;;  %v11490_v28 = vadd.f32 %v11474_v36, %v11470_v61 }
 0x861   : > { %v11438_v42 = vcombine.low %v11431_v38, %v11432_v34  ;;  %v11497_v25 = vadd.f32 %v11475_v37, %v11471_v50  ;;  %v11521_v3 = vrot.slane %v18911_v35, %v18634_v63  ;;  %v11525_v45 = vrot.slane %v18911_v35, %v18640_v11 }
 0x862   : > { %v11477_v40 = vrot.slane %v11476_v4, 4  ;;  %v11539_v46 = vrot.slane %v18927_v56, %v18628_v57  ;;  %v11484_v54 = vrot.slane %v11483_v49, 4  ;;  %v11491_v55 = vrot.slane %v11490_v28, 4 }
 0x863   : > { %v11452_v41 = vrot.slane %v11438_v42, %v18646_v13  ;;  %v11498_v58 = vrot.slane %v11497_v25, 4  ;;  %v11543_v59 = vrot.slane %v18927_v56, %v18637_v5  ;;  %v11547_v20 = vrot.slane %v18927_v56, %v18634_v63 }
 0x864   : > { %v11478_v23 = vadd.f32 %v11477_v40, %v11476_v4  ;;  %v11551_v21 = vrot.slane %v18927_v56, %v18640_v11  ;;  %v11485_v7 = vadd.f32 %v11484_v54, %v11483_v49  ;;  %v11492_v22 = vadd.f32 %v11491_v55, %v11490_v28 }
 0x865   : > { %v11453_v10 = vcombine.low %v11445_v47, %v11452_v41  ;;  %v11499_v29 = vadd.f32 %v11498_v58, %v11497_v25  ;;  %v11595_v1 = vunpack.c.l.bf16 %v11591_v51  ;;  %v11596_v24 = vunpack.c.l.bf16 %v11592_v43 }
 0x866   : > { %v11479_v8 = vrot.slane %v11478_v23, 2  ;;  %v11597_v9 = vunpack.c.l.bf16 %v11593_v17  ;;  %v11486_v44 = vrot.slane %v11485_v7, 2  ;;  %v11493_v0 = vrot.slane %v11492_v22, 2 }
 0x867   : > { %v11460_v6 = vrot.slane %v11453_v10, %v18646_v13  ;;  %v11500_v2 = vrot.slane %v11499_v29, 2  ;;  %v11598_v32 = vunpack.c.l.bf16 %v11594_v31  ;;  %v11599_v62 = vunpack.c.h.bf16 %v11591_v51 }
 0x868   : > { %v11480_v30 = vadd.f32 %v11479_v8, %v11478_v23  ;;  %v11600_v33 = vunpack.c.h.bf16 %v11592_v43  ;;  %v11601_v38 = vunpack.c.h.bf16 %v11593_v17  ;;  %v11487_v26 = vadd.f32 %v11486_v44, %v11485_v7 }
 0x869   : > { %11463 = vst.msk [vmem:[#allocation6 + $0x28] ss:$2 sm:$0xf] %vm18715_vm0, %v11460_v6  ;;  %v11494_v61 = vadd.f32 %v11493_v0, %v11492_v22  ;;  %v11501_v19 = vadd.f32 %v11500_v2, %v11499_v29  ;;  %v11602_v34 = vunpack.c.h.bf16 %v11594_v31  ;;  %v11603_v50 = vadd.f32 %v11599_v62, %v11595_v1 }
 0x86a   : > { %v11481_v48 = vrot.slane %v11480_v30, 1  ;;  %v11610_v52 = vadd.f32 %v11600_v33, %v11596_v24  ;;  %v11617_v27 = vadd.f32 %v11601_v38, %v11597_v9  ;;  %v11488_v36 = vrot.slane %v11487_v26, 1 }
 0x86b   : > { %v11495_v37 = vrot.slane %v11494_v61, 1  ;;  %v11502_v42 = vrot.slane %v11501_v19, 1  ;;  %v11624_v47 = vadd.f32 %v11602_v34, %v11598_v32  ;;  %v11604_v49 = vrot.slane %v11603_v50, 4 }
 0x86c   : > { %v11482_v4 = vadd.f32 %v11481_v48, %v11480_v30  ;;  %v11611_v28 = vrot.slane %v11610_v52, 4  ;;  %v11618_v25 = vrot.slane %v11617_v27, 4  ;;  %v11489_v41 = vadd.f32 %v11488_v36, %v11487_v26  ;;  %v11661_v48 = vld [vmem:[%s19289_s16 + $0x4] sm:$0xf] }
 0x86d   : > { %v11496_v40 = vadd.f32 %v11495_v37, %v11494_v61  ;;  %v11503_v51 = vadd.f32 %v11502_v42, %v11501_v19  ;;  %v11625_v54 = vrot.slane %v11624_v47, 4  ;;  %v11605_v58 = vadd.f32 %v11604_v49, %v11603_v50  ;;  %v11718_v49 = vld [vmem:[#allocation3 + $0xc0] sm:$0xff] }
 0x86e   : > { %v11504_v55 = vmul.f32 0.0625, %v11482_v4  ;;  %v11612_v43 = vadd.f32 %v11611_v28, %v11610_v52  ;;  %v11619_v17 = vadd.f32 %v11618_v25, %v11617_v27  ;;  %v11505_v10 = vmul.f32 0.0625, %v11489_v41  ;;  %v11719_v28 = vld [vmem:[#allocation3 + $0xc8] sm:$0xff] }
 0x86f   : > { %v11506_v23 = vmul.f32 0.0625, %v11496_v40  ;;  %v11507_v31 = vmul.f32 0.0625, %v11503_v51  ;;  %v11626_v7 = vadd.f32 %v11625_v54, %v11624_v47  ;;  %v11606_v29 = vrot.slane %v11605_v58, 2  ;;  %v11720_v54 = vld [vmem:[#allocation3 + $0xd0] sm:$0xff] }
 0x870   : > { %v11530_v22 = vmul.f32 %v11513_v39, %v11504_v55  ;;  %v11613_v1 = vrot.slane %v11612_v43, 2  ;;  %v11620_v6 = vrot.slane %v11619_v17, 2  ;;  %v11531_v8 = vmul.f32 %v11517_v18, %v11505_v10  ;;  %v11635_v39 = vld [vmem:[%s19288_s15 + $0x4] sm:$0xf]  ;;  %v11721_v10 = vld [vmem:[#allocation3 + $0xd8] sm:$0xff] }
 0x871   : > { %v11532_v24 = vmul.f32 %v11521_v3, %v11506_v23  ;;  %v11533_v9 = vmul.f32 %v11525_v45, %v11507_v31  ;;  %v11627_v44 = vrot.slane %v11626_v7, 2  ;;  %v11607_v2 = vadd.f32 %v11606_v29, %v11605_v58  ;;  %v18986_v29 = vld [vmem:[%s19288_s15 + $0x8] sm:$0xf] }
 0x872   : > { %v11556_v0 = vadd.f32 %v11539_v46, %v11530_v22  ;;  %v11614_v32 = vadd.f32 %v11613_v1, %v11612_v43  ;;  %v11621_v18 = vadd.f32 %v11620_v6, %v11619_v17  ;;  %v11557_v3 = vadd.f32 %v11543_v59, %v11531_v8 }
 0x873   : > { %v11558_v30 = vadd.f32 %v11547_v20, %v11532_v24  ;;  %v11559_v62 = vadd.f32 %v11551_v21, %v11533_v9  ;;  %v11628_v35 = vadd.f32 %v11627_v44, %v11626_v7  ;;  %v11608_v45 = vrot.slane %v11607_v2, 1 }
 0x874   : > { %v11615_v33 = vrot.slane %v11614_v32, 1  ;;  %v11622_v38 = vrot.slane %v11621_v18, 1  ;;  %v11640_v26 = vrot.slane %v11635_v39, %v18628_v57  ;;  %v11564_v61 = vcombine.low %v11556_v0, %v11557_v3 }
 0x875   : > { %v11565_v19 = vcombine.low %v11558_v30, %v11559_v62  ;;  %v11629_v34 = vrot.slane %v11628_v35, 1  ;;  %v11644_v46 = vrot.slane %v11635_v39, %v18637_v5  ;;  %v11609_v50 = vadd.f32 %v11608_v45, %v11607_v2 }
 0x876   : > { %v11616_v56 = vadd.f32 %v11615_v33, %v11614_v32  ;;  %v11623_v59 = vadd.f32 %v11622_v38, %v11621_v18  ;;  %v11648_v20 = vrot.slane %v11635_v39, %v18634_v63  ;;  %v11572_v21 = vrot.slane %v11564_v61, %v18646_v13  ;;  %v18997_v33 = vld [vmem:[%s19289_s16 + $0x8] sm:$0xf] }
 0x877   : > { %v11579_v52 = vrot.slane %v11565_v19, %v18646_v13  ;;  %v11630_v27 = vadd.f32 %v11629_v34, %v11628_v35  ;;  %v11652_v36 = vrot.slane %v11635_v39, %v18640_v11  ;;  %v11631_v37 = vmul.f32 0.0625, %v11609_v50 }
 0x878   : > { %v11632_v42 = vmul.f32 0.0625, %v11616_v56  ;;  %v11633_v47 = vmul.f32 0.0625, %v11623_v59  ;;  %v11666_v4 = vrot.slane %v11661_v48, %v18628_v57  ;;  %v11670_v40 = vrot.slane %v11661_v48, %v18637_v5  ;;  %v19005_v56 = vld [vmem:[#allocation3 + $0xe0] sm:$0xff] }
 0x879   : > { %v11580_v25 = vcombine.low %v11572_v21, %v11579_v52  ;;  %v11634_v41 = vmul.f32 0.0625, %v11630_v27  ;;  %v11674_v51 = vrot.slane %v11661_v48, %v18634_v63  ;;  %v11657_v55 = vmul.f32 %v11640_v26, %v11631_v37  ;;  %v19011_v27 = vld [vmem:[#allocation3 + $0xe8] sm:$0xff] }
 0x87a   : > { %v11658_v58 = vmul.f32 %v11644_v46, %v11632_v42  ;;  %v11659_v43 = vmul.f32 %v11648_v20, %v11633_v47  ;;  %v11678_v17 = vrot.slane %v11661_v48, %v18640_v11  ;;  %v11722_v7 = vunpack.c.l.bf16 %v11718_v49 }
 0x87b   : > { %v11587_v23 = vrot.slane %v11580_v25, %v18646_v13  ;;  %v11660_v31 = vmul.f32 %v11652_v36, %v11634_v41  ;;  %v11723_v22 = vunpack.c.l.bf16 %v11719_v28  ;;  %v11683_v1 = vadd.f32 %v11666_v4, %v11657_v55 }
 0x87c   : > { %v11684_v6 = vadd.f32 %v11670_v40, %v11658_v58  ;;  %v11685_v8 = vadd.f32 %v11674_v51, %v11659_v43  ;;  %v11724_v24 = vunpack.c.l.bf16 %v11720_v54  ;;  %v11725_v44 = vunpack.c.l.bf16 %v11721_v10 }
 0x87d   : > { %11590 = vst.msk [vmem:[#allocation6 + $0x11] ss:$2 sm:$0xf] %vm18715_vm0, %v11587_v23  ;;  %v11686_v9 = vadd.f32 %v11678_v17, %v11660_v31  ;;  %v11726_v39 = vunpack.c.h.bf16 %v11718_v49  ;;  %v11727_v0 = vunpack.c.h.bf16 %v11719_v28  ;;  %v11728_v32 = vunpack.c.h.bf16 %v11720_v54 }
 0x87e   : > { %v11691_v2 = vcombine.low %v11683_v1, %v11684_v6  ;;  %v11729_v18 = vunpack.c.h.bf16 %v11721_v10  ;;  %v11767_v3 = vrot.slane %v18986_v29, %v18628_v57  ;;  %v11771_v45 = vrot.slane %v18986_v29, %v18637_v5 }
 0x87f   : > { %v11692_v30 = vcombine.low %v11685_v8, %v11686_v9  ;;  %v11730_v62 = vadd.f32 %v11726_v39, %v11722_v7  ;;  %v11737_v35 = vadd.f32 %v11727_v0, %v11723_v22  ;;  %v11744_v26 = vadd.f32 %v11728_v32, %v11724_v24 }
 0x880   : > { %v11699_v38 = vrot.slane %v11691_v2, %v18646_v13  ;;  %v11751_v61 = vadd.f32 %v11729_v18, %v11725_v44  ;;  %v11775_v19 = vrot.slane %v18986_v29, %v18634_v63  ;;  %v11779_v50 = vrot.slane %v18986_v29, %v18640_v11 }
 0x881   : > { %v11706_v34 = vrot.slane %v11692_v30, %v18646_v13  ;;  %v11731_v46 = vrot.slane %v11730_v62, 4  ;;  %v11738_v48 = vrot.slane %v11737_v35, 4  ;;  %v11745_v59 = vrot.slane %v11744_v26, 4 }
 0x882   : > { %v11752_v20 = vrot.slane %v11751_v61, 4  ;;  %v11793_v21 = vrot.slane %v18997_v33, %v18628_v57  ;;  %v11797_v52 = vrot.slane %v18997_v33, %v18637_v5  ;;  %v11801_v47 = vrot.slane %v18997_v33, %v18634_v63 }
 0x883   : > { %v11707_v36 = vcombine.low %v11699_v38, %v11706_v34  ;;  %v11732_v37 = vadd.f32 %v11731_v46, %v11730_v62  ;;  %v11739_v42 = vadd.f32 %v11738_v48, %v11737_v35  ;;  %v11746_v4 = vadd.f32 %v11745_v59, %v11744_v26 }
 0x884   : > { %v11753_v49 = vadd.f32 %v11752_v20, %v11751_v61  ;;  %v11805_v28 = vrot.slane %v18997_v33, %v18640_v11  ;;  %v11849_v25 = vunpack.c.l.bf16 %v19005_v56  ;;  %v11850_v58 = vunpack.c.l.bf16 %v19011_v27 }
 0x885   : > { %v11714_v51 = vrot.slane %v11707_v36, %v18646_v13  ;;  %v11733_v54 = vrot.slane %v11732_v37, 2  ;;  %v11740_v55 = vrot.slane %v11739_v42, 2  ;;  %v11747_v31 = vrot.slane %v11746_v4, 2 }
 0x886   : > { %v11754_v7 = vrot.slane %v11753_v49, 2 }
 0x887   : > { %11717 = vst.msk [vmem:[#allocation6 + $0x19] ss:$2 sm:$0xf] %vm18715_vm0, %v11714_v51  ;;  %v11734_v6 = vadd.f32 %v11733_v54, %v11732_v37  ;;  %v11741_v8 = vadd.f32 %v11740_v55, %v11739_v42  ;;  %v11748_v0 = vadd.f32 %v11747_v31, %v11746_v4 }
 0x888   : > { %v11755_v2 = vadd.f32 %v11754_v7, %v11753_v49 }
 0x889   : > { %v11735_v35 = vrot.slane %v11734_v6, 1  ;;  %v11742_v38 = vrot.slane %v11741_v8, 1  ;;  %v11749_v34 = vrot.slane %v11748_v0, 1 }
 0x88a   : > { %v11756_v46 = vrot.slane %v11755_v2, 1 }
 0x88b   : > { %v11736_v20 = vadd.f32 %v11735_v35, %v11734_v6  ;;  %v11743_v36 = vadd.f32 %v11742_v38, %v11741_v8  ;;  %v11750_v4 = vadd.f32 %v11749_v34, %v11748_v0  ;;  %v11847_v38 = vld [vmem:[#allocation3 + $0xf0] sm:$0xff] }
 0x88c   : > { %v11757_v49 = vadd.f32 %v11756_v46, %v11755_v2 }
 0x88d   : > { %v11758_v51 = vmul.f32 0.0625, %v11736_v20  ;;  %v11759_v54 = vmul.f32 0.0625, %v11743_v36 }
 0x88e   : > { %v11761_v31 = vmul.f32 0.0625, %v11757_v49 }
 0x88f   : > { %v11784_v8 = vmul.f32 %v11767_v3, %v11758_v51 }
 0x890   : > { %v11787_v35 = vmul.f32 %v11779_v50, %v11761_v31 }
 0x891   : > { %v11810_v34 = vadd.f32 %v11793_v21, %v11784_v8 }
 0x892   : > { %v11813_v50 = vadd.f32 %v11805_v28, %v11787_v35 }
 0x8fb   : > { %v9569_v41 = vpop.f32.mrb[0].mxu0  ;;  %v9993_v40 = vpop.f32.mrb[0].mxu1 }
 0x8fc   : > { %v13429_v43 = vadd.f32 %v9569_v41, %v18643_v12  ;;  %v13437_v17 = vadd.f32 %v9993_v40, %v18649_v14  ;;  %v9571_v10 = vpop.f32.mrb[1].mxu0  ;;  %v9995_v23 = vpop.f32.mrb[1].mxu1 }
 0x8fd   : > { %v13430_v22 = vadd.f32 %v9571_v10, %v18652_v15  ;;  %v13438_v1 = vadd.f32 %v9995_v23, %v18655_v16  ;;  %v19026_v24 = vpop.f32.mrb[2].mxu0  ;;  %v19028_v9 = vpop.f32.mrb[2].mxu1  ;;  %v11760_v23 = vmul.f32 0.0625, %v11750_v4 }
 0x8fe   : > { %v10012_v44 = vmax.f32 %v13429_v43, 0.0  ;;  %v10014_v39 = vmax.f32 %v13437_v17, 0.0  ;;  %v19030_v32 = vpop.f32.mrb[3].mxu0  ;;  %v19032_v18 = vpop.f32.mrb[3].mxu1 }
 0x8ff   : > { %v10013_v30 = vmax.f32 %v13430_v22, 0.0  ;;  %v10015_v62 = vmax.f32 %v13438_v1, 0.0 }
 0x900   : > { %v10028_v26 = vrot.slane %v10012_v44, 4  ;;  %v10040_v61 = vrot.slane %v10014_v39, 4 }
 0x901   : > { %v10034_v48 = vrot.slane %v10013_v30, 4  ;;  %v10046_v59 = vrot.slane %v10015_v62, 4 }
 0x902   : > { %v10029_v37 = vadd.f32 %v10028_v26, %v10012_v44  ;;  %v10041_v42 = vadd.f32 %v10040_v61, %v10014_v39  ;;  %v11785_v44 = vmul.f32 %v11771_v45, %v11759_v54  ;;  %v11853_v54 = vunpack.c.h.bf16 %v19005_v56  ;;  %v19095_v56 = vld [vmem:[%s19289_s16 + $0xc] sm:$0xf] }
 0x903   : > { %v10035_v41 = vadd.f32 %v10034_v48, %v10013_v30  ;;  %v10047_v40 = vadd.f32 %v10046_v59, %v10015_v62  ;;  %v19034_v55 = vpop.f32.mrb[4].mxu0  ;;  %v19036_v43 = vpop.f32.mrb[4].mxu1  ;;  %v11786_v62 = vmul.f32 %v11775_v19, %v11760_v23  ;;  %v11848_v19 = vld [vmem:[#allocation3 + $0xf8] sm:$0xff] }
 0x904   : > { %v10030_v17 = vrot.slane %v10029_v37, 2  ;;  %v10042_v10 = vrot.slane %v10041_v42, 2  ;;  %v19038_v7 = vpop.f32.mrb[5].mxu0  ;;  %v19040_v22 = vpop.f32.mrb[5].mxu1  ;;  %v11811_v46 = vadd.f32 %v11797_v52, %v11785_v44  ;;  %v11857_v44 = vadd.f32 %v11853_v54, %v11849_v25 }
 0x905   : > { %v10036_v1 = vrot.slane %v10035_v41, 2  ;;  %v10048_v6 = vrot.slane %v10047_v40, 2  ;;  %v19048_v39 = vpop.f32.mrb[6].mxu0  ;;  %v19050_v0 = vpop.f32.mrb[6].mxu1  ;;  %v11812_v29 = vadd.f32 %v11801_v47, %v11786_v62  ;;  %v19079_v47 = vld [vmem:[%s19288_s15 + $0xc] sm:$0xf] }
 0x906   : > { %v10031_v2 = vadd.f32 %v10030_v17, %v10029_v37  ;;  %v10043_v30 = vadd.f32 %v10042_v10, %v10041_v42  ;;  %v19058_v3 = vpop.f32.mrb[7].mxu0  ;;  %v19060_v26 = vpop.f32.mrb[7].mxu1  ;;  %v11818_v37 = vcombine.low %v11810_v34, %v11811_v46  ;;  %v11851_v42 = vunpack.c.l.bf16 %v11847_v38 }
 0x907   : > { %v10037_v45 = vadd.f32 %v10036_v1, %v10035_v41  ;;  %v10049_v61 = vadd.f32 %v10048_v6, %v10047_v40  ;;  %v11819_v49 = vcombine.low %v11812_v29, %v11813_v50  ;;  %v11852_v41 = vunpack.c.l.bf16 %v11848_v19 }
 0x908   : > { %v10032_v48 = vrot.slane %v10031_v2, 1  ;;  %v10044_v59 = vrot.slane %v10043_v30, 1  ;;  %v11826_v51 = vrot.slane %v11818_v37, %v18646_v13  ;;  %v11854_v10 = vunpack.c.h.bf16 %v19011_v27 }
 0x909   : > { %v10038_v20 = vrot.slane %v10037_v45, 1  ;;  %v10050_v36 = vrot.slane %v10049_v61, 1  ;;  %v11833_v17 = vrot.slane %v11819_v49, %v18646_v13  ;;  %v11855_v1 = vunpack.c.h.bf16 %v11847_v38 }
 0x90a   : > { %v10033_v21 = vadd.f32 %v10032_v48, %v10031_v2  ;;  %v10045_v4 = vadd.f32 %v10044_v59, %v10043_v30  ;;  %v11856_v6 = vunpack.c.h.bf16 %v11848_v19  ;;  %v11864_v2 = vadd.f32 %v11854_v10, %v11850_v58 }
 0x90b   : > { %v10039_v52 = vadd.f32 %v10038_v20, %v10037_v45  ;;  %v10051_v40 = vadd.f32 %v10050_v36, %v10049_v61  ;;  %v11834_v8 = vcombine.low %v11826_v51, %v11833_v17  ;;  %v11894_v30 = vrot.slane %v19079_v47, %v18628_v57 }
 0x90c   : > { %v10053_v33 = vmul.f32 0.125, %v10033_v21  ;;  %v10055_v28 = vmul.f32 0.125, %v10045_v4  ;;  %v11871_v45 = vadd.f32 %v11855_v1, %v11851_v42  ;;  %v11878_v61 = vadd.f32 %v11856_v6, %v11852_v41 }
 0x90d   : > { %v10054_v23 = vmul.f32 0.125, %v10039_v52  ;;  %v10056_v31 = vmul.f32 0.125, %v10051_v40  ;;  %v11841_v34 = vrot.slane %v11834_v8, %v18646_v13  ;;  %v11858_v46 = vrot.slane %v11857_v44, 4 }
 0x90e   : > { %v11865_v48 = vrot.slane %v11864_v2, 4  ;;  %v11898_v38 = vrot.slane %v19079_v47, %v18637_v5  ;;  %v11872_v58 = vrot.slane %v11871_v45, 4  ;;  %v11879_v19 = vrot.slane %v11878_v61, 4 }
 0x90f   : > { %v10061_v62 = vcombine.low %v10053_v33, %v10054_v23  ;;  %v10062_v35 = vcombine.low %v10055_v28, %v10056_v31  ;;  %11844 = vst.msk [vmem:[#allocation6 + $0x21] ss:$2 sm:$0xf] %vm18715_vm0, %v11841_v34  ;;  %v11859_v59 = vadd.f32 %v11858_v46, %v11857_v44  ;;  %v11902_v50 = vrot.slane %v19079_v47, %v18634_v63 }
 0x910   : > { %v11866_v29 = vadd.f32 %v11865_v48, %v11864_v2  ;;  %v11906_v20 = vrot.slane %v19079_v47, %v18640_v11  ;;  %v11873_v37 = vadd.f32 %v11872_v58, %v11871_v45  ;;  %v11880_v42 = vadd.f32 %v11879_v19, %v11878_v61 }
 0x911   : > { %v10069_v27 = vrot.slane %v10061_v62, %v18646_v13  ;;  %v10076_v25 = vrot.slane %v10062_v35, %v18646_v13  ;;  %v11920_v21 = vrot.slane %v19095_v56, %v18628_v57  ;;  %v11860_v4 = vrot.slane %v11859_v59, 2 }
 0x912   : > { %v11867_v49 = vrot.slane %v11866_v29, 2  ;;  %v11924_v41 = vrot.slane %v19095_v56, %v18637_v5  ;;  %v11928_v52 = vrot.slane %v19095_v56, %v18634_v63  ;;  %v11874_v51 = vrot.slane %v11873_v37, 2 }
 0x913   : > { %v10077_v36 = vcombine.low %v10069_v27, %v10076_v25  ;;  %v11881_v54 = vrot.slane %v11880_v42, 2  ;;  %v11932_v33 = vrot.slane %v19095_v56, %v18640_v11  ;;  %v11861_v28 = vadd.f32 %v11860_v4, %v11859_v59 }
 0x914   : > { %v11868_v17 = vadd.f32 %v11867_v49, %v11866_v29  ;;  %v13431_v10 = vadd.f32 %v19026_v24, %v18643_v12  ;;  %v13439_v23 = vadd.f32 %v19028_v9, %v18649_v14  ;;  %v11875_v31 = vadd.f32 %v11874_v51, %v11873_v37 }
 0x915   : > { %v10084_v40 = vrot.slane %v10077_v36, %v18646_v13  ;;  %v11882_v1 = vadd.f32 %v11881_v54, %v11880_v42  ;;  %v13432_v6 = vadd.f32 %v19030_v32, %v18652_v15  ;;  %v13440_v8 = vadd.f32 %v19032_v18, %v18655_v16 }
 0x916   : > { %v11862_v44 = vrot.slane %v11861_v28, 1  ;;  %v11869_v2 = vrot.slane %v11868_v17, 1  ;;  %v10016_v62 = vmax.f32 %v13431_v10, 0.0  ;;  %v10018_v35 = vmax.f32 %v13439_v23, 0.0 }
 0x917   : > { %10090 = vst.msk [vmem:[#allocation4] ss:$4 sm:$0xf] %vm18715_vm0, %v10084_v40  ;;  %v11876_v45 = vrot.slane %v11875_v31, 1  ;;  %v11883_v24 = vrot.slane %v11882_v1, 1  ;;  %v10017_v61 = vmax.f32 %v13432_v6, 0.0  ;;  %v13433_v47 = vadd.f32 %v19034_v55, %v18643_v12 }
 0x918   : > { %v10019_v34 = vmax.f32 %v13440_v8, 0.0  ;;  %v11863_v9 = vadd.f32 %v11862_v44, %v11861_v28  ;;  %v11870_v46 = vadd.f32 %v11869_v2, %v11868_v17  ;;  %v10150_v48 = vrot.slane %v10016_v62, 4 }
 0x919   : > { %v10162_v56 = vrot.slane %v10018_v35, 4  ;;  %v11877_v27 = vadd.f32 %v11876_v45, %v11875_v31  ;;  %v11884_v25 = vadd.f32 %v11883_v24, %v11882_v1  ;;  %v10156_v58 = vrot.slane %v10017_v61, 4 }
 0x91a   : > { %v10168_v19 = vrot.slane %v10019_v34, 4  ;;  %v11885_v32 = vmul.f32 0.0625, %v11863_v9  ;;  %v11886_v59 = vmul.f32 0.0625, %v11870_v46  ;;  %v10151_v29 = vadd.f32 %v10150_v48, %v10016_v62 }
 0x91b   : > { %v10163_v18 = vadd.f32 %v10162_v56, %v10018_v35  ;;  %v11887_v36 = vmul.f32 0.0625, %v11877_v27  ;;  %v11888_v37 = vmul.f32 0.0625, %v11884_v25  ;;  %v10157_v42 = vadd.f32 %v10156_v58, %v10017_v61 }
 0x91c   : > { %v10169_v4 = vadd.f32 %v10168_v19, %v10019_v34  ;;  %v11911_v49 = vmul.f32 %v11894_v30, %v11885_v32  ;;  %v11912_v40 = vmul.f32 %v11898_v38, %v11886_v59  ;;  %v10152_v51 = vrot.slane %v10151_v29, 2 }
 0x91d   : > { %v10164_v54 = vrot.slane %v10163_v18, 2  ;;  %v11913_v28 = vmul.f32 %v11902_v50, %v11887_v36  ;;  %v11914_v17 = vmul.f32 %v11906_v20, %v11888_v37  ;;  %v10158_v10 = vrot.slane %v10157_v42, 2 }
 0x91e   : > { %v10170_v23 = vrot.slane %v10169_v4, 2  ;;  %v11937_v31 = vadd.f32 %v11920_v21, %v11911_v49  ;;  %v11938_v1 = vadd.f32 %v11924_v41, %v11912_v40  ;;  %v10153_v6 = vadd.f32 %v10152_v51, %v10151_v29 }
 0x91f   : > { %v10165_v8 = vadd.f32 %v10164_v54, %v10163_v18  ;;  %v11939_v44 = vadd.f32 %v11928_v52, %v11913_v28  ;;  %v11940_v2 = vadd.f32 %v11932_v33, %v11914_v17  ;;  %v10159_v62 = vadd.f32 %v10158_v10, %v10157_v42 }
 0x920   : > { %v10171_v35 = vadd.f32 %v10170_v23, %v10169_v4  ;;  %v11945_v45 = vcombine.low %v11937_v31, %v11938_v1  ;;  %v10154_v24 = vrot.slane %v10153_v6, 1  ;;  %v13441_v20 = vadd.f32 %v19036_v43, %v18649_v14 }
 0x921   : > { %v10166_v61 = vrot.slane %v10165_v8, 1  ;;  %v11946_v30 = vcombine.low %v11939_v44, %v11940_v2  ;;  %v10160_v38 = vrot.slane %v10159_v62, 1  ;;  %v10020_v52 = vmax.f32 %v13433_v47, 0.0 }
 0x922   : > { %v10172_v50 = vrot.slane %v10171_v35, 1  ;;  %v11953_v21 = vrot.slane %v11945_v45, %v18646_v13  ;;  %v10155_v41 = vadd.f32 %v10154_v24, %v10153_v6  ;;  %v10022_v48 = vmax.f32 %v13441_v20, 0.0 }
 0x923   : > { %v10167_v34 = vadd.f32 %v10166_v61, %v10165_v8  ;;  %v11960_v33 = vrot.slane %v11946_v30, %v18646_v13  ;;  %v10161_v9 = vadd.f32 %v10160_v38, %v10159_v62  ;;  %v10091_v25 = vrot.slane %v10020_v52, 4 }
 0x924   : > { %v10173_v46 = vadd.f32 %v10172_v50, %v10171_v35  ;;  %v10174_v56 = vmul.f32 0.125, %v10155_v41  ;;  %v13434_v55 = vadd.f32 %v19038_v7, %v18652_v15  ;;  %v10103_v43 = vrot.slane %v10022_v48, 4 }
 0x925   : > { %v10176_v27 = vmul.f32 0.125, %v10167_v34  ;;  %v11961_v58 = vcombine.low %v11953_v21, %v11960_v33  ;;  %v10175_v19 = vmul.f32 0.125, %v10161_v9  ;;  %v10092_v59 = vadd.f32 %v10091_v25, %v10020_v52 }
 0x926   : > { %v10177_v32 = vmul.f32 0.125, %v10173_v46  ;;  %v10021_v29 = vmax.f32 %v13434_v55, 0.0  ;;  %v13442_v18 = vadd.f32 %v19040_v22, %v18655_v16  ;;  %v13435_v36 = vadd.f32 %v19048_v39, %v18643_v12 }
 0x927   : > { %v11968_v37 = vrot.slane %v11961_v58, %v18646_v13  ;;  %v10182_v42 = vcombine.low %v10174_v56, %v10175_v19  ;;  %v10104_v49 = vadd.f32 %v10103_v43, %v10022_v48  ;;  %v10093_v40 = vrot.slane %v10092_v59, 2 }
 0x928   : > { %v10183_v4 = vcombine.low %v10176_v27, %v10177_v32  ;;  %v10097_v51 = vrot.slane %v10021_v29, 4  ;;  %v10023_v7 = vmax.f32 %v13442_v18, 0.0  ;;  %v10024_v54 = vmax.f32 %v13435_v36, 0.0 }
 0x929   : > { %11971 = vst.msk [vmem:[#allocation6 + $0x29] ss:$2 sm:$0xf] %vm18715_vm0, %v11968_v37  ;;  %v10190_v28 = vrot.slane %v10182_v42, %v18646_v13  ;;  %v10105_v22 = vrot.slane %v10104_v49, 2  ;;  %v13443_v12 = vadd.f32 %v19050_v0, %v18649_v14  ;;  %v10094_v39 = vadd.f32 %v10093_v40, %v10092_v59 }
 0x92a   : > { %v10197_v17 = vrot.slane %v10183_v4, %v18646_v13  ;;  %v10098_v10 = vadd.f32 %v10097_v51, %v10021_v29  ;;  %v10109_v23 = vrot.slane %v10023_v7, 4  ;;  %v10209_v31 = vrot.slane %v10024_v54, 4 }
 0x92b   : > { %v10106_v6 = vadd.f32 %v10105_v22, %v10104_v49  ;;  %v10026_v8 = vmax.f32 %v13443_v12, 0.0  ;;  %v13436_v44 = vadd.f32 %v19058_v3, %v18652_v15  ;;  %v10095_v2 = vrot.slane %v10094_v39, 1 }
 0x92c   : > { %v10198_v1 = vcombine.low %v10190_v28, %v10197_v17  ;;  %v10099_v62 = vrot.slane %v10098_v10, 2  ;;  %v10110_v35 = vadd.f32 %v10109_v23, %v10023_v7  ;;  %v10210_v45 = vadd.f32 %v10209_v31, %v10024_v54 }
 0x92d   : > { %v10107_v61 = vrot.slane %v10106_v6, 1  ;;  %v10221_v47 = vrot.slane %v10026_v8, 4  ;;  %v10025_v30 = vmax.f32 %v13436_v44, 0.0  ;;  %v10096_v14 = vadd.f32 %v10095_v2, %v10094_v39 }
 0x92e   : > { %v10205_v24 = vrot.slane %v10198_v1, %v18646_v13  ;;  %v10100_v0 = vadd.f32 %v10099_v62, %v10098_v10  ;;  %v10111_v38 = vrot.slane %v10110_v35, 2  ;;  %v10211_v50 = vrot.slane %v10210_v45, 2 }
 0x92f   : > { %v10222_v20 = vadd.f32 %v10221_v47, %v10026_v8  ;;  %v10215_v21 = vrot.slane %v10025_v30, 4  ;;  %v13444_v15 = vadd.f32 %v19060_v26, %v18655_v16  ;;  %v10108_v3 = vadd.f32 %v10107_v61, %v10106_v6 }
 0x930   : > { %10208 = vst.msk [vmem:[#allocation4 + $0x2] ss:$4 sm:$0xf] %vm18715_vm0, %v10205_v24  ;;  %v10101_v41 = vrot.slane %v10100_v0, 1  ;;  %v10112_v34 = vadd.f32 %v10111_v38, %v10110_v35  ;;  %v10212_v52 = vadd.f32 %v10211_v50, %v10210_v45  ;;  %v10115_v48 = vmul.f32 0.125, %v10096_v14 }
 0x931   : > { %v10223_v33 = vrot.slane %v10222_v20, 2  ;;  %v10216_v9 = vadd.f32 %v10215_v21, %v10025_v30  ;;  %v10027_v46 = vmax.f32 %v13444_v15, 0.0  ;;  %v10117_v32 = vmul.f32 0.125, %v10108_v3  ;;  %v14905_v38 = vld [vmem:[%s19286_s13 + $0xc] ss:$16 sps:$4 sm:$0xff]  }
 0x932   : > { %v10102_v56 = vadd.f32 %v10101_v41, %v10100_v0  ;;  %v10113_v27 = vrot.slane %v10112_v34, 1  ;;  %v10213_v25 = vrot.slane %v10212_v52, 1  ;;  %v14900_v50 = vld [vmem:[%s19286_s13] ss:$16 sps:$4 sm:$0xff]   ;;  %10740 = vmatprep.subr.bf16.mxu1 %v14905_v38  ;;  %v14908_v21 = vld [vmem:[%s19286_s13 + $0x24] ss:$16 sps:$4 sm:$0xff]  }
 0x933   : > { %v10224_v55 = vadd.f32 %v10223_v33, %v10222_v20  ;;  %v10217_v58 = vrot.slane %v10216_v9, 2  ;;  %v10227_v19 = vrot.slane %v10027_v46, 4  ;;  %v14903_v20 = vld [vmem:[%s19286_s13 + $0x8] ss:$16 sps:$4 sm:$0xff]   ;;  %v14911_v15 = vld [vmem:[%s19286_s13 + $0x2c] ss:$16 sps:$4 sm:$0xff]  }
 0x934   : > { %v10116_v43 = vmul.f32 0.125, %v10102_v56  ;;  %v10114_v59 = vadd.f32 %v10113_v27, %v10112_v34  ;;  %v10214_v29 = vadd.f32 %v10213_v25, %v10212_v52  ;;  %v14906_v3 = vld [vmem:[%s19286_s13 + $0x20] ss:$16 sps:$4 sm:$0xff]   ;;  %v14909_v41 = vld [vmem:[%s19286_s13 + $0x28] ss:$16 sps:$4 sm:$0xff]   ;;  %v14984_v34 = vmov 0  }
 0x935   : > { %v10225_v18 = vrot.slane %v10224_v55, 1  ;;  %v10218_v16 = vadd.f32 %v10217_v58, %v10216_v9  ;;  %v10228_v26 = vadd.f32 %v10227_v19, %v10027_v46  ;;  %v13191_v9 = vld [vmem:[%s19285_s12] ss:$0 sm:$0xff] }
 0x936   : > { %v10123_v36 = vcombine.low %v10115_v48, %v10116_v43  ;;  %v10118_v37 = vmul.f32 0.125, %v10114_v59  ;;  %v10233_v51 = vmul.f32 0.125, %v10214_v29 }
 0x937   : > { %v10219_v42 = vrot.slane %v10218_v16, 1  ;;  %v10229_v4 = vrot.slane %v10228_v26, 2  ;;  %v10226_v7 = vadd.f32 %v10225_v18, %v10224_v55  ;;  %v10633_v18 = vld [vmem:[%s19287_s14] sm:$0xf] }
 0x938   : > { %v10131_v49 = vrot.slane %v10123_v36, %v18646_v13  ;;  %v10124_v40 = vcombine.low %v10117_v32, %v10118_v37  ;;  %v10642_v36 = vrot.slane %v10633_v18, %v18637_v5  ;;  %v10650_v37 = vrot.slane %v10633_v18, %v18640_v11 }
 0x939   : > { %v10220_v54 = vadd.f32 %v10219_v42, %v10218_v16  ;;  %v10230_v28 = vadd.f32 %v10229_v4, %v10228_v26  ;;  %v10235_v10 = vmul.f32 0.125, %v10226_v7  ;;  %v10638_v16 = vrot.slane %v10633_v18, %v18628_v57 }
 0x93a   : > { %v10138_v17 = vrot.slane %v10124_v40, %v18646_v13  ;;  %v10646_v26 = vrot.slane %v10633_v18, %v18634_v63 }
 0x93b   : > { %v10234_v22 = vmul.f32 0.125, %v10220_v54  ;;  %v10231_v12 = vrot.slane %v10230_v28, 1 }
 0x93c   : > { %v10139_v39 = vcombine.low %v10131_v49, %v10138_v17 }
 0x93d   : > { %v10241_v23 = vcombine.low %v10233_v51, %v10234_v22  ;;  %v10232_v31 = vadd.f32 %v10231_v12, %v10230_v28 }
 0x93e   : > { %v10146_v1 = vrot.slane %v10139_v39, %v18646_v13 }
 0x93f   : > { %v10236_v6 = vmul.f32 0.125, %v10232_v31  ;;  %v10249_v8 = vrot.slane %v10241_v23, %v18646_v13 }
 0x940   : > { %10149 = vst.msk [vmem:[#allocation4 + $0x1] ss:$4 sm:$0xf] %vm18715_vm0, %v10146_v1 }
 0x941   : > { %v10242_v44 = vcombine.low %v10235_v10, %v10236_v6 }
 0x943   : > { %v10256_v2 = vrot.slane %v10242_v44, %v18646_v13 }
 0x945   : > { %v10257_v62 = vcombine.low %v10249_v8, %v10256_v2 }
 0x947   : > { %v10264_v35 = vrot.slane %v10257_v62, %v18646_v13 }
 0x949   : > { %10267 = vst.msk [vmem:[#allocation4 + $0x3] ss:$4 sm:$0xf] %vm18715_vm0, %v10264_v35 }
 0x950   : > { %v19163_v45 = vld [vmem:[#allocation4] sm:$0xff]  ;;  %v19165_v24 = vld [vmem:[#allocation4 + $0x8] sm:$0xff] }
 0x951   : > { %v10272_v61 = vcombine.high %v19163_v45, %v19163_v45  ;;  %v10273_v47 = vcombine.high %v19165_v24, %v19165_v24  ;;  %v10276_v0 = vpack.c.bf16 %v19163_v45, %v19163_v45  ;;  %v10278_v13 = vpack.c.bf16 %v19165_v24, %v19165_v24 }
 0x953   : > { %v10277_v30 = vpack.c.bf16 %v10272_v61, %v10272_v61  ;;  %v10279_v14 = vpack.c.bf16 %v10273_v47, %v10273_v47 }
 0x955   : > { %10575 = vmatprep.mubr.bf16.mxu0 %v10277_v30  ;;  %10615 = vmatprep.mubr.bf16.mxu1 %v10279_v14  ;;  %v13238_v30 = vld [vmem:[%s19290_s17 + $0x1] ss:$2 sm:$0xf] }
 0x956   : > { %10576 = vmatmul.mubr.bf16.vlgmr.msra.gmra.mrb[8].mxu0 %v10276_v0  ;;  %10616 = vmatmul.mubr.bf16.vlgmr.msra.gmra.mrb[8].mxu1 %v10278_v13  ;;  %v13239_v14 = vld [vmem:[%s19291_s18 + $0x1] ss:$2 sm:$0xf]  ;;  %v10888_v0 = vrot.slane %v13238_v30, %v18628_v57  ;;  %v10892_v13 = vrot.slane %v13238_v30, %v18637_v5  ;;  %v10896_v38 = vrot.slane %v13238_v30, %v18634_v63 }
 0x957   : > { %10700 = vmatpush1.bf16.msra.mxu0 %v14900_v50  ;;  %10741 = vmatpush1.bf16.msra.mxu1 %v14903_v20  ;;  %v10900_v50 = vrot.slane %v13238_v30, %v18640_v11  ;;  %v10915_v20 = vrot.slane %v13239_v14, %v18628_v57 }
 0x958   : > { %10701 = vmatprep.subr.bf16.mxu0 %v14908_v21  ;;  %10742 = vmatprep.subr.bf16.mxu1 %v14911_v15  ;;  %v10919_v21 = vrot.slane %v13239_v14, %v18637_v5  ;;  %v10839_v15 = vld [vmem:[%s19291_s18] ss:$2 sm:$0xf] }
 0x959   : > { %10731 = vmatprep.mubr.bf16.mxu0 %v14984_v34  ;;  %10772 = vmatprep.mubr.bf16.mxu1 %v14984_v34  ;;  %v10820_v34 = vrot.slane %v10815_v60, %v18628_v57 }
 0x95b   : > { %10702 = vmatpush1.bf16.msra.mxu0 %v14906_v3  ;;  %10743 = vmatpush1.bf16.msra.mxu1 %v14909_v41  ;;  %v10923_v3 = vrot.slane %v13239_v14, %v18634_v63  ;;  %v10927_v41 = vrot.slane %v13239_v14, %v18640_v11 }
 0x95d   : > { %v10929_v18 = vcombine.low %v10923_v3, %v10927_v41 }
 0xa29   : > { %v13273_v52 = vpop.f32.mrb[8].mxu0  ;;  %v13295_v33 = vpop.f32.mrb[8].mxu1 }
 0xa2a   : > { %v13274_v46 = vpop.f32.mrb[9].mxu0  ;;  %v13296_v48 = vpop.f32.mrb[9].mxu1 }
 0xa2b   : > { %v13275_v56 = vadd.f32 %v13274_v46, %v13273_v52  ;;  %v13297_v27 = vadd.f32 %v13296_v48, %v13295_v33  ;;  %v13276_v25 = vpop.f32.mrb[10].mxu0  ;;  %v13298_v55 = vpop.f32.mrb[10].mxu1  ;;  %v10824_v52 = vrot.slane %v10815_v60, %v18637_v5  ;;  %v14985_v33 = vmov 1983009808  }
 0xa2c   : > { %v13277_v58 = vpop.f32.mrb[11].mxu0  ;;  %v13299_v19 = vpop.f32.mrb[11].mxu1  ;;  %v10901_v46 = vcombine.low %v10888_v0, %v10892_v13  ;;  %v10902_v25 = vcombine.low %v10896_v38, %v10900_v50 }
 0xa2d   : > { %v10578_v32 = vadd.f32 %v13275_v56, %v13191_v9  ;;  %v10866_v9 = vunpack.c.l.s4 %v14985_v33  ;;  %v10828_v56 = vrot.slane %v10815_v60, %v18634_v63  ;;  %v10844_v58 = vrot.slane %v10839_v15, %v18628_v57 }
 0xa2e   : > { %v10848_v19 = vrot.slane %v10839_v15, %v18637_v5 }
 0xa2f   : > { %v10618_v43 = vadd.f32 %v13297_v27, %v10578_v32  ;;  %v10832_v27 = vrot.slane %v10815_v60, %v18640_v11  ;;  %v10928_v32 = vcombine.low %v10915_v20, %v10919_v21 }
 0xa30   : > { %v10857_v57 = vcombine.low %v10844_v58, %v10848_v19 }
 0xa31   : > { %v10623_v59 = vmax.f32 %v10618_v43, 0.0 }
 0xa33   : > { %v10624_v29 = vpack.c.bf16 %v10623_v59, %v10623_v59  ;;  %v10852_v59 = vrot.slane %v10839_v15, %v18634_v63 }
 0xa35   : > { %13232 = vmatmul.mubr.msk.bf16.vlgmr.msra.gmra.mrb[12].mxu0 %vm10695_vm1, %v10624_v29  ;;  %13233 = vmatmul.mubr.msk.bf16.vlgmr.msra.gmra.mrb[12].mxu1 %vm10695_vm1, %v10624_v29  ;;  %v10856_v29 = vrot.slane %v10839_v15, %v18640_v11 }
 0xb08   : > { %v10733_v42 = vpop.f32.mrb[12].mxu0  ;;  %v10774_v4 = vpop.f32.mrb[12].mxu1 }
 0xb09   : > { %v10734_v49 = vadd.f32 %v10733_v42, %v10638_v16  ;;  %v10775_v40 = vadd.f32 %v10774_v4, %v10646_v26  ;;  %v10735_v51 = vpop.f32.mrb[13].mxu0  ;;  %v10776_v7 = vpop.f32.mrb[13].mxu1  ;;  %v10903_v42 = vrot.slane %v10901_v46, 6 }
 0xb0a   : > { %v10736_v54 = vadd.f32 %v10735_v51, %v10642_v36  ;;  %v10777_v28 = vadd.f32 %v10776_v7, %v10650_v37  ;;  %v10737_v17 = vpop.f32.mrb[14].mxu0  ;;  %v10778_v22 = vpop.f32.mrb[14].mxu1  ;;  %v10833_v36 = vcombine.low %v10820_v34, %v10824_v52  ;;  %v10867_v37 = vunpack.c.0.s8 %v10866_v9 }
 0xb0b   : > { %v13234_v12 = vmul.f32 -1.442695, %v10734_v49  ;;  %v13236_v39 = vmul.f32 -1.442695, %v10775_v40  ;;  %v10738_v10 = vpop.f32.mrb[15].mxu0  ;;  %v10779_v23 = vpop.f32.mrb[15].mxu1  ;;  %v10834_v49 = vcombine.low %v10828_v56, %v10832_v27 }
 0xb0c   : > { %v13235_v31 = vmul.f32 -1.442695, %v10736_v54  ;;  %v13237_v1 = vmul.f32 -1.442695, %v10777_v28  ;;  %v10904_v40 = vrot.slane %v10902_v25, 6  ;;  %v10930_v7 = vrot.slane %v10928_v32, 6 }
 0xb0d   : > { %14912 = vpow2.f32 %v13234_v12  ;;  %v10858_v54 = vcombine.low %v10852_v59, %v10856_v29  ;;  %v10931_v28 = vrot.slane %v10929_v18, 6  ;;  %v10870_v11 = vsub.s32 %v10867_v37, %v18625_v53 }
 0xb0e   : > { %14914 = vpow2.f32 %v13236_v39 }
 0xb0f   : > { %14916 = vpow2.f32 %v13235_v31 }
 0xb10   : > { %14918 = vpow2.f32 %v13237_v1 }
 0xb17   : > { %v14913_v6 = vpop.eup %14912 }
 0xb18   : > { %v14915_v8 = vpop.eup %14914  ;;  %v10793_v44 = vadd.f32 1.0, %v14913_v6 }
 0xb19   : > { %v14917_v2 = vpop.eup %14916  ;;  %v10795_v62 = vadd.f32 1.0, %v14915_v8 }
 0xb1a   : > { %v14919_v35 = vpop.eup %14918  ;;  %14920 = vrcp.f32 %v10793_v44  ;;  %v10794_v61 = vadd.f32 1.0, %v14917_v2 }
 0xb1b   : > { %14922 = vrcp.f32 %v10795_v62  ;;  %v10796_v47 = vadd.f32 1.0, %v14919_v35 }
 0xb1c   : > { %14924 = vrcp.f32 %v10794_v61 }
 0xb1d   : > { %14926 = vrcp.f32 %v10796_v47 }
 0xb24   : > { %v14921_v48 = vpop.eup %14920 }
 0xb25   : > { %v14923_v55 = vpop.eup %14922 }
 0xb26   : > { %v14925_v43 = vpop.eup %14924 }
 0xb27   : > { %v14927_v16 = vpop.eup %14926  ;;  %v10809_v26 = vcombine.low %v14921_v48, %v14925_v43 }
 0xb28   : > { %v10810_v4 = vcombine.low %v14923_v55, %v14927_v16 }
 0xb29   : > { %v10813_v51 = vmul.f32 %v10809_v26, %v19163_v45 }
 0xb2a   : > { %v10814_v5 = vmul.f32 %v10810_v4, %v19165_v24 }
 0xb2b   : > { %v10837_v63 = vmul.f32 %v10833_v36, %v10813_v51  ;;  %v10907_v17 = vmul.f32 %v10903_v42, %v10813_v51 }
 0xb2c   : > { %v10838_v22 = vmul.f32 %v10834_v49, %v10814_v5  ;;  %v10908_v12 = vmul.f32 %v10904_v40, %v10814_v5 }
 0xb2d   : > { %v10861_v39 = vadd.f32 %v10857_v57, %v10837_v63  ;;  %v10934_v10 = vadd.f32 %v10930_v7, %v10907_v17 }
 0xb2e   : > { %v10862_v23 = vadd.f32 %v10858_v54, %v10838_v22  ;;  %v10935_v31 = vadd.f32 %v10931_v28, %v10908_v12 }
 0xb2f   : > { %v10871_v1 = vrot.slane %v10861_v39, %v10870_v11  ;;  %v10944_v6 = vrot.slane %v10934_v10, %v10870_v11 }
 0xb30   : > { %v10878_v8 = vrot.slane %v10862_v23, %v10870_v11  ;;  %v10951_v45 = vrot.slane %v10935_v31, %v10870_v11 }
 0xb32   : > { %v10879_v44 = vcombine.low %v10871_v1, %v10878_v8  ;;  %v10952_v2 = vcombine.high %v10944_v6, %v10951_v45 }
 0xb34   : > { %10881 = vst [vmem:[#allocation6] sm:$0xff] %v10879_v44  ;;  %10954 = vst [vmem:[#allocation6 + $0x8] sm:$0xff] %v10952_v2 }
 0xb35 PF: > { %p13561_p6 = scmp.eq.s32.totalorder %s15103_s21, 5  ;;  %s14986_s0 = smov [#allocation6]  }
 0xb36   : > { %s11979_s27 = sshll.u32 %s14986_s0, 4  ;;  %s11980_s27 = int_to_ptr.vmem [resolvable:$true] %s11979_s27 }
 0xb37   : > { %s14928_s25 = scalar_lea.vmem %s11980_s27, 768  ;;  %p14935_p10 = scmp.lt.s32.totalorder %s11980_s27, %s11980_s27 }
 0xb38   : > { %p14929_p7 = scmp.ne.s32.totalorder %s11980_s27, %s14928_s25  ;;  %p14936_p11 = scmp.lt.s32.totalorder %s14928_s25, %s14928_s25 }
 0xb3a   : > { %p14930_p8 = pnand %p14929_p7, %p13561_p6  ;;  %p14937_p12 = por %p14936_p11, %p14935_p10 }
 0xb3c   : > { %p14931_p9 = pneg %p14930_p8 }
 0xb3e   : > { %p14938_p13 = pnand %p14937_p12, %p14931_p9 }
 0xb40   : > { %14941 = shalt.err (!%p14938_p13)
}
 0xb41   : > { %s19319_s3 = sld [smem:[#allocation17_spill]] }
 0xb47   : > { %s14942_s23 = scalar_lea.hbm %s19319_s3, 768 }
 0xb48   : > { %p14943_p0 = scmp.ne.s32.totalorder %s19319_s3, %s14942_s23  ;;  %p14948_p3 = scmp.lt.u32.totalorder %s14942_s23, %s19319_s3 }
 0xb4a   : > { %p14944_p1 = pnand %p14943_p0, %p13561_p6 }
 0xb4c   : > { %p14945_p2 = pneg %p14944_p1 }
 0xb4e   : > { %p14950_p4 = pnand %p14948_p3, %p14945_p2 }
 0xb50   : > { %14953 = shalt.err (!%p14950_p4)
}
 0xb51   : > { %13558 = dma.vmem_to_hbm [thread:$0]  (%p13561_p6), %s11980_s27, 768, %s19319_s3, [#allocation7]  }
 0xb52   : > { %14967 = dma.done.wait (%p13561_p6), [#allocation7], 768  }
 0xb53   : > { %14969 = vsyncadd (%p13561_p6), [#allocation7], 4294966528 }
 0xb54 PF: > { %s19320_s20 = sld [smem:[#allocation10_spill]]  ;;  %s19321_s0 = sld [smem:[#allocation9_spill]] }
 0xb55   : > { %s19322_s30 = sld [smem:[#allocation11_spill]] }
 0xb5a   : > { %p27_p5 = scmp.ge.s32.totalorder %s19320_s20, 8  }
 0xb5c   :  { %29 = sbr.rel (!%p27_p5) target bundleno = 9 (0x9), region = 180 }
 0xb63   :  { %11992 = vsyncpa [#allocation7], 1 }
 0xb64   :  { %11994 = vsyncpa [#allocation7 + $0x1], 1 }

</bundles_post_ra>
